<compile_context>
chip_gen: v6e
topology: v6e:2x2x1
jax: 0.10.0
libtpu: 0.0.40
codegen_flags: <defaults>
</compile_context>

<pallas_src>
import functools

import numpy as np
import jax
import jax.numpy as jnp
from jax.experimental import pallas as pl
from jax.experimental.pallas import tpu as pltpu


def _round_up(x, m):
    return -(-x // m) * m


# ---------------------------------------------------------------------------
# One-time parameter preparation (hoisted out of the per-forward path)
# ---------------------------------------------------------------------------
def prepare_params(params, *, latent_in, latent_dim, n_freqs,
                   weight_dtype=jnp.float32):
    """Fold Vt/exp(Sigma)/U per layer, split by input source, pack into 2 slabs.

    Returns (wslab, cslab, plan, a_col0):
      wslab : (R, 64) weight_dtype  -- all effective weights, one aligned chunk each
      cslab : (H, W) float32        -- biases (col j = layer j) + PE frequency matrix
      plan  : static per-layer description used to unroll the kernel
      a_col0: column offset of the frequency matrix inside cslab
    """
    latent_in = set(latent_in)
    num_layers = len(params)
    d_raw = latent_dim + 3               # raw input width  [latent | xyz]
    n_pe = 3 * n_freqs                   # sin block width (== cos block width)
    d0 = d_raw + 2 * n_pe                # NeRF-encoded input width (67 here)

    # reference PE order is [sin(f0), cos(f0), sin(f1), ...]; the kernel uses
    # [sin block | cos block] with row r = 3*f + d  (matching the angle matrix)
    sin_cols = [6 * f + d for f in range(n_freqs) for d in range(3)]
    cos_cols = [6 * f + 3 + d for f in range(n_freqs) for d in range(3)]

    def split_embed(w_emb):              # w_emb: (d_out, d0), acts on x_emb
        w_pe = w_emb[:, d_raw:]
        return [(w_emb[:, :d_raw], "raw"),
                (w_pe[:, sin_cols], "sin"),
                (w_pe[:, cos_cols], "cos")]

    chunks, plan = [], []
    for i, (vt, sigma, u, b) in enumerate(params):
        vt64 = np.asarray(vt, np.float64)
        u64 = np.asarray(u, np.float64)
        s64 = np.exp(np.asarray(sigma, np.float64))
        # W_eff^T = U @ diag(exp(Sigma)) @ Vt : (d_out, d_in)  (exact fold)
        w_t = ((u64 * s64[None, :]) @ vt64).astype(np.float32)
        d_out, d_in = w_t.shape
        if i == 0:
            parts = split_embed(w_t)
        elif i in latent_in:
            parts = [(w_t[:, :d_in - d0], "x")] + split_embed(w_t[:, d_in - d0:])
        else:
            parts = [(w_t, "x")]
        layer_parts = []
        for arr, src in parts:
            layer_parts.append((len(chunks), arr.shape[0], arr.shape[1], src))
            chunks.append(arr)
        plan.append((i, tuple(layer_parts)))          # bias column == layer index

    # --- single weight slab: one 32/64-row aligned chunk per weight -----------
    row_blk = _round_up(max(c.shape[0] for c in chunks), 32)
    slab_w = _round_up(max(c.shape[1] for c in chunks), 8)
    wslab = np.zeros((row_blk * len(chunks), slab_w), np.float32)
    final_plan = []
    for bias_col, layer_parts in plan:
        new_parts = []
        for cidx, dout, din, src in layer_parts:
            r0 = cidx * row_blk
            wslab[r0:r0 + dout, :din] = chunks[cidx]
            new_parts.append((r0, dout, din, src))
        final_plan.append((bias_col, tuple(new_parts)))

    # --- const slab (always f32): biases + PE frequency matrix ----------------
    max_dout = max(np.asarray(b).shape[0] for (_, _, _, b) in params)
    a_col0 = _round_up(num_layers, 8)
    c_h = _round_up(max(max_dout, n_pe), 8)
    c_w = a_col0 + _round_up(d_raw, 8)
    cslab = np.zeros((c_h, c_w), np.float32)
    for i, (_, _, _, b) in enumerate(params):
        bb = np.asarray(b, np.float32)
        cslab[:bb.shape[0], i] = bb
    # A[3f+d, latent_dim+d] = 2^f  so that  ang = A @ raw  gives xyz[d]*2^f on row 3f+d
    for f in range(n_freqs):
        for d in range(3):
            cslab[3 * f + d, a_col0 + latent_dim + d] = 2.0 ** f

    return (jnp.asarray(wslab, weight_dtype), jnp.asarray(cslab, jnp.float32),
            tuple(final_plan), a_col0)


# ---------------------------------------------------------------------------
# Fused whole-network kernel: one batch tile, positional encoding + all layers.
# Activations are feature-major with batch on lanes: (features, tb).
# ---------------------------------------------------------------------------
def _fused_dict_exp_kernel(x_ref, w_ref, c_ref, o_ref, *,
                           plan, a_col0, n_freqs, compute_dtype):
    n_pe = 3 * n_freqs
    d_raw = x_ref.shape[0]
    f32 = jnp.float32
    hi = jax.lax.Precision.HIGHEST
    mm_prec = hi if np.dtype(compute_dtype) == np.dtype(np.float32) else None

    def pe_sources():
        # Re-read the VMEM-resident raw tile each time (cheap vld) instead of
        # keeping it live in vregs across all unrolled layers.
        raw = x_ref[...]                                      # (d_raw, tb) f32
        a_mat = c_ref[0:n_pe, a_col0:a_col0 + d_raw]          # (n_pe, d_raw) f32
        ang = jnp.dot(a_mat, raw, precision=hi,
                      preferred_element_type=f32)             # xyz[d] * 2^f (exact)
        return {"raw": raw.astype(compute_dtype),
                "sin": jnp.sin(ang).astype(compute_dtype),    # EUP, overlaps MXU
                "cos": jnp.cos(ang).astype(compute_dtype)}

    x = None
    num_layers = len(plan)
    for li, (bias_col, parts) in enumerate(plan):
        srcs = pe_sources() if any(s != "x" for *_, s in parts) else {}
        if x is not None:
            srcs["x"] = x.astype(compute_dtype)
        d_out = parts[0][1]
        acc = None
        for r0, dout, din, src in parts:
            w = w_ref[r0:r0 + dout, 0:din]                    # static slab slice
            contrib = jnp.dot(w, srcs[src], precision=mm_prec,
                              preferred_element_type=f32)
            acc = contrib if acc is None else acc + contrib
        acc = acc + c_ref[0:d_out, bias_col:bias_col + 1]     # f32 bias (d_out, 1)
        x = jnp.maximum(acc, 0.0) if li < num_layers - 1 else jnp.tanh(acc)
    o_ref[...] = x.astype(o_ref.dtype)                        # (1, tb) lane-dense


@functools.partial(jax.jit, static_argnames=("plan", "a_col0", "n_freqs", "tb"))
def dict_exp_apply(x_in, wslab, cslab, *, plan, a_col0, n_freqs, tb=256):
    """Full Dict_exp forward: one fused Pallas call (PE + all layers + tanh)."""
    n, d_raw = x_in.shape
    # feature-major, batch-on-lanes layout; kept f32 so the PE angles stay exact
    x_t = x_in.astype(jnp.float32).T                          # (d_raw, n)
    tb = _round_up(min(tb, n), 128)
    n_pad = _round_up(n, tb)
    if n_pad != n:
        x_t = jnp.pad(x_t, ((0, 0), (0, n_pad - n)))          # padded cols sliced off

    kernel = functools.partial(
        _fused_dict_exp_kernel, plan=plan, a_col0=a_col0, n_freqs=n_freqs,
        compute_dtype=wslab.dtype)

    out = pl.pallas_call(
        kernel,
        out_shape=jax.ShapeDtypeStruct((1, n_pad), jnp.float32),
        grid=(n_pad // tb,),
        in_specs=[
            pl.BlockSpec((d_raw, tb), lambda i: (0, i)),      # batch-tiled raw input
            pl.BlockSpec(wslab.shape, lambda i: (0, 0)),      # weight slab, resident
            pl.BlockSpec(cslab.shape, lambda i: (0, 0)),      # bias/freq slab, resident
        ],
        out_specs=pl.BlockSpec((1, tb), lambda i: (0, i)),    # lane-dense output
        compiler_params=pltpu.CompilerParams(
            dimension_semantics=("parallel",)),
    )(x_t, wslab, cslab)
    return out[0, :n][:, None]                                # (n, 1)
    # TODO(synk): dropout (self.dropout / dropout_prob) defaults to disabled and is not applied.


# ---------------------------------------------------------------------------
# Pure-JAX reference (mirrors the PyTorch forward exactly) for validation
# ---------------------------------------------------------------------------
def dict_exp_reference(x_in, params, *, latent_in=(4,), n_positional_freqs=8):
    hp = jax.lax.Precision.HIGHEST
    xyz = x_in[:, -3:]
    freqs = 2.0 ** jnp.arange(n_positional_freqs, dtype=jnp.float32)
    outs = [xyz]
    for f in freqs:
        outs.append(jnp.sin(xyz * f))
        outs.append(jnp.cos(xyz * f))
    pe = jnp.concatenate(outs, axis=1)
    x = jnp.concatenate([x_in[:, :-3], pe], axis=1)
    input_embed = x
    num_layers = len(params)
    for i, (vt, sigma, u, b) in enumerate(params):
        if i in latent_in:
            x = jnp.concatenate([x, input_embed], axis=1)
        x = jnp.matmul(x, vt.T, precision=hp)          # Vt linear (no bias)
        x = x * jnp.exp(sigma)[None, :]                # exp(Sigma) scaling
        x = jnp.matmul(x, u.T, precision=hp) + b[None, :]
        if i < num_layers - 1:
            x = jnp.maximum(x, 0.0)
    return jnp.tanh(x)


# ---------------------------------------------------------------------------
# Deterministic synthetic parameters (unit-gain scaling so outputs are O(1))
# ---------------------------------------------------------------------------
def make_params(key, layer_dims, ranks):
    params = []
    for (d_in, d_out), r in zip(layer_dims, ranks):
        k1, k2, k3, k4, key = jax.random.split(key, 5)
        vt = jax.random.normal(k1, (r, d_in), jnp.float32) / np.sqrt(d_in)   # Vt[i]
        sig = 0.1 * jax.random.normal(k2, (r,), jnp.float32)                 # Sigma[i]
        u = jax.random.normal(k3, (d_out, r), jnp.float32) / np.sqrt(r)      # U[i]
        b = 0.01 * jax.random.normal(k4, (d_out,), jnp.float32)              # bias[i]
        params.append((vt, sig, u, b))
    return params


if __name__ == "__main__":
    key = jax.random.PRNGKey(0)

    # input = [latent_code (16) | xyz (3)]  -> N x 19
    # NeRF PE (8 freqs) of xyz -> 51 dims; encoded width d0 = 67
    N = 512
    latent_dim = 16
    n_freqs = 8
    latent_in = (4,)
    hidden = 64
    rank = 32
    num_layers = 6
    d0 = latent_dim + 3 * (1 + 2 * n_freqs)

    layer_dims = []
    d_in = d0
    for i in range(num_layers):
        if i in latent_in:
            d_in += d0
        d_out = hidden if i < num_layers - 1 else 1
        layer_dims.append((d_in, d_out))
        d_in = d_out
    ranks = [rank] * num_layers

    kp, kx = jax.random.split(key)
    params = make_params(kp, layer_dims, ranks)
    x_in = jax.random.normal(kx, (N, latent_dim + 3), dtype=jnp.float32)

    ref = dict_exp_reference(x_in, params, latent_in=latent_in,
                             n_positional_freqs=n_freqs)

    # --- f32 path ------------------------------------------------------------
    wslab, cslab, plan, a_col0 = prepare_params(
        params, latent_in=latent_in, latent_dim=latent_dim, n_freqs=n_freqs,
        weight_dtype=jnp.float32)
    out = dict_exp_apply(x_in, wslab, cslab, plan=plan, a_col0=a_col0,
                         n_freqs=n_freqs, tb=256)
    out = jax.block_until_ready(out)
    assert out.shape == (N, 1), out.shape
    assert bool(jnp.allclose(out, ref, rtol=5e-4, atol=5e-4)), (
        "f32 mismatch vs reference: max |diff| = "
        f"{float(jnp.max(jnp.abs(out - ref)))}")

    # --- bf16 MXU path (valid on v5e, v6e and v7x; elementwise math stays f32) -
    wslab16, cslab16, plan16, a16 = prepare_params(
        params, latent_in=latent_in, latent_dim=latent_dim, n_freqs=n_freqs,
        weight_dtype=jnp.bfloat16)
    out16 = dict_exp_apply(x_in, wslab16, cslab16, plan=plan16, a_col0=a16,
                           n_freqs=n_freqs, tb=256)
    out16 = jax.block_until_ready(out16)
    assert out16.shape == (N, 1), out16.shape
    assert bool(jnp.allclose(out16, ref, rtol=5e-2, atol=5e-2)), (
        "bf16 mismatch vs reference: max |diff| = "
        f"{float(jnp.max(jnp.abs(out16 - ref)))}")

    print("KERNEL_OK")
</pallas_src>

<mosaic_0001>
module attributes {stable_mosaic.version = 11 : i64} {
  func.func @_fused_dict_exp_kernel(%arg0: i32, %arg1: memref<19x256xf32, #tpu.memory_space<vmem>>, %arg2: memref<704x64xf32, #tpu.memory_space<vmem>>, %arg3: memref<64x32xf32, #tpu.memory_space<vmem>>, %arg4: memref<1x256xf32, #tpu.memory_space<vmem>>) attributes {dimension_semantics = [#tpu.dimension_semantics<parallel>], iteration_bounds = array<i64: 2>, scalar_prefetch = 0 : i64, scratch_operands = 0 : i64, tpu.core_type = #tpu.core_type<tc>, window_params = [{transform_indices = @transform_0, window_bounds = array<i64: 19, 256>}, {pipeline_mode = #tpu.pipeline_mode<synchronous>, transform_indices = @transform_1, window_bounds = array<i64: 704, 64>}, {pipeline_mode = #tpu.pipeline_mode<synchronous>, transform_indices = @transform_2, window_bounds = array<i64: 64, 32>}, {transform_indices = @transform_3, window_bounds = array<i64: 1, 256>}]} {
    %c0 = arith.constant 0 : index
    %c0_0 = arith.constant 0 : index
    %0 = vector.load %arg1[%c0, %c0_0] : memref<19x256xf32, #tpu.memory_space<vmem>>, vector<19x256xf32>
    %c0_1 = arith.constant 0 : index
    %c8 = arith.constant 8 : index
    %1 = vector.load %arg3[%c0_1, %c8] : memref<64x32xf32, #tpu.memory_space<vmem>>, vector<24x19xf32>
    %cst = arith.constant dense<0.000000e+00> : vector<24x256xf32>
    %2 = tpu.matmul %1, %0, %cst {dimension_numbers = #tpu.dot_dimension_numbers<[1], [0], [0], [1], [0, 0, 1, 1], [], []>, precision = #tpu.contract_precision<fp32>} : vector<24x19xf32>, vector<19x256xf32>, vector<24x256xf32> -> vector<24x256xf32>
    %3 = math.sin %2 : vector<24x256xf32>
    %4 = math.cos %2 : vector<24x256xf32>
    %c0_2 = arith.constant 0 : index
    %c0_3 = arith.constant 0 : index
    %5 = vector.load %arg2[%c0_2, %c0_3] : memref<704x64xf32, #tpu.memory_space<vmem>>, vector<64x19xf32>
    %cst_4 = arith.constant dense<0.000000e+00> : vector<64x256xf32>
    %6 = tpu.matmul %5, %0, %cst_4 {dimension_numbers = #tpu.dot_dimension_numbers<[1], [0], [0], [1], [0, 0, 1, 1], [], []>, precision = #tpu.contract_precision<fp32>} : vector<64x19xf32>, vector<19x256xf32>, vector<64x256xf32> -> vector<64x256xf32>
    %c64 = arith.constant 64 : index
    %c0_5 = arith.constant 0 : index
    %7 = vector.load %arg2[%c64, %c0_5] : memref<704x64xf32, #tpu.memory_space<vmem>>, vector<64x24xf32>
    %cst_6 = arith.constant dense<0.000000e+00> : vector<64x256xf32>
    %8 = tpu.matmul %7, %3, %cst_6 {dimension_numbers = #tpu.dot_dimension_numbers<[1], [0], [0], [1], [0, 0, 1, 1], [], []>, precision = #tpu.contract_precision<fp32>} : vector<64x24xf32>, vector<24x256xf32>, vector<64x256xf32> -> vector<64x256xf32>
    %9 = arith.addf %6, %8 : vector<64x256xf32>
    %c128 = arith.constant 128 : index
    %c0_7 = arith.constant 0 : index
    %10 = vector.load %arg2[%c128, %c0_7] : memref<704x64xf32, #tpu.memory_space<vmem>>, vector<64x24xf32>
    %cst_8 = arith.constant dense<0.000000e+00> : vector<64x256xf32>
    %11 = tpu.matmul %10, %4, %cst_8 {dimension_numbers = #tpu.dot_dimension_numbers<[1], [0], [0], [1], [0, 0, 1, 1], [], []>, precision = #tpu.contract_precision<fp32>} : vector<64x24xf32>, vector<24x256xf32>, vector<64x256xf32> -> vector<64x256xf32>
    %12 = arith.addf %9, %11 : vector<64x256xf32>
    %c0_9 = arith.constant 0 : index
    %c0_10 = arith.constant 0 : index
    %13 = vector.load %arg3[%c0_9, %c0_10] : memref<64x32xf32, #tpu.memory_space<vmem>>, vector<64x1xf32>
    %14 = vector.broadcast %13 : vector<64x1xf32> to vector<64x256xf32>
    %15 = arith.addf %12, %14 : vector<64x256xf32>
    %cst_11 = arith.constant 0.000000e+00 : f32
    %16 = vector.broadcast %cst_11 : f32 to vector<64x256xf32>
    %17 = arith.maximumf %15, %16 : vector<64x256xf32>
    %c192 = arith.constant 192 : index
    %c0_12 = arith.constant 0 : index
    %18 = vector.load %arg2[%c192, %c0_12] : memref<704x64xf32, #tpu.memory_space<vmem>>, vector<64x64xf32>
    %cst_13 = arith.constant dense<0.000000e+00> : vector<64x256xf32>
    %19 = tpu.matmul %18, %17, %cst_13 {dimension_numbers = #tpu.dot_dimension_numbers<[1], [0], [0], [1], [0, 0, 1, 1], [], []>, precision = #tpu.contract_precision<fp32>} : vector<64x64xf32>, vector<64x256xf32>, vector<64x256xf32> -> vector<64x256xf32>
    %c0_14 = arith.constant 0 : index
    %c1 = arith.constant 1 : index
    %20 = vector.load %arg3[%c0_14, %c1] : memref<64x32xf32, #tpu.memory_space<vmem>>, vector<64x1xf32>
    %21 = vector.broadcast %20 : vector<64x1xf32> to vector<64x256xf32>
    %22 = arith.addf %19, %21 : vector<64x256xf32>
    %cst_15 = arith.constant 0.000000e+00 : f32
    %23 = vector.broadcast %cst_15 : f32 to vector<64x256xf32>
    %24 = arith.maximumf %22, %23 : vector<64x256xf32>
    %c256 = arith.constant 256 : index
    %c0_16 = arith.constant 0 : index
    %25 = vector.load %arg2[%c256, %c0_16] : memref<704x64xf32, #tpu.memory_space<vmem>>, vector<64x64xf32>
    %cst_17 = arith.constant dense<0.000000e+00> : vector<64x256xf32>
    %26 = tpu.matmul %25, %24, %cst_17 {dimension_numbers = #tpu.dot_dimension_numbers<[1], [0], [0], [1], [0, 0, 1, 1], [], []>, precision = #tpu.contract_precision<fp32>} : vector<64x64xf32>, vector<64x256xf32>, vector<64x256xf32> -> vector<64x256xf32>
    %c0_18 = arith.constant 0 : index
    %c2 = arith.constant 2 : index
    %27 = vector.load %arg3[%c0_18, %c2] : memref<64x32xf32, #tpu.memory_space<vmem>>, vector<64x1xf32>
    %28 = vector.broadcast %27 : vector<64x1xf32> to vector<64x256xf32>
    %29 = arith.addf %26, %28 : vector<64x256xf32>
    %cst_19 = arith.constant 0.000000e+00 : f32
    %30 = vector.broadcast %cst_19 : f32 to vector<64x256xf32>
    %31 = arith.maximumf %29, %30 : vector<64x256xf32>
    %c320 = arith.constant 320 : index
    %c0_20 = arith.constant 0 : index
    %32 = vector.load %arg2[%c320, %c0_20] : memref<704x64xf32, #tpu.memory_space<vmem>>, vector<64x64xf32>
    %cst_21 = arith.constant dense<0.000000e+00> : vector<64x256xf32>
    %33 = tpu.matmul %32, %31, %cst_21 {dimension_numbers = #tpu.dot_dimension_numbers<[1], [0], [0], [1], [0, 0, 1, 1], [], []>, precision = #tpu.contract_precision<fp32>} : vector<64x64xf32>, vector<64x256xf32>, vector<64x256xf32> -> vector<64x256xf32>
    %c0_22 = arith.constant 0 : index
    %c3 = arith.constant 3 : index
    %34 = vector.load %arg3[%c0_22, %c3] : memref<64x32xf32, #tpu.memory_space<vmem>>, vector<64x1xf32>
    %35 = vector.broadcast %34 : vector<64x1xf32> to vector<64x256xf32>
    %36 = arith.addf %33, %35 : vector<64x256xf32>
    %cst_23 = arith.constant 0.000000e+00 : f32
    %37 = vector.broadcast %cst_23 : f32 to vector<64x256xf32>
    %38 = arith.maximumf %36, %37 : vector<64x256xf32>
    %c0_24 = arith.constant 0 : index
    %c0_25 = arith.constant 0 : index
    %39 = vector.load %arg1[%c0_24, %c0_25] : memref<19x256xf32, #tpu.memory_space<vmem>>, vector<19x256xf32>
    %c0_26 = arith.constant 0 : index
    %c8_27 = arith.constant 8 : index
    %40 = vector.load %arg3[%c0_26, %c8_27] : memref<64x32xf32, #tpu.memory_space<vmem>>, vector<24x19xf32>
    %cst_28 = arith.constant dense<0.000000e+00> : vector<24x256xf32>
    %41 = tpu.matmul %40, %39, %cst_28 {dimension_numbers = #tpu.dot_dimension_numbers<[1], [0], [0], [1], [0, 0, 1, 1], [], []>, precision = #tpu.contract_precision<fp32>} : vector<24x19xf32>, vector<19x256xf32>, vector<24x256xf32> -> vector<24x256xf32>
    %42 = math.sin %41 : vector<24x256xf32>
    %43 = math.cos %41 : vector<24x256xf32>
    %c384 = arith.constant 384 : index
    %c0_29 = arith.constant 0 : index
    %44 = vector.load %arg2[%c384, %c0_29] : memref<704x64xf32, #tpu.memory_space<vmem>>, vector<64x64xf32>
    %cst_30 = arith.constant dense<0.000000e+00> : vector<64x256xf32>
    %45 = tpu.matmul %44, %38, %cst_30 {dimension_numbers = #tpu.dot_dimension_numbers<[1], [0], [0], [1], [0, 0, 1, 1], [], []>, precision = #tpu.contract_precision<fp32>} : vector<64x64xf32>, vector<64x256xf32>, vector<64x256xf32> -> vector<64x256xf32>
    %c448 = arith.constant 448 : index
    %c0_31 = arith.constant 0 : index
    %46 = vector.load %arg2[%c448, %c0_31] : memref<704x64xf32, #tpu.memory_space<vmem>>, vector<64x19xf32>
    %cst_32 = arith.constant dense<0.000000e+00> : vector<64x256xf32>
    %47 = tpu.matmul %46, %39, %cst_32 {dimension_numbers = #tpu.dot_dimension_numbers<[1], [0], [0], [1], [0, 0, 1, 1], [], []>, precision = #tpu.contract_precision<fp32>} : vector<64x19xf32>, vector<19x256xf32>, vector<64x256xf32> -> vector<64x256xf32>
    %48 = arith.addf %45, %47 : vector<64x256xf32>
    %c512 = arith.constant 512 : index
    %c0_33 = arith.constant 0 : index
    %49 = vector.load %arg2[%c512, %c0_33] : memref<704x64xf32, #tpu.memory_space<vmem>>, vector<64x24xf32>
    %cst_34 = arith.constant dense<0.000000e+00> : vector<64x256xf32>
    %50 = tpu.matmul %49, %42, %cst_34 {dimension_numbers = #tpu.dot_dimension_numbers<[1], [0], [0], [1], [0, 0, 1, 1], [], []>, precision = #tpu.contract_precision<fp32>} : vector<64x24xf32>, vector<24x256xf32>, vector<64x256xf32> -> vector<64x256xf32>
    %51 = arith.addf %48, %50 : vector<64x256xf32>
    %c576 = arith.constant 576 : index
    %c0_35 = arith.constant 0 : index
    %52 = vector.load %arg2[%c576, %c0_35] : memref<704x64xf32, #tpu.memory_space<vmem>>, vector<64x24xf32>
    %cst_36 = arith.constant dense<0.000000e+00> : vector<64x256xf32>
    %53 = tpu.matmul %52, %43, %cst_36 {dimension_numbers = #tpu.dot_dimension_numbers<[1], [0], [0], [1], [0, 0, 1, 1], [], []>, precision = #tpu.contract_precision<fp32>} : vector<64x24xf32>, vector<24x256xf32>, vector<64x256xf32> -> vector<64x256xf32>
    %54 = arith.addf %51, %53 : vector<64x256xf32>
    %c0_37 = arith.constant 0 : index
    %c4 = arith.constant 4 : index
    %55 = vector.load %arg3[%c0_37, %c4] : memref<64x32xf32, #tpu.memory_space<vmem>>, vector<64x1xf32>
    %56 = vector.broadcast %55 : vector<64x1xf32> to vector<64x256xf32>
    %57 = arith.addf %54, %56 : vector<64x256xf32>
    %cst_38 = arith.constant 0.000000e+00 : f32
    %58 = vector.broadcast %cst_38 : f32 to vector<64x256xf32>
    %59 = arith.maximumf %57, %58 : vector<64x256xf32>
    %c640 = arith.constant 640 : index
    %c0_39 = arith.constant 0 : index
    %60 = vector.load %arg2[%c640, %c0_39] : memref<704x64xf32, #tpu.memory_space<vmem>>, vector<1x64xf32>
    %cst_40 = arith.constant dense<0.000000e+00> : vector<1x256xf32>
    %61 = tpu.matmul %60, %59, %cst_40 {dimension_numbers = #tpu.dot_dimension_numbers<[1], [0], [0], [1], [0, 0, 1, 1], [], []>, precision = #tpu.contract_precision<fp32>} : vector<1x64xf32>, vector<64x256xf32>, vector<1x256xf32> -> vector<1x256xf32>
    %c0_41 = arith.constant 0 : index
    %c5 = arith.constant 5 : index
    %62 = vector.load %arg3[%c0_41, %c5] : memref<64x32xf32, #tpu.memory_space<vmem>>, vector<1x1xf32>
    %63 = vector.broadcast %62 : vector<1x1xf32> to vector<1x256xf32>
    %64 = arith.addf %61, %63 : vector<1x256xf32>
    %65 = math.tanh %64 : vector<1x256xf32>
    %c0_42 = arith.constant 0 : index
    %c0_43 = arith.constant 0 : index
    %66 = vector.load %arg4[%c0_42, %c0_43] : memref<1x256xf32, #tpu.memory_space<vmem>>, vector<1x256xf32>
    tpu.vector_store %arg4[%c0_42, %c0_43], %65 {strides = array<i32>} : memref<1x256xf32, #tpu.memory_space<vmem>>, vector<1x256xf32>,
    return
  }
  func.func @transform_0(%arg0: i32) -> (i32, i32) {
    %c0_i32 = arith.constant 0 : i32
    %c0_i32_0 = arith.constant 0 : i32
    return %c0_i32, %arg0 : i32, i32
  }
  func.func @transform_1(%arg0: i32) -> (i32, i32) {
    %c0_i32 = arith.constant 0 : i32
    %c0_i32_0 = arith.constant 0 : i32
    %c0_i32_1 = arith.constant 0 : i32
    return %c0_i32, %c0_i32_0 : i32, i32
  }
  func.func @transform_2(%arg0: i32) -> (i32, i32) {
    %c0_i32 = arith.constant 0 : i32
    %c0_i32_0 = arith.constant 0 : i32
    %c0_i32_1 = arith.constant 0 : i32
    return %c0_i32, %c0_i32_0 : i32, i32
  }
  func.func @transform_3(%arg0: i32) -> (i32, i32) {
    %c0_i32 = arith.constant 0 : i32
    %c0_i32_0 = arith.constant 0 : i32
    return %c0_i32, %arg0 : i32, i32
  }
}

</mosaic_0001>

<bundles_post_ra>
// kernel: dict_exp_apply.1
= control target key start
LH: loop header
LB: loop body
LE: loop exit
PB: predicated region body
PF: predicated region fallthrough
CT: control target
= control target key end

     0   :  { %8 = vsyncpa [#allocation4], 0  ;;  %s19450_s0 = inlined_call_operand.vmem [shape: f32[19,512], index: 0, kind: input, shape index: {}]   ;;  %s19451_s1 = inlined_call_operand.vmem [shape: f32[704,64], index: 1, kind: input, shape index: {}]   ;;  %s19452_s2 = inlined_call_operand.vmem [shape: f32[64,32], index: 2, kind: input, shape index: {}]   ;;  %s19453_s3 = inlined_call_operand.hbm [shape: f32[1,512], index: 3, kind: output, shape index: {}]  }
   0x1   :  { %10 = vsyncpa [#allocation4 + $0x1], 0  ;;  %s12941_s12 = smov 0   ;;  %s12943_s13 = smov 0  }
   0x2   :  { %s12945_s14 = smov 0   ;;  %s12947_s15 = smov 0  }
   0x3 LB: > { %s12629_s16 = sadd.s32 4294967295, %s12903_s15   ;;  %s12630_s17 = sadd.s32 4294967294, %s12903_s15   ;;  %s12903_s15 = sphi %s12947_s15, %s20433_s15   ;;  %s12899_s14 = sphi %s12945_s14, %s20432_s14   ;;  %s12895_s13 = sphi %s12943_s13, %s20431_s13   ;;  %s12891_s12 = sphi %s12941_s12, %s20430_s12  }
   0x4   : > { %s12964_s18 = sadd.s32 1, %s12903_s15   ;;  %s23_s19 = sadd.s32 1, %s12899_s14 }
   0x5   : > { %s20_s20 = ssub.s32 %s12903_s15, %s12964_s18  ;;  %p30_p0 = scmp.ne.s32.totalorder %s12899_s14, %s12895_s13 }
   0x6   : > { %p21_p1 = scmp.eq.s32.totalorder %s20_s20, 0  ;;  %p31_p2 = scmp.eq.s32.totalorder %s12903_s15, 0 }
   0x7   : > { %p102_p3 = scmp.eq.s32.totalorder %s12629_s16, 1  ;;  %p107_p4 = scmp.ne.s32.totalorder %s12895_s13, %s12891_s12 }
   0x8   : > { %s12977_s21 = scalar_select %p21_p1, %s12899_s14, %s23_s19  }
   0x9   : > { %p32_p5 = por %p31_p2, %p30_p0  ;;  %p12979_p6 = por %p102_p3, %p30_p0 }
   0xa   : > { %p108_p7 = scmp.eq.s32.totalorder %s12630_s17, 1  ;;  %p19696_p9 = scmp.ge.s32.totalorder %s12903_s15, 2 }
   0xc   : > { %p12983_p8 = por %p108_p7, %p107_p4  ;;  %130 = sbr.rel (%p19696_p9) target bundleno = 24 (0x18), region = 24 }
  0x11   : > { %133 = sbr.rel (!%p32_p5) target bundleno = 24 (0x18), region = 28  ;;  %s135_s24 = sand.u32 (%p32_p5), 1, %s12899_s14  }
  0x12   : > { %s12690_s25 = sshll.u32 (%p32_p5), %s12903_s15, 4  ;;  %s12692_s26 = smul.u32 (%p32_p5), 48, %s135_s24 }
  0x13   : > { %s140_s29 = scalar_lea.vmem (%p32_p5), %s19450_s0, %s12690_s25 }
  0x14   : > { %v153_v0 = vld [vmem:[%s140_s29] sm:$0xff] (%p32_p5)  ;;  %v155_v1 = vld [vmem:[%s140_s29 + $0x8] sm:$0xff] (%p32_p5)  ;;  %s137_s30 = scalar_lea.vmem (%p32_p5), [#allocation2], %s12692_s26 }
  0x15   : > { %v157_v2 = vld [vmem:[%s140_s29 + $0x20] sm:$0xff] (%p32_p5)  ;;  %v159_v3 = vld [vmem:[%s140_s29 + $0x28] sm:$0xff] (%p32_p5)  ;;  %154 = vst [vmem:[%s137_s30] sm:$0xff] (%p32_p5), %v153_v0  ;;  %156 = vst [vmem:[%s137_s30 + $0x8] sm:$0xff] (%p32_p5), %v155_v1 }
  0x16   : > { %v161_v4 = vld [vmem:[%s140_s29 + $0x40] sm:$0xff]  ;;  %v163_v5 = vld [vmem:[%s140_s29 + $0x48] sm:$0xff]  ;;  %158 = vst [vmem:[%s137_s30 + $0x10] sm:$0xff] %v157_v2  ;;  %160 = vst [vmem:[%s137_s30 + $0x18] sm:$0xff] %v159_v3 }
  0x17   : > { %162 = vst [vmem:[%s137_s30 + $0x20] sm:$0xff] %v161_v4  ;;  %164 = vst [vmem:[%s137_s30 + $0x28] sm:$0xff] %v163_v5 }
  0x18 PF: > { %p12635_p10 = scmp.ge.s32.totalorder %s12903_s15, 1  ;;  %p169_p11 = scmp.lt.s32.totalorder %s12903_s15, 3 }
  0x1a   : > { %p170_p12 = pnand %p12635_p10, %p169_p11 }
  0x1c   : > { %173 = sbr.rel (%p170_p12) target bundleno = 2880 (0xb40), region = 51 }
  0x21   : > { %v207_v6 = vld [vmem:[%s19452_s2] sm:$0xff]  ;;  %v209_v7 = vld [vmem:[%s19452_s2 + $0x10] sm:$0xff]  ;;  %s13004_s8 = sand.u32 1, %s12895_s13   ;;  %s12905_s9 = smov 120   ;;  %v208_v8 = vld [vmem:[%s19452_s2 + $0x8] sm:$0xff]  ;;  %vm226_vm0 = vcmask 1042432  }
  0x22   : > { %213 = vrot.lane.b32.xlu0 %v207_v6, %s12905_s9  ;;  %217 = vrot.lane.b32.xlu1 %v209_v7, %s12905_s9  ;;  %s12693_s10 = smul.u32 48, %s13004_s8  ;;  %v19454_v9 = vmov 0.0   ;;  %vm19504_vm1 = vcmask 154624   ;;  %s12636_s29 = sshll.u32 %s13004_s8, 1 }
  0x23   : > { %431 = vmatprep.mubr.f32.mxu1 %v19454_v9  ;;  %303 = vmatprep.mubr.f32.mxu0 %v19454_v9  ;;  %s12691_s30 = sshll.u32 %s12629_s16, 5  ;;  %s198_s4 = scalar_lea.vmem [#allocation3], %s12636_s29 }
  0x24   : > { %s178_s19 = scalar_lea.vmem [#allocation2], %s12693_s10  ;;  %s12565_s5 = sshll.u32 %s198_s4, 4  ;;  %s12566_s5 = int_to_ptr.vmem [resolvable:$true] %s12565_s5 }
  0x25   : > { %v206_v10 = vld [vmem:[%s178_s19 + $0x28] sm:$0x7]  ;;  %v205_v11 = vld [vmem:[%s178_s19 + $0x20] sm:$0x7]  ;;  %v204_v12 = vld [vmem:[%s178_s19 + $0x18] sm:$0xff]  ;;  %s12551_s10 = scalar_lea.sflag [#allocation4], %s13004_s8 }
  0x26   : > { %215 = vrot.lane.b32.xlu0 %v208_v8, %s12905_s9  ;;  %v231_v13 = vsel %vm226_vm0, %v206_v10, 0  ;;  %v228_v14 = vsel %vm226_vm0, %v205_v11, 0  ;;  %v13012_v15 = vand.u32 4294901760, %v204_v12  ;;  %v203_v16 = vld [vmem:[%s178_s19 + $0x10] sm:$0xff]  ;;  %v202_v17 = vld [vmem:[%s178_s19 + $0x8] sm:$0xff]  ;;  %v201_v18 = vld [vmem:[%s178_s19] sm:$0xff]  ;;  %s12563_s9 = scalar_lea.hbm %s19453_s3, %s12691_s30 }
  0x27   : > { %v13014_v19 = vand.u32 4294901760, %v231_v13  ;;  %v13016_v20 = vand.u32 4294901760, %v228_v14  ;;  %v13018_v21 = vand.u32 4294901760, %v203_v16  ;;  %v13020_v22 = vand.u32 4294901760, %v202_v17  ;;  %s12843_s11 = scalar_lea.vmem %s12566_s5, 32  ;;  %s12920_s17 = smov [#allocation3]  }
  0x28   : > { %19699 = vst [vmem:[#allocation6_spill] sm:$0xff] %v13012_v15  ;;  %v13023_v23 = vsub.f32 %v204_v12, %v13012_v15  ;;  %v13025_v24 = vand.u32 4294901760, %v201_v18  ;;  %p12844_p13 = scmp.ne.s32.totalorder %s12566_s5, %s12843_s11  ;;  %s12847_s19 = sshll.u32 %s12920_s17, 4  ;;  %s12848_s19 = int_to_ptr.vmem [resolvable:$false] %s12847_s19 }
  0x29   : > { %19700 = vst [vmem:[#allocation7_spill] sm:$0xff] %v13014_v19  ;;  %19701 = vst [vmem:[#allocation8_spill] sm:$0xff] %v13016_v20  ;;  %v13028_v25 = vsub.f32 %v231_v13, %v13014_v19  ;;  %v13031_v26 = vsub.f32 %v228_v14, %v13016_v20  ;;  %v13034_v27 = vsub.f32 %v203_v16, %v13018_v21  ;;  %260 = vmatprep.subr.mxu0 %v13014_v19  ;;  %s12849_s16 = scalar_lea.vmem %s12848_s19, 64  ;;  %p12850_p2 = scmp.lt.s32.totalorder %s12566_s5, %s12848_s19 }
  0x2a   : > { %19702 = vst [vmem:[#allocation9_spill] sm:$0xff] %v13018_v21  ;;  %19703 = vst [vmem:[#allocation10_spill] sm:$0xff] %v13020_v22  ;;  %v13037_v28 = vsub.f32 %v202_v17, %v13020_v22  ;;  %v13041_v29 = vand.u32 4294901760, %v13023_v23  ;;  %v13044_v30 = vsub.f32 %v201_v18, %v13025_v24  ;;  %262 = vmatpush1.msra.mxu0 %v13016_v20  ;;  %p12845_p0 = pnand %p12844_p13, %p12979_p6  ;;  %p12851_p3 = scmp.lt.s32.totalorder %s12849_s16, %s12843_s11 }
  0x2b   : > { %19704 = vst [vmem:[#allocation11_spill] sm:$0xff] %v13023_v23  ;;  %19705 = vst [vmem:[#allocation12_spill] sm:$0xff] %v13025_v24  ;;  %v13048_v31 = vand.u32 4294901760, %v13028_v25  ;;  %v13051_v32 = vand.u32 4294901760, %v13031_v26  ;;  %v13054_v33 = vand.u32 4294901760, %v13034_v27  ;;  %264 = vmatprep.subr.mxu0 %v13012_v15 }
  0x2c   : > { %19706 = vst [vmem:[#allocation13_spill] sm:$0xff] %v13028_v25  ;;  %19707 = vst [vmem:[#allocation14_spill] sm:$0xff] %v13031_v26  ;;  %v13057_v34 = vand.u32 4294901760, %v13037_v28  ;;  %v378_v35 = vsub.f32 %v13023_v23, %v13041_v29  ;;  %v13063_v36 = vand.u32 4294901760, %v13044_v30  ;;  %266 = vmatpush1.msra.mxu0 %v13018_v21  ;;  %p12846_p1 = pneg %p12845_p0  ;;  %p12852_p4 = por %p12851_p3, %p12850_p2 }
  0x2d   : > { %19708 = vst [vmem:[#allocation15_spill] sm:$0xff] %v13034_v27  ;;  %19709 = vst [vmem:[#allocation16_spill] sm:$0xff] %v13037_v28  ;;  %v366_v37 = vsub.f32 %v13028_v25, %v13048_v31  ;;  %v372_v38 = vsub.f32 %v13031_v26, %v13051_v32  ;;  %v384_v39 = vsub.f32 %v13034_v27, %v13054_v33  ;;  %268 = vmatprep.subr.mxu0 %v13020_v22 }
  0x2e   : > { %19710 = vst [vmem:[#allocation17_spill] sm:$0xff] %v13041_v29  ;;  %19711 = vst [vmem:[#allocation18_spill] sm:$0xff] %v13044_v30  ;;  %v390_v40 = vsub.f32 %v13037_v28, %v13057_v34  ;;  %v396_v41 = vsub.f32 %v13044_v30, %v13063_v36  ;;  %270 = vmatpush1.msra.mxu0 %v13025_v24  ;;  %v13082_v44 = vand.u32 4294901760, %v378_v35  ;;  %p12853_p5 = pnand %p12852_p4, %p12846_p1 }
  0x2f   : > { %19712 = vst [vmem:[#allocation19_spill] sm:$0xff] %v13048_v31  ;;  %19713 = vst [vmem:[#allocation20_spill] sm:$0xff] %v13051_v32  ;;  %v13078_v42 = vand.u32 4294901760, %v366_v37  ;;  %v13080_v43 = vand.u32 4294901760, %v372_v38  ;;  %481 = vmatprep.subr.mxu0 %v13028_v25  ;;  %v13085_v45 = vand.u32 4294901760, %v384_v39 }
  0x30   : > { %19714 = vst [vmem:[#allocation21_spill] sm:$0xff] %v13054_v33  ;;  %19715 = vst [vmem:[#allocation22_spill] sm:$0xff] %v13057_v34  ;;  %v13088_v46 = vand.u32 4294901760, %v390_v40  ;;  %v13091_v47 = vand.u32 4294901760, %v396_v41 }
  0x31   : > { %19716 = vst [vmem:[#allocation23_spill] sm:$0xff] %v13063_v36  ;;  %19717 = vst [vmem:[#allocation24_spill] sm:$0xff] %v13078_v42  ;;  %368 = vmatprep.subr.mxu1 %v13078_v42 }
  0x32   : > { %19718 = vst [vmem:[#allocation25_spill] sm:$0xff] %v13080_v43  ;;  %19719 = vst [vmem:[#allocation26_spill] sm:$0xff] %v13082_v44  ;;  %374 = vmatpush1.msra.mxu1 %v13080_v43 }
  0x33   : > { %19720 = vst [vmem:[#allocation27_spill] sm:$0xff] %v13085_v45  ;;  %19721 = vst [vmem:[#allocation28_spill] sm:$0xff] %v13088_v46  ;;  %380 = vmatprep.subr.mxu1 %v13082_v44 }
  0x34   : > { %19722 = vst [vmem:[#allocation29_spill] sm:$0xff] %v13091_v47  ;;  %386 = vmatpush1.msra.mxu1 %v13085_v45 }
  0x35   : > { %392 = vmatprep.subr.mxu1 %v13088_v46 }
  0x36   : > { %398 = vmatpush1.msra.mxu1 %v13091_v47 }
  0x37   : > { %581 = vmatprep.subr.mxu1 %v13014_v19 }
  0x94   : > { %v214_v48 = vpop.permute.xlu0 %213  ;;  %v218_v49 = vpop.permute.xlu1 %217 }
  0x95   : > { %v220_v50 = vsel %vm19504_vm1, %v214_v48, 0  ;;  %v224_v51 = vsel %vm19504_vm1, %v218_v49, 0 }
  0x96   : > { %v13100_v52 = vand.u32 4294901760, %v220_v50  ;;  %v13102_v53 = vand.u32 4294901760, %v224_v51 }
  0x98   : > { %v305_v54 = vsub.f32 %v220_v50, %v13100_v52  ;;  %v216_v55 = vpop.permute.xlu0 %215  ;;  %433 = vmatmul.mubr.f32.vlgmr.msra.gmra.mxu1 %v13100_v52  ;;  %v327_v58 = vsub.f32 %v224_v51, %v13102_v53 }
  0x99   : > { %v222_v56 = vsel %vm19504_vm1, %v216_v55, 0  ;;  %438 = vmatprep.mubr.f32.mxu1 %v19454_v9  ;;  %583 = vmatpush1.msra.mxu1 %v13016_v20 }
  0x9a   : > { %v306_v57 = vand.u32 4294901760, %v305_v54  ;;  %v315_v59 = vand.u32 4294901760, %v222_v56  ;;  %585 = vmatprep.subr.mxu1 %v13012_v15  ;;  %v328_v62 = vand.u32 4294901760, %v327_v58 }
  0x9b   : > { %587 = vmatpush1.msra.mxu1 %v13018_v21 }
  0x9c   : > { %v316_v60 = vsub.f32 %v222_v56, %v315_v59  ;;  %440 = vmatmul.mubr.f32.gmra.mxu1 %v315_v59  ;;  %v307_v61 = vsub.f32 %v305_v54, %v306_v57  ;;  %589 = vmatprep.subr.mxu1 %v13020_v22  ;;  %v329_v3 = vsub.f32 %v327_v58, %v328_v62 }
  0x9d   : > { %445 = vmatprep.mubr.f32.mxu1 %v19454_v9  ;;  %591 = vmatpush1.msra.mxu1 %v13025_v24 }
  0x9e   : > { %v317_v63 = vand.u32 4294901760, %v316_v60  ;;  %v308_v0 = vand.u32 4294901760, %v307_v61  ;;  %783 = vmatprep.subr.mxu1 %v13014_v19  ;;  %v330_v4 = vand.u32 4294901760, %v329_v3 }
  0xa0   : > { %309 = vmatmul.mubr.f32.vlgmr.msra.gmra.mxu0 %v308_v0  ;;  %447 = vmatmul.mubr.f32.gmra.mxu1 %v13102_v53  ;;  %v318_v1 = vsub.f32 %v316_v60, %v317_v63 }
  0xa1   : > { %314 = vmatprep.mubr.f32.mxu0 %v19454_v9  ;;  %624 = vmatprep.mubr.f32.mxu1 %v19454_v9 }
  0xa2   : > { %v319_v2 = vand.u32 4294901760, %v318_v1  ;;  %484 = vmatpush1.msra.mxu0 %v13031_v26 }
  0xa3   : > { %487 = vmatprep.subr.mxu0 %v13023_v23 }
  0xa4   : > { %320 = vmatmul.mubr.f32.gmra.mxu0 %v319_v2  ;;  %628 = vmatmul.mubr.f32.vlgmr.msra.gmra.mxu1 %v306_v57 }
  0xa5   : > { %325 = vmatprep.mubr.f32.mxu0 %v19454_v9  ;;  %633 = vmatprep.mubr.f32.mxu1 %v19454_v9 }
  0xa6   : > { %490 = vmatpush1.msra.mxu0 %v13034_v27  ;;  %785 = vmatpush1.msra.mxu1 %v13016_v20 }
  0xa7   : > { %493 = vmatprep.subr.mxu0 %v13037_v28  ;;  %787 = vmatprep.subr.mxu1 %v13012_v15 }
  0xa8   : > { %331 = vmatmul.mubr.f32.gmra.mxu0 %v330_v4  ;;  %637 = vmatmul.mubr.f32.gmra.mxu1 %v317_v63 }
  0xa9   : > { %496 = vmatpush1.msra.mxu0 %v13044_v30  ;;  %529 = vmatprep.mubr.f32.mxu0 %v19454_v9 }
  0xaa   : > { %642 = vmatprep.mubr.f32.mxu1 %v19454_v9  ;;  %789 = vmatpush1.msra.mxu1 %v13018_v21 }
  0xab   : > { %791 = vmatprep.subr.mxu1 %v13020_v22  ;;  %681 = vmatprep.subr.mxu0 %v13048_v31 }
  0xac   : > { %532 = vmatmul.mubr.f32.vlgmr.msra.gmra.mxu0 %v305_v54  ;;  %646 = vmatmul.mubr.f32.gmra.mxu1 %v328_v62 }
  0xad   : > { %537 = vmatprep.mubr.f32.mxu0 %v19454_v9  ;;  %793 = vmatpush1.msra.mxu1 %v13025_v24 }
  0xae   : > { %826 = vmatprep.mubr.f32.mxu1 %v19454_v9  ;;  %685 = vmatpush1.msra.mxu0 %v13051_v32 }
  0xaf   : > { %689 = vmatprep.subr.mxu0 %v13041_v29 }
  0xb0   : > { %540 = vmatmul.mubr.f32.gmra.mxu0 %v316_v60  ;;  %828 = vmatmul.mubr.f32.vlgmr.msra.gmra.mxu1 %v13100_v52 }
  0xb1   : > { %545 = vmatprep.mubr.f32.mxu0 %v19454_v9  ;;  %833 = vmatprep.mubr.f32.mxu1 %v19454_v9 }
  0xb2   : > { %693 = vmatpush1.msra.mxu0 %v13054_v33 }
  0xb3   : > { %697 = vmatprep.subr.mxu0 %v13057_v34 }
  0xb4   : > { %548 = vmatmul.mubr.f32.gmra.mxu0 %v327_v58  ;;  %835 = vmatmul.mubr.f32.gmra.mxu1 %v315_v59 }
  0xb5   : > { %701 = vmatpush1.msra.mxu0 %v13063_v36  ;;  %734 = vmatprep.mubr.f32.mxu0 %v19454_v9 }
  0xb6   : > { %840 = vmatprep.mubr.f32.mxu1 %v19454_v9 }
  0xb8   : > { %736 = vmatmul.mubr.f32.vlgmr.msra.gmra.mxu0 %v13100_v52  ;;  %842 = vmatmul.mubr.f32.gmra.mxu1 %v13102_v53 }
  0xb9   : > { %741 = vmatprep.mubr.f32.mxu0 %v19454_v9  ;;  %2384 = vmatprep.mubr.f32.mxu1 %v19454_v9 }
  0xbc   : > { %743 = vmatmul.mubr.f32.gmra.mxu0 %v315_v59 }
  0xbd   : > { %748 = vmatprep.mubr.f32.mxu0 %v19454_v9 }
  0xc0   : > { %750 = vmatmul.mubr.f32.gmra.mxu0 %v13102_v53 }
  0xc1   : > { %2201 = vmatprep.mubr.f32.mxu0 %v19454_v9 }
 0x158   : > { %v434_v5 = vpop.f32.mrf.mxu1 }
 0x15a   : > { %v436_v6 = vpop.f32.mrf.mxu1 }
 0x15c   : > { %v441_v7 = vpop.f32.mrf.mxu1 }
 0x15e   : > { %v443_v8 = vpop.f32.mrf.mxu1 }
 0x160   : > { %v310_v10 = vpop.f32.mrf.mxu0  ;;  %v13153_v11 = vpop.f32.mrf.mxu1 }
 0x161   : > { %v435_v50 = vadd.f32 %v434_v5, %v310_v10 }
 0x162   : > { %v312_v12 = vpop.f32.mrf.mxu0  ;;  %v13155_v13 = vpop.f32.mrf.mxu1 }
 0x163   : > { %v437_v52 = vadd.f32 %v436_v6, %v312_v12 }
 0x164   : > { %v321_v14 = vpop.f32.mrf.mxu0  ;;  %v629_v16 = vpop.f32.mrf.mxu1 }
 0x165   : > { %v442_v57 = vadd.f32 %v441_v7, %v321_v14 }
 0x166   : > { %v323_v17 = vpop.f32.mrf.mxu0  ;;  %v631_v18 = vpop.f32.mrf.mxu1 }
 0x168   : > { %v13157_v35 = vpop.f32.mrf.mxu0  ;;  %v638_v37 = vpop.f32.mrf.mxu1 }
 0x16a   : > { %v13159_v38 = vpop.f32.mrf.mxu0  ;;  %v640_v39 = vpop.f32.mrf.mxu1 }
 0x16c   : > { %v533_v40 = vpop.f32.mrf.mxu0  ;;  %v13161_v48 = vpop.f32.mrf.mxu1 }
 0x16d   : > { %v534_v53 = vadd.f32 %v533_v40, %v435_v50  ;;  %v444_v40 = vadd.f32 %v443_v8, %v323_v17 }
 0x16e   : > { %v535_v41 = vpop.f32.mrf.mxu0  ;;  %v13163_v54 = vpop.f32.mrf.mxu1 }
 0x16f   : > { %v536_v56 = vadd.f32 %v535_v41, %v437_v52  ;;  %v630_v59 = vadd.f32 %v629_v16, %v534_v53 }
 0x170   : > { %v541_v49 = vpop.f32.mrf.mxu0  ;;  %v829_v61 = vpop.f32.mrf.mxu1 }
 0x171   : > { %v542_v60 = vadd.f32 %v541_v49, %v442_v57  ;;  %v632_v0 = vadd.f32 %v631_v18, %v536_v56 }
 0x172   : > { %v543_v51 = vpop.f32.mrf.mxu0  ;;  %v831_v4 = vpop.f32.mrf.mxu1 }
 0x173   : > { %v639_v5 = vadd.f32 %v638_v37, %v542_v60  ;;  %v544_v53 = vadd.f32 %v543_v51, %v444_v40 }
 0x174   : > { %v13165_v55 = vpop.f32.mrf.mxu0  ;;  %v836_v41 = vpop.f32.mrf.mxu1 }
 0x176   : > { %v13167_v58 = vpop.f32.mrf.mxu0 }
 0x178   : > { %v737_v62 = vpop.f32.mrf.mxu0 }
 0x179   : > { %v738_v63 = vadd.f32 %v737_v62, %v630_v59 }
 0x17a   : > { %v739_v1 = vpop.f32.mrf.mxu0 }
 0x17b   : > { %v13169_v2 = vadd.f32 %v829_v61, %v738_v63  ;;  %v740_v3 = vadd.f32 %v739_v1, %v632_v0  ;;  %v641_v1 = vadd.f32 %v640_v39, %v544_v53 }
 0x17c   : > { %v744_v6 = vpop.f32.mrf.mxu0 }
 0x17d   : > { %v19457_v10 = vand.u32 2147483647, %v13169_v2  ;;  %v851_v12 = vand.u32 2139095040, %v13169_v2  ;;  %v13173_v7 = vadd.f32 %v831_v4, %v740_v3  ;;  %v745_v14 = vadd.f32 %v744_v6, %v639_v5 }
 0x17e   : > { %v746_v62 = vpop.f32.mrf.mxu0  ;;  %vm850_vm0 = vcmp.lt.s32.totalorder %v13169_v2, 0 }
 0x17f   : > { %v852_v16 = vshrl.u32 %v851_v12, 23  ;;  %v855_v18 = vand.u32 8388607, %v19457_v10  ;;  %v19456_v49 = vand.u32 2147483647, %v13173_v7  ;;  %v955_v50 = vand.u32 2139095040, %v13173_v7 }
 0x180   : > { %v13179_v37 = vadd.f32 %v836_v41, %v745_v14  ;;  %v13188_v12 = vadd.f32 %v746_v62, %v641_v1  ;;  %v19458_v41 = vmov 2475754826   ;;  %v19472_v62 = vmov 1326507024  }
 0x181   : > { %v12637_v52 = vadd.s32 4294967169, %v852_v16  ;;  %v956_v56 = vshrl.u32 %v955_v50, 23  ;;  %v959_v57 = vand.u32 8388607, %v19456_v49  ;;  %v856_v60 = vor.u32 8388608, %v855_v18 }
 0x182   : > { %v1059_v17 = vand.u32 2139095040, %v13179_v37  ;;  %v19466_v16 = vmov 683565275   ;;  %v19460_v50 = vmov 2131351028  }
 0x183   : > { %v858_v59 = vadd.s32 1, %v12637_v52  ;;  %v12641_v61 = vadd.s32 4294967169, %v956_v56  ;;  %v960_v8 = vor.u32 8388608, %v959_v57  ;;  %v13184_v5 = vshll.u32 %v856_v60, 8 }
 0x184   : > { %v1060_v6 = vshrl.u32 %v1059_v17, 23  ;;  %v19462_v52 = vmov 2102212464   ;;  %v19468_v56 = vmov 920167782  }
 0x185   : > { %vm859_vm2 = vcmp.gt.s32.totalorder %v858_v59, 0  ;;  %v962_v0 = vadd.s32 1, %v12641_v61  ;;  %v13186_v51 = vshll.u32 %v960_v8, 8 }
 0x186   : > { %v860_v63 = vsel %vm859_vm2, %v858_v59, 0 }
 0x187   : > { %v861_v3 = vshrl.u32 %v860_v63, 5  ;;  %v862_v4 = vand.u32 31, %v860_v63  ;;  %vm963_vm3 = vcmp.gt.s32.totalorder %v962_v0, 0 }
 0x189   : > { %v863_v14 = vsub.s32 32, %v862_v4  ;;  %v865_v40 = vshll.u32 %v19466_v16, %v862_v4  ;;  %v868_v18 = vshll.u32 %v19458_v41, %v862_v4  ;;  %v871_v39 = vshll.u32 %v19460_v50, %v862_v4 }
 0x18a   : > { %v874_v53 = vshll.u32 %v19462_v52, %v862_v4  ;;  %v877_v57 = vshll.u32 %v19468_v56, %v862_v4  ;;  %vm880_vm4 = vcmp.lt.s32.totalorder %v861_v3, 1  ;;  %vm881_vm5 = vcmp.lt.s32.totalorder %v861_v3, 2 }
 0x18b   : > { %v866_v59 = vshrl.u32 %v19458_v41, %v863_v14  ;;  %v869_v60 = vshrl.u32 %v19460_v50, %v863_v14  ;;  %v872_v61 = vshrl.u32 %v19462_v52, %v863_v14  ;;  %v864_v8 = vshrl.u32 %v19466_v16, %v863_v14 }
 0x18c   : > { %v875_v17 = vshrl.u32 %v19468_v56, %v863_v14  ;;  %v878_v63 = vshrl.u32 %v19472_v62, %v863_v14  ;;  %vm882_vm6 = vcmp.lt.s32.totalorder %v861_v3, 3  ;;  %v964_v4 = vsel %vm963_vm3, %v962_v0, 0 }
 0x18d   : > { %v867_v1 = vor.u32 %v866_v59, %v865_v40  ;;  %v870_v9 = vor.u32 %v869_v60, %v868_v18  ;;  %v873_v49 = vor.u32 %v872_v61, %v871_v39  ;;  %vm883_vm7 = vcmp.lt.s32.totalorder %v861_v3, 4 }
 0x18e   : > { %v876_v10 = vor.u32 %v875_v17, %v874_v53  ;;  %v879_v41 = vor.u32 %v878_v63, %v877_v57  ;;  %v966_v50 = vand.u32 31, %v964_v4  ;;  %v12645_v53 = vadd.s32 4294967169, %v1060_v6 }
 0x18f   : > { %v884_v52 = vsel %vm880_vm4, %v864_v8, %v867_v1  ;;  %v885_v36 = vsel %vm883_vm7, %v873_v49, 2102212464  ;;  %v888_v16 = vsel %vm880_vm4, %v867_v1, %v870_v9  ;;  %v892_v56 = vsel %vm880_vm4, %v870_v9, %v873_v49 }
 0x190   : > { %v886_v34 = vsel %vm882_vm6, %v870_v9, %v885_v36  ;;  %v889_v14 = vsel %vm883_vm7, %v876_v10, 920167782  ;;  %v893_v62 = vsel %vm883_vm7, %v879_v41, 1326507024  ;;  %v967_v40 = vsub.s32 32, %v966_v50 }
 0x191   : > { %v887_v18 = vsel %vm881_vm5, %v884_v52, %v886_v34  ;;  %v890_v0 = vsel %vm882_vm6, %v873_v49, %v889_v14  ;;  %v894_v39 = vsel %vm882_vm6, %v876_v10, %v893_v62  ;;  %v965_v60 = vshrl.u32 %v964_v4, 5 }
 0x192   : > { %v891_v57 = vsel %vm881_vm5, %v888_v16, %v890_v0  ;;  %v895_v59 = vsel %vm881_vm5, %v892_v56, %v894_v39  ;;  %v19723_v61 = vmov 683565275   ;;  %v903_v34 = vmul.u32 %v13184_v5, %v887_v18 }
 0x193   : > { %v969_v8 = vshll.u32 %v19723_v61, %v966_v50  ;;  %v13213_v17 = vmul.u32.u64.low %v13184_v5, %v895_v59  ;;  %v13214_v9 = vmul.u32.u64.high %v13184_v5, %v895_v59, %v13213_v17  ;;  %v19724_v10 = vmov 2475754826  }
 0x194   : > { %v13217_v36 = vmul.u32.u64.low %v13184_v5, %v891_v57  ;;  %v13218_v41 = vmul.u32.u64.high %v13184_v5, %v891_v57, %v13217_v36  ;;  %v970_v49 = vshrl.u32 %v19724_v10, %v967_v40  ;;  %v972_v6 = vshll.u32 %v19724_v10, %v966_v50 }
 0x195   : > { %v19725_v3 = vmov 2131351028   ;;  %v19726_v56 = vmov 2102212464   ;;  %v19727_v1 = vmov 920167782   ;;  %v968_v59 = vshrl.u32 %v19723_v61, %v967_v40 }
 0x196   : > { %v973_v16 = vshrl.u32 %v19725_v3, %v967_v40  ;;  %v975_v52 = vshll.u32 %v19725_v3, %v966_v50  ;;  %v976_v62 = vshrl.u32 %v19726_v56, %v967_v40  ;;  %v978_v63 = vshll.u32 %v19726_v56, %v966_v50 }
 0x197   : > { %v979_v4 = vshrl.u32 %v19727_v1, %v967_v40  ;;  %v971_v14 = vor.u32 %v970_v49, %v969_v8  ;;  %v981_v39 = vshll.u32 %v19727_v1, %v966_v50  ;;  %v19728_v57 = vmov 1326507024  }
 0x198   : > { %v974_v0 = vor.u32 %v973_v16, %v972_v6  ;;  %v982_v5 = vshrl.u32 %v19728_v57, %v967_v40  ;;  %vm905_vm8 = vc.u32 %v13214_v9, %v13217_v36  ;;  %v906_v18 = vadd.s32 1, %v13218_v41 }
 0x199   : > { %v977_v17 = vor.u32 %v976_v62, %v975_v52  ;;  %v980_v33 = vor.u32 %v979_v4, %v978_v63  ;;  %vm984_vm9 = vcmp.lt.s32.totalorder %v965_v60, 1  ;;  %vm985_vm10 = vcmp.lt.s32.totalorder %v965_v60, 2 }
 0x19a   : > { %v983_v29 = vor.u32 %v982_v5, %v981_v39  ;;  %v907_v32 = vsel %vm905_vm8, %v906_v18, %v13218_v41  ;;  %vm986_vm11 = vcmp.lt.s32.totalorder %v965_v60, 3  ;;  %vm987_vm12 = vcmp.lt.s32.totalorder %v965_v60, 4 }
 0x19b   : > { %v992_v8 = vsel %vm984_vm9, %v971_v14, %v974_v0  ;;  %v908_v50 = vadd.s32 %v907_v32, %v903_v34  ;;  %v989_v49 = vsel %vm987_vm12, %v977_v17, 2102212464  ;;  %v993_v6 = vsel %vm987_vm12, %v980_v33, 920167782 }
 0x19c   : > { %v996_v16 = vsel %vm984_vm9, %v974_v0, %v977_v17  ;;  %v988_v31 = vsel %vm984_vm9, %v968_v59, %v971_v14  ;;  %v994_v30 = vsel %vm986_vm11, %v977_v17, %v993_v6  ;;  %v997_v28 = vsel %vm987_vm12, %v983_v29, 1326507024 }
 0x19d   : > { %v1066_v27 = vadd.s32 1, %v12645_v53  ;;  %v909_v23 = vadd.s32 536870912, %v908_v50  ;;  %v990_v40 = vsel %vm986_vm11, %v974_v0, %v989_v49  ;;  %v995_v52 = vsel %vm985_vm10, %v992_v8, %v994_v30 }
 0x19e   : > { %v998_v62 = vsel %vm986_vm11, %v980_v33, %v997_v28  ;;  %v13239_v41 = vmul.u32.u64.low %v13186_v51, %v995_v52  ;;  %v13240_v4 = vmul.u32.u64.high %v13186_v51, %v995_v52, %v13239_v41  ;;  %v19490_v32 = vand.u32 2147483647, %v13179_v37  ;;  %v838_v28 = vpop.f32.mrf.mxu1 }
 0x19f   : > { %v999_v63 = vsel %vm985_vm10, %v996_v16, %v998_v62  ;;  %v13244_v34 = vshrl.u32 %v909_v23, 30  ;;  %vm1067_vm13 = vcmp.gt.s32.totalorder %v1066_v27, 0  ;;  %v991_v53 = vsel %vm985_vm10, %v988_v31, %v990_v40 }
 0x1a0   : > { %v13247_v14 = vmul.u32.u64.low %v13186_v51, %v999_v63  ;;  %v13248_v29 = vmul.u32.u64.high %v13186_v51, %v999_v63, %v13247_v14  ;;  %v1068_v30 = vsel %vm1067_vm13, %v1066_v27, 0  ;;  %v1010_v0 = vadd.s32 1, %v13240_v4 }
 0x1a1   : > { %v911_v33 = vshll.u32 %v13244_v34, 30  ;;  %v1063_v39 = vand.u32 8388607, %v19490_v32  ;;  %v13256_v5 = vadd.f32 %v838_v28, %v13188_v12  ;;  %v1007_v18 = vmul.u32 %v13186_v51, %v991_v53 }
 0x1a2   : > { %vm1009_vm14 = vc.u32 %v13248_v29, %v13239_v41  ;;  %v1070_v60 = vand.u32 31, %v1068_v30  ;;  %v449_v27 = vadd.f32 %v13153_v11, %v13157_v35  ;;  %v904_v40 = vadd.s32 %v13217_v36, %v13214_v9 }
 0x1a3   : > { %v912_v23 = vsub.s32 %v908_v50, %v911_v33  ;;  %v1011_v31 = vsel %vm1009_vm14, %v1010_v0, %v13240_v4  ;;  %v1064_v6 = vor.u32 8388608, %v1063_v39  ;;  %v1163_v50 = vand.u32 2139095040, %v13256_v5 }
 0x1a4   : > { %v1012_v17 = vadd.s32 %v1011_v31, %v1007_v18  ;;  %v550_v8 = vadd.f32 %v13165_v55, %v449_v27  ;;  %v1071_v12 = vsub.s32 32, %v1070_v60  ;;  %v13278_v53 = vshrl.u32 %v1068_v30, 5 }
 0x1a5   : > { %v914_v59 = vsub.s32 0, %v912_v23  ;;  %v13274_v63 = vshll.u32 %v1064_v6, 8  ;;  %v1164_v55 = vshrl.u32 %v1163_v50, 23  ;;  %v1073_v9 = vshll.u32 %v19723_v61, %v1070_v60 }
 0x1a6   : > { %v1013_v16 = vadd.s32 536870912, %v1012_v17  ;;  %v13271_v11 = vadd.f32 %v13161_v48, %v550_v8  ;;  %v1074_v62 = vshrl.u32 %v19724_v10, %v1071_v12  ;;  %v1077_v28 = vshrl.u32 %v19725_v3, %v1071_v12 }
 0x1a7   : > { %v12638_v49 = vmin.u32 %v914_v59, %v912_v23  ;;  %v1076_v48 = vshll.u32 %v19724_v10, %v1070_v60  ;;  %v1080_v36 = vshrl.u32 %v19726_v56, %v1071_v12  ;;  %v1083_v39 = vshrl.u32 %v19727_v1, %v1071_v12 }
 0x1a8   : > { %v13268_v52 = vshrl.u32 %v1013_v16, 30  ;;  %v1086_v18 = vshrl.u32 %v19728_v57, %v1071_v12  ;;  %v1075_v30 = vor.u32 %v1074_v62, %v1073_v9  ;;  %v1079_v59 = vshll.u32 %v19725_v3, %v1070_v60 }
 0x1a9   : > { %v916_v51 = vclz %v12638_v49  ;;  %v1078_v49 = vor.u32 %v1077_v28, %v1076_v48  ;;  %v1082_v6 = vshll.u32 %v19726_v56, %v1070_v60  ;;  %v1085_v50 = vshll.u32 %v19727_v1, %v1070_v60 }
 0x1aa   : > { %v1015_v14 = vshll.u32 %v13268_v52, 30  ;;  %v12649_v26 = vadd.s32 4294967169, %v1164_v55  ;;  %v1008_v9 = vadd.s32 %v13239_v41, %v13248_v29  ;;  %v1072_v28 = vshrl.u32 %v19723_v61, %v1071_v12 }
 0x1ab   : > { %v12639_v35 = vadd.s32 4294967294, %v916_v51  ;;  %v1084_v32 = vor.u32 %v1083_v39, %v1082_v6  ;;  %v1087_v4 = vor.u32 %v1086_v18, %v1085_v50  ;;  %vm1088_vm2 = vcmp.lt.s32.totalorder %v13278_v53, 1 }
 0x1ac   : > { %v13284_v0 = vsub.s32 %v1012_v17, %v1015_v14  ;;  %vm1089_vm3 = vcmp.lt.s32.totalorder %v13278_v53, 2  ;;  %vm1091_vm4 = vcmp.lt.s32.totalorder %v13278_v53, 4  ;;  %vm1090_vm6 = vcmp.lt.s32.totalorder %v13278_v53, 3 }
 0x1ad   : > { %vm12640_vm15 = vcmp.lt.s32.totalorder %v12639_v35, 0  ;;  %v1096_v29 = vsel %vm1088_vm2, %v1075_v30, %v1078_v49  ;;  %v1097_v55 = vsel %vm1091_vm4, %v1084_v32, 920167782  ;;  %vm954_vm10 = vcmp.lt.s32.totalorder %v13173_v7, 0 }
 0x1ae   : > { %v919_v33 = vsel %vm12640_vm15, 0, %v12639_v35  ;;  %v1018_v8 = vsub.s32 0, %v13284_v0  ;;  %v1081_v35 = vor.u32 %v1080_v36, %v1079_v59  ;;  %v1092_v59 = vsel %vm1088_vm2, %v1072_v28, %v1075_v30 }
 0x1af   : > { %v920_v27 = vsub.s32 32, %v919_v33  ;;  %v924_v31 = vsub.s32 4294967266, %v919_v33  ;;  %v921_v16 = vshll.u32 %v912_v23, %v919_v33  ;;  %v19729_v23 = vand.u32 2147483647, %v13169_v2 }
 0x1b0   : > { %v12642_v14 = vmin.u32 %v1018_v8, %v13284_v0  ;;  %v1093_v41 = vsel %vm1091_vm4, %v1081_v35, 2102212464  ;;  %v1100_v36 = vsel %vm1088_vm2, %v1078_v49, %v1081_v35  ;;  %v1101_v33 = vsel %vm1091_vm4, %v1087_v4, 1326507024 }
 0x1b1   : > { %v922_v51 = vshrl.u32 %v904_v40, %v920_v27  ;;  %v925_v17 = vadd.s32 127, %v924_v31  ;;  %vm13302_vm5 = vcmp.le.f32.partialorder %v19729_v23, 0.7853982  ;;  %v1098_v27 = vsel %vm1090_vm6, %v1081_v35, %v1097_v55 }
 0x1b2   : > { %v1020_v48 = vclz %v12642_v14  ;;  %v1102_v31 = vsel %vm1090_vm6, %v1084_v32, %v1101_v33  ;;  %v1099_v8 = vsel %vm1089_vm3, %v1096_v29, %v1098_v27  ;;  %v1094_v32 = vsel %vm1090_vm6, %v1078_v49, %v1093_v41 }
 0x1b3   : > { %v923_v25 = vor.u32 %v922_v51, %v921_v16  ;;  %v926_v62 = vshll.u32 %v925_v17, 23  ;;  %v1103_v6 = vsel %vm1089_vm3, %v1100_v36, %v1102_v31  ;;  %v1170_v35 = vadd.s32 1, %v12649_v26 }
 0x1b4   : > { %v12643_v12 = vadd.s32 4294967294, %v1020_v48  ;;  %v1160_v28 = vand.u32 2147483647, %v13256_v5  ;;  %v19732_v49 = vsub.s32 4, %v13244_v34  ;;  %v1095_v41 = vsel %vm1089_vm3, %v1092_v59, %v1094_v32 }
 0x1b5   : > { %v927_v40 = vor.u32 4788187, %v926_v62  ;;  %v930_v18 = vcvt.s32.f32 %v923_v25  ;;  %v13322_v25 = vmul.u32.u64.low %v13274_v63, %v1103_v6  ;;  %v13323_v16 = vmul.u32.u64.high %v13274_v63, %v1103_v6, %v13322_v25 }
 0x1b6   : > { %vm12644_vm7 = vcmp.lt.s32.totalorder %v12643_v12, 0  ;;  %v13328_v30 = vmul.u32.u64.low %v13274_v63, %v1099_v8  ;;  %v13329_v62 = vmul.u32.u64.high %v13274_v63, %v1099_v8, %v13328_v30  ;;  %vm1171_vm8 = vcmp.gt.s32.totalorder %v1170_v35, 0 }
 0x1b7   : > { %v928_v39 = vand.u32 2147483647, %v927_v40  ;;  %v1023_v4 = vsel %vm12644_vm7, 0, %v12643_v12  ;;  %v935_v26 = vsel %vm850_vm0, %v19732_v49, %v13244_v34  ;;  %v1172_v12 = vsel %vm1171_vm8, %v1170_v35, 0 }
 0x1b8   : > { %v1024_v51 = vsub.s32 32, %v1023_v4  ;;  %v1028_v17 = vsub.s32 4294967266, %v1023_v4  ;;  %v1025_v48 = vshll.u32 %v13284_v0, %v1023_v4  ;;  %vm1113_vm9 = vc.u32 %v13323_v16, %v13328_v30 }
 0x1b9   : > { %v931_v50 = vmul.f32 %v930_v18, %v928_v39  ;;  %v1114_v36 = vadd.s32 1, %v13329_v62  ;;  %v1174_v33 = vand.u32 31, %v1172_v12  ;;  %v1111_v53 = vmul.u32 %v13274_v63, %v1095_v41 }
 0x1ba   : > { %v1026_v23 = vshrl.u32 %v1008_v9, %v1024_v51  ;;  %v1029_v40 = vadd.s32 127, %v1028_v17  ;;  %v1167_v39 = vand.u32 8388607, %v1160_v28  ;;  %v13355_v18 = vsel %vm13302_vm5, 0, %v935_v26 }
 0x1bb   : > { %v932_v14 = vxor.u32 2147483648, %v931_v50  ;;  %v1115_v27 = vsel %vm1113_vm9, %v1114_v36, %v13329_v62  ;;  %v13358_v31 = vshrl.u32 %v1172_v12, 5  ;;  %v13360_v59 = vsub.s32 32, %v1174_v33 }
 0x1bc   : > { %v1027_v9 = vor.u32 %v1026_v23, %v1025_v48  ;;  %v1030_v55 = vshll.u32 %v1029_v40, 23  ;;  %v1177_v4 = vshll.u32 %v19723_v61, %v1174_v33  ;;  %v1180_v25 = vshll.u32 %v19724_v10, %v1174_v33  ;;  %v843_v48 = vpop.f32.mrf.mxu1 }
 0x1bd   : > { %v933_v29 = vsel %vm850_vm0, %v932_v14, %v931_v50  ;;  %v1116_v50 = vadd.s32 %v1115_v27, %v1111_v53  ;;  %v1178_v63 = vshrl.u32 %v19724_v10, %v13360_v59  ;;  %v1181_v60 = vshrl.u32 %v19725_v3, %v13360_v59 }
 0x1be   : > { %v936_v0 = vsel %vm13302_vm5, %v13169_v2, %v933_v29  ;;  %v1031_v34 = vor.u32 4788187, %v1030_v55  ;;  %v1034_v6 = vcvt.s32.f32 %v1027_v9  ;;  %v1184_v51 = vshrl.u32 %v19726_v56, %v13360_v59 }
 0x1bf   : > { %12783 = vcosq.f32 %v936_v0  ;;  %v1117_v32 = vadd.s32 536870912, %v1116_v50  ;;  %v1186_v35 = vshll.u32 %v19726_v56, %v1174_v33  ;;  %v1187_v14 = vshrl.u32 %v19727_v1, %v13360_v59 }
 0x1c0   : > { %12785 = vsinq.f32 %v936_v0  ;;  %v1032_v8 = vand.u32 2147483647, %v1031_v34  ;;  %v19733_v62 = vand.u32 2147483647, %v13173_v7  ;;  %v1179_v23 = vor.u32 %v1178_v63, %v1177_v4 }
 0x1c1   : > { %v1182_v40 = vor.u32 %v1181_v60, %v1180_v25  ;;  %v1183_v29 = vshll.u32 %v19725_v3, %v1174_v33  ;;  %v1038_v26 = vsub.s32 4, %v13268_v52  ;;  %v13381_v41 = vshrl.u32 %v1117_v32, 30  ;;  %v751_v25 = vpop.f32.mrf.mxu0 }
 0x1c2   : > { %v1035_v17 = vmul.f32 %v1034_v6, %v1032_v8  ;;  %vm13375_vm11 = vcmp.le.f32.partialorder %v19733_v62, 0.7853982  ;;  %v1188_v12 = vor.u32 %v1187_v14, %v1186_v35  ;;  %v1565_v0 = vand.u32 3, %v13355_v18 }
 0x1c3   : > { %v1168_v9 = vor.u32 8388608, %v1167_v39  ;;  %v1185_v55 = vor.u32 %v1184_v51, %v1183_v29  ;;  %v1190_v36 = vshrl.u32 %v19728_v57, %v13360_v59  ;;  %v1119_v53 = vshll.u32 %v13381_v41, 30 }
 0x1c4   : > { %v1036_v49 = vxor.u32 2147483648, %v1035_v17  ;;  %vm1192_vm12 = vcmp.lt.s32.totalorder %v13358_v31, 1  ;;  %vm1195_vm13 = vcmp.lt.s32.totalorder %v13358_v31, 4  ;;  %v1189_v8 = vshll.u32 %v19727_v1, %v1174_v33 }
 0x1c5   : > { %v1200_v39 = vsel %vm1192_vm12, %v1179_v23, %v1182_v40  ;;  %v1201_v6 = vsel %vm1195_vm13, %v1188_v12, 920167782  ;;  %v1039_v4 = vsel %vm954_vm10, %v1038_v26, %v13268_v52  ;;  %v13402_v63 = vsub.s32 %v1116_v50, %v1119_v53 }
 0x1c6   : > { %v1037_v34 = vsel %vm954_vm10, %v1036_v49, %v1035_v17  ;;  %vm1194_vm14 = vcmp.lt.s32.totalorder %v13358_v31, 3  ;;  %v1191_v60 = vor.u32 %v1190_v36, %v1189_v8  ;;  %vm1193_vm15 = vcmp.lt.s32.totalorder %v13358_v31, 2 }
 0x1c7   : > { %v1040_v27 = vsel %vm13375_vm11, %v13173_v7, %v1037_v34  ;;  %v1202_v33 = vsel %vm1194_vm14, %v1185_v55, %v1201_v6  ;;  %vm940_vm0 = vweird.f32 %v13169_v2  ;;  %v1122_v17 = vsub.s32 0, %v13402_v63  ;;  %v2101_v2 = vld [vmem:[%s19451_s1 + $0x58] sm:$0xff] }
 0x1c8   : > { %12787 = vcosq.f32 %v1040_v27  ;;  %v1203_v52 = vsel %vm1193_vm15, %v1200_v39, %v1202_v33  ;;  %vm1567_vm2 = vcmp.eq.s32.totalorder %v1565_v0, 0  ;;  %v13417_v35 = vshll.u32 %v1168_v9, 8 }
 0x1c9   : > { %12789 = vsinq.f32 %v1040_v27  ;;  %v752_v14 = vadd.f32 %v751_v25, %v13271_v11  ;;  %vm1570_vm3 = vcmp.eq.s32.totalorder %v1565_v0, 2  ;;  %v13423_v29 = vsel %vm13375_vm11, 0, %v1039_v4 }
 0x1ca   : > { %v12646_v49 = vmin.u32 %v1122_v17, %v13402_v63  ;;  %v1205_v36 = vsel %vm1195_vm13, %v1191_v60, 1326507024  ;;  %v13432_v9 = vmul.u32.u64.low %v13417_v35, %v1203_v52  ;;  %v13433_v34 = vmul.u32.u64.high %v13417_v35, %v1203_v52, %v13432_v9 }
 0x1cb   : > { %vm1566_vm4 = vcmp.lt.s32.totalorder %v1565_v0, 2  ;;  %v1204_v27 = vsel %vm1192_vm12, %v1182_v40, %v1185_v55  ;;  %v1176_v39 = vshrl.u32 %v19723_v61, %v13360_v59  ;;  %v1197_v6 = vsel %vm1195_vm13, %v1185_v55, 2102212464 }
 0x1cc   : > { %v13408_v51 = vpop.eup %12783  ;;  %v1124_v53 = vclz %v12646_v49  ;;  %v13445_v4 = vadd.f32 %v843_v48, %v752_v14  ;;  %v1668_v25 = vand.u32 3, %v13423_v29  ;;  %v1206_v33 = vsel %vm1194_vm14, %v1188_v12, %v1205_v36 }
 0x1cd   : > { %v13414_v50 = vpop.eup %12785  ;;  %v19496_v32 = vxor.u32 2147483648, %v13408_v51  ;;  %v1196_v17 = vsel %vm1192_vm12, %v1176_v39, %v1179_v23  ;;  %v1207_v59 = vsel %vm1193_vm15, %v1204_v27, %v1206_v33  ;;  %v1198_v55 = vsel %vm1194_vm14, %v1182_v40, %v1197_v6 }
 0x1ce   : > { %v19495_v62 = vxor.u32 2147483648, %v13414_v50  ;;  %v12647_v60 = vadd.s32 4294967294, %v1124_v53  ;;  %v13461_v52 = vmul.u32.u64.low %v13417_v35, %v1207_v59  ;;  %v13462_v14 = vmul.u32.u64.high %v13417_v35, %v1207_v59, %v13461_v52 }
 0x1cf   : > { %v1572_v26 = vsel %vm1570_vm3, %v19496_v32, %v13414_v50  ;;  %v451_v49 = vadd.f32 %v13155_v13, %v13159_v38  ;;  %v1267_v12 = vand.u32 2139095040, %v13445_v4  ;;  %vm1669_vm6 = vcmp.lt.s32.totalorder %v1668_v25, 2 }
 0x1d0   : > { %v1569_v11 = vsel %vm1567_vm2, %v13408_v51, %v19495_v62  ;;  %vm12648_vm5 = vcmp.lt.s32.totalorder %v12647_v60, 0  ;;  %v1112_v23 = vadd.s32 %v13328_v30, %v13323_v16  ;;  %vm1670_vm7 = vcmp.eq.s32.totalorder %v1668_v25, 0 }
 0x1d1   : > { %v1573_v8 = vsel %vm1566_vm4, %v1569_v11, %v1572_v26  ;;  %v1127_v26 = vsel %vm12648_vm5, 0, %v12647_v60  ;;  %v1199_v40 = vsel %vm1193_vm15, %v1196_v17, %v1198_v55  ;;  %v1218_v53 = vadd.s32 1, %v13433_v34 }
 0x1d2   : > { %v13449_v0 = vsel %vm940_vm0, nan, %v1573_v8  ;;  %v1128_v36 = vsub.s32 32, %v1127_v26  ;;  %v1132_v11 = vsub.s32 4294967266, %v1127_v26  ;;  %v1268_v27 = vshrl.u32 %v1267_v12, 23 }
 0x1d3   : > { %19736 = vst [vmem:[#allocation30_spill] sm:$0xff] %v13449_v0  ;;  %v1129_v38 = vshll.u32 %v13402_v63, %v1127_v26  ;;  %vm1673_vm8 = vcmp.eq.s32.totalorder %v1668_v25, 2  ;;  %vm1217_vm9 = vc.u32 %v13462_v14, %v13432_v9  ;;  %v19499_v17 = vand.u32 2147483647, %v13445_v4 }
 0x1d4   : > { %v1130_v39 = vshrl.u32 %v1112_v23, %v1128_v36  ;;  %v1133_v6 = vadd.s32 127, %v1132_v11  ;;  %v12653_v30 = vadd.s32 4294967169, %v1268_v27  ;;  %v1215_v59 = vmul.u32 %v13417_v35, %v1199_v40 }
 0x1d5   : > { %v13469_v48 = vpop.eup %12787  ;;  %v1219_v55 = vsel %vm1217_vm9, %v1218_v53, %v13433_v34  ;;  %vm1044_vm10 = vweird.f32 %v13173_v7  ;;  %v552_v23 = vadd.f32 %v13167_v58, %v451_v49  ;;  %v1142_v35 = vsub.s32 4, %v13381_v41 }
 0x1d6   : > { %v13474_v8 = vpop.eup %12789  ;;  %v19497_v13 = vxor.u32 2147483648, %v13469_v48  ;;  %v1131_v60 = vor.u32 %v1130_v39, %v1129_v38  ;;  %v1134_v33 = vshll.u32 %v1133_v6, 23  ;;  %v1274_v52 = vadd.s32 1, %v12653_v30  ;;  %v753_v6 = vpop.f32.mrf.mxu0 }
 0x1d7   : > { %v19498_v16 = vxor.u32 2147483648, %v13474_v8  ;;  %v1220_v11 = vadd.s32 %v1219_v55, %v1215_v59  ;;  %v1271_v40 = vand.u32 8388607, %v19499_v17  ;;  %v650_v49 = vadd.f32 %v13163_v54, %v552_v23 }
 0x1d8   : > { %v1675_v31 = vsel %vm1673_vm8, %v19497_v13, %v13474_v8  ;;  %v1135_v12 = vor.u32 4788187, %v1134_v33  ;;  %vm1275_vm11 = vcmp.gt.s32.totalorder %v1274_v52, 0  ;;  %v1138_v38 = vcvt.s32.f32 %v1131_v60 }
 0x1d9   : > { %v1672_v63 = vsel %vm1670_vm7, %v13469_v48, %v19498_v16  ;;  %v1276_v39 = vsel %vm1275_vm11, %v1274_v52, 0  ;;  %v1221_v34 = vadd.s32 536870912, %v1220_v11  ;;  %vm1058_vm13 = vcmp.lt.s32.totalorder %v13179_v37, 0 }
 0x1da   : > { %v1676_v26 = vsel %vm1669_vm6, %v1672_v63, %v1675_v31  ;;  %v1136_v27 = vand.u32 2147483647, %v1135_v12  ;;  %v1278_v25 = vand.u32 31, %v1276_v39  ;;  %v19737_v31 = vand.u32 2147483647, %v13179_v37 }
 0x1db   : > { %v13496_v36 = vsel %vm1044_vm10, nan, %v1676_v26  ;;  %v13501_v30 = vshrl.u32 %v1221_v34, 30  ;;  %v1143_v63 = vsel %vm1058_vm13, %v1142_v35, %v13381_v41  ;;  %v1272_v55 = vor.u32 8388608, %v1271_v40 }
 0x1dc   : > { %v1139_v53 = vmul.f32 %v1138_v38, %v1136_v27  ;;  %v1279_v58 = vsub.s32 32, %v1278_v25  ;;  %vm13506_vm12 = vcmp.le.f32.partialorder %v19737_v31, 0.7853982  ;;  %v754_v52 = vadd.f32 %v753_v6, %v650_v49 }
 0x1dd   : > { %v1223_v59 = vshll.u32 %v13501_v30, 30  ;;  %v1277_v34 = vshrl.u32 %v1276_v39, 5  ;;  %v1281_v35 = vshll.u32 %v19723_v61, %v1278_v25  ;;  %v1284_v40 = vshll.u32 %v19724_v10, %v1278_v25 }
 0x1de   : > { %v1140_v60 = vxor.u32 2147483648, %v1139_v53  ;;  %v1282_v12 = vshrl.u32 %v19724_v10, %v1279_v58  ;;  %v1285_v54 = vshrl.u32 %v19725_v3, %v1279_v58  ;;  %v1291_v23 = vshrl.u32 %v19727_v1, %v1279_v58 }
 0x1df   : > { %v13519_v38 = vsub.s32 %v1220_v11, %v1223_v59  ;;  %v1288_v41 = vshrl.u32 %v19726_v56, %v1279_v58  ;;  %v1287_v49 = vshll.u32 %v19725_v3, %v1278_v25  ;;  %v1293_v31 = vshll.u32 %v19727_v1, %v1278_v25 }
 0x1e0   : > { %v1141_v26 = vsel %vm1058_vm13, %v1140_v60, %v1139_v53  ;;  %v1290_v53 = vshll.u32 %v19726_v56, %v1278_v25  ;;  %v1283_v60 = vor.u32 %v1282_v12, %v1281_v35  ;;  %v1286_v11 = vor.u32 %v1285_v54, %v1284_v40 }
 0x1e1   : > { %v1144_v27 = vsel %vm13506_vm12, %v13179_v37, %v1141_v26  ;;  %v1226_v6 = vsub.s32 0, %v13519_v38  ;;  %v1294_v39 = vshrl.u32 %v19728_v57, %v1279_v58  ;;  %v1289_v62 = vor.u32 %v1288_v41, %v1287_v49 }
 0x1e2   : > { %12791 = vcosq.f32 %v1144_v27  ;;  %v1292_v59 = vor.u32 %v1291_v23, %v1290_v53  ;;  %v13532_v32 = vsel %vm13506_vm12, 0, %v1143_v63  ;;  %vm1296_vm14 = vcmp.lt.s32.totalorder %v1277_v34, 1 }
 0x1e3   : > { %12793 = vsinq.f32 %v1144_v27  ;;  %v12650_v26 = vmin.u32 %v1226_v6, %v13519_v38  ;;  %v1295_v13 = vor.u32 %v1294_v39, %v1293_v31  ;;  %v845_v27 = vpop.f32.mrf.mxu1  ;;  %vm1299_vm15 = vcmp.lt.s32.totalorder %v1277_v34, 4 }
 0x1e4   : > { %v1312_v17 = vshll.u32 %v1272_v55, 8  ;;  %vm1298_vm2 = vcmp.lt.s32.totalorder %v1277_v34, 3  ;;  %v1304_v25 = vsel %vm1296_vm14, %v1283_v60, %v1286_v11  ;;  %v1305_v12 = vsel %vm1299_vm15, %v1292_v59, 920167782 }
 0x1e5   : > { %v1228_v16 = vclz %v12650_v26  ;;  %v13535_v54 = vadd.f32 %v845_v27, %v754_v52  ;;  %vm1297_vm3 = vcmp.lt.s32.totalorder %v1277_v34, 2  ;;  %v1306_v41 = vsel %vm1298_vm2, %v1289_v62, %v1305_v12 }
 0x1e6   : > { %v1308_v33 = vsel %vm1296_vm14, %v1286_v11, %v1289_v62  ;;  %v1280_v63 = vshrl.u32 %v19723_v61, %v1279_v58  ;;  %v1301_v35 = vsel %vm1299_vm15, %v1289_v62, 2102212464  ;;  %v1307_v40 = vsel %vm1297_vm3, %v1304_v25, %v1306_v41 }
 0x1e7   : > { %v12651_v23 = vadd.s32 4294967294, %v1228_v16  ;;  %v1309_v53 = vsel %vm1299_vm15, %v1295_v13, 1326507024  ;;  %v13542_v6 = vmul.u32.u64.low %v1312_v17, %v1307_v40  ;;  %v13543_v49 = vmul.u32.u64.high %v1312_v17, %v1307_v40, %v13542_v6 }
 0x1e8   : > { %v1310_v55 = vsel %vm1298_vm2, %v1292_v59, %v1309_v53  ;;  %v1771_v16 = vand.u32 3, %v13532_v32  ;;  %v1216_v52 = vadd.s32 %v13432_v9, %v13462_v14  ;;  %v1300_v26 = vsel %vm1296_vm14, %v1280_v63, %v1283_v60 }
 0x1e9   : > { %vm12652_vm4 = vcmp.lt.s32.totalorder %v12651_v23, 0  ;;  %v1311_v39 = vsel %vm1297_vm3, %v1308_v33, %v1310_v55  ;;  %v1302_v13 = vsel %vm1298_vm2, %v1286_v11, %v1301_v35  ;;  %v1371_v25 = vand.u32 2139095040, %v13535_v54 }
 0x1ea   : > { %v1231_v31 = vsel %vm12652_vm4, 0, %v12651_v23  ;;  %v13552_v27 = vmul.u32.u64.low %v1312_v17, %v1311_v39  ;;  %v13553_v59 = vmul.u32.u64.high %v1312_v17, %v1311_v39, %v13552_v27  ;;  %v1303_v33 = vsel %vm1297_vm3, %v1300_v26, %v1302_v13 }
 0x1eb   : > { %v1232_v58 = vsub.s32 32, %v1231_v31  ;;  %v1236_v62 = vsub.s32 4294967266, %v1231_v31  ;;  %v1233_v41 = vshll.u32 %v13519_v38, %v1231_v31  ;;  %v1322_v60 = vadd.s32 1, %v13543_v49 }
 0x1ec   : > { %v1372_v11 = vshrl.u32 %v1371_v25, 23  ;;  %vm1776_vm5 = vcmp.eq.s32.totalorder %v1771_v16, 2  ;;  %vm1773_vm6 = vcmp.eq.s32.totalorder %v1771_v16, 0  ;;  %vm1321_vm7 = vc.u32 %v13553_v59, %v13542_v6 }
 0x1ed   : > { %v1234_v40 = vshrl.u32 %v1216_v52, %v1232_v58  ;;  %v1237_v9 = vadd.s32 127, %v1236_v62  ;;  %vm1772_vm8 = vcmp.lt.s32.totalorder %v1771_v16, 2  ;;  %v1319_v52 = vmul.u32 %v1312_v17, %v1303_v33 }
 0x1ee   : > { %vm1148_vm9 = vweird.f32 %v13179_v37  ;;  %v1323_v39 = vsel %vm1321_vm7, %v1322_v60, %v13543_v49  ;;  %v12657_v58 = vadd.s32 4294967169, %v1372_v11  ;;  %vm1161_vm12 = vcmp.le.f32.partialorder %v1160_v28, 0.7853982 }
 0x1ef   : > { %v13556_v12 = vpop.eup %12791  ;;  %v1235_v35 = vor.u32 %v1234_v40, %v1233_v41  ;;  %v1238_v53 = vshll.u32 %v1237_v9, 23  ;;  %v1324_v27 = vadd.s32 %v1323_v39, %v1319_v52  ;;  %v1246_v41 = vsub.s32 4, %v13501_v30 }
 0x1f0   : > { %v13559_v14 = vpop.eup %12793  ;;  %v19501_v23 = vxor.u32 2147483648, %v13556_v12  ;;  %v1378_v16 = vadd.s32 1, %v12657_v58  ;;  %vm1162_vm13 = vcmp.lt.s32.totalorder %v13256_v5, 0 }
 0x1f1   : > { %v19500_v63 = vxor.u32 2147483648, %v13559_v14  ;;  %v1239_v55 = vor.u32 4788187, %v1238_v53  ;;  %v1242_v13 = vcvt.s32.f32 %v1235_v35  ;;  %v1325_v40 = vadd.s32 536870912, %v1324_v27 }
 0x1f2   : > { %v1778_v38 = vsel %vm1776_vm5, %v19501_v23, %v13559_v14  ;;  %vm1379_vm11 = vcmp.gt.s32.totalorder %v1378_v16, 0  ;;  %v1247_v11 = vsel %vm1162_vm13, %v1246_v41, %v13501_v30  ;;  %v19502_v53 = vand.u32 2147483647, %v13535_v54 }
 0x1f3   : > { %v1775_v34 = vsel %vm1773_vm6, %v13556_v12, %v19500_v63  ;;  %v1240_v26 = vand.u32 2147483647, %v1239_v55  ;;  %v13580_v9 = vshrl.u32 %v1325_v40, 30  ;;  %v1380_v33 = vsel %vm1379_vm11, %v1378_v16, 0 }
 0x1f4   : > { %v1779_v31 = vsel %vm1772_vm8, %v1775_v34, %v1778_v38  ;;  %v1382_v49 = vand.u32 31, %v1380_v33  ;;  %v13589_v52 = vsel %vm1161_vm12, 0, %v1247_v11  ;;  %v1375_v39 = vand.u32 8388607, %v19502_v53 }
 0x1f5   : > { %v13577_v62 = vsel %vm1148_vm9, nan, %v1779_v31  ;;  %v1243_v25 = vmul.f32 %v1242_v13, %v1240_v26  ;;  %v1327_v35 = vshll.u32 %v13580_v9, 30  ;;  %v1381_v40 = vshrl.u32 %v1380_v33, 5 }
 0x1f6   : > { %v1383_v34 = vsub.s32 32, %v1382_v49  ;;  %v1385_v30 = vshll.u32 %v19723_v61, %v1382_v49  ;;  %v1388_v26 = vshll.u32 %v19724_v10, %v1382_v49  ;;  %v1394_v16 = vshll.u32 %v19726_v56, %v1382_v49 }
 0x1f7   : > { %v1244_v17 = vxor.u32 2147483648, %v1243_v25  ;;  %v1328_v55 = vsub.s32 %v1324_v27, %v1327_v35  ;;  %v1376_v63 = vor.u32 8388608, %v1375_v39  ;;  %vm1400_vm15 = vcmp.lt.s32.totalorder %v1381_v40, 1 }
 0x1f8   : > { %v1386_v28 = vshrl.u32 %v19724_v10, %v1383_v34  ;;  %v1389_v58 = vshrl.u32 %v19725_v3, %v1383_v34  ;;  %v1392_v13 = vshrl.u32 %v19726_v56, %v1383_v34  ;;  %v1395_v27 = vshrl.u32 %v19727_v1, %v1383_v34 }
 0x1f9   : > { %v1245_v60 = vsel %vm1162_vm13, %v1244_v17, %v1243_v25  ;;  %v1330_v31 = vsub.s32 0, %v1328_v55  ;;  %v1874_v25 = vand.u32 3, %v13589_v52  ;;  %v1391_v17 = vshll.u32 %v19725_v3, %v1382_v49 }
 0x1fa   : > { %v1248_v38 = vsel %vm1161_vm12, %v13256_v5, %v1245_v60  ;;  %v1387_v60 = vor.u32 %v1386_v28, %v1385_v30  ;;  %v1390_v11 = vor.u32 %v1389_v58, %v1388_v26  ;;  %v1396_v35 = vor.u32 %v1395_v27, %v1394_v16 }
 0x1fb   : > { %12795 = vcosq.f32 %v1248_v38  ;;  %v12654_v41 = vmin.u32 %v1330_v31, %v1328_v55  ;;  %v1393_v23 = vor.u32 %v1392_v13, %v1391_v17  ;;  %v1320_v10 = vadd.s32 %v13542_v6, %v13553_v59 }
 0x1fc   : > { %12797 = vsinq.f32 %v1248_v38  ;;  %v1384_v53 = vshrl.u32 %v19723_v61, %v1383_v34  ;;  %v1397_v56 = vshll.u32 %v19727_v1, %v1382_v49  ;;  %v1398_v0 = vshrl.u32 %v19728_v57, %v1383_v34 }
 0x1fd   : > { %v1332_v38 = vclz %v12654_v41  ;;  %vm1876_vm14 = vcmp.eq.s32.totalorder %v1874_v25, 0  ;;  %vm1401_vm2 = vcmp.lt.s32.totalorder %v1381_v40, 2  ;;  %vm1403_vm3 = vcmp.lt.s32.totalorder %v1381_v40, 4 }
 0x1fe   : > { %v1399_v3 = vor.u32 %v1398_v0, %v1397_v56  ;;  %vm1402_vm4 = vcmp.lt.s32.totalorder %v1381_v40, 3  ;;  %v1408_v33 = vsel %vm1400_vm15, %v1387_v60, %v1390_v11  ;;  %v1409_v28 = vsel %vm1403_vm3, %v1396_v35, 920167782 }
 0x1ff   : > { %v12655_v31 = vadd.s32 4294967294, %v1332_v38  ;;  %v1405_v39 = vsel %vm1403_vm3, %v1393_v23, 2102212464  ;;  %v1410_v6 = vsel %vm1402_vm4, %v1393_v23, %v1409_v28  ;;  %v1412_v61 = vsel %vm1400_vm15, %v1390_v11, %v1393_v23 }
 0x200   : > { %v1411_v1 = vsel %vm1401_vm2, %v1408_v33, %v1410_v6  ;;  %v1413_v57 = vsel %vm1403_vm3, %v1399_v3, 1326507024  ;;  %v1416_v49 = vshll.u32 %v1376_v63, 8  ;;  %v1404_v58 = vsel %vm1400_vm15, %v1384_v53, %v1387_v60 }
 0x201   : > { %vm12656_vm5 = vcmp.lt.s32.totalorder %v12655_v31, 0  ;;  %v1414_v0 = vsel %vm1402_vm4, %v1396_v35, %v1413_v57  ;;  %v1406_v13 = vsel %vm1402_vm4, %v1390_v11, %v1405_v39  ;;  %vm1879_vm6 = vcmp.eq.s32.totalorder %v1874_v25, 2 }
 0x202   : > { %v1335_v59 = vsel %vm12656_vm5, 0, %v12655_v31  ;;  %v1415_v16 = vsel %vm1401_vm2, %v1412_v61, %v1414_v0  ;;  %v13617_v27 = vmul.u32.u64.low %v1416_v49, %v1411_v1  ;;  %v13618_v41 = vmul.u32.u64.high %v1416_v49, %v1411_v1, %v13617_v27 }
 0x203   : > { %v1336_v34 = vsub.s32 32, %v1335_v59  ;;  %v1340_v30 = vsub.s32 4294967266, %v1335_v59  ;;  %v1337_v63 = vshll.u32 %v1328_v55, %v1335_v59  ;;  %v1407_v33 = vsel %vm1401_vm2, %v1404_v58, %v1406_v13 }
 0x204   : > { %v13624_v60 = vmul.u32.u64.low %v1416_v49, %v1415_v16  ;;  %v13625_v35 = vmul.u32.u64.high %v1416_v49, %v1415_v16, %v13624_v60  ;;  %vm1875_vm7 = vcmp.lt.s32.totalorder %v1874_v25, 2  ;;  %vm19505_vm8 = vweird.f32 %v13256_v5 }
 0x205   : > { %v1338_v38 = vshrl.u32 %v1320_v10, %v1336_v34  ;;  %v1341_v56 = vadd.s32 127, %v1340_v30  ;;  %v1426_v10 = vadd.s32 1, %v13618_v41  ;;  %v1423_v61 = vmul.u32 %v1416_v49, %v1407_v33 }
 0x206   : > { %vm1425_vm11 = vc.u32 %v13625_v35, %v13617_v27  ;;  %vm1266_vm12 = vcmp.lt.s32.totalorder %v13445_v4, 0  ;;  %v19740_v0 = vand.u32 2147483647, %v13445_v4  ;;  %vm1356_vm4 = vweird.f32 %v13445_v4 }
 0x207   : > { %v1339_v31 = vor.u32 %v1338_v38, %v1337_v63  ;;  %v1342_v3 = vshll.u32 %v1341_v56, 23  ;;  %v1427_v1 = vsel %vm1425_vm11, %v1426_v10, %v13618_v41  ;;  %v1350_v63 = vsub.s32 4, %v13580_v9 }
 0x208   : > { %v13613_v26 = vpop.eup %12795  ;;  %v1428_v57 = vadd.s32 %v1427_v1, %v1423_v61  ;;  %vm1265_vm13 = vcmp.le.f32.partialorder %v19740_v0, 0.7853982 }
 0x209   : > { %v13620_v23 = vpop.eup %12797  ;;  %v1260_v17 = vxor.u32 2147483648, %v13613_v26  ;;  %v1343_v39 = vor.u32 4788187, %v1342_v3  ;;  %v1346_v59 = vcvt.s32.f32 %v1339_v31  ;;  %v1351_v56 = vsel %vm1266_vm12, %v1350_v63, %v13580_v9 }
 0x20a   : > { %v1257_v53 = vxor.u32 2147483648, %v13620_v23  ;;  %v1429_v34 = vadd.s32 536870912, %v1428_v57 }
 0x20b   : > { %v1881_v11 = vsel %vm1879_vm6, %v1260_v17, %v13620_v23  ;;  %v1344_v40 = vand.u32 2147483647, %v1343_v39 }
 0x20c   : > { %v1878_v55 = vsel %vm1876_vm14, %v13613_v26, %v1257_v53  ;;  %v13644_v58 = vshrl.u32 %v1429_v34, 30  ;;  %v941_v34 = vadd.s32 3, %v13355_v18 }
 0x20d   : > { %v1882_v28 = vsel %vm1875_vm7, %v1878_v55, %v1881_v11  ;;  %v1347_v25 = vmul.f32 %v1346_v59, %v1344_v40  ;;  %v1353_v11 = vsel %vm1265_vm13, 0, %v1351_v56  ;;  %v1149_v56 = vadd.s32 3, %v13532_v32 }
 0x20e   : > { %v13639_v6 = vsel %vm19505_vm8, nan, %v1882_v28  ;;  %v1431_v16 = vshll.u32 %v13644_v58, 30  ;;  %v1977_v33 = vand.u32 3, %v1353_v11  ;;  %v1424_v28 = vadd.s32 %v13617_v27, %v13625_v35 }
 0x20f   : > { %v1348_v30 = vxor.u32 2147483648, %v1347_v25  ;;  %v942_v63 = vand.u32 3, %v941_v34 }
 0x210   : > { %v1432_v41 = vsub.s32 %v1428_v57, %v1431_v16  ;;  %vm1982_vm15 = vcmp.eq.s32.totalorder %v1977_v33, 2  ;;  %vm1979_vm2 = vcmp.eq.s32.totalorder %v1977_v33, 0  ;;  %vm1978_vm3 = vcmp.lt.s32.totalorder %v1977_v33, 2 }
 0x211   : > { %v1349_v13 = vsel %vm1266_vm12, %v1348_v30, %v1347_v25  ;;  %v1045_v30 = vadd.s32 3, %v13423_v29  ;;  %vm947_vm5 = vcmp.eq.s32.totalorder %v942_v63, 2  ;;  %vm943_vm7 = vcmp.lt.s32.totalorder %v942_v63, 2 }
 0x212   : > { %v1352_v49 = vsel %vm1265_vm13, %v13445_v4, %v1349_v13  ;;  %v1434_v38 = vsub.s32 0, %v1432_v41  ;;  %vm1370_vm12 = vcmp.lt.s32.totalorder %v13535_v54, 0 }
 0x213   : > { %12799 = vcosq.f32 %v1352_v49  ;;  %v1046_v29 = vand.u32 3, %v1045_v30 }
 0x214   : > { %12801 = vsinq.f32 %v1352_v49  ;;  %v12658_v60 = vmin.u32 %v1434_v38, %v1432_v41 }
 0x215   : > { %vm1048_vm6 = vcmp.eq.s32.totalorder %v1046_v29, 0  ;;  %vm1051_vm11 = vcmp.eq.s32.totalorder %v1046_v29, 2 }
 0x216   : > { %v1436_v31 = vclz %v12658_v60  ;;  %v1253_v60 = vadd.s32 3, %v13589_v52  ;;  %v19744_v52 = vxor.u32 2147483648, %v13474_v8 }
 0x218   : > { %v12659_v3 = vadd.s32 4294967294, %v1436_v31 }
 0x21a   : > { %vm12660_vm14 = vcmp.lt.s32.totalorder %v12659_v3, 0 }
 0x21b   : > { %v1439_v55 = vsel %vm12660_vm14, 0, %v12659_v3  ;;  %v1357_v3 = vadd.s32 3, %v1353_v11  ;;  %vm2106_vm14 = vcmask 195584   ;;  %v1050_v11 = vsel %vm1048_vm6, %v13469_v48, %v19744_v52 }
 0x21c   : > { %v1440_v39 = vsub.s32 32, %v1439_v55  ;;  %v1444_v61 = vsub.s32 4294967266, %v1439_v55  ;;  %v1441_v1 = vshll.u32 %v1432_v41, %v1439_v55  ;;  %v1150_v55 = vand.u32 3, %v1149_v56 }
 0x21d   : > { %v1358_v34 = vand.u32 3, %v1357_v3 }
 0x21e   : > { %v1442_v57 = vshrl.u32 %v1424_v28, %v1440_v39  ;;  %v1445_v25 = vadd.s32 127, %v1444_v61  ;;  %v1454_v28 = vsub.s32 4, %v13644_v58  ;;  %v1254_v39 = vand.u32 3, %v1253_v60 }
 0x21f   : > { %v19741_v61 = vand.u32 2147483647, %v13535_v54  ;;  %vm1155_vm6 = vcmp.eq.s32.totalorder %v1150_v55, 2  ;;  %vm1360_vm1 = vcmp.eq.s32.totalorder %v1358_v34, 0  ;;  %vm1363_vm8 = vcmp.eq.s32.totalorder %v1358_v34, 2 }
 0x220   : > { %v13652_v10 = vpop.eup %12799  ;;  %v1443_v0 = vor.u32 %v1442_v57, %v1441_v1  ;;  %v1446_v13 = vshll.u32 %v1445_v25, 23  ;;  %v19745_v57 = vxor.u32 2147483648, %v13469_v48  ;;  %v19747_v48 = vxor.u32 2147483648, %v13414_v50 }
 0x221   : > { %v13655_v40 = vpop.eup %12801  ;;  %v1364_v59 = vxor.u32 2147483648, %v13652_v10  ;;  %vm13676_vm13 = vcmp.le.f32.partialorder %v19741_v61, 0.7853982 }
 0x222   : > { %v1361_v9 = vxor.u32 2147483648, %v13655_v40  ;;  %v1447_v18 = vor.u32 4788187, %v1446_v13  ;;  %v1450_v38 = vcvt.s32.f32 %v1443_v0  ;;  %v1053_v25 = vsel %vm1051_vm11, %v19745_v57, %v13474_v8 }
 0x223   : > { %v1984_v27 = vsel %vm1982_vm15, %v1364_v59, %v13655_v40  ;;  %vm944_vm15 = vcmp.eq.s32.totalorder %v942_v63, 0  ;;  %v1455_v13 = vsel %vm1370_vm12, %v1454_v28, %v13644_v58  ;;  %vm1256_vm11 = vcmp.eq.s32.totalorder %v1254_v39, 0 }
 0x224   : > { %v1981_v35 = vsel %vm1979_vm2, %v13652_v10, %v1361_v9  ;;  %v1448_v41 = vand.u32 2147483647, %v1447_v18  ;;  %vm1047_vm2 = vcmp.lt.s32.totalorder %v1046_v29, 2  ;;  %v946_v8 = vsel %vm944_vm15, %v13408_v51, %v19747_v48 }
 0x225   : > { %v1985_v49 = vsel %vm1978_vm3, %v1981_v35, %v1984_v27  ;;  %v2098_v27 = vld [vmem:[%s19451_s1 + $0x40] sm:$0xff]  ;;  %v19746_v35 = vxor.u32 2147483648, %v13408_v51  ;;  %vm1152_vm3 = vcmp.eq.s32.totalorder %v1150_v55, 0  ;;  %v2099_v51 = vld [vmem:[%s19451_s1 + $0x48] sm:$0xff]  ;;  %v1365_v56 = vsel %vm1363_vm8, %v1364_v59, %v13655_v40 }
 0x226   : > { %v13668_v16 = vsel %vm1356_vm4, nan, %v1985_v49  ;;  %v1451_v31 = vmul.f32 %v1450_v38, %v1448_v41  ;;  %v1054_v49 = vsel %vm1047_vm2, %v1050_v11, %v1053_v25  ;;  %v2108_v18 = vsel %vm2106_vm14, %v2098_v27, 0 }
 0x227   : > { %v949_v0 = vsel %vm947_vm5, %v19746_v35, %v13414_v50  ;;  %v19748_v41 = vxor.u32 2147483648, %v13556_v12  ;;  %vm1259_vm5 = vcmp.eq.s32.totalorder %v1254_v39, 2  ;;  %v19749_v50 = vxor.u32 2147483648, %v13559_v14 }
 0x228   : > { %v1452_v33 = vxor.u32 2147483648, %v1451_v31  ;;  %v1362_v38 = vsel %vm1360_vm1, %v13652_v10, %v1361_v9  ;;  %v1457_v60 = vsel %vm13676_vm13, 0, %v1455_v13  ;;  %v1258_v3 = vsel %vm1256_vm11, %v13613_v26, %v1257_v53  ;;  %v2100_v26 = vld [vmem:[%s19451_s1 + $0x50] sm:$0xff] }
 0x229   : > { %v1157_v29 = vsel %vm1155_vm6, %v19748_v41, %v13559_v14  ;;  %v1154_v58 = vsel %vm1152_vm3, %v13556_v12, %v19749_v50  ;;  %v1261_v12 = vsel %vm1259_vm5, %v1260_v17, %v13620_v23  ;;  %v13728_v14 = vand.u32 4294901760, %v2108_v18 }
 0x22a   : > { %v1453_v32 = vsel %vm1370_vm12, %v1452_v33, %v1451_v31  ;;  %v1055_v31 = vsel %vm1044_vm10, nan, %v1054_v49  ;;  %v950_v9 = vsel %vm943_vm7, %v946_v8, %v949_v0  ;;  %vm1151_vm1 = vcmp.lt.s32.totalorder %v1150_v55, 2 }
 0x22b   : > { %v1456_v30 = vsel %vm13676_vm13, %v13535_v54, %v1453_v32  ;;  %vm1359_vm8 = vcmp.lt.s32.totalorder %v1358_v34, 2  ;;  %v2111_v10 = vsel %vm2106_vm14, %v2099_v51, 0  ;;  %v1158_v40 = vsel %vm1151_vm1, %v1154_v58, %v1157_v29 }
 0x22c   : > { %12803 = vcosq.f32 %v1456_v30  ;;  %vm1255_vm12 = vcmp.lt.s32.totalorder %v1254_v39, 2  ;;  %v1366_v7 = vsel %vm1359_vm8, %v1362_v38, %v1365_v56  ;;  %v1461_v59 = vadd.s32 3, %v1457_v60  ;;  %v2102_v38 = vld [vmem:[%s19451_s1 + $0x60] sm:$0xff] }
 0x22d   : > { %12805 = vsinq.f32 %v1456_v30  ;;  %v13732_v33 = vand.u32 4294901760, %v1055_v31  ;;  %v1262_v28 = vsel %vm1255_vm12, %v1258_v3, %v1261_v12  ;;  %v951_v23 = vsel %vm940_vm0, nan, %v950_v9 }
 0x22e   : > { %v13740_v17 = vsub.f32 %v2108_v18, %v13728_v14  ;;  %v13742_v53 = vand.u32 4294901760, %v2111_v10  ;;  %v1159_v63 = vsel %vm1148_vm9, nan, %v1158_v40  ;;  %v1367_v55 = vsel %vm1356_vm4, nan, %v1366_v7 }
 0x22f   : > { %19750 = vst [vmem:[#allocation31_spill] sm:$0xff] %v13732_v33  ;;  %vm19751_vm10 = vweird.f32 %v13256_v5  ;;  %v1462_v61 = vand.u32 3, %v1461_v59  ;;  %v2080_v1 = vand.u32 3, %v1457_v60  ;;  %v2114_v32 = vsel %vm2106_vm14, %v2100_v26, 0  ;;  %v2103_v26 = vld [vmem:[%s19451_s1 + $0x68] sm:$0xff] }
 0x230   : > { %v1263_v39 = vsel %vm19751_vm10, nan, %v1262_v28  ;;  %v13754_v52 = vand.u32 4294901760, %v951_v23  ;;  %vm1460_vm0 = vweird.f32 %v13535_v54  ;;  %v13758_v37 = vsub.f32 %v1055_v31, %v13732_v33 }
 0x231   : > { %v13760_v11 = vand.u32 4294901760, %v1159_v63  ;;  %v13762_v5 = vand.u32 4294901760, %v1367_v55  ;;  %v19508_v57 = vand.u32 4294901760, %v13740_v17  ;;  %v13766_v25 = vsub.f32 %v2111_v10, %v13742_v53 }
 0x232   : > { %19752 = vst [vmem:[#allocation32_spill] sm:$0xff] %v13754_v52  ;;  %19753 = vst [vmem:[#allocation33_spill] sm:$0xff] %v13758_v37  ;;  %v13768_v30 = vand.u32 4294901760, %v1263_v39  ;;  %v13770_v35 = vand.u32 4294901760, %v2114_v32  ;;  %v2117_v0 = vsel %vm2106_vm14, %v2101_v2, 0  ;;  %vm1467_vm9 = vcmp.eq.s32.totalorder %v1462_v61, 2 }
 0x233   : > { %19754 = vst [vmem:[#allocation34_spill] sm:$0xff] %v13760_v11  ;;  %19755 = vst [vmem:[#allocation35_spill] sm:$0xff] %v13762_v5  ;;  %vm2081_vm4 = vcmp.lt.s32.totalorder %v2080_v1, 2  ;;  %vm2085_vm7 = vcmp.eq.s32.totalorder %v2080_v1, 2  ;;  %vm1464_vm13 = vcmp.eq.s32.totalorder %v1462_v61, 0  ;;  %vm2082_vm15 = vcmp.eq.s32.totalorder %v2080_v1, 0 }
 0x234   : > { %19756 = vst [vmem:[#allocation36_spill] sm:$0xff] %v13768_v30  ;;  %vm1463_vm2 = vcmp.lt.s32.totalorder %v1462_v61, 2  ;;  %v13774_v41 = vsub.f32 %v1367_v55, %v13762_v5  ;;  %v13777_v50 = vsub.f32 %v1263_v39, %v13768_v30  ;;  %v13780_v58 = vsub.f32 %v1159_v63, %v13760_v11 }
 0x235   : > { %v19507_v31 = vand.u32 4294901760, %v13766_v25  ;;  %v13792_v3 = vand.u32 4294901760, %v2117_v0  ;;  %v2205_v9 = vsub.f32 %v13740_v17, %v19508_v57  ;;  %v13800_v10 = vsub.f32 %v2114_v32, %v13770_v35 }
 0x236   : > { %19757 = vst [vmem:[#allocation37_spill] sm:$0xff] %v13774_v41  ;;  %19758 = vst [vmem:[#allocation38_spill] sm:$0xff] %v13777_v50  ;;  %v13803_v40 = vand.u32 4294901760, %v13774_v41  ;;  %v2120_v54 = vsel %vm2106_vm14, %v2102_v38, 0  ;;  %v13811_v59 = vand.u32 4294901760, %v13777_v50  ;;  %v13814_v28 = vsub.f32 %v951_v23, %v13754_v52 }
 0x237   : > { %19759 = vst [vmem:[#allocation39_spill] sm:$0xff] %v13780_v58  ;;  %v2216_v63 = vsub.f32 %v13766_v25, %v19507_v31  ;;  %v13824_v55 = vand.u32 4294901760, %v13780_v58  ;;  %v13827_v39 = vand.u32 4294901760, %v13758_v37  ;;  %v13830_v61 = vsub.f32 %v2117_v0, %v13792_v3 }
 0x238   : > { %19761 = vst [vmem:[#allocation41_spill] sm:$0xff] %v13803_v40  ;;  %19763 = vst [vmem:[#allocation43_spill] sm:$0xff] %v13811_v59  ;;  %v2206_v23 = vand.u32 4294901760, %v2205_v9  ;;  %v19506_v32 = vand.u32 4294901760, %v13800_v10  ;;  %v13837_v2 = vand.u32 4294901760, %v2120_v54  ;;  %v2331_v0 = vsub.f32 %v13777_v50, %v13811_v59 }
 0x239   : > { %v12804_v4 = vpop.eup %12803  ;;  %19764 = vst [vmem:[#allocation44_spill] sm:$0xff] %v13814_v28  ;;  %19765 = vst [vmem:[#allocation45_spill] sm:$0xff] %v13824_v55  ;;  %vm19782_vm3 = vcmask 154624  }
 0x23a   : > { %v12806_v34 = vpop.eup %12805  ;;  %v1468_v27 = vxor.u32 2147483648, %v12804_v4  ;;  %19766 = vst [vmem:[#allocation46_spill] sm:$0xff] %v13827_v39  ;;  %v2227_v38 = vsub.f32 %v13800_v10, %v19506_v32  ;;  %v2105_v32 = vld [vmem:[%s19451_s1 + $0x78] sm:$0xff]  ;;  %vm19783_vm6 = vmmov %vm19782_vm3 }
 0x23b   : > { %v1465_v48 = vxor.u32 2147483648, %v12806_v34  ;;  %vm19785_vm11 = vmmov %vm19782_vm3 }
 0x23c   : > { %v1469_v8 = vsel %vm1467_vm9, %v1468_v27, %v12806_v34  ;;  %v2087_v13 = vsel %vm2085_vm7, %v1468_v27, %v12806_v34  ;;  %v2123_v34 = vsel %vm2106_vm14, %v2103_v26, 0  ;;  %v19770_v26 = vmov 0.0   ;;  %vm19786_vm5 = vmmov %vm19782_vm3 }
 0x23d   : > { %v1466_v49 = vsel %vm1464_vm13, %v12804_v4, %v1465_v48  ;;  %v2084_v18 = vsel %vm2082_vm15, %v12804_v4, %v1465_v48  ;;  %v2325_v4 = vsub.f32 %v13774_v41, %v13803_v40  ;;  %v13849_v48 = vand.u32 4294901760, %v13814_v28  ;;  %vm19787_vm1 = vmmov %vm19782_vm3 }
 0x23e   : > { %v1470_v29 = vsel %vm1463_vm2, %v1466_v49, %v1469_v8  ;;  %v2088_v51 = vsel %vm2081_vm4, %v2084_v18, %v2087_v13  ;;  %v2104_v8 = vld [vmem:[%s19451_s1 + $0x70] sm:$0xff]  ;;  %v2217_v13 = vand.u32 4294901760, %v2216_v63  ;;  %v2337_v49 = vsub.f32 %v13780_v58, %v13824_v55  ;;  %vm19788_vm8 = vmmov %vm19787_vm1 }
 0x23f   : > { %v1471_v56 = vsel %vm1460_vm0, nan, %v1470_v29  ;;  %v13789_v60 = vsel %vm1460_vm0, nan, %v2088_v51  ;;  %19768 = vst [vmem:[#allocation48_spill] sm:$0xff] %v13849_v48  ;;  %v2343_v18 = vsub.f32 %v13758_v37, %v13827_v39  ;;  %v19511_v29 = vand.u32 4294901760, %v13830_v61  ;;  %vm19789_vm12 = vmmov %vm19787_vm1 }
 0x240   : > { %v13794_v12 = vand.u32 4294901760, %v1471_v56  ;;  %v13869_v9 = vand.u32 4294901760, %v2123_v34  ;;  %v13873_v63 = vand.u32 4294901760, %v2325_v4  ;;  %v13887_v4 = vand.u32 4294901760, %v2337_v49  ;;  %vm19793_vm10 = vmmov %vm19787_vm1 }
 0x241   : > { %v2228_v31 = vand.u32 4294901760, %v2227_v38  ;;  %v2129_v49 = vsel %vm2106_vm14, %v2105_v32, 0  ;;  %vm4903_vm0 = vcmask 523264   ;;  %vm20155_vm9 = vmmov %vm19787_vm1 }
 0x242   : > { %19760 = vst [vmem:[#allocation40_spill] sm:$0xff] %v13794_v12  ;;  %2158 = vmatprep.subr.mxu0 %v13794_v12  ;;  %v13808_v7 = vsub.f32 %v1471_v56, %v13794_v12  ;;  %v13867_v56 = vsub.f32 %v2120_v54, %v13837_v2  ;;  %19771 = vst [vmem:[#allocation50_spill] sm:$0xff] %v13873_v63  ;;  %v2349_v54 = vsub.f32 %v13814_v28, %v13849_v48 }
 0x243   : > { %2160 = vmatpush1.msra.mxu0 %v13762_v5  ;;  %19773 = vst [vmem:[#allocation52_spill] sm:$0xff] %v13887_v4  ;;  %vm20160_vm4 = vmmov %vm19787_vm1 }
 0x244   : > { %19762 = vst [vmem:[#allocation42_spill] sm:$0xff] %v13808_v7  ;;  %2162 = vmatprep.subr.mxu0 %v13768_v30  ;;  %v13834_v1 = vand.u32 4294901760, %v13808_v7  ;;  %v19513_v57 = vand.u32 4294901760, %v13867_v56  ;;  %vm20164_vm7 = vmmov %vm19787_vm1 }
 0x245   : > { %2164 = vmatpush1.msra.mxu0 %v13760_v11  ;;  %vm20165_vm13 = vmmov %vm19787_vm1 }
 0x246   : > { %19767 = vst [vmem:[#allocation47_spill] sm:$0xff] %v13834_v1  ;;  %2166 = vmatprep.subr.mxu0 %v13732_v33  ;;  %v2319_v27 = vsub.f32 %v13808_v7, %v13834_v1  ;;  %vm20166_vm15 = vmmov %vm19787_vm1 }
 0x247   : > { %2168 = vmatpush1.msra.mxu0 %v13754_v52  ;;  %vm20167_vm2 = vmmov %vm19787_vm1 }
 0x248   : > { %2207 = vmatmul.mubr.f32.vlgmr.msra.gmra.mxu0 %v2206_v23  ;;  %2469 = vmatprep.subr.mxu0 %v13808_v7  ;;  %v13861_v51 = vand.u32 4294901760, %v2319_v27  ;;  %v2126_v23 = vsel %vm2106_vm14, %v2104_v8, 0  ;;  %v13878_v27 = vand.u32 4294901760, %v2331_v0  ;;  %v13889_v8 = vand.u32 4294901760, %v2343_v18  ;;  %v3875_v7 = vld [vmem:[%s19451_s1 + $0x80] sm:$0xff] }
 0x249   : > { %2472 = vmatpush1.msra.mxu0 %v13774_v41  ;;  %2212 = vmatprep.mubr.f32.mxu0 %v19770_v26  ;;  %v2238_v0 = vsub.f32 %v13830_v61, %v19511_v29  ;;  %v13899_v41 = vand.u32 4294901760, %v2126_v23  ;;  %v2249_v18 = vsub.f32 %v13867_v56, %v19513_v57  ;;  %v13918_v29 = vand.u32 4294901760, %v2129_v49 }
 0x24a   : > { %19769 = vst [vmem:[#allocation49_spill] sm:$0xff] %v13861_v51  ;;  %2321 = vmatprep.subr.mxu1 %v13861_v51  ;;  %2475 = vmatprep.subr.mxu0 %v13777_v50  ;;  %19772 = vst [vmem:[#allocation51_spill] sm:$0xff] %v13878_v27  ;;  %v13897_v50 = vsub.f32 %v2123_v34, %v13869_v9 }
 0x24b   : > { %2327 = vmatpush1.msra.mxu1 %v13873_v63  ;;  %2478 = vmatpush1.msra.mxu0 %v13780_v58  ;;  %19774 = vst [vmem:[#allocation53_spill] sm:$0xff] %v13889_v8  ;;  %v2239_v34 = vand.u32 4294901760, %v2238_v0  ;;  %v13916_v38 = vsub.f32 %v2126_v23, %v13899_v41  ;;  %v13932_v0 = vsub.f32 %v2129_v49, %v13918_v29 }
 0x24c   : > { %2218 = vmatmul.mubr.f32.gmra.mxu0 %v2217_v13  ;;  %2333 = vmatprep.subr.mxu1 %v13878_v27  ;;  %v13906_v13 = vand.u32 4294901760, %v2349_v54  ;;  %v19512_v32 = vand.u32 4294901760, %v13897_v50 }
 0x24d   : > { %2481 = vmatprep.subr.mxu0 %v13758_v37  ;;  %2339 = vmatpush1.msra.mxu1 %v13887_v4  ;;  %v2270_v54 = vand.u32 4294901760, %v13916_v38  ;;  %v2281_v49 = vand.u32 4294901760, %v13932_v0 }
 0x24e   : > { %2484 = vmatpush1.msra.mxu0 %v13814_v28  ;;  %2345 = vmatprep.subr.mxu1 %v13889_v8  ;;  %19775 = vst [vmem:[#allocation54_spill] sm:$0xff] %v13906_v13  ;;  %v2260_v23 = vsub.f32 %v13897_v50, %v19512_v32 }
 0x24f   : > { %2754 = vmatprep.subr.mxu0 %v13834_v1  ;;  %2223 = vmatprep.mubr.f32.mxu0 %v19770_v26  ;;  %v2282_v57 = vsub.f32 %v13932_v0, %v2281_v49  ;;  %v19797_v1 = vld [vmem:[#allocation19_spill] sm:$0xff] }
 0x250   : > { %2351 = vmatpush1.msra.mxu1 %v13906_v13  ;;  %2229 = vmatmul.mubr.f32.gmra.mxu0 %v2228_v31  ;;  %v2250_v31 = vand.u32 4294901760, %v2249_v18  ;;  %v2271_v18 = vsub.f32 %v13916_v38, %v2270_v54 }
 0x251   : > { %2386 = vmatmul.mubr.f32.vlgmr.msra.gmra.mxu1 %v13728_v14  ;;  %2609 = vmatprep.subr.mxu1 %v13794_v12 }
 0x252   : > { %2611 = vmatpush1.msra.mxu1 %v13762_v5  ;;  %2234 = vmatprep.mubr.f32.mxu0 %v19770_v26  ;;  %v2272_v32 = vand.u32 4294901760, %v2271_v18 }
 0x253   : > { %2613 = vmatprep.subr.mxu1 %v13768_v30  ;;  %2391 = vmatprep.mubr.f32.mxu1 %v19770_v26 }
 0x254   : > { %2615 = vmatpush1.msra.mxu1 %v13760_v11  ;;  %2240 = vmatmul.mubr.f32.gmra.mxu0 %v2239_v34  ;;  %v2261_v34 = vand.u32 4294901760, %v2260_v23  ;;  %v19780_v23 = vand.u32 4294901760, %v13867_v56 }
 0x255   : > { %2393 = vmatmul.mubr.f32.gmra.mxu1 %v13742_v53  ;;  %2617 = vmatprep.subr.mxu1 %v13732_v33 }
 0x256   : > { %2619 = vmatpush1.msra.mxu1 %v13754_v52  ;;  %2245 = vmatprep.mubr.f32.mxu0 %v19770_v26 }
 0x257   : > { %2891 = vmatprep.subr.mxu1 %v13794_v12  ;;  %2398 = vmatprep.mubr.f32.mxu1 %v19770_v26 }
 0x258   : > { %2251 = vmatmul.mubr.f32.gmra.mxu0 %v2250_v31  ;;  %v2283_v31 = vand.u32 4294901760, %v2282_v57  ;;  %v19776_v57 = vand.u32 4294901760, %v13740_v17 }
 0x259   : > { %2400 = vmatmul.mubr.f32.gmra.mxu1 %v13770_v35  ;;  %2256 = vmatprep.mubr.f32.mxu0 %v19770_v26 }
 0x25a   : > { %2405 = vmatprep.mubr.f32.mxu1 %v19770_v26 }
 0x25c   : > { %2262 = vmatmul.mubr.f32.gmra.mxu0 %v2261_v34 }
 0x25d   : > { %2407 = vmatmul.mubr.f32.gmra.mxu1 %v13792_v3  ;;  %2267 = vmatprep.mubr.f32.mxu0 %v19770_v26 }
 0x25e   : > { %2412 = vmatprep.mubr.f32.mxu1 %v19770_v26 }
 0x260   : > { %2273 = vmatmul.mubr.f32.gmra.mxu0 %v2272_v32  ;;  %v19777_v32 = vand.u32 4294901760, %v13766_v25 }
 0x261   : > { %2414 = vmatmul.mubr.f32.gmra.mxu1 %v13837_v2  ;;  %2278 = vmatprep.mubr.f32.mxu0 %v19770_v26 }
 0x262   : > { %2419 = vmatprep.mubr.f32.mxu1 %v19770_v26 }
 0x264   : > { %2284 = vmatmul.mubr.f32.gmra.mxu0 %v2283_v31 }
 0x265   : > { %2421 = vmatmul.mubr.f32.gmra.mxu1 %v13869_v9  ;;  %2517 = vmatprep.mubr.f32.mxu0 %v19770_v26 }
 0x266   : > { %2426 = vmatprep.mubr.f32.mxu1 %v19770_v26 }
 0x268   : > { %2520 = vmatmul.mubr.f32.vlgmr.msra.gmra.mxu0 %v13740_v17  ;;  %v19778_v17 = vand.u32 4294901760, %v13800_v10 }
 0x269   : > { %2428 = vmatmul.mubr.f32.gmra.mxu1 %v13899_v41  ;;  %2758 = vmatpush1.msra.mxu0 %v13803_v40 }
 0x26a   : > { %2762 = vmatprep.subr.mxu0 %v13811_v59  ;;  %2433 = vmatprep.mubr.f32.mxu1 %v19770_v26 }
 0x26b   : > { %2766 = vmatpush1.msra.mxu0 %v13824_v55  ;;  %2525 = vmatprep.mubr.f32.mxu0 %v19770_v26 }
 0x26c   : > { %2770 = vmatprep.subr.mxu0 %v13827_v39  ;;  %2528 = vmatmul.mubr.f32.gmra.mxu0 %v13766_v25  ;;  %v19779_v25 = vand.u32 4294901760, %v13830_v61 }
 0x26d   : > { %2435 = vmatmul.mubr.f32.gmra.mxu1 %v13918_v29  ;;  %2774 = vmatpush1.msra.mxu0 %v13849_v48 }
 0x26e   : > { %2533 = vmatprep.mubr.f32.mxu0 %v19770_v26  ;;  %2652 = vmatprep.mubr.f32.mxu1 %v19770_v26 }
 0x26f   : > { %3042 = vmatprep.subr.mxu0 %v13014_v19 }
 0x270   : > { %2536 = vmatmul.mubr.f32.gmra.mxu0 %v13800_v10  ;;  %v19781_v10 = vand.u32 4294901760, %v13897_v50 }
 0x271   : > { %2656 = vmatmul.mubr.f32.vlgmr.msra.gmra.mxu1 %v19776_v57  ;;  %2541 = vmatprep.mubr.f32.mxu0 %v19770_v26 }
 0x272   : > { %2893 = vmatpush1.msra.mxu1 %v13762_v5  ;;  %2661 = vmatprep.mubr.f32.mxu1 %v19770_v26 }
 0x273   : > { %2895 = vmatprep.subr.mxu1 %v13768_v30 }
 0x274   : > { %2897 = vmatpush1.msra.mxu1 %v13760_v11  ;;  %2544 = vmatmul.mubr.f32.gmra.mxu0 %v13830_v61 }
 0x275   : > { %2899 = vmatprep.subr.mxu1 %v13732_v33  ;;  %2665 = vmatmul.mubr.f32.gmra.mxu1 %v19777_v32  ;;  %v3884_v33 = vsel %vm2106_vm14, %v3875_v7, 0 }
 0x276   : > { %2901 = vmatpush1.msra.mxu1 %v13754_v52  ;;  %2549 = vmatprep.mubr.f32.mxu0 %v19770_v26  ;;  %v14360_v7 = vand.u32 4294901760, %v3884_v33 }
 0x277   : > { %2670 = vmatprep.mubr.f32.mxu1 %v19770_v26  ;;  %3205 = vmatprep.subr.mxu1 %v13078_v42 }
 0x278   : > { %2552 = vmatmul.mubr.f32.gmra.mxu0 %v13867_v56  ;;  %v2091_v56 = vld [vmem:[%s19451_s1 + $0x8] sm:$0xff] }
 0x279   : > { %2674 = vmatmul.mubr.f32.gmra.mxu1 %v19778_v17  ;;  %2557 = vmatprep.mubr.f32.mxu0 %v19770_v26  ;;  %v2094_v17 = vld [vmem:[%s19451_s1 + $0x20] sm:$0xff] }
 0x27a   : > { %2679 = vmatprep.mubr.f32.mxu1 %v19770_v26 }
 0x27c   : > { %2560 = vmatmul.mubr.f32.gmra.mxu0 %v13897_v50  ;;  %v2090_v50 = vld [vmem:[%s19451_s1] sm:$0xff] }
 0x27d   : > { %2683 = vmatmul.mubr.f32.gmra.mxu1 %v19779_v25  ;;  %2565 = vmatprep.mubr.f32.mxu0 %v19770_v26  ;;  %v2992_v61 = vsel %vm19782_vm3, %v2090_v50, 0  ;;  %v3004_v50 = vsel %vm19787_vm1, %v2094_v17, 0  ;;  %v19790_v17 = vld [vmem:[#allocation14_spill] sm:$0xff]  ;;  %vm20168_vm3 = vmmov %vm19787_vm1 }
 0x27e   : > { %2688 = vmatprep.mubr.f32.mxu1 %v19770_v26 }
 0x280   : > { %2568 = vmatmul.mubr.f32.gmra.mxu0 %v13916_v38  ;;  %v14038_v38 = vand.u32 4294901760, %v2992_v61 }
 0x281   : > { %2692 = vmatmul.mubr.f32.gmra.mxu1 %v19780_v23  ;;  %2573 = vmatprep.mubr.f32.mxu0 %v19770_v26 }
 0x282   : > { %2697 = vmatprep.mubr.f32.mxu1 %v19770_v26 }
 0x284   : > { %2576 = vmatmul.mubr.f32.gmra.mxu0 %v13932_v0  ;;  %v19784_v0 = vld [vmem:[#allocation13_spill] sm:$0xff] }
 0x285   : > { %2701 = vmatmul.mubr.f32.gmra.mxu1 %v19781_v10  ;;  %2807 = vmatprep.mubr.f32.mxu0 %v19770_v26 }
 0x286   : > { %2706 = vmatprep.mubr.f32.mxu1 %v19770_v26 }
 0x288   : > { %2809 = vmatmul.mubr.f32.vlgmr.msra.gmra.mxu0 %v13728_v14 }
 0x289   : > { %2710 = vmatmul.mubr.f32.gmra.mxu1 %v2270_v54  ;;  %2814 = vmatprep.mubr.f32.mxu0 %v19770_v26  ;;  %v2092_v54 = vld [vmem:[%s19451_s1 + $0x10] sm:$0xff] }
 0x28a   : > { %2715 = vmatprep.mubr.f32.mxu1 %v19770_v26  ;;  %3044 = vmatpush1.msra.mxu0 %v13016_v20  ;;  %v2998_v18 = vsel %vm19785_vm11, %v2092_v54, 0 }
 0x28b   : > { %3046 = vmatprep.subr.mxu0 %v13012_v15  ;;  %v14070_v32 = vand.u32 4294901760, %v2998_v18 }
 0x28c   : > { %2816 = vmatmul.mubr.f32.gmra.mxu0 %v13742_v53 }
 0x28d   : > { %2719 = vmatmul.mubr.f32.gmra.mxu1 %v2281_v49  ;;  %2821 = vmatprep.mubr.f32.mxu0 %v19770_v26  ;;  %v2093_v49 = vld [vmem:[%s19451_s1 + $0x18] sm:$0xff] }
 0x28e   : > { %2934 = vmatprep.mubr.f32.mxu1 %v19770_v26  ;;  %3048 = vmatpush1.msra.mxu0 %v13018_v21 }
 0x28f   : > { %3050 = vmatprep.subr.mxu0 %v13020_v22 }
 0x290   : > { %2823 = vmatmul.mubr.f32.gmra.mxu0 %v13770_v35 }
 0x291   : > { %2936 = vmatmul.mubr.f32.vlgmr.msra.gmra.mxu1 %v13728_v14  ;;  %2828 = vmatprep.mubr.f32.mxu0 %v19770_v26  ;;  %v2995_v14 = vsel %vm19783_vm6, %v2091_v56, 0  ;;  %vm20171_vm6 = vmmov %vm19787_vm1 }
 0x292   : > { %2941 = vmatprep.mubr.f32.mxu1 %v19770_v26  ;;  %3211 = vmatpush1.msra.mxu1 %v13080_v43  ;;  %v14055_v34 = vand.u32 4294901760, %v2995_v14 }
 0x293   : > { %3052 = vmatpush1.msra.mxu0 %v13025_v24  ;;  %3217 = vmatprep.subr.mxu1 %v13082_v44 }
 0x294   : > { %2830 = vmatmul.mubr.f32.gmra.mxu0 %v13792_v3  ;;  %3223 = vmatpush1.msra.mxu1 %v13085_v45  ;;  %v14068_v57 = vsub.f32 %v2995_v14, %v14055_v34 }
 0x295   : > { %2943 = vmatmul.mubr.f32.gmra.mxu1 %v13742_v53  ;;  %2835 = vmatprep.mubr.f32.mxu0 %v19770_v26  ;;  %v14053_v53 = vsub.f32 %v2992_v61, %v14038_v38  ;;  %v2095_v61 = vld [vmem:[%s19451_s1 + $0x28] sm:$0xff] }
 0x296   : > { %2948 = vmatprep.mubr.f32.mxu1 %v19770_v26  ;;  %3229 = vmatprep.subr.mxu1 %v13088_v46  ;;  %v19514_v10 = vand.u32 4294901760, %v14068_v57 }
 0x297   : > { %3235 = vmatpush1.msra.mxu1 %v13091_v47  ;;  %3353 = vmatprep.subr.mxu0 %v19784_v0  ;;  %v19515_v31 = vand.u32 4294901760, %v14053_v53 }
 0x298   : > { %2837 = vmatmul.mubr.f32.gmra.mxu0 %v13837_v2  ;;  %3493 = vmatprep.subr.mxu1 %v13014_v19 }
 0x299   : > { %2950 = vmatmul.mubr.f32.gmra.mxu1 %v13770_v35  ;;  %2842 = vmatprep.mubr.f32.mxu0 %v19770_v26  ;;  %v3001_v35 = vsel %vm19786_vm5, %v2093_v49, 0  ;;  %v3089_v23 = vsub.f32 %v14053_v53, %v19515_v31  ;;  %v3007_v49 = vsel %vm19788_vm8, %v2095_v61, 0 }
 0x29a   : > { %2955 = vmatprep.mubr.f32.mxu1 %v19770_v26  ;;  %v14079_v25 = vand.u32 4294901760, %v3001_v35  ;;  %v14120_v31 = vand.u32 4294901760, %v3007_v49 }
 0x29b   : > { %v3090_v14 = vand.u32 4294901760, %v3089_v23 }
 0x29c   : > { %2844 = vmatmul.mubr.f32.gmra.mxu0 %v13869_v9  ;;  %v14097_v56 = vsub.f32 %v3001_v35, %v14079_v25  ;;  %v2096_v35 = vld [vmem:[%s19451_s1 + $0x30] sm:$0xff] }
 0x29d   : > { %2957 = vmatmul.mubr.f32.gmra.mxu1 %v13792_v3  ;;  %2849 = vmatprep.mubr.f32.mxu0 %v19770_v26  ;;  %v14087_v3 = vsub.f32 %v2998_v18, %v14070_v32  ;;  %v14104_v18 = vand.u32 4294901760, %v3004_v50  ;;  %v3010_v61 = vsel %vm19789_vm12, %v2096_v35, 0  ;;  %v14136_v35 = vsub.f32 %v3007_v49, %v14120_v31 }
 0x29e   : > { %2962 = vmatprep.mubr.f32.mxu1 %v19770_v26  ;;  %v14138_v39 = vand.u32 4294901760, %v3010_v61 }
 0x29f   : > { %v19516_v54 = vand.u32 4294901760, %v14087_v3  ;;  %v19524_v49 = vand.u32 4294901760, %v14136_v35  ;;  %v19809_v58 = vand.u32 4294901760, %v14087_v3 }
 0x2a0   : > { %2851 = vmatmul.mubr.f32.gmra.mxu0 %v13899_v41 }
 0x2a1   : > { %2964 = vmatmul.mubr.f32.gmra.mxu1 %v13837_v2  ;;  %2856 = vmatprep.mubr.f32.mxu0 %v19770_v26  ;;  %v3100_v2 = vsub.f32 %v14068_v57, %v19514_v10  ;;  %v3111_v10 = vsub.f32 %v14087_v3, %v19516_v54  ;;  %v19792_v54 = vld [vmem:[#allocation11_spill] sm:$0xff] }
 0x2a2   : > { %2969 = vmatprep.mubr.f32.mxu1 %v19770_v26 }
 0x2a3   : > { %v3101_v23 = vand.u32 4294901760, %v3100_v2  ;;  %v19791_v2 = vand.u32 4294901760, %v14097_v56 }
 0x2a4   : > { %2858 = vmatmul.mubr.f32.gmra.mxu0 %v13918_v29 }
 0x2a5   : > { %2971 = vmatmul.mubr.f32.gmra.mxu1 %v13869_v9  ;;  %3085 = vmatprep.mubr.f32.mxu0 %v19770_v26  ;;  %v14118_v9 = vsub.f32 %v3004_v50, %v14104_v18  ;;  %v3122_v50 = vsub.f32 %v14097_v56, %v19791_v2  ;;  %v19794_v2 = vld [vmem:[#allocation15_spill] sm:$0xff] }
 0x2a6   : > { %2976 = vmatprep.mubr.f32.mxu1 %v19770_v26 }
 0x2a7   : > { %v19522_v48 = vand.u32 4294901760, %v14118_v9  ;;  %v3123_v59 = vand.u32 4294901760, %v3122_v50 }
 0x2a8   : > { %3091 = vmatmul.mubr.f32.vlgmr.msra.gmra.mxu0 %v3090_v14  ;;  %v2097_v14 = vld [vmem:[%s19451_s1 + $0x38] sm:$0xff] }
 0x2a9   : > { %2978 = vmatmul.mubr.f32.gmra.mxu1 %v13899_v41  ;;  %3096 = vmatprep.mubr.f32.mxu0 %v19770_v26  ;;  %v3112_v41 = vand.u32 4294901760, %v3111_v10  ;;  %v3013_v55 = vsel %vm19793_vm10, %v2097_v14, 0  ;;  %v3133_v10 = vsub.f32 %v14118_v9, %v19522_v48  ;;  %v19796_v14 = vld [vmem:[#allocation18_spill] sm:$0xff] }
 0x2aa   : > { %2983 = vmatprep.mubr.f32.mxu1 %v19770_v26  ;;  %3356 = vmatpush1.msra.mxu0 %v19790_v17  ;;  %v14153_v40 = vand.u32 4294901760, %v3013_v55 }
 0x2ab   : > { %3359 = vmatprep.subr.mxu0 %v19792_v54  ;;  %v3134_v50 = vand.u32 4294901760, %v3133_v10 }
 0x2ac   : > { %3102 = vmatmul.mubr.f32.gmra.mxu0 %v3101_v23  ;;  %v19795_v23 = vld [vmem:[#allocation16_spill] sm:$0xff]  ;;  %v14166_v48 = vsub.f32 %v3013_v55, %v14153_v40 }
 0x2ad   : > { %2985 = vmatmul.mubr.f32.gmra.mxu1 %v13918_v29  ;;  %3107 = vmatprep.mubr.f32.mxu0 %v19770_v26  ;;  %v14151_v29 = vsub.f32 %v3010_v61, %v14138_v39  ;;  %v3144_v61 = vsub.f32 %v14136_v35, %v19524_v49 }
 0x2ae   : > { %3268 = vmatprep.mubr.f32.mxu1 %v19770_v26  ;;  %3362 = vmatpush1.msra.mxu0 %v19794_v2  ;;  %v19525_v55 = vand.u32 4294901760, %v14166_v48 }
 0x2af   : > { %3365 = vmatprep.subr.mxu0 %v19795_v23 }
 0x2b0   : > { %3113 = vmatmul.mubr.f32.gmra.mxu0 %v3112_v41  ;;  %v19526_v41 = vand.u32 4294901760, %v14151_v29 }
 0x2b1   : > { %3270 = vmatmul.mubr.f32.vlgmr.msra.gmra.mxu1 %v14038_v38  ;;  %3118 = vmatprep.mubr.f32.mxu0 %v19770_v26 }
 0x2b2   : > { %3275 = vmatprep.mubr.f32.mxu1 %v19770_v26  ;;  %3495 = vmatpush1.msra.mxu1 %v13016_v20  ;;  %v3155_v10 = vsub.f32 %v14151_v29, %v19526_v41  ;;  %v19804_v41 = vld [vmem:[#allocation23_spill] sm:$0xff] }
 0x2b3   : > { %3368 = vmatpush1.msra.mxu0 %v19796_v14  ;;  %3497 = vmatprep.subr.mxu1 %v13012_v15 }
 0x2b4   : > { %3124 = vmatmul.mubr.f32.gmra.mxu0 %v3123_v59  ;;  %3638 = vmatprep.subr.mxu0 %v19797_v1  ;;  %v3145_v59 = vand.u32 4294901760, %v3144_v61  ;;  %v3156_v49 = vand.u32 4294901760, %v3155_v10 }
 0x2b5   : > { %3277 = vmatmul.mubr.f32.gmra.mxu1 %v14055_v34  ;;  %3129 = vmatprep.mubr.f32.mxu0 %v19770_v26 }
 0x2b6   : > { %3282 = vmatprep.mubr.f32.mxu1 %v19770_v26  ;;  %3499 = vmatpush1.msra.mxu1 %v13018_v21 }
 0x2b7   : > { %3501 = vmatprep.subr.mxu1 %v13020_v22 }
 0x2b8   : > { %3135 = vmatmul.mubr.f32.gmra.mxu0 %v3134_v50  ;;  %3503 = vmatpush1.msra.mxu1 %v13025_v24  ;;  %v3166_v50 = vsub.f32 %v14166_v48, %v19525_v55  ;;  %v19803_v55 = vld [vmem:[#allocation22_spill] sm:$0xff] }
 0x2b9   : > { %3284 = vmatmul.mubr.f32.gmra.mxu1 %v14070_v32  ;;  %3140 = vmatprep.mubr.f32.mxu0 %v19770_v26 }
 0x2ba   : > { %3289 = vmatprep.mubr.f32.mxu1 %v19770_v26  ;;  %3775 = vmatprep.subr.mxu1 %v13014_v19  ;;  %v3167_v61 = vand.u32 4294901760, %v3166_v50  ;;  %v19801_v50 = vld [vmem:[#allocation17_spill] sm:$0xff] }
 0x2bc   : > { %3146 = vmatmul.mubr.f32.gmra.mxu0 %v3145_v59  ;;  %v14193_v59 = vand.u32 4294901760, %v13789_v60 }
 0x2bd   : > { %3291 = vmatmul.mubr.f32.gmra.mxu1 %v14079_v25  ;;  %3151 = vmatprep.mubr.f32.mxu0 %v19770_v26 }
 0x2be   : > { %3296 = vmatprep.mubr.f32.mxu1 %v19770_v26  ;;  %19798 = vst [vmem:[#allocation55_spill] sm:$0xff] %v14193_v59  ;;  %v14203_v10 = vsub.f32 %v13789_v60, %v14193_v59  ;;  %v19806_v60 = vand.u32 4294901760, %v14053_v53 }
 0x2c0   : > { %3157 = vmatmul.mubr.f32.gmra.mxu0 %v3156_v49  ;;  %v19799_v49 = vld [vmem:[#allocation20_spill] sm:$0xff]  ;;  %19800 = vst [vmem:[#allocation56_spill] sm:$0xff] %v14203_v10  ;;  %v14214_v28 = vand.u32 4294901760, %v14203_v10 }
 0x2c1   : > { %3298 = vmatmul.mubr.f32.gmra.mxu1 %v14104_v18  ;;  %3162 = vmatprep.mubr.f32.mxu0 %v19770_v26 }
 0x2c2   : > { %3303 = vmatprep.mubr.f32.mxu1 %v19770_v26  ;;  %19805 = vst [vmem:[#allocation57_spill] sm:$0xff] %v14214_v28  ;;  %v4095_v37 = vsub.f32 %v14203_v10, %v14214_v28 }
 0x2c4   : > { %3168 = vmatmul.mubr.f32.gmra.mxu0 %v3167_v61  ;;  %v19802_v61 = vld [vmem:[#allocation21_spill] sm:$0xff] }
 0x2c5   : > { %3305 = vmatmul.mubr.f32.gmra.mxu1 %v14120_v31  ;;  %3401 = vmatprep.mubr.f32.mxu0 %v19770_v26 }
 0x2c6   : > { %3310 = vmatprep.mubr.f32.mxu1 %v19770_v26 }
 0x2c8   : > { %3404 = vmatmul.mubr.f32.vlgmr.msra.gmra.mxu0 %v14053_v53  ;;  %v19807_v53 = vand.u32 4294901760, %v14068_v57 }
 0x2c9   : > { %3312 = vmatmul.mubr.f32.gmra.mxu1 %v14138_v39  ;;  %3642 = vmatpush1.msra.mxu0 %v19799_v49 }
 0x2ca   : > { %3646 = vmatprep.subr.mxu0 %v19801_v50  ;;  %3317 = vmatprep.mubr.f32.mxu1 %v19770_v26 }
 0x2cb   : > { %3650 = vmatpush1.msra.mxu0 %v19802_v61  ;;  %3409 = vmatprep.mubr.f32.mxu0 %v19770_v26 }
 0x2cc   : > { %3654 = vmatprep.subr.mxu0 %v19803_v55  ;;  %3412 = vmatmul.mubr.f32.gmra.mxu0 %v14068_v57  ;;  %v14250_v57 = vand.u32 4294901760, %v13668_v16 }
 0x2cd   : > { %3319 = vmatmul.mubr.f32.gmra.mxu1 %v14153_v40  ;;  %3658 = vmatpush1.msra.mxu0 %v19804_v41 }
 0x2ce   : > { %3934 = vmatprep.subr.mxu0 %v14193_v59  ;;  %3417 = vmatprep.mubr.f32.mxu0 %v19770_v26  ;;  %19811 = vst [vmem:[#allocation59_spill] sm:$0xff] %v14250_v57  ;;  %v14272_v13 = vsub.f32 %v13668_v16, %v14250_v57 }
 0x2cf   : > { %3536 = vmatprep.mubr.f32.mxu1 %v19770_v26 }
 0x2d0   : > { %3420 = vmatmul.mubr.f32.gmra.mxu0 %v14087_v3  ;;  %v19813_v3 = vand.u32 4294901760, %v14118_v9  ;;  %19818 = vst [vmem:[#allocation63_spill] sm:$0xff] %v14272_v13  ;;  %v14292_v16 = vand.u32 4294901760, %v14272_v13 }
 0x2d1   : > { %3540 = vmatmul.mubr.f32.vlgmr.msra.gmra.mxu1 %v19806_v60  ;;  %3425 = vmatprep.mubr.f32.mxu0 %v19770_v26  ;;  %v14233_v60 = vand.u32 4294901760, %v4095_v37  ;;  %v19810_v37 = vand.u32 4294901760, %v14097_v56 }
 0x2d2   : > { %3777 = vmatpush1.msra.mxu1 %v13016_v20  ;;  %3545 = vmatprep.mubr.f32.mxu1 %v19770_v26  ;;  %19823 = vst [vmem:[#allocation67_spill] sm:$0xff] %v14292_v16 }
 0x2d3   : > { %3779 = vmatprep.subr.mxu1 %v13012_v15  ;;  %19808 = vst [vmem:[#allocation58_spill] sm:$0xff] %v14233_v60 }
 0x2d4   : > { %3781 = vmatpush1.msra.mxu1 %v13018_v21  ;;  %3428 = vmatmul.mubr.f32.gmra.mxu0 %v14097_v56  ;;  %v14260_v56 = vand.u32 4294901760, %v13577_v62 }
 0x2d5   : > { %3783 = vmatprep.subr.mxu1 %v13020_v22  ;;  %3549 = vmatmul.mubr.f32.gmra.mxu1 %v19807_v53  ;;  %v14264_v53 = vand.u32 4294901760, %v13496_v36 }
 0x2d6   : > { %3785 = vmatpush1.msra.mxu1 %v13025_v24  ;;  %3433 = vmatprep.mubr.f32.mxu0 %v19770_v26  ;;  %19814 = vst [vmem:[#allocation61_spill] sm:$0xff] %v14260_v56  ;;  %v14284_v8 = vsub.f32 %v13577_v62, %v14260_v56 }
 0x2d7   : > { %4097 = vmatprep.subr.mxu1 %v14233_v60  ;;  %3554 = vmatprep.mubr.f32.mxu1 %v19770_v26  ;;  %19815 = vst [vmem:[#allocation62_spill] sm:$0xff] %v14264_v53  ;;  %v14288_v4 = vsub.f32 %v13496_v36, %v14264_v53 }
 0x2d8   : > { %3436 = vmatmul.mubr.f32.gmra.mxu0 %v14118_v9  ;;  %v19819_v9 = vand.u32 4294901760, %v14136_v35  ;;  %19821 = vst [vmem:[#allocation65_spill] sm:$0xff] %v14284_v8  ;;  %v14307_v36 = vand.u32 4294901760, %v14284_v8 }
 0x2d9   : > { %3558 = vmatmul.mubr.f32.gmra.mxu1 %v19809_v58  ;;  %3441 = vmatprep.mubr.f32.mxu0 %v19770_v26  ;;  %v14254_v58 = vand.u32 4294901760, %v13639_v6  ;;  %19822 = vst [vmem:[#allocation66_spill] sm:$0xff] %v14288_v4 }
 0x2da   : > { %3563 = vmatprep.mubr.f32.mxu1 %v19770_v26  ;;  %19827 = vst [vmem:[#allocation70_spill] sm:$0xff] %v14307_v36  ;;  %v4113_v63 = vsub.f32 %v14284_v8, %v14307_v36 }
 0x2db   : > { %19812 = vst [vmem:[#allocation60_spill] sm:$0xff] %v14254_v58 }
 0x2dc   : > { %3444 = vmatmul.mubr.f32.gmra.mxu0 %v14136_v35  ;;  %v14347_v11 = vand.u32 4294901760, %v4113_v63 }
 0x2dd   : > { %3567 = vmatmul.mubr.f32.gmra.mxu1 %v19810_v37  ;;  %3449 = vmatprep.mubr.f32.mxu0 %v19770_v26  ;;  %v19816_v37 = vld [vmem:[#allocation30_spill] sm:$0xff] }
 0x2de   : > { %3572 = vmatprep.mubr.f32.mxu1 %v19770_v26  ;;  %v14267_v60 = vand.u32 4294901760, %v19816_v37  ;;  %19833 = vst [vmem:[#allocation75_spill] sm:$0xff] %v14347_v11 }
 0x2e0   : > { %3452 = vmatmul.mubr.f32.gmra.mxu0 %v14151_v29  ;;  %19817 = vst [vmem:[#allocation30_spill] sm:$0xff] %v14267_v60  ;;  %v14296_v35 = vsub.f32 %v19816_v37, %v14267_v60  ;;  %v14312_v37 = vand.u32 4294901760, %v14288_v4 }
 0x2e1   : > { %3576 = vmatmul.mubr.f32.gmra.mxu1 %v19813_v3  ;;  %3457 = vmatprep.mubr.f32.mxu0 %v19770_v26  ;;  %v14279_v3 = vsub.f32 %v13639_v6, %v14254_v58  ;;  %v19825_v6 = vand.u32 4294901760, %v14151_v29  ;;  %v4101_v29 = vsub.f32 %v14272_v13, %v14292_v16 }
 0x2e2   : > { %3581 = vmatprep.mubr.f32.mxu1 %v19770_v26  ;;  %19824 = vst [vmem:[#allocation68_spill] sm:$0xff] %v14296_v35  ;;  %19828 = vst [vmem:[#allocation71_spill] sm:$0xff] %v14312_v37 }
 0x2e3   : > { %19820 = vst [vmem:[#allocation64_spill] sm:$0xff] %v14279_v3  ;;  %v14302_v62 = vand.u32 4294901760, %v14279_v3 }
 0x2e4   : > { %3460 = vmatmul.mubr.f32.gmra.mxu0 %v14166_v48 }
 0x2e5   : > { %3585 = vmatmul.mubr.f32.gmra.mxu1 %v19819_v9  ;;  %3691 = vmatprep.mubr.f32.mxu0 %v19770_v26  ;;  %19826 = vst [vmem:[#allocation69_spill] sm:$0xff] %v14302_v62  ;;  %v14319_v9 = vand.u32 4294901760, %v14296_v35  ;;  %v4107_v27 = vsub.f32 %v14279_v3, %v14302_v62 }
 0x2e6   : > { %3590 = vmatprep.mubr.f32.mxu1 %v19770_v26 }
 0x2e7   : > { %19829 = vst [vmem:[#allocation72_spill] sm:$0xff] %v14319_v9  ;;  %v14342_v52 = vand.u32 4294901760, %v4107_v27 }
 0x2e8   : > { %3693 = vmatmul.mubr.f32.vlgmr.msra.gmra.mxu0 %v14038_v38 }
 0x2e9   : > { %3594 = vmatmul.mubr.f32.gmra.mxu1 %v19825_v6  ;;  %3936 = vmatpush1.msra.mxu0 %v14250_v57  ;;  %v19830_v6 = vand.u32 4294901760, %v14166_v48  ;;  %v4119_v48 = vsub.f32 %v14288_v4, %v14312_v37  ;;  %19832 = vst [vmem:[#allocation74_spill] sm:$0xff] %v14342_v52 }
 0x2ea   : > { %3938 = vmatprep.subr.mxu0 %v14254_v58  ;;  %3599 = vmatprep.mubr.f32.mxu1 %v19770_v26 }
 0x2eb   : > { %3940 = vmatpush1.msra.mxu0 %v14260_v56  ;;  %3698 = vmatprep.mubr.f32.mxu0 %v19770_v26  ;;  %v14354_v30 = vand.u32 4294901760, %v4119_v48 }
 0x2ec   : > { %3942 = vmatprep.subr.mxu0 %v14264_v53  ;;  %3700 = vmatmul.mubr.f32.gmra.mxu0 %v14055_v34 }
 0x2ed   : > { %3603 = vmatmul.mubr.f32.gmra.mxu1 %v19830_v6  ;;  %3944 = vmatpush1.msra.mxu0 %v14267_v60  ;;  %v14337_v6 = vand.u32 4294901760, %v4101_v29  ;;  %v3876_v29 = vld [vmem:[%s19451_s1 + $0x88] sm:$0xff]  ;;  %19834 = vst [vmem:[#allocation76_spill] sm:$0xff] %v14354_v30 }
 0x2ee   : > { %4245 = vmatprep.subr.mxu0 %v14203_v10  ;;  %3705 = vmatprep.mubr.f32.mxu0 %v19770_v26  ;;  %v4125_v10 = vsub.f32 %v14296_v35, %v14319_v9  ;;  %v3887_v63 = vsel %vm2106_vm14, %v3876_v29, 0  ;;  %v3878_v29 = vld [vmem:[%s19451_s1 + $0x98] sm:$0xff] }
 0x2ef   : > { %3818 = vmatprep.mubr.f32.mxu1 %v19770_v26  ;;  %19831 = vst [vmem:[#allocation73_spill] sm:$0xff] %v14337_v6 }
 0x2f0   : > { %3707 = vmatmul.mubr.f32.gmra.mxu0 %v14070_v32  ;;  %v14358_v27 = vand.u32 4294901760, %v4125_v10  ;;  %v14374_v10 = vsub.f32 %v3884_v33, %v14360_v7 }
 0x2f1   : > { %3820 = vmatmul.mubr.f32.vlgmr.msra.gmra.mxu1 %v14038_v38  ;;  %3712 = vmatprep.mubr.f32.mxu0 %v19770_v26  ;;  %v3877_v38 = vld [vmem:[%s19451_s1 + $0x90] sm:$0xff] }
 0x2f2   : > { %4103 = vmatpush1.msra.mxu1 %v14337_v6  ;;  %3825 = vmatprep.mubr.f32.mxu1 %v19770_v26  ;;  %19835 = vst [vmem:[#allocation77_spill] sm:$0xff] %v14358_v27  ;;  %v3890_v48 = vsel %vm2106_vm14, %v3877_v38, 0  ;;  %v19553_v33 = vand.u32 4294901760, %v14374_v10  ;;  %v3879_v38 = vld [vmem:[%s19451_s1 + $0xa0] sm:$0xff]  ;;  %v3881_v6 = vld [vmem:[%s19451_s1 + $0xb0] sm:$0xff] }
 0x2f3   : > { %4109 = vmatprep.subr.mxu1 %v14342_v52 }
 0x2f4   : > { %4115 = vmatpush1.msra.mxu1 %v14347_v11  ;;  %3714 = vmatmul.mubr.f32.gmra.mxu0 %v14079_v25 }
 0x2f5   : > { %4121 = vmatprep.subr.mxu1 %v14354_v30  ;;  %3827 = vmatmul.mubr.f32.gmra.mxu1 %v14055_v34  ;;  %v14376_v34 = vand.u32 4294901760, %v3887_v63 }
 0x2f6   : > { %4127 = vmatpush1.msra.mxu1 %v14358_v27  ;;  %3719 = vmatprep.mubr.f32.mxu0 %v19770_v26  ;;  %v14385_v27 = vand.u32 4294901760, %v3890_v48 }
 0x2f7   : > { %4385 = vmatprep.subr.mxu1 %v14193_v59  ;;  %3832 = vmatprep.mubr.f32.mxu1 %v19770_v26  ;;  %v14390_v30 = vsub.f32 %v3887_v63, %v14376_v34  ;;  %v3981_v63 = vsub.f32 %v14374_v10, %v19553_v33 }
 0x2f8   : > { %3721 = vmatmul.mubr.f32.gmra.mxu0 %v14104_v18  ;;  %v14400_v11 = vsub.f32 %v3890_v48, %v14385_v27  ;;  %v3880_v48 = vld [vmem:[%s19451_s1 + $0xa8] sm:$0xff] }
 0x2f9   : > { %3834 = vmatmul.mubr.f32.gmra.mxu1 %v14070_v32  ;;  %3726 = vmatprep.mubr.f32.mxu0 %v19770_v26  ;;  %v3893_v32 = vsel %vm2106_vm14, %v3878_v29, 0  ;;  %v3896_v29 = vsel %vm2106_vm14, %v3879_v38, 0  ;;  %v3982_v33 = vand.u32 4294901760, %v3981_v63  ;;  %v3899_v51 = vsel %vm2106_vm14, %v3880_v48, 0 }
 0x2fa   : > { %3839 = vmatprep.mubr.f32.mxu1 %v19770_v26  ;;  %v14407_v52 = vand.u32 4294901760, %v3893_v32  ;;  %v14417_v5 = vand.u32 4294901760, %v3896_v29  ;;  %v19836_v63 = vand.u32 4294901760, %v14400_v11  ;;  %v14440_v55 = vand.u32 4294901760, %v3899_v51 }
 0x2fb   : > { %v3902_v48 = vsel %vm2106_vm14, %v3881_v6, 0 }
 0x2fc   : > { %3728 = vmatmul.mubr.f32.gmra.mxu0 %v14120_v31  ;;  %v4003_v12 = vsub.f32 %v14400_v11, %v19836_v63  ;;  %v14458_v63 = vsub.f32 %v3899_v51, %v14440_v55 }
 0x2fd   : > { %3841 = vmatmul.mubr.f32.gmra.mxu1 %v14079_v25  ;;  %3733 = vmatprep.mubr.f32.mxu0 %v19770_v26  ;;  %v19557_v25 = vand.u32 4294901760, %v14390_v30 }
 0x2fe   : > { %3846 = vmatprep.mubr.f32.mxu1 %v19770_v26 }
 0x2ff   : > { %v3992_v38 = vsub.f32 %v14390_v30, %v19557_v25  ;;  %v14437_v25 = vsub.f32 %v3896_v29, %v14417_v5  ;;  %v4004_v29 = vand.u32 4294901760, %v4003_v12 }
 0x300   : > { %3735 = vmatmul.mubr.f32.gmra.mxu0 %v14138_v39 }
 0x301   : > { %3848 = vmatmul.mubr.f32.gmra.mxu1 %v14104_v18  ;;  %3740 = vmatprep.mubr.f32.mxu0 %v19770_v26  ;;  %v14424_v18 = vsub.f32 %v3893_v32, %v14407_v52  ;;  %v19837_v51 = vand.u32 4294901760, %v14437_v25 }
 0x302   : > { %3853 = vmatprep.mubr.f32.mxu1 %v19770_v26 }
 0x303   : > { %v19559_v41 = vand.u32 4294901760, %v14424_v18 }
 0x304   : > { %3742 = vmatmul.mubr.f32.gmra.mxu0 %v14153_v40 }
 0x305   : > { %3855 = vmatmul.mubr.f32.gmra.mxu1 %v14120_v31  ;;  %3977 = vmatprep.mubr.f32.mxu0 %v19770_v26  ;;  %v3993_v31 = vand.u32 4294901760, %v3992_v38  ;;  %v4014_v6 = vsub.f32 %v14424_v18, %v19559_v41  ;;  %v4025_v41 = vsub.f32 %v14437_v25, %v19837_v51 }
 0x306   : > { %3860 = vmatprep.mubr.f32.mxu1 %v19770_v26 }
 0x308   : > { %v2208_v32 = vpop.f32.mrf.mxu0  ;;  %3983 = vmatmul.mubr.f32.vlgmr.msra.gmra.mxu0 %v3982_v33  ;;  %v3882_v33 = vld [vmem:[%s19451_s1 + $0xb8] sm:$0xff] }
 0x309   : > { %3862 = vmatmul.mubr.f32.gmra.mxu1 %v14138_v39  ;;  %4248 = vmatpush1.msra.mxu0 %v14272_v13  ;;  %v3905_v12 = vsel %vm2106_vm14, %v3882_v33, 0  ;;  %v4790_v39 = vld [vmem:[%s19452_s2 + $0x38] sm:$0xff]  ;;  %v4015_v33 = vand.u32 4294901760, %v4014_v6 }
 0x30a   : > { %4251 = vmatprep.subr.mxu0 %v14279_v3  ;;  %v2210_v61 = vpop.f32.mrf.mxu0  ;;  %3867 = vmatprep.mubr.f32.mxu1 %v19770_v26  ;;  %v14460_v3 = vand.u32 4294901760, %v3902_v48 }
 0x30b   : > { %4254 = vmatpush1.msra.mxu0 %v14284_v8  ;;  %3988 = vmatprep.mubr.f32.mxu0 %v19770_v26 }
 0x30c   : > { %4257 = vmatprep.subr.mxu0 %v14288_v4  ;;  %v2219_v38 = vpop.f32.mrf.mxu0  ;;  %3994 = vmatmul.mubr.f32.gmra.mxu0 %v3993_v31  ;;  %v19565_v4 = vand.u32 4294901760, %v14458_v63  ;;  %v14476_v8 = vsub.f32 %v3902_v48, %v14460_v3  ;;  %v4026_v48 = vand.u32 4294901760, %v4025_v41  ;;  %v4788_v41 = vld [vmem:[%s19452_s2 + $0x28] sm:$0xff] }
 0x30d   : > { %3869 = vmatmul.mubr.f32.gmra.mxu1 %v14153_v40  ;;  %4260 = vmatpush1.msra.mxu0 %v14296_v35  ;;  %v12913_v40 = vmov 0  }
 0x30e   : > { %4530 = vmatprep.subr.mxu0 %v14214_v28  ;;  %v2221_v31 = vpop.f32.mrf.mxu0  ;;  %3999 = vmatprep.mubr.f32.mxu0 %v19770_v26  ;;  %v14478_v28 = vand.u32 4294901760, %v3905_v12 }
 0x30f   : > { %4160 = vmatprep.mubr.f32.mxu1 %v19770_v26  ;;  %12772 = vset.pattern.permute.xlu1 %v12913_v40 }
 0x310   : > { %v2230_v35 = vpop.f32.mrf.mxu0  ;;  %4005 = vmatmul.mubr.f32.gmra.mxu0 %v4004_v29  ;;  %4828 = vperm.xlu1 %12772, %v4790_v39   ;;  %v14495_v49 = vsub.f32 %v3905_v12, %v14478_v28 }
 0x311   : > { %v2387_v13 = vpop.f32.mrf.mxu1  ;;  %4162 = vmatmul.mubr.f32.vlgmr.msra.gmra.mxu1 %v14360_v7  ;;  %4010 = vmatprep.mubr.f32.mxu0 %v19770_v26 }
 0x312   : > { %v14482_v50 = vadd.f32 %v2387_v13, %v2208_v32  ;;  %4387 = vmatpush1.msra.mxu1 %v14250_v57  ;;  %v2232_v51 = vpop.f32.mrf.mxu0  ;;  %4167 = vmatprep.mubr.f32.mxu1 %v19770_v26  ;;  %v4036_v13 = vsub.f32 %v14458_v63, %v19565_v4  ;;  %v19568_v32 = vand.u32 4294901760, %v14476_v8  ;;  %v19838_v2 = vand.u32 4294901760, %v14495_v49 }
 0x313   : > { %4389 = vmatprep.subr.mxu1 %v14254_v58  ;;  %v2389_v29 = vpop.f32.mrf.mxu1  ;;  %12773 = vset.pattern.permute.xlu0 %v12913_v40 }
 0x314   : > { %v14487_v6 = vadd.f32 %v2389_v29, %v2210_v61  ;;  %4391 = vmatpush1.msra.mxu1 %v14260_v56  ;;  %v2241_v39 = vpop.f32.mrf.mxu0  ;;  %4016 = vmatmul.mubr.f32.gmra.mxu0 %v4015_v33  ;;  %v4789_v33 = vld [vmem:[%s19452_s2 + $0x30] sm:$0xff]  ;;  %v4058_v54 = vsub.f32 %v14495_v49, %v19838_v2  ;;  %v4784_v2 = vld [vmem:[%s19452_s2 + $0x8] sm:$0xff] }
 0x315   : > { %4393 = vmatprep.subr.mxu1 %v14264_v53  ;;  %v2394_v1 = vpop.f32.mrf.mxu1  ;;  %4169 = vmatmul.mubr.f32.gmra.mxu1 %v14376_v34 }
 0x316   : > { %v14502_v61 = vadd.f32 %v2394_v1, %v2219_v38  ;;  %4395 = vmatpush1.msra.mxu1 %v14267_v60  ;;  %v2243_v40 = vpop.f32.mrf.mxu0  ;;  %4021 = vmatprep.mubr.f32.mxu0 %v19770_v26  ;;  %v4037_v1 = vand.u32 4294901760, %v4036_v13  ;;  %v4047_v38 = vsub.f32 %v14476_v8, %v19568_v32 }
 0x317   : > { %4667 = vmatprep.subr.mxu1 %v14193_v59  ;;  %v2396_v12 = vpop.f32.mrf.mxu1  ;;  %4174 = vmatprep.mubr.f32.mxu1 %v19770_v26 }
 0x318   : > { %v14511_v29 = vadd.f32 %v2396_v12, %v2221_v31  ;;  %v2252_v4 = vpop.f32.mrf.mxu0  ;;  %4027 = vmatmul.mubr.f32.gmra.mxu0 %v4026_v48  ;;  %4818 = vperm.xlu1 %12772, %v4788_v41   ;;  %v4787_v31 = vld [vmem:[%s19452_s2 + $0x20] sm:$0xff]  ;;  %v4786_v41 = vld [vmem:[%s19452_s2 + $0x18] sm:$0xff]  ;;  %v4048_v23 = vand.u32 4294901760, %v4047_v38 }
 0x319   : > { %v2401_v59 = vpop.f32.mrf.mxu1  ;;  %4176 = vmatmul.mubr.f32.gmra.mxu1 %v14385_v27  ;;  %4032 = vmatprep.mubr.f32.mxu0 %v19770_v26 }
 0x31a   : > { %v14522_v12 = vadd.f32 %v2401_v59, %v2230_v35  ;;  %v2254_v48 = vpop.f32.mrf.mxu0  ;;  %4181 = vmatprep.mubr.f32.mxu1 %v19770_v26  ;;  %4823 = vperm.xlu0 %12773, %v4789_v33   ;;  %v4785_v35 = vld [vmem:[%s19452_s2 + $0x10] sm:$0xff] }
 0x31b   : > { %v2403_v13 = vpop.f32.mrf.mxu1 }
 0x31c   : > { %v14528_v32 = vadd.f32 %v2403_v13, %v2232_v51  ;;  %v2263_v14 = vpop.f32.mrf.mxu0  ;;  %4038 = vmatmul.mubr.f32.gmra.mxu0 %v4037_v1  ;;  %4813 = vperm.xlu1 %12772, %v4787_v31   ;;  %v4059_v13 = vand.u32 4294901760, %v4058_v54 }
 0x31d   : > { %v2408_v59 = vpop.f32.mrf.mxu1  ;;  %4183 = vmatmul.mubr.f32.gmra.mxu1 %v14407_v52  ;;  %4043 = vmatprep.mubr.f32.mxu0 %v19770_v26 }
 0x31e   : > { %v14538_v33 = vadd.f32 %v2408_v59, %v2241_v39  ;;  %v2265_v51 = vpop.f32.mrf.mxu0  ;;  %4188 = vmatprep.mubr.f32.mxu1 %v19770_v26  ;;  %4808 = vperm.xlu0 %12773, %v4786_v41   ;;  %v4783_v39 = vld [vmem:[%s19452_s2] sm:$0xff] }
 0x31f   : > { %v2410_v1 = vpop.f32.mrf.mxu1 }
 0x320   : > { %v14544_v38 = vadd.f32 %v2410_v1, %v2243_v40  ;;  %v2274_v31 = vpop.f32.mrf.mxu0  ;;  %4049 = vmatmul.mubr.f32.gmra.mxu0 %v4048_v23  ;;  %4803 = vperm.xlu1 %12772, %v4785_v35  }
 0x321   : > { %v2415_v17 = vpop.f32.mrf.mxu1  ;;  %4190 = vmatmul.mubr.f32.gmra.mxu1 %v14417_v5  ;;  %4054 = vmatprep.mubr.f32.mxu0 %v19770_v26 }
 0x322   : > { %v14551_v41 = vadd.f32 %v2415_v17, %v2252_v4  ;;  %v2276_v59 = vpop.f32.mrf.mxu0  ;;  %4195 = vmatprep.mubr.f32.mxu1 %v19770_v26  ;;  %4798 = vperm.xlu0 %12773, %v4784_v2  }
 0x323   : > { %v2417_v40 = vpop.f32.mrf.mxu1 }
 0x324   : > { %v14554_v1 = vadd.f32 %v2417_v40, %v2254_v48  ;;  %v2285_v54 = vpop.f32.mrf.mxu0  ;;  %4060 = vmatmul.mubr.f32.gmra.mxu0 %v4059_v13  ;;  %4793 = vperm.xlu1 %12772, %v4783_v39  }
 0x325   : > { %v2422_v23 = vpop.f32.mrf.mxu1  ;;  %4197 = vmatmul.mubr.f32.gmra.mxu1 %v14440_v55  ;;  %4293 = vmatprep.mubr.f32.mxu0 %v19770_v26 }
 0x326   : > { %v14558_v35 = vadd.f32 %v2422_v23, %v2263_v14  ;;  %v2287_v0 = vpop.f32.mrf.mxu0  ;;  %4202 = vmatprep.mubr.f32.mxu1 %v19770_v26 }
 0x327   : > { %v2424_v4 = vpop.f32.mrf.mxu1 }
 0x328   : > { %v14561_v17 = vadd.f32 %v2424_v4, %v2265_v51  ;;  %v2521_v2 = vpop.f32.mrf.mxu0  ;;  %4296 = vmatmul.mubr.f32.vlgmr.msra.gmra.mxu0 %v14374_v10 }
 0x329   : > { %v2429_v48 = vpop.f32.mrf.mxu1  ;;  %v2522_v13 = vadd.f32 %v2521_v2, %v14482_v50  ;;  %4204 = vmatmul.mubr.f32.gmra.mxu1 %v14460_v3  ;;  %4534 = vmatpush1.msra.mxu0 %v14292_v16 }
 0x32a   : > { %v14567_v39 = vadd.f32 %v2429_v48, %v2274_v31  ;;  %4538 = vmatprep.subr.mxu0 %v14302_v62  ;;  %v2523_v14 = vpop.f32.mrf.mxu0  ;;  %4209 = vmatprep.mubr.f32.mxu1 %v19770_v26 }
 0x32b   : > { %v2431_v40 = vpop.f32.mrf.mxu1  ;;  %v2524_v51 = vadd.f32 %v2523_v14, %v14487_v6  ;;  %4542 = vmatpush1.msra.mxu0 %v14307_v36  ;;  %4301 = vmatprep.mubr.f32.mxu0 %v19770_v26 }
 0x32c   : > { %v14574_v23 = vadd.f32 %v2431_v40, %v2276_v59  ;;  %4546 = vmatprep.subr.mxu0 %v14312_v37  ;;  %v2529_v50 = vpop.f32.mrf.mxu0  ;;  %4304 = vmatmul.mubr.f32.gmra.mxu0 %v14390_v30 }
 0x32d   : > { %v2436_v31 = vpop.f32.mrf.mxu1  ;;  %v2530_v4 = vadd.f32 %v2529_v50, %v14502_v61  ;;  %4211 = vmatmul.mubr.f32.gmra.mxu1 %v14478_v28  ;;  %4550 = vmatpush1.msra.mxu0 %v14319_v9  ;;  %v19839_v9 = vand.u32 4294901760, %v14374_v10 }
 0x32e   : > { %v14581_v2 = vadd.f32 %v2436_v31, %v2285_v54  ;;  %v2531_v6 = vpop.f32.mrf.mxu0  ;;  %4309 = vmatprep.mubr.f32.mxu0 %v19770_v26  ;;  %4428 = vmatprep.mubr.f32.mxu1 %v19770_v26 }
 0x32f   : > { %v2438_v59 = vpop.f32.mrf.mxu1  ;;  %v2532_v48 = vadd.f32 %v2531_v6, %v14511_v29 }
 0x330   : > { %v14586_v14 = vadd.f32 %v2438_v59, %v2287_v0  ;;  %v2537_v40 = vpop.f32.mrf.mxu0  ;;  %4312 = vmatmul.mubr.f32.gmra.mxu0 %v14400_v11 }
 0x331   : > { %v2538_v61 = vadd.f32 %v2537_v40, %v14522_v12  ;;  %v2657_v50 = vpop.f32.mrf.mxu1  ;;  %4432 = vmatmul.mubr.f32.vlgmr.msra.gmra.mxu1 %v19839_v9  ;;  %4317 = vmatprep.mubr.f32.mxu0 %v19770_v26 }
 0x332   : > { %v14593_v54 = vadd.f32 %v2657_v50, %v2522_v13  ;;  %4669 = vmatpush1.msra.mxu1 %v14250_v57  ;;  %v2539_v31 = vpop.f32.mrf.mxu0  ;;  %4437 = vmatprep.mubr.f32.mxu1 %v19770_v26  ;;  %v19840_v13 = vand.u32 4294901760, %v14390_v30 }
 0x333   : > { %4671 = vmatprep.subr.mxu1 %v14254_v58  ;;  %v2540_v0 = vadd.f32 %v2539_v31, %v14528_v32  ;;  %v2659_v29 = vpop.f32.mrf.mxu1 }
 0x334   : > { %v14599_v6 = vadd.f32 %v2659_v29, %v2524_v51  ;;  %4673 = vmatpush1.msra.mxu1 %v14260_v56  ;;  %v2545_v10 = vpop.f32.mrf.mxu0  ;;  %4320 = vmatmul.mubr.f32.gmra.mxu0 %v14424_v18 }
 0x335   : > { %4675 = vmatprep.subr.mxu1 %v14264_v53  ;;  %v2546_v9 = vadd.f32 %v2545_v10, %v14538_v33  ;;  %v2666_v12 = vpop.f32.mrf.mxu1  ;;  %4441 = vmatmul.mubr.f32.gmra.mxu1 %v19840_v13 }
 0x336   : > { %v14607_v59 = vadd.f32 %v2666_v12, %v2530_v4  ;;  %4677 = vmatpush1.msra.mxu1 %v14267_v60  ;;  %v2547_v32 = vpop.f32.mrf.mxu0  ;;  %4325 = vmatprep.mubr.f32.mxu0 %v19770_v26  ;;  %v19841_v4 = vand.u32 4294901760, %v14400_v11  ;;  %v19842_v11 = vand.u32 4294901760, %v14424_v18  ;;  %v19843_v18 = vand.u32 4294901760, %v14437_v25 }
 0x337   : > { %v2548_v51 = vadd.f32 %v2547_v32, %v14544_v38  ;;  %v2668_v40 = vpop.f32.mrf.mxu1  ;;  %4446 = vmatprep.mubr.f32.mxu1 %v19770_v26 }
 0x338   : > { %v14613_v50 = vadd.f32 %v2668_v40, %v2532_v48  ;;  %v2553_v31 = vpop.f32.mrf.mxu0  ;;  %4328 = vmatmul.mubr.f32.gmra.mxu0 %v14437_v25  ;;  %v19844_v25 = vand.u32 4294901760, %v14458_v63 }
 0x339   : > { %v2554_v30 = vadd.f32 %v2553_v31, %v14551_v41  ;;  %v2675_v33 = vpop.f32.mrf.mxu1  ;;  %4450 = vmatmul.mubr.f32.gmra.mxu1 %v19841_v4  ;;  %4333 = vmatprep.mubr.f32.mxu0 %v19770_v26 }
 0x33a   : > { %v14620_v29 = vadd.f32 %v2675_v33, %v2538_v61  ;;  %v2555_v10 = vpop.f32.mrf.mxu0  ;;  %4455 = vmatprep.mubr.f32.mxu1 %v19770_v26 }
 0x33b   : > { %v2556_v38 = vadd.f32 %v2555_v10, %v14554_v1  ;;  %v2677_v48 = vpop.f32.mrf.mxu1 }
 0x33c   : > { %v14624_v12 = vadd.f32 %v2677_v48, %v2540_v0  ;;  %v2561_v13 = vpop.f32.mrf.mxu0  ;;  %4336 = vmatmul.mubr.f32.gmra.mxu0 %v14458_v63  ;;  %v19845_v63 = vand.u32 4294901760, %v14476_v8 }
 0x33d   : > { %v2562_v41 = vadd.f32 %v2561_v13, %v14558_v35  ;;  %v2684_v32 = vpop.f32.mrf.mxu1  ;;  %4459 = vmatmul.mubr.f32.gmra.mxu1 %v19842_v11  ;;  %4341 = vmatprep.mubr.f32.mxu0 %v19770_v26 }
 0x33e   : > { %v14631_v61 = vadd.f32 %v2684_v32, %v2546_v9  ;;  %v2563_v40 = vpop.f32.mrf.mxu0  ;;  %4464 = vmatprep.mubr.f32.mxu1 %v19770_v26 }
 0x33f   : > { %v2564_v1 = vadd.f32 %v2563_v40, %v14561_v17  ;;  %v2686_v0 = vpop.f32.mrf.mxu1 }
 0x340   : > { %v14635_v31 = vadd.f32 %v2686_v0, %v2548_v51  ;;  %v2569_v33 = vpop.f32.mrf.mxu0  ;;  %4344 = vmatmul.mubr.f32.gmra.mxu0 %v14476_v8 }
 0x341   : > { %v2570_v35 = vadd.f32 %v2569_v33, %v14567_v39  ;;  %v2693_v4 = vpop.f32.mrf.mxu1  ;;  %4468 = vmatmul.mubr.f32.gmra.mxu1 %v19843_v18  ;;  %4349 = vmatprep.mubr.f32.mxu0 %v19770_v26 }
 0x342   : > { %v2694_v9 = vadd.f32 %v2693_v4, %v2554_v30  ;;  %v2571_v10 = vpop.f32.mrf.mxu0  ;;  %4473 = vmatprep.mubr.f32.mxu1 %v19770_v26 }
 0x343   : > { %v2572_v17 = vadd.f32 %v2571_v10, %v14574_v23  ;;  %v2695_v48 = vpop.f32.mrf.mxu1 }
 0x344   : > { %v14644_v51 = vadd.f32 %v2695_v48, %v2556_v38  ;;  %v2577_v13 = vpop.f32.mrf.mxu0  ;;  %4352 = vmatmul.mubr.f32.gmra.mxu0 %v14495_v49 }
 0x345   : > { %v2578_v39 = vadd.f32 %v2577_v13, %v14581_v2  ;;  %v2702_v32 = vpop.f32.mrf.mxu1  ;;  %4477 = vmatmul.mubr.f32.gmra.mxu1 %v19844_v25  ;;  %4583 = vmatprep.mubr.f32.mxu0 %v19770_v26 }
 0x346   : > { %v2703_v30 = vadd.f32 %v2702_v32, %v2562_v41  ;;  %v2579_v11 = vpop.f32.mrf.mxu0  ;;  %4482 = vmatprep.mubr.f32.mxu1 %v19770_v26 }
 0x347   : > { %v2580_v23 = vadd.f32 %v2579_v11, %v14586_v14  ;;  %v2704_v40 = vpop.f32.mrf.mxu1 }
 0x348   : > { %v14653_v38 = vadd.f32 %v2704_v40, %v2564_v1  ;;  %v2810_v0 = vpop.f32.mrf.mxu0  ;;  %4585 = vmatmul.mubr.f32.vlgmr.msra.gmra.mxu0 %v14360_v7 }
 0x349   : > { %v2711_v33 = vpop.f32.mrf.mxu1  ;;  %v2811_v2 = vadd.f32 %v2810_v0, %v14593_v54  ;;  %4486 = vmatmul.mubr.f32.gmra.mxu1 %v19845_v63  ;;  %4590 = vmatprep.mubr.f32.mxu0 %v19770_v26  ;;  %v19846_v54 = vand.u32 4294901760, %v14495_v49 }
 0x34a   : > { %v2712_v41 = vadd.f32 %v2711_v33, %v2570_v35  ;;  %v14660_v4 = vpop.f32.mrf.mxu0  ;;  %4491 = vmatprep.mubr.f32.mxu1 %v19770_v26 }
 0x34b   : > { %v2713_v14 = vpop.f32.mrf.mxu1 }
 0x34c   : > { %v14663_v18 = vadd.f32 %v2713_v14, %v2572_v17  ;;  %v2817_v1 = vpop.f32.mrf.mxu0  ;;  %4592 = vmatmul.mubr.f32.gmra.mxu0 %v14376_v34 }
 0x34d   : > { %v2720_v10 = vpop.f32.mrf.mxu1  ;;  %v2818_v48 = vadd.f32 %v2817_v1, %v14607_v59  ;;  %4495 = vmatmul.mubr.f32.gmra.mxu1 %v19846_v54  ;;  %4597 = vmatprep.mubr.f32.mxu0 %v19770_v26 }
 0x34e   : > { %v2721_v8 = vadd.f32 %v2720_v10, %v2578_v39  ;;  %v14670_v35 = vpop.f32.mrf.mxu0  ;;  %4710 = vmatprep.mubr.f32.mxu1 %v19770_v26 }
 0x34f   : > { %v2722_v13 = vpop.f32.mrf.mxu1 }
 0x350   : > { %v14673_v32 = vadd.f32 %v2722_v13, %v2580_v23  ;;  %v2824_v17 = vpop.f32.mrf.mxu0  ;;  %4599 = vmatmul.mubr.f32.gmra.mxu0 %v14385_v27 }
 0x351   : > { %v2825_v25 = vadd.f32 %v2824_v17, %v14620_v29  ;;  %v2937_v11 = vpop.f32.mrf.mxu1  ;;  %4712 = vmatmul.mubr.f32.vlgmr.msra.gmra.mxu1 %v14360_v7  ;;  %4604 = vmatprep.mubr.f32.mxu0 %v19770_v26 }
 0x352   : > { %v2938_v49 = vadd.f32 %v2937_v11, %v2811_v2  ;;  %v14679_v59 = vpop.f32.mrf.mxu0  ;;  %4717 = vmatprep.mubr.f32.mxu1 %v19770_v26 }
 0x353   : > { %v14682_v39 = vpop.f32.mrf.mxu1 }
 0x354   : > { %v2831_v40 = vpop.f32.mrf.mxu0  ;;  %4606 = vmatmul.mubr.f32.gmra.mxu0 %v14407_v52 }
 0x355   : > { %v2832_v23 = vadd.f32 %v2831_v40, %v14631_v61  ;;  %v2944_v0 = vpop.f32.mrf.mxu1  ;;  %4719 = vmatmul.mubr.f32.gmra.mxu1 %v14376_v34  ;;  %4611 = vmatprep.mubr.f32.mxu0 %v19770_v26 }
 0x356   : > { %v2945_v7 = vadd.f32 %v2944_v0, %v2818_v48  ;;  %v14688_v29 = vpop.f32.mrf.mxu0  ;;  %4724 = vmatprep.mubr.f32.mxu1 %v19770_v26 }
 0x357   : > { %v14691_v33 = vpop.f32.mrf.mxu1 }
 0x358   : > { %v2838_v2 = vpop.f32.mrf.mxu0  ;;  %4613 = vmatmul.mubr.f32.gmra.mxu0 %v14417_v5 }
 0x359   : > { %v2839_v63 = vadd.f32 %v2838_v2, %v2694_v9  ;;  %v2951_v14 = vpop.f32.mrf.mxu1  ;;  %4726 = vmatmul.mubr.f32.gmra.mxu1 %v14385_v27  ;;  %4618 = vmatprep.mubr.f32.mxu0 %v19770_v26 }
 0x35a   : > { %v2952_v61 = vadd.f32 %v2951_v14, %v2825_v25  ;;  %v14696_v34 = vpop.f32.mrf.mxu0  ;;  %4731 = vmatprep.mubr.f32.mxu1 %v19770_v26 }
 0x35b   : > { %v14699_v1 = vpop.f32.mrf.mxu1 }
 0x35c   : > { %v2845_v10 = vpop.f32.mrf.mxu0  ;;  %4620 = vmatmul.mubr.f32.gmra.mxu0 %v14440_v55 }
 0x35d   : > { %v2846_v48 = vadd.f32 %v2845_v10, %v2703_v30  ;;  %v2958_v54 = vpop.f32.mrf.mxu1  ;;  %4733 = vmatmul.mubr.f32.gmra.mxu1 %v14407_v52  ;;  %4625 = vmatprep.mubr.f32.mxu0 %v19770_v26 }
 0x35e   : > { %v2959_v9 = vadd.f32 %v2958_v54, %v2832_v23  ;;  %v14704_v27 = vpop.f32.mrf.mxu0  ;;  %4738 = vmatprep.mubr.f32.mxu1 %v19770_v26 }
 0x35f   : > { %v14707_v13 = vpop.f32.mrf.mxu1 }
 0x360   : > { %v2852_v17 = vpop.f32.mrf.mxu0  ;;  %4627 = vmatmul.mubr.f32.gmra.mxu0 %v14460_v3 }
 0x361   : > { %v2853_v25 = vadd.f32 %v2852_v17, %v2712_v41  ;;  %v2965_v11 = vpop.f32.mrf.mxu1  ;;  %4740 = vmatmul.mubr.f32.gmra.mxu1 %v14417_v5  ;;  %4632 = vmatprep.mubr.f32.mxu0 %v19770_v26 }
 0x362   : > { %v2966_v30 = vadd.f32 %v2965_v11, %v2839_v63  ;;  %v14712_v52 = vpop.f32.mrf.mxu0  ;;  %4745 = vmatprep.mubr.f32.mxu1 %v19770_v26 }
 0x363   : > { %v14715_v40 = vpop.f32.mrf.mxu1 }
 0x364   : > { %v2859_v23 = vpop.f32.mrf.mxu0  ;;  %4634 = vmatmul.mubr.f32.gmra.mxu0 %v14478_v28 }
 0x365   : > { %v2860_v0 = vadd.f32 %v2859_v23, %v2721_v8  ;;  %v2972_v2 = vpop.f32.mrf.mxu1  ;;  %4747 = vmatmul.mubr.f32.gmra.mxu1 %v14440_v55  ;;  %5008 = vmatprep.mubr.f32.mxu0 %v19770_v26 }
 0x366   : > { %v2973_v41 = vadd.f32 %v2972_v2, %v2846_v48  ;;  %v14720_v5 = vpop.f32.mrf.mxu0  ;;  %4752 = vmatprep.mubr.f32.mxu1 %v19770_v26 }
 0x367   : > { %v14723_v63 = vpop.f32.mrf.mxu1 }
 0x368   : > { %v3092_v14 = vpop.f32.mrf.mxu0 }
 0x369   : > { %v2979_v10 = vpop.f32.mrf.mxu1  ;;  %v3093_v54 = vadd.f32 %v3092_v14, %v2938_v49  ;;  %4754 = vmatmul.mubr.f32.gmra.mxu1 %v14460_v3 }
 0x36a   : > { %v2980_v17 = vadd.f32 %v2979_v10, %v2853_v25  ;;  %v14726_v11 = vpop.f32.mrf.mxu0  ;;  %4759 = vmatprep.mubr.f32.mxu1 %v19770_v26 }
 0x36b   : > { %v14729_v55 = vpop.f32.mrf.mxu1 }
 0x36c   : > { %v3103_v8 = vpop.f32.mrf.mxu0 }
 0x36d   : > { %v2986_v48 = vpop.f32.mrf.mxu1  ;;  %v3104_v23 = vadd.f32 %v3103_v8, %v2945_v7  ;;  %4761 = vmatmul.mubr.f32.gmra.mxu1 %v14478_v28 }
 0x36e   : > { %v2987_v2 = vadd.f32 %v2986_v48, %v2860_v0  ;;  %v14732_v37 = vpop.f32.mrf.mxu0  ;;  %5241 = vmatprep.mubr.f32.mxu1 %v19770_v26 }
 0x36f   : > { %v14735_v49 = vpop.f32.mrf.mxu1 }
 0x370   : > { %v3114_v3 = vpop.f32.mrf.mxu0 }
 0x371   : > { %v3115_v25 = vadd.f32 %v3114_v3, %v2952_v61  ;;  %v3271_v14 = vpop.f32.mrf.mxu1 }
 0x372   : > { %v3272_v10 = vadd.f32 %v3271_v14, %v3093_v54  ;;  %v14737_v36 = vpop.f32.mrf.mxu0 }
 0x373   : > { %v14739_v62 = vpop.f32.mrf.mxu1 }
 0x374   : > { %v3125_v16 = vpop.f32.mrf.mxu0 }
 0x375   : > { %v3126_v60 = vadd.f32 %v3125_v16, %v2959_v9  ;;  %v3278_v7 = vpop.f32.mrf.mxu1 }
 0x376   : > { %v3279_v8 = vadd.f32 %v3278_v7, %v3104_v23  ;;  %v14741_v28 = vpop.f32.mrf.mxu0 }
 0x377   : > { %v14743_v0 = vpop.f32.mrf.mxu1 }
 0x378   : > { %v3136_v48 = vpop.f32.mrf.mxu0 }
 0x379   : > { %v3137_v53 = vadd.f32 %v3136_v48, %v2966_v30  ;;  %v3285_v56 = vpop.f32.mrf.mxu1 }
 0x37a   : > { %v3286_v58 = vadd.f32 %v3285_v56, %v3115_v25  ;;  %v14745_v57 = vpop.f32.mrf.mxu0 }
 0x37b   : > { %v14747_v61 = vpop.f32.mrf.mxu1 }
 0x37c   : > { %v3147_v54 = vpop.f32.mrf.mxu0 }
 0x37d   : > { %v3148_v3 = vadd.f32 %v3147_v54, %v2973_v41  ;;  %v3292_v14 = vpop.f32.mrf.mxu1 }
 0x37e   : > { %v3293_v47 = vadd.f32 %v3292_v14, %v3126_v60  ;;  %v14749_v46 = vpop.f32.mrf.mxu0 }
 0x37f   : > { %v14751_v16 = vpop.f32.mrf.mxu1 }
 0x380   : > { %v3158_v9 = vpop.f32.mrf.mxu0 }
 0x381   : > { %v3159_v23 = vadd.f32 %v3158_v9, %v2980_v17  ;;  %v3299_v7 = vpop.f32.mrf.mxu1 }
 0x382   : > { %v3300_v45 = vadd.f32 %v3299_v7, %v3137_v53  ;;  %v14753_v24 = vpop.f32.mrf.mxu0 }
 0x383   : > { %v14755_v30 = vpop.f32.mrf.mxu1 }
 0x384   : > { %v3169_v56 = vpop.f32.mrf.mxu0 }
 0x385   : > { %v3170_v25 = vadd.f32 %v3169_v56, %v2987_v2  ;;  %v3306_v48 = vpop.f32.mrf.mxu1 }
 0x386   : > { %v3307_v44 = vadd.f32 %v3306_v48, %v3148_v3  ;;  %v14757_v43 = vpop.f32.mrf.mxu0 }
 0x387   : > { %v14759_v41 = vpop.f32.mrf.mxu1 }
 0x388   : > { %v3405_v60 = vpop.f32.mrf.mxu0 }
 0x389   : > { %v3313_v54 = vpop.f32.mrf.mxu1  ;;  %v3406_v14 = vadd.f32 %v3405_v60, %v3272_v10 }
 0x38a   : > { %v3314_v22 = vadd.f32 %v3313_v54, %v3159_v23  ;;  %v14761_v21 = vpop.f32.mrf.mxu0 }
 0x38b   : > { %v14763_v17 = vpop.f32.mrf.mxu1 }
 0x38c   : > { %19847 = vst [vmem:[#allocation78_spill] sm:$0xff] %v14763_v17  ;;  %v3413_v53 = vpop.f32.mrf.mxu0 }
 0x38d   : > { %v3320_v9 = vpop.f32.mrf.mxu1  ;;  %v3414_v7 = vadd.f32 %v3413_v53, %v3279_v8 }
 0x38e   : > { %v3321_v15 = vadd.f32 %v3320_v9, %v3170_v25  ;;  %v14765_v20 = vpop.f32.mrf.mxu0 }
 0x38f   : > { %19848 = vst [vmem:[#allocation79_spill] sm:$0xff] %v14765_v20  ;;  %v14767_v2 = vpop.f32.mrf.mxu1 }
 0x390   : > { %19849 = vst [vmem:[#allocation80_spill] sm:$0xff] %v14767_v2  ;;  %v3421_v3 = vpop.f32.mrf.mxu0 }
 0x391   : > { %v3422_v56 = vadd.f32 %v3421_v3, %v3286_v58  ;;  %v3541_v48 = vpop.f32.mrf.mxu1 }
 0x392   : > { %v3542_v42 = vadd.f32 %v3541_v48, %v3406_v14  ;;  %v14769_v19 = vpop.f32.mrf.mxu0 }
 0x393   : > { %19850 = vst [vmem:[#allocation81_spill] sm:$0xff] %v14769_v19  ;;  %v14771_v10 = vpop.f32.mrf.mxu1 }
 0x394   : > { %19851 = vst [vmem:[#allocation82_spill] sm:$0xff] %v14771_v10  ;;  %v3429_v23 = vpop.f32.mrf.mxu0 }
 0x395   : > { %v3430_v60 = vadd.f32 %v3429_v23, %v3293_v47  ;;  %v3550_v54 = vpop.f32.mrf.mxu1 }
 0x396   : > { %v3551_v26 = vadd.f32 %v3550_v54, %v3414_v7  ;;  %v14773_v17 = vpop.f32.mrf.mxu0 }
 0x397   : > { %19852 = vst [vmem:[#allocation83_spill] sm:$0xff] %v14773_v17  ;;  %v14775_v8 = vpop.f32.mrf.mxu1 }
 0x398   : > { %19853 = vst [vmem:[#allocation84_spill] sm:$0xff] %v14775_v8  ;;  %v3437_v25 = vpop.f32.mrf.mxu0 }
 0x399   : > { %v3438_v53 = vadd.f32 %v3437_v25, %v3300_v45  ;;  %v3559_v9 = vpop.f32.mrf.mxu1 }
 0x39a   : > { %v3560_v2 = vadd.f32 %v3559_v9, %v3422_v56  ;;  %v14777_v20 = vpop.f32.mrf.mxu0 }
 0x39b   : > { %19854 = vst [vmem:[#allocation85_spill] sm:$0xff] %v14777_v20  ;;  %v14779_v58 = vpop.f32.mrf.mxu1 }
 0x39c   : > { %19855 = vst [vmem:[#allocation86_spill] sm:$0xff] %v14779_v58  ;;  %v3445_v14 = vpop.f32.mrf.mxu0 }
 0x39d   : > { %v3446_v3 = vadd.f32 %v3445_v14, %v3307_v44  ;;  %v3568_v48 = vpop.f32.mrf.mxu1 }
 0x39e   : > { %v3569_v10 = vadd.f32 %v3568_v48, %v3430_v60  ;;  %v14781_v19 = vpop.f32.mrf.mxu0 }
 0x39f   : > { %19856 = vst [vmem:[#allocation87_spill] sm:$0xff] %v14781_v19  ;;  %v14783_v47 = vpop.f32.mrf.mxu1 }
 0x3a0   : > { %19857 = vst [vmem:[#allocation88_spill] sm:$0xff] %v14783_v47  ;;  %v3453_v7 = vpop.f32.mrf.mxu0 }
 0x3a1   : > { %v3454_v23 = vadd.f32 %v3453_v7, %v3314_v22  ;;  %v3577_v54 = vpop.f32.mrf.mxu1 }
 0x3a2   : > { %v3578_v8 = vadd.f32 %v3577_v54, %v3438_v53  ;;  %v14785_v17 = vpop.f32.mrf.mxu0 }
 0x3a3   : > { %19858 = vst [vmem:[#allocation89_spill] sm:$0xff] %v14785_v17  ;;  %v14787_v45 = vpop.f32.mrf.mxu1 }
 0x3a4   : > { %19859 = vst [vmem:[#allocation90_spill] sm:$0xff] %v14787_v45  ;;  %v3461_v56 = vpop.f32.mrf.mxu0 }
 0x3a5   : > { %v3462_v25 = vadd.f32 %v3461_v56, %v3321_v15  ;;  %v3586_v9 = vpop.f32.mrf.mxu1 }
 0x3a6   : > { %v3587_v58 = vadd.f32 %v3586_v9, %v3446_v3  ;;  %v14789_v20 = vpop.f32.mrf.mxu0 }
 0x3a7   : > { %19860 = vst [vmem:[#allocation91_spill] sm:$0xff] %v14789_v20  ;;  %v14791_v44 = vpop.f32.mrf.mxu1 }
 0x3a8   : > { %19861 = vst [vmem:[#allocation92_spill] sm:$0xff] %v14791_v44  ;;  %v3694_v60 = vpop.f32.mrf.mxu0 }
 0x3a9   : > { %v3595_v14 = vpop.f32.mrf.mxu1  ;;  %v3695_v48 = vadd.f32 %v3694_v60, %v3542_v42 }
 0x3aa   : > { %v3596_v47 = vadd.f32 %v3595_v14, %v3454_v23  ;;  %v14793_v19 = vpop.f32.mrf.mxu0 }
 0x3ab   : > { %19862 = vst [vmem:[#allocation93_spill] sm:$0xff] %v14793_v19  ;;  %v14795_v22 = vpop.f32.mrf.mxu1 }
 0x3ac   : > { %v3701_v53 = vpop.f32.mrf.mxu0 }
 0x3ad   : > { %v3604_v7 = vpop.f32.mrf.mxu1  ;;  %v3702_v54 = vadd.f32 %v3701_v53, %v3551_v26 }
 0x3ae   : > { %v3605_v45 = vadd.f32 %v3604_v7, %v3462_v25  ;;  %v14797_v17 = vpop.f32.mrf.mxu0 }
 0x3af   : > { %v14799_v15 = vpop.f32.mrf.mxu1 }
 0x3b0   : > { %19863 = vst [vmem:[#allocation94_spill] sm:$0xff] %v14799_v15  ;;  %v3708_v3 = vpop.f32.mrf.mxu0 }
 0x3b1   : > { %v3709_v56 = vadd.f32 %v3708_v3, %v3560_v2  ;;  %v3821_v9 = vpop.f32.mrf.mxu1 }
 0x3b2   : > { %v14801_v44 = vadd.f32 %v3821_v9, %v3695_v48  ;;  %v14803_v20 = vpop.f32.mrf.mxu0 }
 0x3b3   : > { %v14805_v42 = vpop.f32.mrf.mxu1 }
 0x3b4   : > { %19864 = vst [vmem:[#allocation95_spill] sm:$0xff] %v14801_v44  ;;  %19865 = vst [vmem:[#allocation96_spill] sm:$0xff] %v14805_v42  ;;  %v3715_v23 = vpop.f32.mrf.mxu0 }
 0x3b5   : > { %v3716_v60 = vadd.f32 %v3715_v23, %v3569_v10  ;;  %v3828_v14 = vpop.f32.mrf.mxu1 }
 0x3b6   : > { %v14807_v19 = vadd.f32 %v3828_v14, %v3702_v54  ;;  %v14809_v26 = vpop.f32.mrf.mxu0 }
 0x3b7   : > { %v14811_v25 = vpop.f32.mrf.mxu1 }
 0x3b8   : > { %19866 = vst [vmem:[#allocation97_spill] sm:$0xff] %v14807_v19  ;;  %19867 = vst [vmem:[#allocation98_spill] sm:$0xff] %v14811_v25  ;;  %v3722_v53 = vpop.f32.mrf.mxu0 }
 0x3b9   : > { %v3723_v7 = vadd.f32 %v3722_v53, %v3578_v8  ;;  %v3835_v15 = vpop.f32.mrf.mxu1 }
 0x3ba   : > { %v14813_v2 = vadd.f32 %v3835_v15, %v3709_v56  ;;  %v14815_v48 = vpop.f32.mrf.mxu0 }
 0x3bb   : > { %v14817_v3 = vpop.f32.mrf.mxu1 }
 0x3bc   : > { %19868 = vst [vmem:[#allocation99_spill] sm:$0xff] %v14813_v2  ;;  %19869 = vst [vmem:[#allocation100_spill] sm:$0xff] %v14817_v3  ;;  %v3729_v9 = vpop.f32.mrf.mxu0 }
 0x3bd   : > { %v3730_v42 = vadd.f32 %v3729_v9, %v3587_v58  ;;  %v3842_v44 = vpop.f32.mrf.mxu1 }
 0x3be   : > { %v14819_v10 = vadd.f32 %v3842_v44, %v3716_v60  ;;  %v14821_v54 = vpop.f32.mrf.mxu0 }
 0x3bf   : > { %v14823_v23 = vpop.f32.mrf.mxu1 }
 0x3c0   : > { %19870 = vst [vmem:[#allocation101_spill] sm:$0xff] %v14819_v10  ;;  %19871 = vst [vmem:[#allocation102_spill] sm:$0xff] %v14823_v23  ;;  %v3736_v14 = vpop.f32.mrf.mxu0 }
 0x3c1   : > { %v3737_v19 = vadd.f32 %v3736_v14, %v3596_v47  ;;  %v3849_v25 = vpop.f32.mrf.mxu1 }
 0x3c2   : > { %v14825_v8 = vadd.f32 %v3849_v25, %v3723_v7  ;;  %v14827_v15 = vpop.f32.mrf.mxu0 }
 0x3c3   : > { %19873 = vst [vmem:[#allocation104_spill] sm:$0xff] %v14827_v15  ;;  %v14829_v56 = vpop.f32.mrf.mxu1 }
 0x3c4   : > { %19872 = vst [vmem:[#allocation103_spill] sm:$0xff] %v14825_v8  ;;  %19874 = vst [vmem:[#allocation105_spill] sm:$0xff] %v14829_v56  ;;  %v3743_v53 = vpop.f32.mrf.mxu0 }
 0x3c5   : > { %v3744_v2 = vadd.f32 %v3743_v53, %v3605_v45  ;;  %v3856_v3 = vpop.f32.mrf.mxu1 }
 0x3c6   : > { %v14831_v58 = vadd.f32 %v3856_v3, %v3730_v42  ;;  %v14833_v44 = vpop.f32.mrf.mxu0 }
 0x3c7   : > { %19876 = vst [vmem:[#allocation107_spill] sm:$0xff] %v14833_v44  ;;  %v14835_v60 = vpop.f32.mrf.mxu1 }
 0x3c8   : > { %19875 = vst [vmem:[#allocation106_spill] sm:$0xff] %v14831_v58  ;;  %19877 = vst [vmem:[#allocation108_spill] sm:$0xff] %v14835_v60  ;;  %v3984_v9 = vpop.f32.mrf.mxu0 }
 0x3c9   : > { %v3863_v10 = vpop.f32.mrf.mxu1 }
 0x3ca   : > { %v14837_v23 = vadd.f32 %v3863_v10, %v3737_v19  ;;  %v14839_v47 = vpop.f32.mrf.mxu0 }
 0x3cb   : > { %19879 = vst [vmem:[#allocation110_spill] sm:$0xff] %v14839_v47  ;;  %v14841_v25 = vpop.f32.mrf.mxu1 }
 0x3cc   : > { %19878 = vst [vmem:[#allocation109_spill] sm:$0xff] %v14837_v23  ;;  %19880 = vst [vmem:[#allocation111_spill] sm:$0xff] %v14841_v25  ;;  %v3995_v7 = vpop.f32.mrf.mxu0 }
 0x3cd   : > { %v3870_v14 = vpop.f32.mrf.mxu1 }
 0x3ce   : > { %v14843_v8 = vadd.f32 %v3870_v14, %v3744_v2  ;;  %v14845_v45 = vpop.f32.mrf.mxu0 }
 0x3cf   : > { %19882 = vst [vmem:[#allocation113_spill] sm:$0xff] %v14845_v45  ;;  %v14847_v42 = vpop.f32.mrf.mxu1 }
 0x3d0   : > { %19881 = vst [vmem:[#allocation112_spill] sm:$0xff] %v14843_v8  ;;  %19883 = vst [vmem:[#allocation114_spill] sm:$0xff] %v14847_v42  ;;  %v4006_v3 = vpop.f32.mrf.mxu0 }
 0x3d1   : > { %v4163_v53 = vpop.f32.mrf.mxu1 }
 0x3d2   : > { %v4164_v58 = vadd.f32 %v4163_v53, %v3984_v9  ;;  %v14849_v60 = vpop.f32.mrf.mxu0 }
 0x3d3   : > { %19884 = vst [vmem:[#allocation115_spill] sm:$0xff] %v14849_v60  ;;  %v14851_v56 = vpop.f32.mrf.mxu1 }
 0x3d4   : > { %19885 = vst [vmem:[#allocation116_spill] sm:$0xff] %v14851_v56  ;;  %v4017_v19 = vpop.f32.mrf.mxu0 }
 0x3d5   : > { %v4170_v10 = vpop.f32.mrf.mxu1 }
 0x3d6   : > { %v4171_v23 = vadd.f32 %v4170_v10, %v3995_v7  ;;  %v14853_v47 = vpop.f32.mrf.mxu0 }
 0x3d7   : > { %19886 = vst [vmem:[#allocation117_spill] sm:$0xff] %v14853_v47  ;;  %v14855_v25 = vpop.f32.mrf.mxu1 }
 0x3d8   : > { %19887 = vst [vmem:[#allocation118_spill] sm:$0xff] %v14855_v25  ;;  %v4028_v2 = vpop.f32.mrf.mxu0 }
 0x3d9   : > { %v4177_v14 = vpop.f32.mrf.mxu1 }
 0x3da   : > { %v14857_v8 = vadd.f32 %v4177_v14, %v4006_v3  ;;  %v14859_v45 = vpop.f32.mrf.mxu0 }
 0x3db   : > { %19888 = vst [vmem:[#allocation119_spill] sm:$0xff] %v14859_v45  ;;  %v14861_v42 = vpop.f32.mrf.mxu1 }
 0x3dc   : > { %19889 = vst [vmem:[#allocation120_spill] sm:$0xff] %v14861_v42  ;;  %v4039_v9 = vpop.f32.mrf.mxu0 }
 0x3dd   : > { %v4184_v53 = vpop.f32.mrf.mxu1 }
 0x3de   : > { %v14863_v60 = vadd.f32 %v4184_v53, %v4017_v19  ;;  %v14865_v56 = vpop.f32.mrf.mxu0 }
 0x3df   : > { %19891 = vst [vmem:[#allocation122_spill] sm:$0xff] %v14865_v56  ;;  %v14867_v44 = vpop.f32.mrf.mxu1 }
 0x3e0   : > { %19890 = vst [vmem:[#allocation121_spill] sm:$0xff] %v14863_v60  ;;  %19892 = vst [vmem:[#allocation123_spill] sm:$0xff] %v14867_v44  ;;  %v4050_v7 = vpop.f32.mrf.mxu0 }
 0x3e1   : > { %v4191_v10 = vpop.f32.mrf.mxu1 }
 0x3e2   : > { %v14869_v47 = vadd.f32 %v4191_v10, %v4028_v2  ;;  %v14871_v25 = vpop.f32.mrf.mxu0 }
 0x3e3   : > { %19894 = vst [vmem:[#allocation125_spill] sm:$0xff] %v14871_v25  ;;  %v14873_v3 = vpop.f32.mrf.mxu1 }
 0x3e4   : > { %19893 = vst [vmem:[#allocation124_spill] sm:$0xff] %v14869_v47  ;;  %19895 = vst [vmem:[#allocation126_spill] sm:$0xff] %v14873_v3  ;;  %v14875_v14 = vpop.f32.mrf.mxu0 }
 0x3e5   : > { %19896 = vst [vmem:[#allocation127_spill] sm:$0xff] %v14875_v14  ;;  %v4198_v45 = vpop.f32.mrf.mxu1 }
 0x3e6   : > { %v14877_v42 = vadd.f32 %v4198_v45, %v4039_v9  ;;  %v14879_v15 = vpop.f32.mrf.mxu0 }
 0x3e7   : > { %19898 = vst [vmem:[#allocation129_spill] sm:$0xff] %v14879_v15  ;;  %v14881_v19 = vpop.f32.mrf.mxu1 }
 0x3e8   : > { %19897 = vst [vmem:[#allocation128_spill] sm:$0xff] %v14877_v42  ;;  %v4297_v53 = vpop.f32.mrf.mxu0 }
 0x3e9   : > { %v4205_v56 = vpop.f32.mrf.mxu1  ;;  %v4298_v44 = vadd.f32 %v4297_v53, %v4164_v58 }
 0x3ea   : > { %v14883_v60 = vadd.f32 %v4205_v56, %v4050_v7  ;;  %v14885_v2 = vpop.f32.mrf.mxu0 }
 0x3eb   : > { %v14887_v10 = vpop.f32.mrf.mxu1 }
 0x3ec   : > { %19899 = vst [vmem:[#allocation130_spill] sm:$0xff] %v14883_v60  ;;  %19900 = vst [vmem:[#allocation131_spill] sm:$0xff] %v14887_v10  ;;  %v4305_v25 = vpop.f32.mrf.mxu0 }
 0x3ed   : > { %v14889_v3 = vpop.f32.mrf.mxu1  ;;  %v4306_v14 = vadd.f32 %v4305_v25, %v4171_v23 }
 0x3ee   : > { %19901 = vst [vmem:[#allocation132_spill] sm:$0xff] %v14889_v3  ;;  %v14891_v47 = vpop.f32.mrf.mxu0 }
 0x3ef   : > { %19902 = vst [vmem:[#allocation133_spill] sm:$0xff] %v14891_v47  ;;  %v14893_v45 = vpop.f32.mrf.mxu1 }
 0x3f0   : > { %19903 = vst [vmem:[#allocation134_spill] sm:$0xff] %v14893_v45  ;;  %v14895_v9 = vpop.f32.mrf.mxu0 }
 0x3f1   : > { %v4433_v42 = vpop.f32.mrf.mxu1 }
 0x3f2   : > { %v14897_v15 = vadd.f32 %v4433_v42, %v4298_v44  ;;  %v14899_v58 = vpop.f32.mrf.mxu0 }
 0x3f3   : > { %19904 = vst [vmem:[#allocation135_spill] sm:$0xff] %v14899_v58  ;;  %v14901_v56 = vpop.f32.mrf.mxu1 }
 0x3f4   : > { %19905 = vst [vmem:[#allocation136_spill] sm:$0xff] %v14901_v56  ;;  %v14903_v7 = vpop.f32.mrf.mxu0 }
 0x3f5   : > { %v4442_v53 = vpop.f32.mrf.mxu1 }
 0x3f6   : > { %v14905_v60 = vadd.f32 %v4442_v53, %v4306_v14  ;;  %v14907_v3 = vpop.f32.mrf.mxu0 }
 0x3f7   : > { %19906 = vst [vmem:[#allocation137_spill] sm:$0xff] %v14907_v3  ;;  %v14909_v23 = vpop.f32.mrf.mxu1 }
 0x3f8   : > { %19907 = vst [vmem:[#allocation138_spill] sm:$0xff] %v14909_v23  ;;  %v14911_v25 = vpop.f32.mrf.mxu0 }
 0x3f9   : > { %v14913_v45 = vpop.f32.mrf.mxu1 }
 0x3fa   : > { %v14915_v47 = vpop.f32.mrf.mxu0 }
 0x3fb   : > { %19908 = vst [vmem:[#allocation139_spill] sm:$0xff] %v14915_v47  ;;  %v14917_v44 = vpop.f32.mrf.mxu1  ;;  %v2813_v47 = vadd.f32 %v14660_v4, %v14599_v6  ;;  %v2834_v6 = vadd.f32 %v14688_v29, %v14635_v31  ;;  %v2841_v4 = vadd.f32 %v14696_v34, %v14644_v51 }
 0x3fc   : > { %19909 = vst [vmem:[#allocation140_spill] sm:$0xff] %v14917_v44  ;;  %v14919_v42 = vpop.f32.mrf.mxu0 }
 0x3fd   : > { %19910 = vst [vmem:[#allocation141_spill] sm:$0xff] %v14919_v42  ;;  %v14921_v58 = vpop.f32.mrf.mxu1  ;;  %v4863_v42 = vld [vmem:[%s19451_s1 + $0xc0] sm:$0xff]  ;;  %v2961_v31 = vadd.f32 %v14707_v13, %v2834_v6  ;;  %v2968_v51 = vadd.f32 %v14715_v40, %v2841_v4 }
 0x3fe   : > { %v14923_v56 = vpop.f32.mrf.mxu0  ;;  %v19922_v6 = vld [vmem:[#allocation81_spill] sm:$0xff] }
 0x3ff   : > { %19911 = vst [vmem:[#allocation142_spill] sm:$0xff] %v14923_v56  ;;  %v14925_v14 = vpop.f32.mrf.mxu1 }
 0x400   : > { %19912 = vst [vmem:[#allocation143_spill] sm:$0xff] %v14925_v14  ;;  %v14927_v53 = vpop.f32.mrf.mxu0  ;;  %v2820_v14 = vadd.f32 %v14670_v35, %v14613_v50  ;;  %v2848_v50 = vadd.f32 %v14704_v27, %v14653_v38  ;;  %v2855_v35 = vadd.f32 %v14712_v52, %v14663_v18  ;;  %v3128_v52 = vadd.f32 %v14741_v28, %v2961_v31  ;;  %v19926_v31 = vld [vmem:[#allocation84_spill] sm:$0xff] }
 0x401   : > { %19913 = vst [vmem:[#allocation144_spill] sm:$0xff] %v14927_v53  ;;  %v14929_v3 = vpop.f32.mrf.mxu1 }
 0x402   : > { %v14931_v23 = vpop.f32.mrf.mxu0  ;;  %v2947_v56 = vadd.f32 %v14691_v33, %v2820_v14  ;;  %v2975_v33 = vadd.f32 %v14723_v63, %v2848_v50  ;;  %v2982_v38 = vadd.f32 %v14729_v55, %v2855_v35  ;;  %v19925_v35 = vld [vmem:[#allocation83_spill] sm:$0xff] }
 0x403   : > { %19914 = vst [vmem:[#allocation145_spill] sm:$0xff] %v14931_v23  ;;  %v14933_v10 = vpop.f32.mrf.mxu1  ;;  %v2827_v23 = vadd.f32 %v14679_v59, %v14624_v12  ;;  %v4905_v12 = vsel %vm4903_vm0, %v4863_v42, 0 }
 0x404   : > { %19915 = vst [vmem:[#allocation146_spill] sm:$0xff] %v14933_v10  ;;  %v14937_v44 = vpop.f32.mrf.mxu0  ;;  %v2940_v10 = vadd.f32 %v14682_v39, %v2813_v47  ;;  %v2862_v39 = vadd.f32 %v14720_v5, %v14673_v32  ;;  %v3106_v34 = vadd.f32 %v14732_v37, %v2947_v56  ;;  %v14979_v32 = vand.u32 4294901760, %v4905_v12 }
 0x405   : > { %19916 = vst [vmem:[#allocation147_spill] sm:$0xff] %v14937_v44  ;;  %v14944_v53 = vpop.f32.mrf.mxu1  ;;  %v2954_v59 = vadd.f32 %v14699_v1, %v2827_v23  ;;  %v3150_v37 = vadd.f32 %v14749_v46, %v2975_v33  ;;  %v3161_v28 = vadd.f32 %v14753_v24, %v2982_v38  ;;  %v14995_v46 = vpop.permute.xlu1 %4828  ;;  %v19920_v24 = vld [vmem:[#allocation78_spill] sm:$0xff] }
 0x406   : > { %19917 = vst [vmem:[#allocation148_spill] sm:$0xff] %v14944_v53  ;;  %v14953_v44 = vpop.f32.mrf.mxu0  ;;  %v3095_v18 = vadd.f32 %v14726_v11, %v2940_v10  ;;  %v2989_v1 = vadd.f32 %v14735_v49, %v2862_v39  ;;  %19918 = vst [vmem:[#allocation149_spill] sm:$0xff] %v14979_v32  ;;  %v3281_v63 = vadd.f32 %v14743_v0, %v3106_v34  ;;  %v19927_v39 = vld [vmem:[#allocation85_spill] sm:$0xff] }
 0x407   : > { %v14960_v53 = vpop.f32.mrf.mxu1  ;;  %v3117_v13 = vadd.f32 %v14737_v36, %v2954_v59  ;;  %v3139_v11 = vadd.f32 %v14745_v57, %v2968_v51  ;;  %v3295_v36 = vadd.f32 %v14751_v16, %v3128_v52  ;;  %v19919_v57 = vld [vmem:[#allocation79_spill] sm:$0xff]  ;;  %v3316_v16 = vadd.f32 %v19920_v24, %v3161_v28 }
 0x408   : > { %v4586_v29 = vpop.f32.mrf.mxu0  ;;  %v3274_v5 = vadd.f32 %v14739_v62, %v3095_v18  ;;  %v3172_v47 = vadd.f32 %v14757_v43, %v2989_v1  ;;  %v3309_v62 = vadd.f32 %v14759_v41, %v3150_v37  ;;  %v3416_v23 = vadd.f32 %v19919_v57, %v3281_v63  ;;  %v19921_v43 = vld [vmem:[#allocation80_spill] sm:$0xff]  ;;  %v19924_v41 = vld [vmem:[#allocation82_spill] sm:$0xff]  ;;  %v19929_v1 = vld [vmem:[#allocation87_spill] sm:$0xff] }
 0x409   : > { %v14972_v27 = vpop.f32.mrf.mxu1  ;;  %v3288_v49 = vadd.f32 %v14747_v61, %v3117_v13  ;;  %v3302_v56 = vadd.f32 %v14755_v30, %v3139_v11  ;;  %v4864_v61 = vld [vmem:[%s19451_s1 + $0xc8] sm:$0xff]  ;;  %v3432_v59 = vadd.f32 %v19925_v35, %v3295_v36  ;;  %v4587_v52 = vadd.f32 %v4586_v29, %v14897_v15  ;;  %v19930_v63 = vld [vmem:[#allocation88_spill] sm:$0xff]  ;;  %v19931_v37 = vld [vmem:[#allocation89_spill] sm:$0xff] }
 0x40a   : > { %v14977_v40 = vpop.f32.mrf.mxu0  ;;  %v3408_v0 = vadd.f32 %v14761_v21, %v3274_v5  ;;  %v3323_v14 = vadd.f32 %v19921_v43, %v3172_v47  ;;  %v15008_v21 = vsub.f32 %v4905_v12, %v14979_v32  ;;  %v3553_v51 = vadd.f32 %v19926_v31, %v3416_v23  ;;  %v19928_v18 = vld [vmem:[#allocation86_spill] sm:$0xff]  ;;  %v19934_v57 = vld [vmem:[#allocation92_spill] sm:$0xff] }
 0x40b   : > { %v14985_v55 = vpop.f32.mrf.mxu1  ;;  %v3424_v30 = vadd.f32 %v19922_v6, %v3288_v49  ;;  %v3440_v33 = vadd.f32 %v19927_v39, %v3302_v56  ;;  %v3448_v13 = vadd.f32 %v19929_v1, %v3309_v62  ;;  %v4908_v12 = vsel %vm4903_vm0, %v4864_v61, 0  ;;  %v19932_v36 = vld [vmem:[#allocation90_spill] sm:$0xff]  ;;  %v19935_v61 = vld [vmem:[#allocation93_spill] sm:$0xff] }
 0x40c   : > { %v4593_v10 = vpop.f32.mrf.mxu0  ;;  %19923 = vst [vmem:[#allocation79_spill] sm:$0xff] %v15008_v21  ;;  %v3544_v50 = vadd.f32 %v19924_v41, %v3408_v0  ;;  %v3571_v11 = vadd.f32 %v19930_v63, %v3432_v59  ;;  %v3456_v49 = vadd.f32 %v19931_v37, %v3316_v16  ;;  %v19933_v0 = vld [vmem:[#allocation91_spill] sm:$0xff]  ;;  %v19603_v62 = vand.u32 4294901760, %v15008_v21  ;;  %v12811_v35 = vld [vmem:[%s19452_s2 + $0x38] sm:$0xff]  ;;  %v19984_v32 = vld [vmem:[#allocation146_spill] sm:$0xff] }
 0x40d   : > { %v14997_v42 = vpop.f32.mrf.mxu1  ;;  %v3562_v34 = vadd.f32 %v19928_v18, %v3424_v30  ;;  %v3580_v28 = vadd.f32 %v19932_v36, %v3440_v33  ;;  %v3464_v56 = vadd.f32 %v19933_v0, %v3323_v14  ;;  %v3589_v23 = vadd.f32 %v19934_v57, %v3448_v13  ;;  %v15031_v30 = vpop.permute.xlu1 %4818  ;;  %v12812_v59 = vld [vmem:[%s19452_s2 + $0x30] sm:$0xff]  ;;  %v12814_v0 = vld [vmem:[%s19452_s2 + $0x28] sm:$0xff] }
 0x40e   : > { %v15005_v4 = vpop.f32.mrf.mxu0  ;;  %v12914_v15 = vmov 1   ;;  %v3598_v29 = vadd.f32 %v14795_v22, %v3456_v49  ;;  %v3697_v6 = vadd.f32 %v19935_v61, %v3544_v50  ;;  %v3704_v16 = vadd.f32 %v14797_v17, %v3553_v51  ;;  %v19937_v22 = vld [vmem:[#allocation94_spill] sm:$0xff]  ;;  %v19938_v51 = vld [vmem:[#allocation95_spill] sm:$0xff]  ;;  %v19939_v18 = vld [vmem:[#allocation96_spill] sm:$0xff] }
 0x40f   : > { %v15014_v38 = vpop.f32.mrf.mxu1  ;;  %12774 = vset.pattern.permute.xlu0 %v12914_v15  ;;  %12775 = vset.pattern.permute.xlu1 %v12914_v15  ;;  %v15035_v14 = vand.u32 4294901760, %v4908_v12  ;;  %v3607_v50 = vadd.f32 %v19937_v22, %v3464_v56  ;;  %v3711_v17 = vadd.f32 %v14803_v20, %v3562_v34  ;;  %v4594_v31 = vadd.f32 %v4593_v10, %v14905_v60  ;;  %v19941_v34 = vld [vmem:[#allocation100_spill] sm:$0xff]  ;;  %v19944_v56 = vld [vmem:[#allocation102_spill] sm:$0xff]  ;;  %v19947_v15 = vld [vmem:[#allocation97_spill] sm:$0xff] }
 0x410   : > { %v4600_v5 = vpop.f32.mrf.mxu0  ;;  %4900 = vperm.xlu0 %12774, %v12811_v35   ;;  %4896 = vperm.xlu1 %12775, %v12812_v59   ;;  %v15050_v1 = vadd.f32 %v19939_v18, %v3697_v6  ;;  %v3718_v13 = vadd.f32 %v14809_v26, %v3571_v11  ;;  %v4314_v37 = vadd.f32 %v14895_v9, %v14857_v8  ;;  %v4865_v26 = vld [vmem:[%s19451_s1 + $0xd0] sm:$0xff]  ;;  %v19948_v6 = vld [vmem:[#allocation105_spill] sm:$0xff] }
 0x411   : > { %v4713_v47 = vpop.f32.mrf.mxu1  ;;  %19936 = vst [vmem:[#allocation78_spill] sm:$0xff] %v15035_v14  ;;  %v3725_v20 = vadd.f32 %v14815_v48, %v3580_v28  ;;  %v15060_v60 = vadd.f32 %v19941_v34, %v3711_v17  ;;  %v3732_v8 = vadd.f32 %v14821_v54, %v3589_v23  ;;  %v15077_v11 = vsub.f32 %v4908_v12, %v15035_v14  ;;  %v12813_v28 = vld [vmem:[%s19452_s2 + $0x20] sm:$0xff]  ;;  %v19945_v54 = vld [vmem:[#allocation104_spill] sm:$0xff]  ;;  %v19946_v23 = vld [vmem:[#allocation107_spill] sm:$0xff]  ;;  %v15098_v22 = vpop.permute.xlu1 %4813 }
 0x412   : > { %v4714_v24 = vadd.f32 %v4713_v47, %v4587_v52  ;;  %v15025_v43 = vpop.f32.mrf.mxu0  ;;  %v19940_v52 = vld [vmem:[#allocation98_spill] sm:$0xff]  ;;  %v15067_v47 = vsub.f32 %v15008_v21, %v19603_v62  ;;  %v4452_v9 = vadd.f32 %v14913_v45, %v4314_v37  ;;  %v15086_v57 = vadd.f32 %v19944_v56, %v3718_v13  ;;  %v19949_v35 = vld [vmem:[#allocation121_spill] sm:$0xff]  ;;  %v19955_v34 = vld [vmem:[#allocation116_spill] sm:$0xff] }
 0x413   : > { %v15033_v41 = vpop.f32.mrf.mxu1  ;;  %v15054_v63 = vadd.f32 %v19940_v52, %v3704_v16  ;;  %19943 = vst [vmem:[#allocation81_spill] sm:$0xff] %v15077_v11  ;;  %v3739_v45 = vadd.f32 %v19945_v54, %v3598_v29  ;;  %v15094_v16 = vadd.f32 %v19948_v6, %v3725_v20  ;;  %v4322_v59 = vadd.f32 %v14903_v7, %v19949_v35  ;;  %v19951_v29 = vld [vmem:[#allocation108_spill] sm:$0xff]  ;;  %v19953_v52 = vld [vmem:[#allocation114_spill] sm:$0xff]  ;;  %v19956_v56 = vld [vmem:[#allocation113_spill] sm:$0xff] }
 0x414   : > { %v15047_v39 = vadd.f32 %v4714_v24, %v19938_v51  ;;  %v4607_v33 = vpop.f32.mrf.mxu0  ;;  %19942 = vst [vmem:[#allocation80_spill] sm:$0xff] %v15067_v47  ;;  %4888 = vperm.xlu0 %12774, %v12813_v28   ;;  %4892 = vperm.xlu1 %12775, %v12814_v0   ;;  %v3746_v24 = vadd.f32 %v19946_v23, %v3607_v50  ;;  %v15101_v51 = vsel %vm4903_vm0, %v4865_v26, 0  ;;  %v19952_v50 = vld [vmem:[#allocation111_spill] sm:$0xff]  ;;  %v19954_v7 = vld [vmem:[#allocation110_spill] sm:$0xff]  ;;  %v12816_v0 = vld [vmem:[%s19452_s2 + $0x18] sm:$0xff] }
 0x415   : > { %v4720_v49 = vpop.f32.mrf.mxu1  ;;  %v4601_v17 = vadd.f32 %v4600_v5, %v4452_v9  ;;  %19950 = vst [vmem:[#allocation82_spill] sm:$0xff] %v15101_v51  ;;  %v15104_v18 = vadd.f32 %v19951_v29, %v3732_v8  ;;  %v15107_v13 = vadd.f32 %v19952_v50, %v3739_v45  ;;  %v4461_v5 = vadd.f32 %v14921_v58, %v4322_v59  ;;  %v12815_v28 = vld [vmem:[%s19452_s2 + $0x10] sm:$0xff]  ;;  %v19957_v54 = vld [vmem:[#allocation118_spill] sm:$0xff] }
 0x416   : > { %v4721_v10 = vadd.f32 %v4720_v49, %v4594_v31  ;;  %v15062_v36 = vpop.f32.mrf.mxu0  ;;  %v15110_v37 = vadd.f32 %v19953_v52, %v3746_v24  ;;  %v4173_v45 = vadd.f32 %v19957_v54, %v19956_v56  ;;  %v19958_v23 = vld [vmem:[#allocation115_spill] sm:$0xff]  ;;  %v19959_v58 = vld [vmem:[#allocation120_spill] sm:$0xff]  ;;  %v15132_v59 = vand.u32 4294901760, %v15101_v51  ;;  %v19967_v56 = vld [vmem:[#allocation126_spill] sm:$0xff] }
 0x417   : > { %v15074_v48 = vpop.f32.mrf.mxu1  ;;  %v4180_v24 = vadd.f32 %v19959_v58, %v19958_v23  ;;  %v4608_v52 = vadd.f32 %v4607_v33, %v4461_v5  ;;  %v19968_v23 = vld [vmem:[#allocation122_spill] sm:$0xff]  ;;  %v19969_v58 = vld [vmem:[#allocation125_spill] sm:$0xff]  ;;  %v19974_v5 = vld [vmem:[#allocation136_spill] sm:$0xff] }
 0x418   : > { %v15091_v12 = vadd.f32 %v4721_v10, %v19947_v15  ;;  %v4614_v61 = vpop.f32.mrf.mxu0  ;;  %v4166_v10 = vadd.f32 %v19955_v34, %v19954_v7  ;;  %4880 = vperm.xlu0 %12774, %v12815_v28   ;;  %4884 = vperm.xlu1 %12775, %v12816_v0   ;;  %v19960_v15 = vld [vmem:[#allocation124_spill] sm:$0xff]  ;;  %19961 = vst [vmem:[#allocation83_spill] sm:$0xff] %v15132_v59  ;;  %v19964_v7 = vld [vmem:[#allocation99_spill] sm:$0xff]  ;;  %v19973_v33 = vld [vmem:[#allocation133_spill] sm:$0xff] }
 0x419   : > { %v4727_v31 = vpop.f32.mrf.mxu1  ;;  %v4330_v6 = vadd.f32 %v14911_v25, %v19960_v15  ;;  %v19966_v0 = vld [vmem:[#allocation119_spill] sm:$0xff]  ;;  %v4201_v25 = vadd.f32 %v14881_v19, %v19968_v23  ;;  %v12817_v19 = vld [vmem:[%s19452_s2] sm:$0xff] }
 0x41a   : > { %v4616_v49 = vpop.f32.mrf.mxu0  ;;  %v4728_v9 = vadd.f32 %v4727_v31, %v4601_v17  ;;  %v19962_v17 = vld [vmem:[#allocation117_spill] sm:$0xff]  ;;  %v19963_v31 = vld [vmem:[#allocation123_spill] sm:$0xff]  ;;  %v4300_v50 = vadd.f32 %v14885_v2, %v4166_v10  ;;  %v4194_v54 = vadd.f32 %v19967_v56, %v19966_v0  ;;  %v4308_v10 = vadd.f32 %v19973_v33, %v4173_v45  ;;  %v19976_v23 = vld [vmem:[#allocation134_spill] sm:$0xff]  ;;  %v15161_v45 = vpop.permute.xlu0 %4823 }
 0x41b   : > { %v15116_v26 = vpop.f32.mrf.mxu1  ;;  %v4187_v29 = vadd.f32 %v19963_v31, %v19962_v17  ;;  %v19970_v15 = vld [vmem:[#allocation131_spill] sm:$0xff]  ;;  %v4470_v20 = vadd.f32 %v14929_v3, %v4330_v6  ;;  %v19972_v31 = vld [vmem:[#allocation132_spill] sm:$0xff]  ;;  %v19975_v56 = vld [vmem:[#allocation129_spill] sm:$0xff] }
 0x41c   : > { %v4621_v35 = vpop.f32.mrf.mxu0  ;;  %v15138_v34 = vadd.f32 %v4728_v9, %v19964_v7  ;;  %v4208_v62 = vadd.f32 %v19970_v15, %v19969_v58  ;;  %v19971_v17 = vld [vmem:[#allocation127_spill] sm:$0xff]  ;;  %v4436_v9 = vadd.f32 %v19974_v5, %v4300_v50  ;;  %v15151_v7 = vpop.permute.xlu1 %4803  ;;  %4872 = vperm.xlu0 %12774, %v12817_v19   ;;  %v4215_v3 = vadd.f32 %v19976_v23, %v19975_v56  ;;  %v19978_v15 = vld [vmem:[#allocation128_spill] sm:$0xff]  ;;  %v19981_v19 = vld [vmem:[#allocation137_spill] sm:$0xff] }
 0x41d   : > { %v4734_v28 = vpop.f32.mrf.mxu1  ;;  %v4213_v2 = vadd.f32 %v19972_v31, %v19971_v17  ;;  %v19977_v6 = vld [vmem:[#allocation139_spill] sm:$0xff]  ;;  %v19979_v17 = vld [vmem:[#allocation141_spill] sm:$0xff]  ;;  %v4615_v50 = vadd.f32 %v4614_v61, %v4470_v20  ;;  %v4324_v14 = vadd.f32 %v19981_v19, %v4187_v29  ;;  %v19985_v20 = vld [vmem:[#allocation148_spill] sm:$0xff] }
 0x41e   : > { %19965 = vst [vmem:[#allocation84_spill] sm:$0xff] %v15138_v34  ;;  %v4623_v8 = vpop.f32.mrf.mxu0  ;;  %v4735_v21 = vadd.f32 %v4734_v28, %v4608_v52  ;;  %v4332_v58 = vadd.f32 %v19977_v6, %v4194_v54  ;;  %v4338_v31 = vadd.f32 %v19979_v17, %v19978_v15  ;;  %v12818_v52 = vld [vmem:[%s19452_s2 + $0x8] sm:$0xff]  ;;  %v4589_v56 = vadd.f32 %v14977_v40, %v4436_v9  ;;  %v19982_v23 = vld [vmem:[#allocation101_spill] sm:$0xff] }
 0x41f   : > { %v4736_v0 = vpop.f32.mrf.mxu1  ;;  %4876 = vperm.xlu1 %12775, %v12818_v52   ;;  %v19980_v28 = vld [vmem:[#allocation135_spill] sm:$0xff]  ;;  %v19983_v15 = vld [vmem:[#allocation142_spill] sm:$0xff] }
 0x420   : > { %v4628_v33 = vpop.f32.mrf.mxu0  ;;  %v4316_v5 = vadd.f32 %v19980_v28, %v4180_v24  ;;  %v15170_v54 = vadd.f32 %v4735_v21, %v19982_v23  ;;  %v4340_v17 = vadd.f32 %v19983_v15, %v4201_v25  ;;  %v4472_v61 = vadd.f32 %v19984_v32, %v4332_v58  ;;  %v19986_v51 = vld [vmem:[#allocation138_spill] sm:$0xff]  ;;  %v19987_v52 = vld [vmem:[#allocation143_spill] sm:$0xff]  ;;  %v19989_v28 = vld [vmem:[#allocation144_spill] sm:$0xff] }
 0x421   : > { %v4741_v6 = vpop.f32.mrf.mxu1  ;;  %v4479_v47 = vadd.f32 %v19985_v20, %v4338_v31  ;;  %v4445_v59 = vadd.f32 %v19986_v51, %v4308_v10  ;;  %v4463_v34 = vadd.f32 %v19987_v52, %v4324_v14  ;;  %v19988_v24 = vld [vmem:[#allocation130_spill] sm:$0xff]  ;;  %v4716_v40 = vadd.f32 %v15033_v41, %v4589_v56  ;;  %v19990_v15 = vld [vmem:[#allocation103_spill] sm:$0xff]  ;;  %v19991_v58 = vld [vmem:[#allocation140_spill] sm:$0xff]  ;;  %v4794_v14 = vpop.permute.xlu1 %4793 }
 0x422   : > { %v4742_v11 = vadd.f32 %v4741_v6, %v4615_v50  ;;  %v4346_v29 = vadd.f32 %v19989_v28, %v19988_v24  ;;  %v4630_v9 = vpop.f32.mrf.mxu0  ;;  %v4481_v19 = vadd.f32 %v14960_v53, %v4340_v17  ;;  %v4617_v23 = vadd.f32 %v4616_v49, %v4472_v61  ;;  %v19992_v50 = vld [vmem:[#allocation145_spill] sm:$0xff]  ;;  %v19993_v51 = vld [vmem:[#allocation147_spill] sm:$0xff]  ;;  %v4809_v56 = vpop.permute.xlu0 %4808 }
 0x423   : > { %v4743_v21 = vpop.f32.mrf.mxu1  ;;  %v4622_v25 = vadd.f32 %v4621_v35, %v4479_v47  ;;  %v4454_v31 = vadd.f32 %v19991_v58, %v4316_v5  ;;  %v4348_v6 = vadd.f32 %v19992_v50, %v4208_v62  ;;  %v4354_v10 = vadd.f32 %v19993_v51, %v4213_v2 }
 0x424   : > { %v4775_v32 = vadd.f32 %v4742_v11, %v19990_v15  ;;  %v4610_v20 = vadd.f32 %v15062_v36, %v4463_v34  ;;  %v4488_v41 = vadd.f32 %v14972_v27, %v4346_v29  ;;  %v4624_v24 = vadd.f32 %v4623_v8, %v4481_v19  ;;  %v4635_v62 = vpop.f32.mrf.mxu0  ;;  %v19994_v34 = vld [vmem:[#allocation106_spill] sm:$0xff] }
 0x425   : > { %v4748_v52 = vpop.f32.mrf.mxu1  ;;  %v4744_v28 = vadd.f32 %v4743_v21, %v4617_v23  ;;  %v4596_v47 = vadd.f32 %v15005_v4, %v4445_v59  ;;  %v4603_v11 = vadd.f32 %v15025_v43, %v4454_v31  ;;  %v4768_v49 = vadd.f32 %v4716_v40, %v15050_v1  ;;  %v19995_v23 = vld [vmem:[#allocation109_spill] sm:$0xff] }
 0x426   : > { %v4749_v53 = vadd.f32 %v4748_v52, %v4622_v25  ;;  %v4737_v35 = vadd.f32 %v4736_v0, %v4610_v20  ;;  %v4490_v2 = vadd.f32 %v14985_v55, %v4348_v6  ;;  %v15192_v36 = vadd.f32 %v4794_v14, %v15047_v39  ;;  %v19996_v20 = vld [vmem:[#allocation112_spill] sm:$0xff] }
 0x427   : > { %v4750_v5 = vpop.f32.mrf.mxu1  ;;  %v4356_v8 = vadd.f32 %v14953_v44, %v4215_v3  ;;  %v4723_v61 = vadd.f32 %v15074_v48, %v4596_v47  ;;  %v4730_v4 = vadd.f32 %v15116_v26, %v4603_v11  ;;  %v4629_v43 = vadd.f32 %v4628_v33, %v4488_v41  ;;  %v4637_v44 = vpop.f32.mrf.mxu0 }
 0x428   : > { %v4777_v27 = vadd.f32 %v4749_v53, %v19994_v34  ;;  %v4751_v17 = vadd.f32 %v4750_v5, %v4624_v24  ;;  %v4497_v1 = vadd.f32 %v14997_v42, %v4354_v10  ;;  %v4631_v0 = vadd.f32 %v4630_v9, %v4490_v2  ;;  %v4799_v33 = vpop.permute.xlu0 %4798 }
 0x429   : > { %v4755_v59 = vpop.f32.mrf.mxu1  ;;  %v4776_v29 = vadd.f32 %v4744_v28, %v15094_v16  ;;  %v4499_v39 = vadd.f32 %v15014_v38, %v4356_v8  ;;  %v15202_v40 = vadd.f32 %v4794_v14, %v4768_v49  ;;  %v4774_v21 = vadd.f32 %v4737_v35, %v15086_v57 }
 0x42a   : > { %v4778_v55 = vadd.f32 %v4751_v17, %v15104_v18  ;;  %v4756_v3 = vadd.f32 %v4755_v59, %v4629_v43  ;;  %v4847_v26 = vmax.f32 %v15192_v36, 0.0  ;;  %v4636_v19 = vadd.f32 %v4635_v62, %v4497_v1 }
 0x42b   : > { %v4757_v48 = vpop.f32.mrf.mxu1  ;;  %v4770_v16 = vadd.f32 %v4723_v61, %v15054_v63  ;;  %v4772_v18 = vadd.f32 %v4730_v4, %v15060_v60  ;;  %v4841_v38 = vadd.f32 %v15031_v30, %v4777_v27  ;;  %v4840_v57 = vadd.f32 %v15098_v22, %v4776_v29 }
 0x42c   : > { %v4842_v42 = vadd.f32 %v15031_v30, %v4778_v55  ;;  %v4758_v9 = vadd.f32 %v4757_v48, %v4631_v0  ;;  %v4779_v25 = vadd.f32 %v4756_v3, %v19995_v23  ;;  %v4638_v58 = vadd.f32 %v4637_v44, %v4499_v39 }
 0x42d   : > { %v4762_v15 = vpop.f32.mrf.mxu1  ;;  %v15214_v6 = vadd.f32 %v4799_v33, %v15091_v12  ;;  %v4838_v51 = vadd.f32 %v4809_v56, %v4774_v21  ;;  %v4839_v10 = vadd.f32 %v15098_v22, %v4775_v32  ;;  %v4836_v24 = vadd.f32 %v15151_v7, %v4772_v18  ;;  %v19997_v32 = vld [vmem:[#allocation84_spill] sm:$0xff] }
 0x42e   : > { %v4780_v31 = vadd.f32 %v4758_v9, %v15107_v13  ;;  %v4763_v50 = vadd.f32 %v4762_v15, %v4636_v19  ;;  %v4843_v63 = vadd.f32 %v15161_v45, %v4779_v25  ;;  %v4858_v14 = vmax.f32 %v4842_v42, 0.0 }
 0x42f   : > { %v4764_v60 = vpop.f32.mrf.mxu1  ;;  %v4837_v13 = vadd.f32 %v4809_v56, %v15170_v54  ;;  %v4857_v28 = vmax.f32 %v4841_v38, 0.0  ;;  %v4856_v12 = vmax.f32 %v4840_v57, 0.0  ;;  %v4835_v49 = vadd.f32 %v15151_v7, %v19997_v32 }
 0x430   : > { %v4844_v30 = vadd.f32 %v15161_v45, %v4780_v31  ;;  %v4781_v52 = vadd.f32 %v4763_v50, %v19996_v20  ;;  %v4765_v41 = vadd.f32 %v4764_v60, %v4638_v58  ;;  %v4859_v53 = vmax.f32 %v4843_v63, 0.0 }
 0x431   : > { %v4854_v35 = vmax.f32 %v4838_v51, 0.0  ;;  %v4855_v45 = vmax.f32 %v4839_v10, 0.0  ;;  %v15231_v54 = vand.u32 4294901760, %v4858_v14  ;;  %v4834_v56 = vadd.f32 %v4799_v33, %v4770_v16 }
 0x432   : > { %v4860_v47 = vmax.f32 %v4844_v30, 0.0  ;;  %v4845_v11 = vadd.f32 %v14995_v46, %v4781_v52  ;;  %v4782_v22 = vadd.f32 %v4765_v41, %v15110_v37  ;;  %v15226_v62 = vand.u32 4294901760, %v4859_v53 }
 0x433   : > { %v4852_v27 = vmax.f32 %v4836_v24, 0.0  ;;  %v4853_v17 = vmax.f32 %v4837_v13, 0.0  ;;  %v15233_v8 = vand.u32 4294901760, %v4857_v28  ;;  %v15237_v7 = vand.u32 4294901760, %v4856_v12 }
 0x434   : > { %v4861_v5 = vmax.f32 %v4845_v11, 0.0  ;;  %v4846_v2 = vadd.f32 %v14995_v46, %v4782_v22  ;;  %v15229_v34 = vand.u32 4294901760, %v4860_v47  ;;  %v4849_v43 = vmax.f32 %v15214_v6, 0.0 }
 0x435   : > { %v4851_v46 = vmax.f32 %v4835_v49, 0.0  ;;  %v15243_v59 = vand.u32 4294901760, %v4855_v45  ;;  %v15246_v1 = vsub.f32 %v4859_v53, %v15226_v62  ;;  %v15253_v55 = vand.u32 4294901760, %v4854_v35  ;;  %v4866_v53 = vld [vmem:[%s19451_s1 + $0xd8] sm:$0xff] }
 0x436   : > { %v15235_v37 = vand.u32 4294901760, %v4861_v5  ;;  %v4862_v61 = vmax.f32 %v4846_v2, 0.0  ;;  %v15240_v4 = vsub.f32 %v4860_v47, %v15229_v34  ;;  %v15256_v39 = vsub.f32 %v4858_v14, %v15231_v54 }
 0x437   : > { %v4850_v21 = vmax.f32 %v4834_v56, 0.0  ;;  %v15258_v44 = vand.u32 4294901760, %v4853_v17  ;;  %v15261_v3 = vsub.f32 %v4857_v28, %v15233_v8  ;;  %v15263_v48 = vand.u32 4294901760, %v4852_v27 }
 0x438   : > { %v15249_v0 = vsub.f32 %v4861_v5, %v15235_v37  ;;  %v15251_v29 = vand.u32 4294901760, %v4862_v61  ;;  %v5127_v42 = vand.u32 4294901760, %v15240_v4  ;;  %v15272_v9 = vsub.f32 %v4856_v12, %v15237_v7 }
 0x439   : > { %v4848_v16 = vmax.f32 %v15202_v40, 0.0  ;;  %v15275_v18 = vand.u32 4294901760, %v4849_v43  ;;  %v15278_v38 = vsub.f32 %v4855_v45, %v15243_v59  ;;  %v5133_v23 = vand.u32 4294901760, %v15246_v1 }
 0x43a   : > { %4945 = vmatprep.subr.mxu0 %v15251_v29  ;;  %v15267_v33 = vsub.f32 %v4862_v61, %v15251_v29  ;;  %v5121_v19 = vand.u32 4294901760, %v15249_v0  ;;  %v15282_v25 = vand.u32 4294901760, %v4851_v46  ;;  %v5139_v57 = vand.u32 4294901760, %v15256_v39 }
 0x43b   : > { %4947 = vmatpush1.msra.mxu0 %v15235_v37  ;;  %v15288_v58 = vsub.f32 %v4854_v35, %v15253_v55  ;;  %v15290_v40 = vand.u32 4294901760, %v4850_v21  ;;  %v15293_v31 = vsub.f32 %v4853_v17, %v15258_v44  ;;  %v5145_v6 = vand.u32 4294901760, %v15261_v3 }
 0x43c   : > { %4949 = vmatprep.subr.mxu0 %v15229_v34  ;;  %v5115_v15 = vand.u32 4294901760, %v15267_v33  ;;  %v5122_v50 = vsub.f32 %v15249_v0, %v5121_v19  ;;  %v5128_v10 = vsub.f32 %v15240_v4, %v5127_v42  ;;  %v5151_v63 = vand.u32 4294901760, %v15272_v9 }
 0x43d   : > { %4951 = vmatpush1.msra.mxu0 %v15226_v62  ;;  %v15309_v60 = vsub.f32 %v4852_v27, %v15263_v48  ;;  %v15311_v14 = vand.u32 4294901760, %v4848_v16  ;;  %v15315_v30 = vand.u32 4294901760, %v4847_v26  ;;  %v5134_v20 = vsub.f32 %v15246_v1, %v5133_v23 }
 0x43e   : > { %4953 = vmatprep.subr.mxu0 %v15231_v54  ;;  %v5116_v51 = vsub.f32 %v15267_v33, %v5115_v15  ;;  %v19619_v52 = vand.u32 4294901760, %v15278_v38  ;;  %v15323_v41 = vsub.f32 %v4851_v46, %v15282_v25  ;;  %v5140_v13 = vsub.f32 %v15256_v39, %v5139_v57  ;;  %v19998_v46 = vld [vmem:[#allocation83_spill] sm:$0xff] }
 0x43f   : > { %4955 = vmatpush1.msra.mxu0 %v15233_v8  ;;  %v19617_v28 = vand.u32 4294901760, %v15288_v58  ;;  %v15334_v12 = vsub.f32 %v4850_v21, %v15290_v40  ;;  %v5123_v47 = vand.u32 4294901760, %v5122_v50  ;;  %v5146_v11 = vsub.f32 %v15261_v3, %v5145_v6  ;;  %v19999_v21 = vld [vmem:[#allocation82_spill] sm:$0xff] }
 0x440   : > { %4957 = vmatprep.subr.mxu0 %v15237_v7  ;;  %v5117_v24 = vand.u32 4294901760, %v5116_v51  ;;  %v19616_v22 = vand.u32 4294901760, %v15293_v31  ;;  %v15342_v32 = vsub.f32 %v4849_v43, %v15275_v18  ;;  %v5129_v49 = vand.u32 4294901760, %v5128_v10 }
 0x441   : > { %4959 = vmatpush1.msra.mxu0 %v15243_v59  ;;  %v5152_v35 = vsub.f32 %v15272_v9, %v5151_v63  ;;  %v19615_v45 = vand.u32 4294901760, %v15309_v60  ;;  %v15350_v5 = vsub.f32 %v4848_v16, %v15311_v14  ;;  %v5135_v2 = vand.u32 4294901760, %v5134_v20 }
 0x442   : > { %4961 = vmatprep.subr.mxu0 %v15253_v55  ;;  %5118 = vmatprep.subr.mxu1 %v5117_v24  ;;  %v5158_v56 = vsub.f32 %v15278_v38, %v19619_v52  ;;  %v4914_v27 = vsel %vm4903_vm0, %v4866_v53, 0  ;;  %v5141_v17 = vand.u32 4294901760, %v5140_v13  ;;  %v5164_v61 = vsub.f32 %v15288_v58, %v19617_v28  ;;  %v4867_v53 = vld [vmem:[%s19451_s1 + $0xe0] sm:$0xff] }
 0x443   : > { %4963 = vmatpush1.msra.mxu0 %v15258_v44  ;;  %5124 = vmatpush1.msra.mxu1 %v5123_v47  ;;  %v19618_v43 = vand.u32 4294901760, %v15323_v41  ;;  %v15364_v16 = vsub.f32 %v19999_v21, %v19998_v46  ;;  %v15369_v50 = vsub.f32 %v4847_v26, %v15315_v30  ;;  %v5147_v51 = vand.u32 4294901760, %v5146_v11  ;;  %v20000_v11 = vld [vmem:[#allocation81_spill] sm:$0xff] }
 0x444   : > { %4965 = vmatprep.subr.mxu0 %v15263_v48  ;;  %5130 = vmatprep.subr.mxu1 %v5129_v49  ;;  %v5170_v10 = vsub.f32 %v15293_v31, %v19616_v22  ;;  %v5187_v20 = vand.u32 4294901760, %v15334_v12  ;;  %v5193_v24 = vand.u32 4294901760, %v15342_v32  ;;  %v5153_v13 = vand.u32 4294901760, %v5152_v35 }
 0x445   : > { %4967 = vmatpush1.msra.mxu0 %v15282_v25  ;;  %5136 = vmatpush1.msra.mxu1 %v5135_v2  ;;  %v5176_v36 = vsub.f32 %v15309_v60, %v19615_v45  ;;  %v15381_v26 = vand.u32 4294901760, %v4914_v27  ;;  %v5159_v47 = vand.u32 4294901760, %v5158_v56  ;;  %v20001_v49 = vand.u32 4294901760, %v20000_v11 }
 0x446   : > { %4969 = vmatprep.subr.mxu0 %v15290_v40  ;;  %5142 = vmatprep.subr.mxu1 %v5141_v17  ;;  %v19621_v35 = vand.u32 4294901760, %v15350_v5  ;;  %v5165_v17 = vand.u32 4294901760, %v5164_v61  ;;  %v5182_v21 = vsub.f32 %v15323_v41, %v19618_v43  ;;  %v19620_v45 = vand.u32 4294901760, %v15364_v16 }
 0x447   : > { %4971 = vmatpush1.msra.mxu0 %v15275_v18  ;;  %5148 = vmatpush1.msra.mxu1 %v5147_v51  ;;  %v5023_v2 = vsub.f32 %v20000_v11, %v20001_v49  ;;  %v19622_v22 = vand.u32 4294901760, %v15369_v50  ;;  %v5171_v56 = vand.u32 4294901760, %v5170_v10  ;;  %v5188_v51 = vsub.f32 %v15334_v12, %v5187_v20  ;;  %v4868_v10 = vld [vmem:[%s19451_s1 + $0xe8] sm:$0xff] }
 0x448   : > { %4973 = vmatprep.subr.mxu0 %v15311_v14  ;;  %5154 = vmatprep.subr.mxu1 %v5153_v13  ;;  %v4917_v49 = vsel %vm4903_vm0, %v4867_v53, 0  ;;  %v20002_v13 = vld [vmem:[#allocation80_spill] sm:$0xff]  ;;  %v5177_v28 = vand.u32 4294901760, %v5176_v36  ;;  %v5194_v43 = vsub.f32 %v15342_v32, %v5193_v24  ;;  %v15408_v52 = vsub.f32 %v4914_v27, %v15381_v26 }
 0x449   : > { %4975 = vmatpush1.msra.mxu0 %v15315_v30  ;;  %5160 = vmatpush1.msra.mxu1 %v5159_v47  ;;  %v20003_v61 = vand.u32 4294901760, %v20002_v13  ;;  %v5024_v53 = vand.u32 4294901760, %v5023_v2  ;;  %v5200_v47 = vsub.f32 %v15350_v5, %v19621_v35  ;;  %v5183_v36 = vand.u32 4294901760, %v5182_v21 }
 0x44a   : > { %5166 = vmatprep.subr.mxu1 %v5165_v17  ;;  %5316 = vmatprep.subr.mxu0 %v15267_v33  ;;  %v5034_v27 = vsub.f32 %v15364_v16, %v19620_v45  ;;  %v15421_v17 = vand.u32 4294901760, %v4917_v49  ;;  %v20004_v13 = vmov 0.0   ;;  %v5206_v2 = vsub.f32 %v15369_v50, %v19622_v22  ;;  %v4869_v45 = vld [vmem:[%s19451_s1 + $0xf0] sm:$0xff] }
 0x44b   : > { %5014 = vmatmul.mubr.f32.vlgmr.msra.gmra.mxu0 %v20003_v61  ;;  %5172 = vmatpush1.msra.mxu1 %v5171_v56  ;;  %v5189_v56 = vand.u32 4294901760, %v5188_v51  ;;  %v4920_v61 = vsel %vm4903_vm0, %v4868_v10, 0  ;;  %v19624_v21 = vand.u32 4294901760, %v15408_v52  ;;  %v5201_v35 = vand.u32 4294901760, %v5200_v47 }
 0x44c   : > { %5319 = vmatpush1.msra.mxu0 %v15249_v0  ;;  %5178 = vmatprep.subr.mxu1 %v5177_v28  ;;  %v5195_v28 = vand.u32 4294901760, %v5194_v43  ;;  %v5035_v51 = vand.u32 4294901760, %v5034_v27  ;;  %v15436_v22 = vsub.f32 %v4917_v49, %v15421_v17  ;;  %v15438_v10 = vand.u32 4294901760, %v4920_v61  ;;  %v4870_v49 = vld [vmem:[%s19451_s1 + $0xf8] sm:$0xff] }
 0x44d   : > { %5322 = vmatprep.subr.mxu0 %v15240_v4  ;;  %5019 = vmatprep.mubr.f32.mxu0 %v20004_v13  ;;  %v5207_v43 = vand.u32 4294901760, %v5206_v2  ;;  %v20008_v4 = vand.u32 4294901760, %v15278_v38 }
 0x44e   : > { %5184 = vmatpush1.msra.mxu1 %v5183_v36  ;;  %5325 = vmatpush1.msra.mxu0 %v15246_v1  ;;  %v4923_v36 = vsel %vm4903_vm0, %v4869_v45, 0  ;;  %v19623_v45 = vand.u32 4294901760, %v15436_v22  ;;  %v15454_v47 = vsub.f32 %v4920_v61, %v15438_v10  ;;  %v20009_v1 = vand.u32 4294901760, %v15288_v58 }
 0x44f   : > { %5025 = vmatmul.mubr.f32.gmra.mxu0 %v5024_v53  ;;  %5190 = vmatprep.subr.mxu1 %v5189_v56  ;;  %v5045_v53 = vsub.f32 %v15408_v52, %v19624_v21  ;;  %v15456_v27 = vand.u32 4294901760, %v4923_v36  ;;  %v4926_v56 = vsel %vm4903_vm0, %v4870_v49, 0 }
 0x450   : > { %5328 = vmatprep.subr.mxu0 %v15256_v39  ;;  %5196 = vmatpush1.msra.mxu1 %v5195_v28  ;;  %v5056_v61 = vsub.f32 %v15436_v22, %v19623_v45  ;;  %v5066_v28 = vand.u32 4294901760, %v15454_v47  ;;  %v20012_v39 = vand.u32 4294901760, %v15309_v60 }
 0x451   : > { %5331 = vmatpush1.msra.mxu0 %v15261_v3  ;;  %5202 = vmatprep.subr.mxu1 %v5201_v35  ;;  %v20005_v35 = vld [vmem:[#allocation149_spill] sm:$0xff]  ;;  %v5046_v2 = vand.u32 4294901760, %v5045_v53  ;;  %v20006_v53 = vld [vmem:[#allocation78_spill] sm:$0xff]  ;;  %v20013_v3 = vand.u32 4294901760, %v15323_v41 }
 0x452   : > { %5334 = vmatprep.subr.mxu0 %v15272_v9  ;;  %5030 = vmatprep.mubr.f32.mxu0 %v20004_v13  ;;  %v5057_v49 = vand.u32 4294901760, %v5056_v61 }
 0x453   : > { %5208 = vmatpush1.msra.mxu1 %v5207_v43  ;;  %5337 = vmatpush1.msra.mxu0 %v15278_v38  ;;  %v15474_v43 = vand.u32 4294901760, %v4926_v56 }
 0x454   : > { %5036 = vmatmul.mubr.f32.gmra.mxu0 %v5035_v51  ;;  %5243 = vmatmul.mubr.f32.vlgmr.msra.gmra.mxu1 %v20005_v35  ;;  %v15472_v51 = vsub.f32 %v4923_v36, %v15456_v27  ;;  %v5067_v36 = vsub.f32 %v15454_v47, %v5066_v28 }
 0x455   : > { %5340 = vmatprep.subr.mxu0 %v15288_v58  ;;  %5476 = vmatprep.subr.mxu1 %v15251_v29  ;;  %v15488_v21 = vsub.f32 %v4926_v56, %v15474_v43 }
 0x456   : > { %5343 = vmatpush1.msra.mxu0 %v15293_v31  ;;  %5478 = vmatpush1.msra.mxu1 %v15235_v37  ;;  %v5077_v45 = vand.u32 4294901760, %v15472_v51 }
 0x457   : > { %5346 = vmatprep.subr.mxu0 %v15309_v60  ;;  %5480 = vmatprep.subr.mxu1 %v15229_v34  ;;  %v5088_v61 = vand.u32 4294901760, %v15488_v21 }
 0x458   : > { %5041 = vmatprep.mubr.f32.mxu0 %v20004_v13  ;;  %5248 = vmatprep.mubr.f32.mxu1 %v20004_v13  ;;  %v5078_v56 = vsub.f32 %v15472_v51, %v5077_v45 }
 0x459   : > { %5349 = vmatpush1.msra.mxu0 %v15323_v41  ;;  %5482 = vmatpush1.msra.mxu1 %v15226_v62 }
 0x45a   : > { %5047 = vmatmul.mubr.f32.gmra.mxu0 %v5046_v2  ;;  %5250 = vmatmul.mubr.f32.gmra.mxu1 %v20006_v53  ;;  %v5068_v2 = vand.u32 4294901760, %v5067_v36  ;;  %v5089_v36 = vsub.f32 %v15488_v21, %v5088_v61 }
 0x45b   : > { %5352 = vmatprep.subr.mxu0 %v15334_v12  ;;  %5484 = vmatprep.subr.mxu1 %v15231_v54 }
 0x45c   : > { %5355 = vmatpush1.msra.mxu0 %v15342_v32  ;;  %5486 = vmatpush1.msra.mxu1 %v15233_v8  ;;  %v5090_v33 = vand.u32 4294901760, %v5089_v36 }
 0x45d   : > { %5358 = vmatprep.subr.mxu0 %v15350_v5  ;;  %5488 = vmatprep.subr.mxu1 %v15237_v7 }
 0x45e   : > { %5052 = vmatprep.mubr.f32.mxu0 %v20004_v13  ;;  %5255 = vmatprep.mubr.f32.mxu1 %v20004_v13 }
 0x45f   : > { %5361 = vmatpush1.msra.mxu0 %v15369_v50  ;;  %5490 = vmatpush1.msra.mxu1 %v15243_v59 }
 0x460   : > { %5058 = vmatmul.mubr.f32.gmra.mxu0 %v5057_v49  ;;  %5257 = vmatmul.mubr.f32.gmra.mxu1 %v19998_v46  ;;  %v5079_v49 = vand.u32 4294901760, %v5078_v56 }
 0x461   : > { %5492 = vmatprep.subr.mxu1 %v15253_v55  ;;  %5631 = vmatprep.subr.mxu0 %v5115_v15  ;;  %v20007_v15 = vld [vmem:[#allocation79_spill] sm:$0xff] }
 0x462   : > { %5494 = vmatpush1.msra.mxu1 %v15258_v44  ;;  %5063 = vmatprep.mubr.f32.mxu0 %v20004_v13  ;;  %v20010_v0 = vand.u32 4294901760, %v20007_v15 }
 0x463   : > { %5496 = vmatprep.subr.mxu1 %v15263_v48  ;;  %5262 = vmatprep.mubr.f32.mxu1 %v20004_v13 }
 0x464   : > { %5498 = vmatpush1.msra.mxu1 %v15282_v25  ;;  %5069 = vmatmul.mubr.f32.gmra.mxu0 %v5068_v2 }
 0x465   : > { %5264 = vmatmul.mubr.f32.gmra.mxu1 %v15381_v26  ;;  %5500 = vmatprep.subr.mxu1 %v15290_v40 }
 0x466   : > { %5502 = vmatpush1.msra.mxu1 %v15275_v18  ;;  %5074 = vmatprep.mubr.f32.mxu0 %v20004_v13 }
 0x467   : > { %5504 = vmatprep.subr.mxu1 %v15311_v14  ;;  %5269 = vmatprep.mubr.f32.mxu1 %v20004_v13 }
 0x468   : > { %5506 = vmatpush1.msra.mxu1 %v15315_v30  ;;  %5080 = vmatmul.mubr.f32.gmra.mxu0 %v5079_v49 }
 0x469   : > { %5271 = vmatmul.mubr.f32.gmra.mxu1 %v15421_v17  ;;  %5798 = vmatprep.subr.mxu1 %v15251_v29  ;;  %v20011_v29 = vand.u32 4294901760, %v15293_v31 }
 0x46a   : > { %5085 = vmatprep.mubr.f32.mxu0 %v20004_v13  ;;  %5276 = vmatprep.mubr.f32.mxu1 %v20004_v13 }
 0x46c   : > { %5091 = vmatmul.mubr.f32.gmra.mxu0 %v5090_v33 }
 0x46d   : > { %5278 = vmatmul.mubr.f32.gmra.mxu1 %v15438_v10  ;;  %5394 = vmatprep.mubr.f32.mxu0 %v20004_v13 }
 0x46e   : > { %5283 = vmatprep.mubr.f32.mxu1 %v20004_v13 }
 0x470   : > { %5397 = vmatmul.mubr.f32.vlgmr.msra.gmra.mxu0 %v20007_v15 }
 0x471   : > { %5285 = vmatmul.mubr.f32.gmra.mxu1 %v15456_v27  ;;  %5635 = vmatpush1.msra.mxu0 %v5121_v19 }
 0x472   : > { %5639 = vmatprep.subr.mxu0 %v5127_v42  ;;  %5290 = vmatprep.mubr.f32.mxu1 %v20004_v13 }
 0x473   : > { %5643 = vmatpush1.msra.mxu0 %v5133_v23  ;;  %5402 = vmatprep.mubr.f32.mxu0 %v20004_v13 }
 0x474   : > { %5647 = vmatprep.subr.mxu0 %v5139_v57  ;;  %5405 = vmatmul.mubr.f32.gmra.mxu0 %v20000_v11 }
 0x475   : > { %5292 = vmatmul.mubr.f32.gmra.mxu1 %v15474_v43  ;;  %5651 = vmatpush1.msra.mxu0 %v5145_v6 }
 0x476   : > { %5655 = vmatprep.subr.mxu0 %v5151_v63  ;;  %5410 = vmatprep.mubr.f32.mxu0 %v20004_v13 }
 0x477   : > { %5659 = vmatpush1.msra.mxu0 %v20008_v4  ;;  %5539 = vmatprep.mubr.f32.mxu1 %v20004_v13 }
 0x478   : > { %5663 = vmatprep.subr.mxu0 %v20009_v1  ;;  %5413 = vmatmul.mubr.f32.gmra.mxu0 %v15364_v16 }
 0x479   : > { %5543 = vmatmul.mubr.f32.vlgmr.msra.gmra.mxu1 %v20010_v0  ;;  %5667 = vmatpush1.msra.mxu0 %v20011_v29 }
 0x47a   : > { %5800 = vmatpush1.msra.mxu1 %v15235_v37  ;;  %5671 = vmatprep.subr.mxu0 %v20012_v39  ;;  %v20014_v37 = vand.u32 4294901760, %v20000_v11 }
 0x47b   : > { %5802 = vmatprep.subr.mxu1 %v15229_v34  ;;  %5675 = vmatpush1.msra.mxu0 %v20013_v3  ;;  %v20016_v34 = vand.u32 4294901760, %v15369_v50 }
 0x47c   : > { %5804 = vmatpush1.msra.mxu1 %v15226_v62  ;;  %5418 = vmatprep.mubr.f32.mxu0 %v20004_v13  ;;  %v20015_v62 = vand.u32 4294901760, %v15350_v5 }
 0x47d   : > { %5548 = vmatprep.mubr.f32.mxu1 %v20004_v13  ;;  %5679 = vmatprep.subr.mxu0 %v5187_v20 }
 0x47e   : > { %5806 = vmatprep.subr.mxu1 %v15231_v54  ;;  %5421 = vmatmul.mubr.f32.gmra.mxu0 %v15408_v52  ;;  %v20017_v54 = vand.u32 4294901760, %v15364_v16 }
 0x47f   : > { %5552 = vmatmul.mubr.f32.gmra.mxu1 %v20014_v37  ;;  %5683 = vmatpush1.msra.mxu0 %v5193_v24 }
 0x480   : > { %5808 = vmatpush1.msra.mxu1 %v15233_v8  ;;  %5687 = vmatprep.subr.mxu0 %v20015_v62  ;;  %v20018_v8 = vand.u32 4294901760, %v15408_v52 }
 0x481   : > { %5810 = vmatprep.subr.mxu1 %v15237_v7  ;;  %5691 = vmatpush1.msra.mxu0 %v20016_v34  ;;  %v20019_v7 = vand.u32 4294901760, %v15436_v22 }
 0x482   : > { %5812 = vmatpush1.msra.mxu1 %v15243_v59  ;;  %5426 = vmatprep.mubr.f32.mxu0 %v20004_v13 }
 0x483   : > { %5557 = vmatprep.mubr.f32.mxu1 %v20004_v13  ;;  %5814 = vmatprep.subr.mxu1 %v15253_v55 }
 0x484   : > { %5429 = vmatmul.mubr.f32.gmra.mxu0 %v15436_v22  ;;  %5561 = vmatmul.mubr.f32.gmra.mxu1 %v20017_v54 }
 0x485   : > { %5816 = vmatpush1.msra.mxu1 %v15258_v44  ;;  %5434 = vmatprep.mubr.f32.mxu0 %v20004_v13 }
 0x486   : > { %5818 = vmatprep.subr.mxu1 %v15263_v48  ;;  %5566 = vmatprep.mubr.f32.mxu1 %v20004_v13 }
 0x487   : > { %5820 = vmatpush1.msra.mxu1 %v15282_v25 }
 0x488   : > { %5822 = vmatprep.subr.mxu1 %v15290_v40  ;;  %5437 = vmatmul.mubr.f32.gmra.mxu0 %v15454_v47 }
 0x489   : > { %5570 = vmatmul.mubr.f32.gmra.mxu1 %v20018_v8  ;;  %5442 = vmatprep.mubr.f32.mxu0 %v20004_v13 }
 0x48a   : > { %5824 = vmatpush1.msra.mxu1 %v15275_v18  ;;  %5575 = vmatprep.mubr.f32.mxu1 %v20004_v13 }
 0x48b   : > { %5826 = vmatprep.subr.mxu1 %v15311_v14  ;;  %v15647_v59 = vpop.permute.xlu0 %4900  ;;  %v15649_v55 = vpop.permute.xlu1 %4896 }
 0x48c   : > { %5828 = vmatpush1.msra.mxu1 %v15315_v30  ;;  %5445 = vmatmul.mubr.f32.gmra.mxu0 %v15472_v51 }
 0x48d   : > { %5579 = vmatmul.mubr.f32.gmra.mxu1 %v20019_v7  ;;  %5450 = vmatprep.mubr.f32.mxu0 %v20004_v13 }
 0x48e   : > { %5584 = vmatprep.mubr.f32.mxu1 %v20004_v13 }
 0x48f   : > { %v15651_v44 = vpop.permute.xlu0 %4888  ;;  %v15653_v48 = vpop.permute.xlu1 %4892 }
 0x490   : > { %5453 = vmatmul.mubr.f32.gmra.mxu0 %v15488_v21 }
 0x491   : > { %5588 = vmatmul.mubr.f32.gmra.mxu1 %v5066_v28  ;;  %5724 = vmatprep.mubr.f32.mxu0 %v20004_v13 }
 0x492   : > { %5593 = vmatprep.mubr.f32.mxu1 %v20004_v13 }
 0x493   : > { %v15655_v19 = vpop.permute.xlu0 %4880  ;;  %v15659_v18 = vpop.permute.xlu1 %4884 }
 0x494   : > { %5726 = vmatmul.mubr.f32.vlgmr.msra.gmra.mxu0 %v20005_v35 }
 0x495   : > { %5597 = vmatmul.mubr.f32.gmra.mxu1 %v5077_v45  ;;  %5731 = vmatprep.mubr.f32.mxu0 %v20004_v13 }
 0x496   : > { %5602 = vmatprep.mubr.f32.mxu1 %v20004_v13 }
 0x497   : > { %v15661_v38 = vpop.permute.xlu0 %4872 }
 0x498   : > { %5733 = vmatmul.mubr.f32.gmra.mxu0 %v20006_v53 }
 0x499   : > { %5606 = vmatmul.mubr.f32.gmra.mxu1 %v5088_v61  ;;  %5738 = vmatprep.mubr.f32.mxu0 %v20004_v13 }
 0x49a   : > { %5861 = vmatprep.mubr.f32.mxu1 %v20004_v13  ;;  %v15666_v58 = vpop.permute.xlu1 %4876 }
 0x49c   : > { %5740 = vmatmul.mubr.f32.gmra.mxu0 %v19998_v46 }
 0x49d   : > { %5863 = vmatmul.mubr.f32.vlgmr.msra.gmra.mxu1 %v20005_v35  ;;  %5745 = vmatprep.mubr.f32.mxu0 %v20004_v13 }
 0x49e   : > { %5868 = vmatprep.mubr.f32.mxu1 %v20004_v13 }
 0x4a0   : > { %5747 = vmatmul.mubr.f32.gmra.mxu0 %v15381_v26 }
 0x4a1   : > { %5870 = vmatmul.mubr.f32.gmra.mxu1 %v20006_v53  ;;  %5752 = vmatprep.mubr.f32.mxu0 %v20004_v13 }
 0x4a2   : > { %5875 = vmatprep.mubr.f32.mxu1 %v20004_v13 }
 0x4a4   : > { %5754 = vmatmul.mubr.f32.gmra.mxu0 %v15421_v17 }
 0x4a5   : > { %5877 = vmatmul.mubr.f32.gmra.mxu1 %v19998_v46  ;;  %5759 = vmatprep.mubr.f32.mxu0 %v20004_v13 }
 0x4a6   : > { %5882 = vmatprep.mubr.f32.mxu1 %v20004_v13 }
 0x4a8   : > { %5761 = vmatmul.mubr.f32.gmra.mxu0 %v15438_v10 }
 0x4a9   : > { %5884 = vmatmul.mubr.f32.gmra.mxu1 %v15381_v26  ;;  %5766 = vmatprep.mubr.f32.mxu0 %v20004_v13 }
 0x4aa   : > { %5889 = vmatprep.mubr.f32.mxu1 %v20004_v13 }
 0x4ac   : > { %5768 = vmatmul.mubr.f32.gmra.mxu0 %v15456_v27 }
 0x4ad   : > { %5891 = vmatmul.mubr.f32.gmra.mxu1 %v15421_v17  ;;  %5773 = vmatprep.mubr.f32.mxu0 %v20004_v13 }
 0x4ae   : > { %5896 = vmatprep.mubr.f32.mxu1 %v20004_v13 }
 0x4b0   : > { %5775 = vmatmul.mubr.f32.gmra.mxu0 %v15474_v43 }
 0x4b1   : > { %5898 = vmatmul.mubr.f32.gmra.mxu1 %v15438_v10  ;;  %6078 = vmatprep.mubr.f32.mxu0 %v20004_v13 }
 0x4b2   : > { %5903 = vmatprep.mubr.f32.mxu1 %v20004_v13 }
 0x4b5   : > { %5905 = vmatmul.mubr.f32.gmra.mxu1 %v15456_v27 }
 0x4b6   : > { %5910 = vmatprep.mubr.f32.mxu1 %v20004_v13 }
 0x4b9   : > { %5912 = vmatmul.mubr.f32.gmra.mxu1 %v15474_v43 }
 0x4ba   : > { %6311 = vmatprep.mubr.f32.mxu1 %v20004_v13 }
 0x50b   : > { %v5015_v42 = vpop.f32.mrf.mxu0 }
 0x50c   : > { %v5016_v25 = vadd.f32 %v5015_v42, %v15661_v38 }
 0x50d   : > { %v15657_v9 = vpop.f32.mrf.mxu0 }
 0x50f   : > { %v5026_v23 = vpop.f32.mrf.mxu0 }
 0x510   : > { %v5027_v14 = vadd.f32 %v5026_v23, %v15666_v58 }
 0x511   : > { %v15664_v57 = vpop.f32.mrf.mxu0 }
 0x514   : > { %v5037_v40 = vpop.f32.mrf.mxu0  ;;  %v5244_v31 = vpop.f32.mrf.mxu1 }
 0x515   : > { %v5245_v6 = vadd.f32 %v5244_v31, %v5016_v25  ;;  %v5038_v32 = vadd.f32 %v5037_v40, %v15655_v19 }
 0x516   : > { %v15668_v63 = vpop.f32.mrf.mxu0  ;;  %v15670_v60 = vpop.f32.mrf.mxu1 }
 0x51a   : > { %v5048_v30 = vpop.f32.mrf.mxu0  ;;  %v5251_v52 = vpop.f32.mrf.mxu1 }
 0x51b   : > { %v5252_v41 = vadd.f32 %v5251_v52, %v5027_v14  ;;  %v5049_v50 = vadd.f32 %v5048_v30, %v15659_v18 }
 0x51c   : > { %v15673_v12 = vpop.f32.mrf.mxu0  ;;  %v15675_v22 = vpop.f32.mrf.mxu1 }
 0x520   : > { %v5059_v5 = vpop.f32.mrf.mxu0  ;;  %v5258_v46 = vpop.f32.mrf.mxu1 }
 0x521   : > { %v15678_v16 = vadd.f32 %v5258_v46, %v5038_v32  ;;  %v5060_v17 = vadd.f32 %v5059_v5, %v15651_v44 }
 0x522   : > { %v15681_v20 = vpop.f32.mrf.mxu0  ;;  %v15683_v24 = vpop.f32.mrf.mxu1 }
 0x524   : > { %v5070_v26 = vpop.f32.mrf.mxu0 }
 0x525   : > { %v5265_v11 = vpop.f32.mrf.mxu1  ;;  %v5071_v27 = vadd.f32 %v5070_v26, %v15653_v48 }
 0x526   : > { %v15686_v21 = vadd.f32 %v5265_v11, %v5049_v50  ;;  %v15688_v10 = vpop.f32.mrf.mxu0 }
 0x527   : > { %v15690_v35 = vpop.f32.mrf.mxu1 }
 0x528   : > { %v5081_v45 = vpop.f32.mrf.mxu0 }
 0x529   : > { %v5272_v47 = vpop.f32.mrf.mxu1  ;;  %v5082_v56 = vadd.f32 %v5081_v45, %v15649_v55 }
 0x52a   : > { %v15693_v28 = vadd.f32 %v5272_v47, %v5060_v17  ;;  %v15695_v51 = vpop.f32.mrf.mxu0 }
 0x52b   : > { %v15697_v43 = vpop.f32.mrf.mxu1 }
 0x52c   : > { %v15699_v53 = vpop.f32.mrf.mxu0 }
 0x52d   : > { %v5279_v2 = vpop.f32.mrf.mxu1 }
 0x52e   : > { %v15702_v61 = vadd.f32 %v5279_v2, %v5071_v27  ;;  %v15704_v49 = vpop.f32.mrf.mxu0 }
 0x52f   : > { %v15706_v36 = vpop.f32.mrf.mxu1 }
 0x530   : > { %v5398_v33 = vpop.f32.mrf.mxu0 }
 0x531   : > { %v5286_v15 = vpop.f32.mrf.mxu1  ;;  %v5399_v4 = vadd.f32 %v5398_v33, %v5245_v6 }
 0x532   : > { %v15708_v1 = vadd.f32 %v5286_v15, %v5082_v56  ;;  %v15710_v0 = vpop.f32.mrf.mxu0  ;;  %v5934_v56 = vld [vmem:[%s19451_s1 + $0x100] sm:$0xff] }
 0x533   : > { %v15712_v29 = vpop.f32.mrf.mxu1 }
 0x534   : > { %v5406_v39 = vpop.f32.mrf.mxu0 }
 0x535   : > { %v15714_v3 = vpop.f32.mrf.mxu1  ;;  %v5407_v37 = vadd.f32 %v5406_v39, %v5252_v41  ;;  %v5975_v39 = vsel %vm4903_vm0, %v5934_v56, 0  ;;  %v12820_v56 = vld [vmem:[%s19452_s2 + $0x30] sm:$0xff] }
 0x536   : > { %v15716_v62 = vpop.f32.mrf.mxu0 }
 0x537   : > { %v15718_v34 = vpop.f32.mrf.mxu1 }
 0x538   : > { %v15720_v54 = vpop.f32.mrf.mxu0 }
 0x539   : > { %v5544_v8 = vpop.f32.mrf.mxu1 }
 0x53a   : > { %v15722_v7 = vadd.f32 %v5544_v8, %v5399_v4  ;;  %v15724_v42 = vpop.f32.mrf.mxu0 }
 0x53b   : > { %v15726_v23 = vpop.f32.mrf.mxu1 }
 0x53c   : > { %20020 = vst [vmem:[#allocation85_spill] sm:$0xff] %v15722_v7 }
 0x53e   : > { %v15728_v25 = vpop.f32.mrf.mxu0 }
 0x53f   : > { %v5553_v40 = vpop.f32.mrf.mxu1 }
 0x540   : > { %v15730_v31 = vadd.f32 %v5553_v40, %v5407_v37  ;;  %v15732_v6 = vpop.f32.mrf.mxu0  ;;  %v12915_v40 = vmov 2  }
 0x541   : > { %v15734_v14 = vpop.f32.mrf.mxu1  ;;  %12776 = vset.pattern.permute.xlu1 %v12915_v40  ;;  %12777 = vset.pattern.permute.xlu0 %v12915_v40  ;;  %v5935_v40 = vld [vmem:[%s19451_s1 + $0x108] sm:$0xff] }
 0x542   : > { %20021 = vst [vmem:[#allocation86_spill] sm:$0xff] %v15730_v31  ;;  %v15780_v31 = vand.u32 4294901760, %v5975_v39  ;;  %5967 = vperm.xlu0 %12777, %v12820_v56   ;;  %v12822_v56 = vld [vmem:[%s19452_s2 + $0x18] sm:$0xff] }
 0x544   : > { %v15736_v30 = vpop.f32.mrf.mxu0  ;;  %v15738_v52 = vpop.f32.mrf.mxu1  ;;  %20029 = vst [vmem:[#allocation94_spill] sm:$0xff] %v15780_v31 }
 0x546   : > { %v15740_v41 = vpop.f32.mrf.mxu0  ;;  %v15742_v32 = vpop.f32.mrf.mxu1  ;;  %5955 = vperm.xlu0 %12777, %v12822_v56   ;;  %v12824_v56 = vld [vmem:[%s19452_s2 + $0x8] sm:$0xff] }
 0x548   : > { %v15744_v5 = vpop.f32.mrf.mxu0 }
 0x549   : > { %v15746_v46 = vpop.f32.mrf.mxu1 }
 0x54a   : > { %v15748_v50 = vpop.f32.mrf.mxu0  ;;  %5947 = vperm.xlu0 %12777, %v12824_v56   ;;  %v5936_v56 = vld [vmem:[%s19451_s1 + $0x110] sm:$0xff] }
 0x54b   : > { %v15750_v26 = vpop.f32.mrf.mxu1 }
 0x54c   : > { %v15752_v11 = vpop.f32.mrf.mxu0 }
 0x54d   : > { %v15754_v17 = vpop.f32.mrf.mxu1 }
 0x54e   : > { %v15756_v45 = vpop.f32.mrf.mxu0 }
 0x54f   : > { %v15758_v47 = vpop.f32.mrf.mxu1 }
 0x550   : > { %v15760_v27 = vpop.f32.mrf.mxu0 }
 0x551   : > { %v15762_v2 = vpop.f32.mrf.mxu1 }
 0x552   : > { %20022 = vst [vmem:[#allocation87_spill] sm:$0xff] %v15762_v2  ;;  %v15767_v33 = vpop.f32.mrf.mxu0 }
 0x553   : > { %20023 = vst [vmem:[#allocation88_spill] sm:$0xff] %v15767_v33  ;;  %v15769_v15 = vpop.f32.mrf.mxu1  ;;  %v12819_v33 = vld [vmem:[%s19452_s2 + $0x38] sm:$0xff] }
 0x554   : > { %20024 = vst [vmem:[#allocation89_spill] sm:$0xff] %v15769_v15  ;;  %v15771_v4 = vpop.f32.mrf.mxu0  ;;  %5971 = vperm.xlu1 %12776, %v12819_v33   ;;  %v12821_v33 = vld [vmem:[%s19452_s2 + $0x28] sm:$0xff]  ;;  %v15862_v15 = vsel %vm4903_vm0, %v5936_v56, 0 }
 0x555   : > { %20025 = vst [vmem:[#allocation90_spill] sm:$0xff] %v15771_v4  ;;  %v15774_v37 = vpop.f32.mrf.mxu1  ;;  %v15800_v4 = vsub.f32 %v5975_v39, %v15780_v31 }
 0x556   : > { %20026 = vst [vmem:[#allocation91_spill] sm:$0xff] %v15774_v37  ;;  %v15776_v8 = vpop.f32.mrf.mxu0 }
 0x557   : > { %20027 = vst [vmem:[#allocation92_spill] sm:$0xff] %v15776_v8  ;;  %v15778_v13 = vpop.f32.mrf.mxu1  ;;  %20034 = vst [vmem:[#allocation102_spill] sm:$0xff] %v15800_v4  ;;  %v19628_v31 = vand.u32 4294901760, %v15800_v4 }
 0x558   : > { %20028 = vst [vmem:[#allocation93_spill] sm:$0xff] %v15778_v13  ;;  %v15788_v37 = vpop.f32.mrf.mxu0  ;;  %5963 = vperm.xlu1 %12776, %v12821_v33   ;;  %v12823_v33 = vld [vmem:[%s19452_s2 + $0x20] sm:$0xff] }
 0x559   : > { %20030 = vst [vmem:[#allocation95_spill] sm:$0xff] %v15788_v37  ;;  %v15790_v8 = vpop.f32.mrf.mxu1  ;;  %v5978_v37 = vsel %vm4903_vm0, %v5935_v40, 0 }
 0x55a   : > { %20031 = vst [vmem:[#allocation96_spill] sm:$0xff] %v15790_v8  ;;  %v15795_v13 = vpop.f32.mrf.mxu0  ;;  %v15818_v7 = vand.u32 4294901760, %v5978_v37 }
 0x55b   : > { %20032 = vst [vmem:[#allocation98_spill] sm:$0xff] %v15795_v13  ;;  %v15797_v2 = vpop.f32.mrf.mxu1 }
 0x55c   : > { %20033 = vst [vmem:[#allocation100_spill] sm:$0xff] %v15797_v2  ;;  %v15808_v8 = vpop.f32.mrf.mxu0  ;;  %20039 = vst [vmem:[#allocation121_spill] sm:$0xff] %v15818_v7  ;;  %5959 = vperm.xlu1 %12776, %v12823_v33   ;;  %v15840_v33 = vsub.f32 %v5978_v37, %v15818_v7  ;;  %v5029_v37 = vadd.f32 %v15664_v57, %v15666_v58  ;;  %v5095_v57 = vadd.f32 %v15704_v49, %v15647_v59 }
 0x55d   : > { %20035 = vst [vmem:[#allocation104_spill] sm:$0xff] %v15808_v8  ;;  %v15811_v13 = vpop.f32.mrf.mxu1 }
 0x55e   : > { %20036 = vst [vmem:[#allocation107_spill] sm:$0xff] %v15811_v13  ;;  %v15813_v2 = vpop.f32.mrf.mxu0  ;;  %v15837_v13 = vsub.f32 %v15800_v4, %v19628_v31  ;;  %v5040_v31 = vadd.f32 %v15668_v63, %v15655_v19  ;;  %v19636_v58 = vand.u32 4294901760, %v15840_v33  ;;  %v12826_v19 = vld [vmem:[%s19452_s2] sm:$0xff]  ;;  %v5254_v63 = vadd.f32 %v15675_v22, %v5029_v37 }
 0x55f   : > { %20037 = vst [vmem:[#allocation97_spill] sm:$0xff] %v15813_v2  ;;  %v15815_v39 = vpop.f32.mrf.mxu1  ;;  %v15889_v22 = vand.u32 4294901760, %v15862_v15  ;;  %v20046_v37 = vld [vmem:[#allocation90_spill] sm:$0xff] }
 0x560   : > { %20038 = vst [vmem:[#allocation105_spill] sm:$0xff] %v15815_v39  ;;  %v15826_v40 = vpop.f32.mrf.mxu0 }
 0x561   : > { %20040 = vst [vmem:[#allocation108_spill] sm:$0xff] %v15826_v40  ;;  %v15828_v8 = vpop.f32.mrf.mxu1 }
 0x562   : > { %20041 = vst [vmem:[#allocation111_spill] sm:$0xff] %v15828_v8  ;;  %v15830_v2 = vpop.f32.mrf.mxu0  ;;  %v12825_v8 = vld [vmem:[%s19452_s2 + $0x10] sm:$0xff] }
 0x563   : > { %20042 = vst [vmem:[#allocation114_spill] sm:$0xff] %v15830_v2  ;;  %v15832_v39 = vpop.f32.mrf.mxu1  ;;  %5951 = vperm.xlu1 %12776, %v12825_v8  }
 0x564   : > { %20043 = vst [vmem:[#allocation110_spill] sm:$0xff] %v15832_v39  ;;  %v5018_v39 = vadd.f32 %v15657_v9, %v15661_v38  ;;  %v15850_v40 = vpop.f32.mrf.mxu0  ;;  %v5051_v9 = vadd.f32 %v15673_v12, %v15659_v18  ;;  %v5093_v38 = vadd.f32 %v15699_v53, %v15647_v59  ;;  %v5073_v18 = vadd.f32 %v15688_v10, %v15653_v48 }
 0x565   : > { %v15852_v2 = vpop.f32.mrf.mxu1  ;;  %v5084_v12 = vadd.f32 %v15695_v51, %v15649_v55  ;;  %v5409_v59 = vadd.f32 %v15716_v62, %v5254_v63  ;;  %v5415_v51 = vadd.f32 %v15720_v54, %v15678_v16 }
 0x566   : > { %v5247_v4 = vadd.f32 %v15670_v60, %v5018_v39  ;;  %v15859_v7 = vpop.f32.mrf.mxu0  ;;  %v5062_v60 = vadd.f32 %v15681_v20, %v15651_v44  ;;  %v5261_v39 = vadd.f32 %v15683_v24, %v5040_v31  ;;  %v5268_v56 = vadd.f32 %v15690_v35, %v5051_v9  ;;  %v20047_v9 = vld [vmem:[#allocation87_spill] sm:$0xff] }
 0x567   : > { %v15868_v8 = vpop.f32.mrf.mxu1  ;;  %5943 = vperm.xlu1 %12776, %v12826_v19   ;;  %v5282_v48 = vadd.f32 %v15706_v36, %v5073_v18  ;;  %v5289_v20 = vadd.f32 %v15712_v29, %v5084_v12  ;;  %v5294_v24 = vadd.f32 %v15714_v3, %v5093_v38  ;;  %v5296_v35 = vadd.f32 %v15718_v34, %v5095_v57  ;;  %v20048_v38 = vld [vmem:[#allocation88_spill] sm:$0xff]  ;;  %v20052_v12 = vld [vmem:[#allocation86_spill] sm:$0xff] }
 0x568   : > { %v5762_v53 = vpop.f32.mrf.mxu0  ;;  %v5275_v44 = vadd.f32 %v15697_v43, %v5062_v60  ;;  %v5401_v55 = vadd.f32 %v15710_v0, %v5247_v4  ;;  %v5417_v31 = vadd.f32 %v15724_v42, %v5261_v39  ;;  %v5423_v36 = vadd.f32 %v15728_v25, %v15686_v21  ;;  %v20051_v60 = vld [vmem:[#allocation93_spill] sm:$0xff] }
 0x569   : > { %v15886_v19 = vpop.f32.mrf.mxu1  ;;  %v5425_v0 = vadd.f32 %v15732_v6, %v5268_v56  ;;  %v5556_v3 = vadd.f32 %v15734_v14, %v5409_v59  ;;  %v5431_v34 = vadd.f32 %v15736_v30, %v15693_v28  ;;  %v5563_v62 = vadd.f32 %v15738_v52, %v5415_v51  ;;  %v20057_v59 = vld [vmem:[#allocation98_spill] sm:$0xff] }
 0x56a   : > { %v5764_v10 = vpop.f32.mrf.mxu0  ;;  %v5547_v43 = vadd.f32 %v15726_v23, %v5401_v55  ;;  %v5433_v16 = vadd.f32 %v15740_v41, %v5275_v44  ;;  %v5565_v42 = vadd.f32 %v15742_v32, %v5417_v31  ;;  %v5439_v23 = vadd.f32 %v15744_v5, %v15702_v61  ;;  %v20044_v61 = vld [vmem:[#allocation89_spill] sm:$0xff]  ;;  %v20056_v55 = vld [vmem:[#allocation100_spill] sm:$0xff] }
 0x56b   : > { %v5887_v49 = vpop.f32.mrf.mxu1  ;;  %v5572_v21 = vadd.f32 %v15746_v46, %v5423_v36  ;;  %v5441_v25 = vadd.f32 %v15748_v50, %v5282_v48  ;;  %v5574_v6 = vadd.f32 %v15750_v26, %v5425_v0  ;;  %v5447_v14 = vadd.f32 %v15752_v11, %v15708_v1  ;;  %v20045_v46 = vld [vmem:[#allocation85_spill] sm:$0xff]  ;;  %v20049_v1 = vld [vmem:[#allocation91_spill] sm:$0xff]  ;;  %v20055_v48 = vld [vmem:[#allocation96_spill] sm:$0xff] }
 0x56c   : > { %v5769_v29 = vpop.f32.mrf.mxu0  ;;  %v5581_v28 = vadd.f32 %v15754_v17, %v5431_v34  ;;  %v5449_v30 = vadd.f32 %v15756_v45, %v5289_v20  ;;  %v5583_v32 = vadd.f32 %v15758_v47, %v5433_v16  ;;  %v5455_v4 = vadd.f32 %v15760_v27, %v5294_v24  ;;  %v20050_v17 = vld [vmem:[#allocation92_spill] sm:$0xff]  ;;  %v20053_v47 = vld [vmem:[#allocation95_spill] sm:$0xff] }
 0x56d   : > { %v5892_v54 = vpop.f32.mrf.mxu1  ;;  %v5592_v5 = vadd.f32 %v20044_v61, %v5441_v25  ;;  %v5728_v50 = vadd.f32 %v20046_v37, %v20045_v46  ;;  %v5590_v26 = vadd.f32 %v20047_v9, %v5439_v23  ;;  %v5457_v57 = vadd.f32 %v20048_v38, %v5296_v35  ;;  %v20054_v27 = vld [vmem:[#allocation107_spill] sm:$0xff]  ;;  %v20059_v25 = vld [vmem:[#allocation97_spill] sm:$0xff] }
 0x56e   : > { %v5771_v52 = vpop.f32.mrf.mxu0  ;;  %v5599_v11 = vadd.f32 %v20049_v1, %v5447_v14  ;;  %v5730_v63 = vadd.f32 %v20050_v17, %v5547_v43  ;;  %v5601_v18 = vadd.f32 %v20051_v60, %v5449_v30  ;;  %v5735_v39 = vadd.f32 %v20053_v47, %v20052_v12  ;;  %v20058_v43 = vld [vmem:[#allocation104_spill] sm:$0xff]  ;;  %v20060_v30 = vld [vmem:[#allocation114_spill] sm:$0xff] }
 0x56f   : > { %v5894_v41 = vpop.f32.mrf.mxu1  ;;  %v15933_v56 = vadd.f32 %v20054_v27, %v5728_v50  ;;  %v5765_v44 = vadd.f32 %v5764_v10, %v5592_v5  ;;  %v5608_v20 = vadd.f32 %v20055_v48, %v5455_v4  ;;  %v5610_v24 = vadd.f32 %v20056_v55, %v5457_v57  ;;  %v20061_v50 = vld [vmem:[#allocation105_spill] sm:$0xff] }
 0x570   : > { %v5737_v35 = vadd.f32 %v20057_v59, %v5556_v3  ;;  %v5763_v51 = vadd.f32 %v5762_v53, %v5590_v26  ;;  %v5776_v31 = vpop.f32.mrf.mxu0  ;;  %v5742_v0 = vadd.f32 %v20058_v43, %v5563_v62  ;;  %v5758_v34 = vadd.f32 %v15859_v7, %v5583_v32  ;;  %v20062_v62 = vld [vmem:[#allocation108_spill] sm:$0xff] }
 0x571   : > { %v5899_v45 = vpop.f32.mrf.mxu1  ;;  %v5770_v16 = vadd.f32 %v5769_v29, %v5599_v11  ;;  %v5744_v14 = vadd.f32 %v20059_v25, %v5565_v42  ;;  %v5751_v61 = vadd.f32 %v20060_v30, %v5574_v6  ;;  %v5756_v10 = vadd.f32 %v15850_v40, %v5581_v28  ;;  %v20063_v28 = vld [vmem:[#allocation111_spill] sm:$0xff] }
 0x572   : > { %v5900_v4 = vadd.f32 %v5899_v45, %v5763_v51  ;;  %v5918_v46 = vmax.f32 %v15933_v56, 0.0  ;;  %v5772_v3 = vadd.f32 %v5771_v52, %v5601_v18  ;;  %v5895_v53 = vadd.f32 %v5894_v41, %v5758_v34  ;;  %v5778_v26 = vpop.f32.mrf.mxu0 }
 0x573   : > { %v5901_v36 = vpop.f32.mrf.mxu1  ;;  %v15945_v9 = vadd.f32 %v20061_v50, %v5730_v63  ;;  %v5749_v7 = vadd.f32 %v20062_v62, %v5572_v21  ;;  %v5888_v29 = vadd.f32 %v5887_v49, %v5751_v61  ;;  %v5893_v32 = vadd.f32 %v5892_v54, %v5756_v10 }
 0x574   : > { %v5902_v23 = vadd.f32 %v5901_v36, %v5765_v44  ;;  %v5777_v38 = vadd.f32 %v5776_v31, %v5608_v20  ;;  %v15949_v1 = vadd.f32 %v20063_v28, %v5735_v39  ;;  %v5881_v52 = vadd.f32 %v15868_v8, %v5744_v14 }
 0x575   : > { %v5906_v5 = vpop.f32.mrf.mxu1  ;;  %v5886_v41 = vadd.f32 %v15886_v19, %v5749_v7  ;;  %v5928_v11 = vmax.f32 %v5900_v4, 0.0  ;;  %v5927_v63 = vmax.f32 %v5895_v53, 0.0  ;;  %v5779_v45 = vadd.f32 %v5778_v26, %v5610_v24  ;;  %v20064_v19 = vld [vmem:[#allocation110_spill] sm:$0xff] }
 0x576   : > { %v5907_v37 = vadd.f32 %v5906_v5, %v5770_v16  ;;  %v5929_v6 = vmax.f32 %v5902_v23, 0.0  ;;  %v5879_v54 = vadd.f32 %v15852_v2, %v5742_v0  ;;  %v5925_v60 = vmax.f32 %v5888_v29, 0.0 }
 0x577   : > { %v5908_v42 = vpop.f32.mrf.mxu1  ;;  %v5926_v18 = vmax.f32 %v5893_v32, 0.0  ;;  %v5874_v48 = vadd.f32 %v20064_v19, %v5737_v35  ;;  %v5923_v20 = vmax.f32 %v5881_v52, 0.0  ;;  %v5924_v55 = vmax.f32 %v5886_v41, 0.0 }
 0x578   : > { %v5930_v57 = vmax.f32 %v5907_v37, 0.0  ;;  %v5909_v40 = vadd.f32 %v5908_v42, %v5772_v3  ;;  %v15956_v27 = vand.u32 4294901760, %v5929_v6  ;;  %v15961_v24 = vand.u32 4294901760, %v5928_v11 }
 0x579   : > { %v5913_v17 = vpop.f32.mrf.mxu1  ;;  %v15963_v59 = vand.u32 4294901760, %v5927_v63  ;;  %v5920_v36 = vmax.f32 %v15949_v1, 0.0  ;;  %v5922_v43 = vmax.f32 %v5879_v54, 0.0  ;;  %v15971_v0 = vand.u32 4294901760, %v5926_v18 }
 0x57a   : > { %v5931_v21 = vmax.f32 %v5909_v40, 0.0  ;;  %v5914_v49 = vadd.f32 %v5913_v17, %v5777_v38  ;;  %v15954_v12 = vand.u32 4294901760, %v5930_v57  ;;  %v15976_v35 = vand.u32 4294901760, %v5925_v60 }
 0x57b   : > { %v5915_v47 = vpop.f32.mrf.mxu1  ;;  %v15979_v16 = vsub.f32 %v5929_v6, %v15956_v27  ;;  %v5921_v14 = vmax.f32 %v5874_v48, 0.0  ;;  %v15986_v30 = vand.u32 4294901760, %v5923_v20  ;;  %v15988_v61 = vand.u32 4294901760, %v5924_v55 }
 0x57c   : > { %v15958_v39 = vand.u32 4294901760, %v5931_v21  ;;  %v5932_v8 = vmax.f32 %v5914_v49, 0.0  ;;  %v5916_v44 = vadd.f32 %v5915_v47, %v5779_v45  ;;  %v15974_v34 = vsub.f32 %v5930_v57, %v15954_v12 }
 0x57d   : > { %v15991_v10 = vsub.f32 %v5928_v11, %v15961_v24  ;;  %v15994_v4 = vsub.f32 %v5927_v63, %v15963_v59  ;;  %v5919_v37 = vmax.f32 %v15945_v9, 0.0  ;;  %v16003_v50 = vand.u32 4294901760, %v5920_v36 }
 0x57e   : > { %v15966_v2 = vsub.f32 %v5931_v21, %v15958_v39  ;;  %v15968_v51 = vand.u32 4294901760, %v5932_v8  ;;  %v5933_v31 = vmax.f32 %v5916_v44, 0.0  ;;  %v16006_v62 = vsub.f32 %v5926_v18, %v15971_v0 }
 0x57f   : > { %v6203_v7 = vand.u32 4294901760, %v15974_v34  ;;  %v16010_v29 = vand.u32 4294901760, %v5922_v43  ;;  %v16013_v32 = vsub.f32 %v5925_v60, %v15976_v35  ;;  %v6209_v9 = vand.u32 4294901760, %v15979_v16  ;;  %v5937_v60 = vld [vmem:[%s19451_s1 + $0x118] sm:$0xff] }
 0x580   : > { %v15982_v23 = vsub.f32 %v5932_v8, %v15968_v51  ;;  %v15984_v25 = vand.u32 4294901760, %v5933_v31  ;;  %v6197_v53 = vand.u32 4294901760, %v15966_v2  ;;  %v16018_v42 = vand.u32 4294901760, %v5921_v14 }
 0x581   : > { %v16021_v38 = vsub.f32 %v5924_v55, %v15988_v61  ;;  %v6215_v6 = vand.u32 4294901760, %v15991_v10  ;;  %v16029_v40 = vsub.f32 %v5923_v20, %v15986_v30  ;;  %v6221_v52 = vand.u32 4294901760, %v15994_v4 }
 0x582   : > { %v6191_v5 = vand.u32 4294901760, %v15982_v23  ;;  %v15998_v3 = vsub.f32 %v5933_v31, %v15984_v25  ;;  %6015 = vmatprep.subr.mxu0 %v15984_v25  ;;  %v6198_v1 = vsub.f32 %v15966_v2, %v6197_v53  ;;  %v16041_v41 = vand.u32 4294901760, %v5918_v46 }
 0x583   : > { %6017 = vmatpush1.msra.mxu0 %v15968_v51  ;;  %v16043_v11 = vand.u32 4294901760, %v5919_v37  ;;  %v19638_v17 = vand.u32 4294901760, %v16006_v62  ;;  %v6204_v63 = vsub.f32 %v15974_v34, %v6203_v7  ;;  %v16051_v45 = vsub.f32 %v5922_v43, %v16010_v29 }
 0x584   : > { %6019 = vmatprep.subr.mxu0 %v15958_v39  ;;  %v6185_v26 = vand.u32 4294901760, %v15998_v3  ;;  %v6192_v57 = vsub.f32 %v15982_v23, %v6191_v5  ;;  %v6210_v49 = vsub.f32 %v15979_v16, %v6209_v9  ;;  %v19635_v54 = vand.u32 4294901760, %v16013_v32 }
 0x585   : > { %6021 = vmatpush1.msra.mxu0 %v15954_v12  ;;  %v16062_v18 = vsub.f32 %v5921_v14, %v16018_v42  ;;  %v19634_v47 = vand.u32 4294901760, %v16021_v38  ;;  %v6216_v8 = vsub.f32 %v15991_v10, %v6215_v6  ;;  %v16070_v19 = vsub.f32 %v5920_v36, %v16003_v50 }
 0x586   : > { %6023 = vmatprep.subr.mxu0 %v15956_v27  ;;  %v6186_v28 = vsub.f32 %v15998_v3, %v6185_v26  ;;  %v6193_v44 = vand.u32 4294901760, %v6192_v57  ;;  %v6199_v48 = vand.u32 4294901760, %v6198_v1  ;;  %v6222_v20 = vsub.f32 %v15994_v4, %v6221_v52 }
 0x587   : > { %6025 = vmatpush1.msra.mxu0 %v15961_v24  ;;  %v19633_v55 = vand.u32 4294901760, %v16029_v40  ;;  %v16078_v31 = vsub.f32 %v5919_v37, %v16043_v11  ;;  %v6228_v43 = vsub.f32 %v16006_v62, %v19638_v17  ;;  %v6205_v36 = vand.u32 4294901760, %v6204_v63 }
 0x588   : > { %6027 = vmatprep.subr.mxu0 %v15963_v59  ;;  %v6187_v21 = vand.u32 4294901760, %v6186_v28  ;;  %v5984_v14 = vsel %vm4903_vm0, %v5937_v60, 0  ;;  %v19637_v57 = vand.u32 4294901760, %v16051_v45  ;;  %v6211_v28 = vand.u32 4294901760, %v6210_v49 }
 0x589   : > { %6029 = vmatpush1.msra.mxu0 %v15971_v0  ;;  %v6234_v37 = vsub.f32 %v16013_v32, %v19635_v54  ;;  %v16092_v1 = vsub.f32 %v15862_v15, %v15889_v22  ;;  %v16097_v63 = vsub.f32 %v5918_v46, %v16041_v41  ;;  %v6217_v49 = vand.u32 4294901760, %v6216_v8 }
 0x58a   : > { %6031 = vmatprep.subr.mxu0 %v15976_v35  ;;  %6188 = vmatprep.subr.mxu1 %v6187_v21  ;;  %v6240_v21 = vsub.f32 %v16021_v38, %v19634_v47  ;;  %v6257_v60 = vand.u32 4294901760, %v16062_v18  ;;  %v6223_v15 = vand.u32 4294901760, %v6222_v20  ;;  %v6246_v56 = vsub.f32 %v16029_v40, %v19633_v55 }
 0x58b   : > { %6033 = vmatpush1.msra.mxu0 %v15988_v61  ;;  %6194 = vmatpush1.msra.mxu1 %v6193_v44  ;;  %v6263_v44 = vand.u32 4294901760, %v16070_v19  ;;  %v16109_v46 = vand.u32 4294901760, %v5984_v14  ;;  %v6229_v8 = vand.u32 4294901760, %v6228_v43  ;;  %v19641_v20 = vand.u32 4294901760, %v16078_v31 }
 0x58c   : > { %6035 = vmatprep.subr.mxu0 %v15986_v30  ;;  %6200 = vmatprep.subr.mxu1 %v6199_v48  ;;  %v5938_v48 = vld [vmem:[%s19451_s1 + $0x120] sm:$0xff]  ;;  %v6235_v55 = vand.u32 4294901760, %v6234_v37  ;;  %v19639_v47 = vand.u32 4294901760, %v16092_v1  ;;  %v19640_v54 = vand.u32 4294901760, %v16097_v63  ;;  %v6241_v43 = vand.u32 4294901760, %v6240_v21  ;;  %v5939_v21 = vld [vmem:[%s19451_s1 + $0x128] sm:$0xff] }
 0x58d   : > { %6037 = vmatpush1.msra.mxu0 %v16010_v29  ;;  %6206 = vmatpush1.msra.mxu1 %v6205_v36  ;;  %v6093_v36 = vsub.f32 %v15840_v33, %v19636_v58  ;;  %v5987_v58 = vsel %vm4903_vm0, %v5938_v48, 0  ;;  %v20065_v37 = vand.u32 4294901760, %v15837_v13  ;;  %v16136_v17 = vsub.f32 %v5984_v14, %v16109_v46 }
 0x58e   : > { %6039 = vmatprep.subr.mxu0 %v16018_v42  ;;  %6212 = vmatprep.subr.mxu1 %v6211_v28  ;;  %v6252_v28 = vsub.f32 %v16051_v45, %v19637_v57  ;;  %v6264_v57 = vsub.f32 %v16070_v19, %v6263_v44  ;;  %v16149_v14 = vand.u32 4294901760, %v5987_v58 }
 0x58f   : > { %6041 = vmatpush1.msra.mxu0 %v16003_v50  ;;  %6218 = vmatpush1.msra.mxu1 %v6217_v49  ;;  %v6258_v49 = vsub.f32 %v16062_v18, %v6257_v60  ;;  %v6094_v48 = vand.u32 4294901760, %v6093_v36  ;;  %v20066_v36 = vmov 0.0  }
 0x590   : > { %6043 = vmatprep.subr.mxu0 %v16043_v11  ;;  %6224 = vmatprep.subr.mxu1 %v6223_v15  ;;  %v6247_v15 = vand.u32 4294901760, %v6246_v56  ;;  %v6253_v13 = vand.u32 4294901760, %v6252_v28  ;;  %v6276_v56 = vsub.f32 %v16097_v63, %v19640_v54  ;;  %v6265_v28 = vand.u32 4294901760, %v6264_v57 }
 0x591   : > { %6045 = vmatpush1.msra.mxu0 %v16041_v41  ;;  %6230 = vmatpush1.msra.mxu1 %v6229_v8  ;;  %v6270_v8 = vsub.f32 %v16078_v31, %v19641_v20 }
 0x592   : > { %6084 = vmatmul.mubr.f32.vlgmr.msra.gmra.mxu0 %v20065_v37  ;;  %6236 = vmatprep.subr.mxu1 %v6235_v55  ;;  %v6104_v55 = vsub.f32 %v16092_v1, %v19639_v47  ;;  %v5990_v37 = vsel %vm4903_vm0, %v5939_v21, 0  ;;  %v5940_v47 = vld [vmem:[%s19451_s1 + $0x130] sm:$0xff]  ;;  %v6277_v57 = vand.u32 4294901760, %v6276_v56 }
 0x593   : > { %6386 = vmatprep.subr.mxu0 %v15998_v3  ;;  %6242 = vmatpush1.msra.mxu1 %v6241_v43  ;;  %v6259_v43 = vand.u32 4294901760, %v6258_v49  ;;  %v6271_v54 = vand.u32 4294901760, %v6270_v8  ;;  %v16164_v49 = vsub.f32 %v5987_v58, %v16149_v14  ;;  %v16166_v21 = vand.u32 4294901760, %v5990_v37  ;;  %v5941_v58 = vld [vmem:[%s19451_s1 + $0x138] sm:$0xff] }
 0x594   : > { %6389 = vmatpush1.msra.mxu0 %v15982_v23  ;;  %6248 = vmatprep.subr.mxu1 %v6247_v15  ;;  %v19643_v15 = vand.u32 4294901760, %v16136_v17  ;;  %v6105_v20 = vand.u32 4294901760, %v6104_v55  ;;  %v5996_v56 = vsel %vm4903_vm0, %v5941_v58, 0  ;;  %v20073_v23 = vand.u32 4294901760, %v16021_v38 }
 0x595   : > { %6392 = vmatprep.subr.mxu0 %v15966_v2  ;;  %6089 = vmatprep.mubr.f32.mxu0 %v20066_v36  ;;  %v16182_v8 = vsub.f32 %v5990_v37, %v16166_v21  ;;  %v20070_v2 = vand.u32 4294901760, %v16006_v62 }
 0x596   : > { %6254 = vmatpush1.msra.mxu1 %v6253_v13  ;;  %6395 = vmatpush1.msra.mxu0 %v15974_v34  ;;  %v5993_v13 = vsel %vm4903_vm0, %v5940_v47, 0  ;;  %v19642_v47 = vand.u32 4294901760, %v16164_v49  ;;  %v20071_v34 = vand.u32 4294901760, %v16013_v32 }
 0x597   : > { %6095 = vmatmul.mubr.f32.gmra.mxu0 %v6094_v48  ;;  %6260 = vmatprep.subr.mxu1 %v6259_v43  ;;  %v6115_v48 = vsub.f32 %v16136_v17, %v19643_v15  ;;  %v16184_v55 = vand.u32 4294901760, %v5993_v13  ;;  %v6136_v37 = vand.u32 4294901760, %v16182_v8 }
 0x598   : > { %6398 = vmatprep.subr.mxu0 %v15979_v16  ;;  %6266 = vmatpush1.msra.mxu1 %v6265_v28  ;;  %v6126_v43 = vsub.f32 %v16164_v49, %v19642_v47 }
 0x599   : > { %6401 = vmatpush1.msra.mxu0 %v15991_v10  ;;  %6272 = vmatprep.subr.mxu1 %v6271_v54  ;;  %v20067_v54 = vld [vmem:[#allocation94_spill] sm:$0xff]  ;;  %v16200_v28 = vsub.f32 %v5993_v13, %v16184_v55  ;;  %v6137_v13 = vsub.f32 %v16182_v8, %v6136_v37  ;;  %v20075_v10 = vand.u32 4294901760, %v16051_v45 }
 0x59a   : > { %6404 = vmatprep.subr.mxu0 %v15994_v4  ;;  %6100 = vmatprep.mubr.f32.mxu0 %v20066_v36  ;;  %v6127_v58 = vand.u32 4294901760, %v6126_v43 }
 0x59b   : > { %6278 = vmatpush1.msra.mxu1 %v6277_v57  ;;  %6407 = vmatpush1.msra.mxu0 %v16006_v62  ;;  %v16202_v57 = vand.u32 4294901760, %v5996_v56  ;;  %v6147_v47 = vand.u32 4294901760, %v16200_v28 }
 0x59c   : > { %6106 = vmatmul.mubr.f32.gmra.mxu0 %v6105_v20  ;;  %6313 = vmatmul.mubr.f32.vlgmr.msra.gmra.mxu1 %v20067_v54  ;;  %v6116_v20 = vand.u32 4294901760, %v6115_v48  ;;  %v20068_v48 = vld [vmem:[#allocation121_spill] sm:$0xff] }
 0x59d   : > { %6410 = vmatprep.subr.mxu0 %v16013_v32  ;;  %6546 = vmatprep.subr.mxu1 %v15984_v25  ;;  %v16216_v15 = vsub.f32 %v5996_v56, %v16202_v57  ;;  %v6148_v56 = vsub.f32 %v16200_v28, %v6147_v47 }
 0x59e   : > { %6413 = vmatpush1.msra.mxu0 %v16021_v38  ;;  %6548 = vmatpush1.msra.mxu1 %v15968_v51 }
 0x59f   : > { %6416 = vmatprep.subr.mxu0 %v16029_v40  ;;  %6550 = vmatprep.subr.mxu1 %v15958_v39  ;;  %v6158_v43 = vand.u32 4294901760, %v16216_v15 }
 0x5a0   : > { %6111 = vmatprep.mubr.f32.mxu0 %v20066_v36  ;;  %6318 = vmatprep.mubr.f32.mxu1 %v20066_v36 }
 0x5a1   : > { %6419 = vmatpush1.msra.mxu0 %v16051_v45  ;;  %6552 = vmatpush1.msra.mxu1 %v15954_v12 }
 0x5a2   : > { %6117 = vmatmul.mubr.f32.gmra.mxu0 %v6116_v20  ;;  %6320 = vmatmul.mubr.f32.gmra.mxu1 %v20068_v48  ;;  %v6138_v20 = vand.u32 4294901760, %v6137_v13  ;;  %v6159_v13 = vsub.f32 %v16216_v15, %v6158_v43 }
 0x5a3   : > { %6422 = vmatprep.subr.mxu0 %v16062_v18  ;;  %6554 = vmatprep.subr.mxu1 %v15956_v27 }
 0x5a4   : > { %6425 = vmatpush1.msra.mxu0 %v16070_v19  ;;  %6556 = vmatpush1.msra.mxu1 %v15961_v24  ;;  %v6160_v3 = vand.u32 4294901760, %v6159_v13 }
 0x5a5   : > { %6428 = vmatprep.subr.mxu0 %v16078_v31  ;;  %6558 = vmatprep.subr.mxu1 %v15963_v59 }
 0x5a6   : > { %6122 = vmatprep.mubr.f32.mxu0 %v20066_v36  ;;  %6325 = vmatprep.mubr.f32.mxu1 %v20066_v36 }
 0x5a7   : > { %6431 = vmatpush1.msra.mxu0 %v16097_v63  ;;  %6560 = vmatpush1.msra.mxu1 %v15971_v0 }
 0x5a8   : > { %6128 = vmatmul.mubr.f32.gmra.mxu0 %v6127_v58  ;;  %6327 = vmatmul.mubr.f32.gmra.mxu1 %v15889_v22  ;;  %v6149_v58 = vand.u32 4294901760, %v6148_v56 }
 0x5a9   : > { %6562 = vmatprep.subr.mxu1 %v15976_v35  ;;  %6701 = vmatprep.subr.mxu0 %v6185_v26  ;;  %v20069_v26 = vld [vmem:[#allocation102_spill] sm:$0xff] }
 0x5aa   : > { %6564 = vmatpush1.msra.mxu1 %v15988_v61  ;;  %6133 = vmatprep.mubr.f32.mxu0 %v20066_v36  ;;  %v20072_v16 = vand.u32 4294901760, %v20069_v26 }
 0x5ab   : > { %6566 = vmatprep.subr.mxu1 %v15986_v30  ;;  %6332 = vmatprep.mubr.f32.mxu1 %v20066_v36 }
 0x5ac   : > { %6568 = vmatpush1.msra.mxu1 %v16010_v29  ;;  %6139 = vmatmul.mubr.f32.gmra.mxu0 %v6138_v20 }
 0x5ad   : > { %6334 = vmatmul.mubr.f32.gmra.mxu1 %v16109_v46  ;;  %6570 = vmatprep.subr.mxu1 %v16018_v42 }
 0x5ae   : > { %6572 = vmatpush1.msra.mxu1 %v16003_v50  ;;  %6144 = vmatprep.mubr.f32.mxu0 %v20066_v36 }
 0x5af   : > { %6574 = vmatprep.subr.mxu1 %v16043_v11  ;;  %6339 = vmatprep.mubr.f32.mxu1 %v20066_v36 }
 0x5b0   : > { %6576 = vmatpush1.msra.mxu1 %v16041_v41  ;;  %6150 = vmatmul.mubr.f32.gmra.mxu0 %v6149_v58 }
 0x5b1   : > { %6341 = vmatmul.mubr.f32.gmra.mxu1 %v16149_v14  ;;  %6868 = vmatprep.subr.mxu1 %v15984_v25  ;;  %v20074_v25 = vand.u32 4294901760, %v16029_v40 }
 0x5b2   : > { %6155 = vmatprep.mubr.f32.mxu0 %v20066_v36  ;;  %6346 = vmatprep.mubr.f32.mxu1 %v20066_v36 }
 0x5b4   : > { %6161 = vmatmul.mubr.f32.gmra.mxu0 %v6160_v3 }
 0x5b5   : > { %6348 = vmatmul.mubr.f32.gmra.mxu1 %v16166_v21  ;;  %6464 = vmatprep.mubr.f32.mxu0 %v20066_v36 }
 0x5b6   : > { %6353 = vmatprep.mubr.f32.mxu1 %v20066_v36 }
 0x5b8   : > { %6467 = vmatmul.mubr.f32.vlgmr.msra.gmra.mxu0 %v20069_v26 }
 0x5b9   : > { %6355 = vmatmul.mubr.f32.gmra.mxu1 %v16184_v55  ;;  %6705 = vmatpush1.msra.mxu0 %v6191_v5 }
 0x5ba   : > { %6709 = vmatprep.subr.mxu0 %v6197_v53  ;;  %6360 = vmatprep.mubr.f32.mxu1 %v20066_v36 }
 0x5bb   : > { %6713 = vmatpush1.msra.mxu0 %v6203_v7  ;;  %6472 = vmatprep.mubr.f32.mxu0 %v20066_v36 }
 0x5bc   : > { %6717 = vmatprep.subr.mxu0 %v6209_v9  ;;  %6475 = vmatmul.mubr.f32.gmra.mxu0 %v15840_v33 }
 0x5bd   : > { %6362 = vmatmul.mubr.f32.gmra.mxu1 %v16202_v57  ;;  %6721 = vmatpush1.msra.mxu0 %v6215_v6 }
 0x5be   : > { %6725 = vmatprep.subr.mxu0 %v6221_v52  ;;  %6480 = vmatprep.mubr.f32.mxu0 %v20066_v36 }
 0x5bf   : > { %6729 = vmatpush1.msra.mxu0 %v20070_v2  ;;  %6609 = vmatprep.mubr.f32.mxu1 %v20066_v36 }
 0x5c0   : > { %6733 = vmatprep.subr.mxu0 %v20071_v34  ;;  %6483 = vmatmul.mubr.f32.gmra.mxu0 %v16092_v1 }
 0x5c1   : > { %6613 = vmatmul.mubr.f32.vlgmr.msra.gmra.mxu1 %v20072_v16  ;;  %6737 = vmatpush1.msra.mxu0 %v20073_v23 }
 0x5c2   : > { %6870 = vmatpush1.msra.mxu1 %v15968_v51  ;;  %6741 = vmatprep.subr.mxu0 %v20074_v25  ;;  %v20076_v51 = vand.u32 4294901760, %v15840_v33  ;;  %v20079_v33 = vand.u32 4294901760, %v16092_v1 }
 0x5c3   : > { %6872 = vmatprep.subr.mxu1 %v15958_v39  ;;  %6745 = vmatpush1.msra.mxu0 %v20075_v10  ;;  %v20078_v39 = vand.u32 4294901760, %v16097_v63 }
 0x5c4   : > { %6874 = vmatpush1.msra.mxu1 %v15954_v12  ;;  %6488 = vmatprep.mubr.f32.mxu0 %v20066_v36  ;;  %v20077_v12 = vand.u32 4294901760, %v16078_v31 }
 0x5c5   : > { %6618 = vmatprep.mubr.f32.mxu1 %v20066_v36  ;;  %6749 = vmatprep.subr.mxu0 %v6257_v60 }
 0x5c6   : > { %6876 = vmatprep.subr.mxu1 %v15956_v27  ;;  %6491 = vmatmul.mubr.f32.gmra.mxu0 %v16136_v17  ;;  %v20080_v27 = vand.u32 4294901760, %v16136_v17 }
 0x5c7   : > { %6622 = vmatmul.mubr.f32.gmra.mxu1 %v20076_v51  ;;  %6753 = vmatpush1.msra.mxu0 %v6263_v44 }
 0x5c8   : > { %6878 = vmatpush1.msra.mxu1 %v15961_v24  ;;  %6757 = vmatprep.subr.mxu0 %v20077_v12  ;;  %v20081_v24 = vand.u32 4294901760, %v16164_v49 }
 0x5c9   : > { %6880 = vmatprep.subr.mxu1 %v15963_v59  ;;  %6761 = vmatpush1.msra.mxu0 %v20078_v39 }
 0x5ca   : > { %6882 = vmatpush1.msra.mxu1 %v15971_v0  ;;  %6496 = vmatprep.mubr.f32.mxu0 %v20066_v36 }
 0x5cb   : > { %6627 = vmatprep.mubr.f32.mxu1 %v20066_v36  ;;  %6884 = vmatprep.subr.mxu1 %v15976_v35  ;;  %v16381_v35 = vpop.permute.xlu0 %5967 }
 0x5cc   : > { %6499 = vmatmul.mubr.f32.gmra.mxu0 %v16164_v49  ;;  %6631 = vmatmul.mubr.f32.gmra.mxu1 %v20079_v33 }
 0x5cd   : > { %6886 = vmatpush1.msra.mxu1 %v15988_v61  ;;  %6504 = vmatprep.mubr.f32.mxu0 %v20066_v36 }
 0x5ce   : > { %6888 = vmatprep.subr.mxu1 %v15986_v30  ;;  %6636 = vmatprep.mubr.f32.mxu1 %v20066_v36 }
 0x5cf   : > { %6890 = vmatpush1.msra.mxu1 %v16010_v29  ;;  %v16387_v5 = vpop.permute.xlu0 %5955 }
 0x5d0   : > { %6892 = vmatprep.subr.mxu1 %v16018_v42  ;;  %6507 = vmatmul.mubr.f32.gmra.mxu0 %v16182_v8 }
 0x5d1   : > { %6640 = vmatmul.mubr.f32.gmra.mxu1 %v20080_v27  ;;  %6512 = vmatprep.mubr.f32.mxu0 %v20066_v36 }
 0x5d2   : > { %6894 = vmatpush1.msra.mxu1 %v16003_v50  ;;  %6645 = vmatprep.mubr.f32.mxu1 %v20066_v36 }
 0x5d3   : > { %6896 = vmatprep.subr.mxu1 %v16043_v11  ;;  %v16394_v29 = vpop.permute.xlu0 %5947 }
 0x5d4   : > { %6898 = vmatpush1.msra.mxu1 %v16041_v41  ;;  %6515 = vmatmul.mubr.f32.gmra.mxu0 %v16200_v28 }
 0x5d5   : > { %6649 = vmatmul.mubr.f32.gmra.mxu1 %v20081_v24  ;;  %6520 = vmatprep.mubr.f32.mxu0 %v20066_v36 }
 0x5d6   : > { %6654 = vmatprep.mubr.f32.mxu1 %v20066_v36 }
 0x5d8   : > { %6523 = vmatmul.mubr.f32.gmra.mxu0 %v16216_v15 }
 0x5d9   : > { %6658 = vmatmul.mubr.f32.gmra.mxu1 %v6136_v37  ;;  %6794 = vmatprep.mubr.f32.mxu0 %v20066_v36 }
 0x5da   : > { %6663 = vmatprep.mubr.f32.mxu1 %v20066_v36 }
 0x5dc   : > { %6796 = vmatmul.mubr.f32.vlgmr.msra.gmra.mxu0 %v20067_v54 }
 0x5dd   : > { %6667 = vmatmul.mubr.f32.gmra.mxu1 %v6147_v47  ;;  %6801 = vmatprep.mubr.f32.mxu0 %v20066_v36 }
 0x5de   : > { %6672 = vmatprep.mubr.f32.mxu1 %v20066_v36 }
 0x5e0   : > { %6803 = vmatmul.mubr.f32.gmra.mxu0 %v20068_v48 }
 0x5e1   : > { %6676 = vmatmul.mubr.f32.gmra.mxu1 %v6158_v43  ;;  %6808 = vmatprep.mubr.f32.mxu0 %v20066_v36 }
 0x5e2   : > { %6931 = vmatprep.mubr.f32.mxu1 %v20066_v36 }
 0x5e4   : > { %6810 = vmatmul.mubr.f32.gmra.mxu0 %v15889_v22 }
 0x5e5   : > { %6933 = vmatmul.mubr.f32.vlgmr.msra.gmra.mxu1 %v20067_v54  ;;  %6815 = vmatprep.mubr.f32.mxu0 %v20066_v36 }
 0x5e6   : > { %6938 = vmatprep.mubr.f32.mxu1 %v20066_v36 }
 0x5e8   : > { %6817 = vmatmul.mubr.f32.gmra.mxu0 %v16109_v46 }
 0x5e9   : > { %6940 = vmatmul.mubr.f32.gmra.mxu1 %v20068_v48  ;;  %6822 = vmatprep.mubr.f32.mxu0 %v20066_v36 }
 0x5ea   : > { %6945 = vmatprep.mubr.f32.mxu1 %v20066_v36 }
 0x5ec   : > { %6824 = vmatmul.mubr.f32.gmra.mxu0 %v16149_v14 }
 0x5ed   : > { %6947 = vmatmul.mubr.f32.gmra.mxu1 %v15889_v22  ;;  %6829 = vmatprep.mubr.f32.mxu0 %v20066_v36  ;;  %v16375_v22 = vpop.permute.xlu1 %5971 }
 0x5ee   : > { %6952 = vmatprep.mubr.f32.mxu1 %v20066_v36 }
 0x5f0   : > { %6831 = vmatmul.mubr.f32.gmra.mxu0 %v16166_v21 }
 0x5f1   : > { %6954 = vmatmul.mubr.f32.gmra.mxu1 %v16109_v46  ;;  %6836 = vmatprep.mubr.f32.mxu0 %v20066_v36  ;;  %v16377_v59 = vpop.permute.xlu1 %5963 }
 0x5f2   : > { %6959 = vmatprep.mubr.f32.mxu1 %v20066_v36 }
 0x5f4   : > { %6838 = vmatmul.mubr.f32.gmra.mxu0 %v16184_v55 }
 0x5f5   : > { %6961 = vmatmul.mubr.f32.gmra.mxu1 %v16149_v14  ;;  %6843 = vmatprep.mubr.f32.mxu0 %v20066_v36  ;;  %v16379_v0 = vpop.permute.xlu1 %5959 }
 0x5f6   : > { %6966 = vmatprep.mubr.f32.mxu1 %v20066_v36 }
 0x5f8   : > { %6845 = vmatmul.mubr.f32.gmra.mxu0 %v16202_v57 }
 0x5f9   : > { %6968 = vmatmul.mubr.f32.gmra.mxu1 %v16166_v21  ;;  %7148 = vmatprep.mubr.f32.mxu0 %v20066_v36  ;;  %v16383_v30 = vpop.permute.xlu1 %5951 }
 0x5fa   : > { %6973 = vmatprep.mubr.f32.mxu1 %v20066_v36 }
 0x5fd   : > { %6975 = vmatmul.mubr.f32.gmra.mxu1 %v16184_v55  ;;  %v16389_v53 = vpop.permute.xlu1 %5943 }
 0x5fe   : > { %6980 = vmatprep.mubr.f32.mxu1 %v20066_v36 }
 0x601   : > { %6982 = vmatmul.mubr.f32.gmra.mxu1 %v16202_v57 }
 0x602   : > { %7381 = vmatprep.mubr.f32.mxu1 %v20066_v36 }
 0x652   : > { %v6085_v61 = vpop.f32.mrf.mxu0 }
 0x653   : > { %v6086_v62 = vadd.f32 %v6085_v61, %v16389_v53 }
 0x654   : > { %v16385_v4 = vpop.f32.mrf.mxu0 }
 0x657   : > { %v6096_v50 = vpop.f32.mrf.mxu0 }
 0x658   : > { %v6097_v40 = vadd.f32 %v6096_v50, %v16394_v29 }
 0x659   : > { %v16392_v7 = vpop.f32.mrf.mxu0 }
 0x65c   : > { %v6107_v32 = vpop.f32.mrf.mxu0  ;;  %v6314_v9 = vpop.f32.mrf.mxu1 }
 0x65d   : > { %v6315_v42 = vadd.f32 %v6314_v9, %v6086_v62  ;;  %v6108_v18 = vadd.f32 %v6107_v32, %v16383_v30 }
 0x65e   : > { %v16396_v38 = vpop.f32.mrf.mxu0  ;;  %v16398_v6 = vpop.f32.mrf.mxu1 }
 0x662   : > { %v6118_v52 = vpop.f32.mrf.mxu0  ;;  %v6321_v41 = vpop.f32.mrf.mxu1 }
 0x663   : > { %v6322_v11 = vadd.f32 %v6321_v41, %v6097_v40  ;;  %v6119_v63 = vadd.f32 %v6118_v52, %v16387_v5 }
 0x664   : > { %v16401_v17 = vpop.f32.mrf.mxu0  ;;  %v16403_v45 = vpop.f32.mrf.mxu1 }
 0x668   : > { %v6129_v19 = vpop.f32.mrf.mxu0  ;;  %v6328_v31 = vpop.f32.mrf.mxu1 }
 0x669   : > { %v16406_v1 = vadd.f32 %v6328_v31, %v6108_v18  ;;  %v6130_v15 = vadd.f32 %v6129_v19, %v16379_v0 }
 0x66a   : > { %v16409_v60 = vpop.f32.mrf.mxu0  ;;  %v16411_v44 = vpop.f32.mrf.mxu1 }
 0x66c   : > { %v6140_v46 = vpop.f32.mrf.mxu0 }
 0x66d   : > { %v6335_v14 = vpop.f32.mrf.mxu1  ;;  %v6141_v55 = vadd.f32 %v6140_v46, %v16377_v59 }
 0x66e   : > { %v16414_v49 = vadd.f32 %v6335_v14, %v6119_v63  ;;  %v16416_v21 = vpop.f32.mrf.mxu0 }
 0x66f   : > { %v16418_v54 = vpop.f32.mrf.mxu1 }
 0x670   : > { %v6151_v47 = vpop.f32.mrf.mxu0 }
 0x671   : > { %v6342_v8 = vpop.f32.mrf.mxu1  ;;  %v6152_v56 = vadd.f32 %v6151_v47, %v16381_v35 }
 0x672   : > { %v16421_v37 = vadd.f32 %v6342_v8, %v6130_v15  ;;  %v16423_v28 = vpop.f32.mrf.mxu0 }
 0x673   : > { %v16425_v57 = vpop.f32.mrf.mxu1 }
 0x674   : > { %v16427_v48 = vpop.f32.mrf.mxu0 }
 0x675   : > { %v6349_v20 = vpop.f32.mrf.mxu1 }
 0x676   : > { %v16430_v43 = vadd.f32 %v6349_v20, %v6141_v55  ;;  %v16432_v58 = vpop.f32.mrf.mxu0  ;;  %v7004_v20 = vld [vmem:[%s19451_s1 + $0x140] sm:$0xff] }
 0x677   : > { %v16434_v13 = vpop.f32.mrf.mxu1 }
 0x678   : > { %v6468_v3 = vpop.f32.mrf.mxu0 }
 0x679   : > { %v6356_v26 = vpop.f32.mrf.mxu1  ;;  %v6469_v2 = vadd.f32 %v6468_v3, %v6315_v42 }
 0x67a   : > { %v16436_v34 = vadd.f32 %v6356_v26, %v6152_v56  ;;  %v16438_v16 = vpop.f32.mrf.mxu0 }
 0x67b   : > { %v16440_v23 = vpop.f32.mrf.mxu1 }
 0x67c   : > { %v6476_v25 = vpop.f32.mrf.mxu0 }
 0x67d   : > { %v16442_v10 = vpop.f32.mrf.mxu1  ;;  %v6477_v51 = vadd.f32 %v6476_v25, %v6322_v11 }
 0x67e   : > { %v16444_v12 = vpop.f32.mrf.mxu0 }
 0x67f   : > { %v16446_v39 = vpop.f32.mrf.mxu1 }
 0x680   : > { %v16448_v33 = vpop.f32.mrf.mxu0 }
 0x681   : > { %v6614_v27 = vpop.f32.mrf.mxu1 }
 0x682   : > { %v16450_v24 = vadd.f32 %v6614_v27, %v6469_v2  ;;  %v16452_v61 = vpop.f32.mrf.mxu0  ;;  %v7045_v2 = vsel %vm4903_vm0, %v7004_v20, 0 }
 0x683   : > { %v16454_v50 = vpop.f32.mrf.mxu1 }
 0x684   : > { %20082 = vst [vmem:[#allocation116_spill] sm:$0xff] %v16450_v24 }
 0x686   : > { %v16456_v62 = vpop.f32.mrf.mxu0 }
 0x687   : > { %v6623_v32 = vpop.f32.mrf.mxu1 }
 0x688   : > { %v16458_v9 = vadd.f32 %v6623_v32, %v6477_v51  ;;  %v16460_v42 = vpop.f32.mrf.mxu0  ;;  %v16506_v32 = vand.u32 4294901760, %v7045_v2 }
 0x689   : > { %v16462_v40 = vpop.f32.mrf.mxu1 }
 0x68a   : > { %20083 = vst [vmem:[#allocation113_spill] sm:$0xff] %v16458_v9  ;;  %20090 = vst [vmem:[#allocation99_spill] sm:$0xff] %v16506_v32  ;;  %v16520_v20 = vsub.f32 %v7045_v2, %v16506_v32 }
 0x68c   : > { %v16464_v52 = vpop.f32.mrf.mxu0  ;;  %v16466_v41 = vpop.f32.mrf.mxu1  ;;  %20095 = vst [vmem:[#allocation131_spill] sm:$0xff] %v16520_v20 }
 0x68e   : > { %v16468_v11 = vpop.f32.mrf.mxu0  ;;  %v16470_v18 = vpop.f32.mrf.mxu1 }
 0x690   : > { %v16472_v19 = vpop.f32.mrf.mxu0 }
 0x691   : > { %v16474_v31 = vpop.f32.mrf.mxu1 }
 0x692   : > { %v16476_v63 = vpop.f32.mrf.mxu0 }
 0x693   : > { %v16478_v46 = vpop.f32.mrf.mxu1 }
 0x694   : > { %v16480_v14 = vpop.f32.mrf.mxu0 }
 0x695   : > { %v16482_v15 = vpop.f32.mrf.mxu1 }
 0x696   : > { %v16484_v47 = vpop.f32.mrf.mxu0 }
 0x697   : > { %v16486_v8 = vpop.f32.mrf.mxu1 }
 0x698   : > { %v16488_v55 = vpop.f32.mrf.mxu0 }
 0x699   : > { %v16493_v56 = vpop.f32.mrf.mxu1 }
 0x69a   : > { %20084 = vst [vmem:[#allocation118_spill] sm:$0xff] %v16493_v56  ;;  %v16495_v3 = vpop.f32.mrf.mxu0 }
 0x69b   : > { %20085 = vst [vmem:[#allocation115_spill] sm:$0xff] %v16495_v3  ;;  %v16497_v26 = vpop.f32.mrf.mxu1  ;;  %v7005_v3 = vld [vmem:[%s19451_s1 + $0x148] sm:$0xff] }
 0x69c   : > { %20086 = vst [vmem:[#allocation120_spill] sm:$0xff] %v16497_v26  ;;  %v16500_v25 = vpop.f32.mrf.mxu0 }
 0x69d   : > { %20087 = vst [vmem:[#allocation124_spill] sm:$0xff] %v16500_v25  ;;  %v16502_v51 = vpop.f32.mrf.mxu1 }
 0x69e   : > { %20088 = vst [vmem:[#allocation117_spill] sm:$0xff] %v16502_v51  ;;  %v16504_v27 = vpop.f32.mrf.mxu0  ;;  %v12916_v51 = vmov 3  }
 0x69f   : > { %20089 = vst [vmem:[#allocation123_spill] sm:$0xff] %v16504_v27  ;;  %v16508_v36 = vpop.f32.mrf.mxu1  ;;  %12778 = vset.pattern.permute.xlu0 %v12916_v51  ;;  %12779 = vset.pattern.permute.xlu1 %v12916_v51  ;;  %v7006_v51 = vld [vmem:[%s19451_s1 + $0x150] sm:$0xff] }
 0x6a0   : > { %20091 = vst [vmem:[#allocation119_spill] sm:$0xff] %v16508_v36  ;;  %v16510_v9 = vpop.f32.mrf.mxu0  ;;  %v7048_v36 = vsel %vm4903_vm0, %v7005_v3, 0 }
 0x6a1   : > { %20092 = vst [vmem:[#allocation126_spill] sm:$0xff] %v16510_v9  ;;  %v16515_v56 = vpop.f32.mrf.mxu1  ;;  %v12827_v9 = vld [vmem:[%s19452_s2 + $0x38] sm:$0xff] }
 0x6a2   : > { %20093 = vst [vmem:[#allocation122_spill] sm:$0xff] %v16515_v56  ;;  %v16517_v24 = vpop.f32.mrf.mxu0  ;;  %7041 = vperm.xlu0 %12778, %v12827_v9   ;;  %v12828_v56 = vld [vmem:[%s19452_s2 + $0x30] sm:$0xff]  ;;  %v12829_v9 = vld [vmem:[%s19452_s2 + $0x20] sm:$0xff] }
 0x6a3   : > { %20094 = vst [vmem:[#allocation125_spill] sm:$0xff] %v16517_v24  ;;  %v16522_v27 = vpop.f32.mrf.mxu1  ;;  %7037 = vperm.xlu1 %12779, %v12828_v56   ;;  %v12830_v56 = vld [vmem:[%s19452_s2 + $0x28] sm:$0xff] }
 0x6a4   : > { %20096 = vst [vmem:[#allocation127_spill] sm:$0xff] %v16522_v27  ;;  %v16531_v24 = vpop.f32.mrf.mxu0  ;;  %v16538_v27 = vand.u32 4294901760, %v7048_v36 }
 0x6a5   : > { %20097 = vst [vmem:[#allocation132_spill] sm:$0xff] %v16531_v24  ;;  %v16533_v2 = vpop.f32.mrf.mxu1 }
 0x6a6   : > { %20098 = vst [vmem:[#allocation133_spill] sm:$0xff] %v16533_v2  ;;  %v16535_v32 = vpop.f32.mrf.mxu0  ;;  %20100 = vst [vmem:[#allocation129_spill] sm:$0xff] %v16538_v27  ;;  %7029 = vperm.xlu0 %12778, %v12829_v9   ;;  %v16563_v9 = vsub.f32 %v7048_v36, %v16538_v27  ;;  %v6088_v36 = vadd.f32 %v16385_v4, %v16389_v53  ;;  %v6099_v27 = vadd.f32 %v16392_v7, %v16394_v29  ;;  %v12833_v53 = vld [vmem:[%s19452_s2] sm:$0xff] }
 0x6a7   : > { %20099 = vst [vmem:[#allocation136_spill] sm:$0xff] %v16535_v32  ;;  %v16540_v3 = vpop.f32.mrf.mxu1  ;;  %7033 = vperm.xlu1 %12779, %v12830_v56   ;;  %v12831_v56 = vld [vmem:[%s19452_s2 + $0x10] sm:$0xff]  ;;  %v6132_v7 = vadd.f32 %v16409_v60, %v16379_v0  ;;  %v6143_v29 = vadd.f32 %v16416_v21, %v16377_v59 }
 0x6a8   : > { %20101 = vst [vmem:[#allocation134_spill] sm:$0xff] %v16540_v3  ;;  %v16548_v24 = vpop.f32.mrf.mxu0  ;;  %v20105_v3 = vand.u32 4294901760, %v16520_v20 }
 0x6a9   : > { %20102 = vst [vmem:[#allocation139_spill] sm:$0xff] %v16548_v24  ;;  %v16550_v2 = vpop.f32.mrf.mxu1  ;;  %v6345_v0 = vadd.f32 %v16425_v57, %v6132_v7  ;;  %v6352_v60 = vadd.f32 %v16434_v13, %v6143_v29  ;;  %v6493_v13 = vadd.f32 %v16456_v62, %v16414_v49  ;;  %v20117_v29 = vld [vmem:[#allocation113_spill] sm:$0xff] }
 0x6aa   : > { %20103 = vst [vmem:[#allocation128_spill] sm:$0xff] %v16550_v2  ;;  %v16555_v32 = vpop.f32.mrf.mxu0  ;;  %v16560_v25 = vsub.f32 %v16520_v20, %v20105_v3  ;;  %7021 = vperm.xlu0 %12778, %v12831_v56   ;;  %v12832_v2 = vld [vmem:[%s19452_s2 + $0x18] sm:$0xff]  ;;  %v16576_v3 = vsel %vm4903_vm0, %v7006_v51, 0  ;;  %v6121_v51 = vadd.f32 %v16401_v17, %v16387_v5  ;;  %v6317_v5 = vadd.f32 %v16398_v6, %v6088_v36  ;;  %v20112_v36 = vld [vmem:[#allocation118_spill] sm:$0xff] }
 0x6ab   : > { %20104 = vst [vmem:[#allocation141_spill] sm:$0xff] %v16555_v32  ;;  %v16565_v26 = vpop.f32.mrf.mxu1  ;;  %7025 = vperm.xlu1 %12779, %v12832_v2   ;;  %v19654_v32 = vand.u32 4294901760, %v16563_v9  ;;  %v6110_v2 = vadd.f32 %v16396_v38, %v16383_v30  ;;  %v16597_v4 = vand.u32 4294901760, %v16576_v3  ;;  %v12834_v30 = vld [vmem:[%s19452_s2 + $0x8] sm:$0xff]  ;;  %v6154_v38 = vadd.f32 %v16423_v28, %v16381_v35 }
 0x6ac   : > { %20106 = vst [vmem:[#allocation135_spill] sm:$0xff] %v16565_v26  ;;  %v16573_v24 = vpop.f32.mrf.mxu0  ;;  %v6338_v56 = vadd.f32 %v16418_v54, %v6121_v51  ;;  %v6471_v35 = vadd.f32 %v16438_v16, %v6317_v5  ;;  %v6642_v49 = vadd.f32 %v16474_v31, %v6493_v13  ;;  %v6511_v62 = vadd.f32 %v16476_v63, %v6352_v60  ;;  %v20110_v31 = vld [vmem:[#allocation116_spill] sm:$0xff]  ;;  %v20116_v5 = vld [vmem:[#allocation119_spill] sm:$0xff] }
 0x6ad   : > { %20107 = vst [vmem:[#allocation137_spill] sm:$0xff] %v16573_v24  ;;  %v16578_v20 = vpop.f32.mrf.mxu1  ;;  %v6359_v59 = vadd.f32 %v16440_v23, %v6154_v38  ;;  %v20121_v60 = vld [vmem:[#allocation127_spill] sm:$0xff] }
 0x6ae   : > { %20108 = vst [vmem:[#allocation101_spill] sm:$0xff] %v16578_v20  ;;  %v16584_v26 = vpop.f32.mrf.mxu0  ;;  %v6163_v20 = vadd.f32 %v16427_v48, %v16375_v22  ;;  %7013 = vperm.xlu0 %12778, %v12833_v53   ;;  %v6324_v48 = vadd.f32 %v16403_v45, %v6099_v27  ;;  %v6331_v53 = vadd.f32 %v16411_v44, %v6110_v2 }
 0x6af   : > { %v16594_v24 = vpop.f32.mrf.mxu1  ;;  %7017 = vperm.xlu1 %12779, %v12834_v30   ;;  %v6165_v30 = vadd.f32 %v16432_v58, %v16375_v22  ;;  %v6485_v22 = vadd.f32 %v16448_v33, %v16406_v1  ;;  %v6617_v57 = vadd.f32 %v16454_v50, %v6471_v35  ;;  %v6495_v16 = vadd.f32 %v16460_v42, %v6338_v56  ;;  %v20113_v56 = vld [vmem:[#allocation115_spill] sm:$0xff]  ;;  %v20122_v35 = vld [vmem:[#allocation125_spill] sm:$0xff] }
 0x6b0   : > { %v6832_v17 = vpop.f32.mrf.mxu0  ;;  %v6364_v45 = vadd.f32 %v16442_v10, %v6163_v20  ;;  %v6479_v54 = vadd.f32 %v16444_v12, %v6324_v48  ;;  %v6487_v58 = vadd.f32 %v16452_v61, %v6331_v53  ;;  %v6503_v1 = vadd.f32 %v16468_v11, %v6345_v0  ;;  %v20111_v20 = vld [vmem:[#allocation124_spill] sm:$0xff] }
 0x6b1   : > { %v16617_v6 = vpop.f32.mrf.mxu1  ;;  %v6366_v44 = vadd.f32 %v16446_v39, %v6165_v30  ;;  %v6501_v39 = vadd.f32 %v16464_v52, %v16421_v37  ;;  %v6633_v12 = vadd.f32 %v16466_v41, %v6485_v22  ;;  %v6509_v50 = vadd.f32 %v16472_v19, %v16430_v43  ;;  %v20109_v43 = vld [vmem:[#allocation120_spill] sm:$0xff]  ;;  %v20120_v30 = vld [vmem:[#allocation122_spill] sm:$0xff] }
 0x6b2   : > { %v6834_v21 = vpop.f32.mrf.mxu0  ;;  %v6626_v10 = vadd.f32 %v16462_v40, %v6479_v54  ;;  %v6635_v61 = vadd.f32 %v16470_v18, %v6487_v58  ;;  %v6644_v42 = vadd.f32 %v16478_v46, %v6495_v16  ;;  %v6517_v40 = vadd.f32 %v16480_v14, %v16436_v34  ;;  %v20114_v34 = vld [vmem:[#allocation117_spill] sm:$0xff]  ;;  %v20123_v58 = vld [vmem:[#allocation132_spill] sm:$0xff] }
 0x6b3   : > { %v6957_v28 = vpop.f32.mrf.mxu1  ;;  %v6651_v37 = vadd.f32 %v16482_v15, %v6501_v39  ;;  %v6519_v52 = vadd.f32 %v16484_v47, %v6359_v59  ;;  %v6653_v18 = vadd.f32 %v16486_v8, %v6503_v1  ;;  %v6525_v27 = vadd.f32 %v16488_v55, %v6364_v45  ;;  %v20115_v15 = vld [vmem:[#allocation123_spill] sm:$0xff]  ;;  %v20118_v8 = vld [vmem:[#allocation126_spill] sm:$0xff]  ;;  %v20119_v55 = vld [vmem:[#allocation133_spill] sm:$0xff] }
 0x6b4   : > { %v6839_v23 = vpop.f32.mrf.mxu0  ;;  %v6662_v19 = vadd.f32 %v20109_v43, %v6511_v62  ;;  %v6798_v63 = vadd.f32 %v20111_v20, %v20110_v31  ;;  %v6660_v46 = vadd.f32 %v20112_v36, %v6509_v50  ;;  %v6527_v2 = vadd.f32 %v20113_v56, %v6366_v44  ;;  %v20124_v1 = vld [vmem:[#allocation136_spill] sm:$0xff]  ;;  %v20125_v62 = vld [vmem:[#allocation141_spill] sm:$0xff]  ;;  %v20127_v20 = vld [vmem:[#allocation134_spill] sm:$0xff] }
 0x6b5   : > { %v6962_v33 = vpop.f32.mrf.mxu1  ;;  %v6669_v14 = vadd.f32 %v20114_v34, %v6517_v40  ;;  %v6800_v51 = vadd.f32 %v20115_v15, %v6617_v57  ;;  %v6671_v7 = vadd.f32 %v20116_v5, %v6519_v52  ;;  %v6805_v38 = vadd.f32 %v20118_v8, %v20117_v29 }
 0x6b6   : > { %v6841_v41 = vpop.f32.mrf.mxu0  ;;  %v16661_v48 = vadd.f32 %v20119_v55, %v6798_v63  ;;  %v6835_v53 = vadd.f32 %v6834_v21, %v6662_v19  ;;  %v6678_v0 = vadd.f32 %v20120_v30, %v6525_v27  ;;  %v6680_v59 = vadd.f32 %v20121_v60, %v6527_v2  ;;  %v20126_v21 = vld [vmem:[#allocation137_spill] sm:$0xff]  ;;  %v20129_v2 = vld [vmem:[#allocation128_spill] sm:$0xff] }
 0x6b7   : > { %v6964_v11 = vpop.f32.mrf.mxu1  ;;  %v6807_v45 = vadd.f32 %v20122_v35, %v6626_v10  ;;  %v6833_v44 = vadd.f32 %v6832_v17, %v6660_v46  ;;  %v6812_v57 = vadd.f32 %v20123_v58, %v6633_v12  ;;  %v6828_v13 = vadd.f32 %v16584_v26, %v6653_v18  ;;  %v20128_v12 = vld [vmem:[#allocation139_spill] sm:$0xff] }
 0x6b8   : > { %v6846_v54 = vpop.f32.mrf.mxu0  ;;  %v6840_v16 = vadd.f32 %v6839_v23, %v6669_v14  ;;  %v6814_v50 = vadd.f32 %v20124_v1, %v6635_v61  ;;  %v6821_v40 = vadd.f32 %v20125_v62, %v6644_v42  ;;  %v6826_v52 = vadd.f32 %v20126_v21, %v6651_v37 }
 0x6b9   : > { %v6969_v47 = vpop.f32.mrf.mxu1  ;;  %v6988_v19 = vmax.f32 %v16661_v48, 0.0  ;;  %v6842_v10 = vadd.f32 %v6841_v41, %v6671_v7  ;;  %v6965_v17 = vadd.f32 %v6964_v11, %v6828_v13  ;;  %v16673_v63 = vadd.f32 %v20127_v20, %v6800_v51 }
 0x6ba   : > { %v6970_v27 = vadd.f32 %v6969_v47, %v6833_v44  ;;  %v6819_v26 = vadd.f32 %v20128_v12, %v6642_v49  ;;  %v6958_v23 = vadd.f32 %v6957_v28, %v6821_v40  ;;  %v6963_v18 = vadd.f32 %v6962_v33, %v6826_v52  ;;  %v6848_v36 = vpop.f32.mrf.mxu0  ;;  %v20130_v33 = vld [vmem:[#allocation101_spill] sm:$0xff] }
 0x6bb   : > { %v6971_v22 = vpop.f32.mrf.mxu1  ;;  %v6847_v46 = vadd.f32 %v6846_v54, %v6678_v0  ;;  %v16677_v34 = vadd.f32 %v20129_v2, %v6805_v38  ;;  %v6951_v41 = vadd.f32 %v16594_v24, %v6814_v50  ;;  %v6997_v51 = vmax.f32 %v6965_v17, 0.0 }
 0x6bc   : > { %v6972_v39 = vadd.f32 %v6971_v22, %v6835_v53  ;;  %v6956_v11 = vadd.f32 %v16617_v6, %v6819_v26  ;;  %v6998_v14 = vmax.f32 %v6970_v27, 0.0  ;;  %v6849_v47 = vadd.f32 %v6848_v36, %v6680_v59  ;;  %v20131_v6 = vld [vmem:[#allocation135_spill] sm:$0xff] }
 0x6bd   : > { %v6976_v43 = vpop.f32.mrf.mxu1  ;;  %v6949_v5 = vadd.f32 %v20130_v33, %v6812_v57  ;;  %v6995_v7 = vmax.f32 %v6958_v23, 0.0  ;;  %v6996_v29 = vmax.f32 %v6963_v18, 0.0  ;;  %v6944_v0 = vadd.f32 %v20131_v6, %v6807_v45 }
 0x6be   : > { %v6977_v31 = vadd.f32 %v6976_v43, %v6840_v16  ;;  %v6999_v42 = vmax.f32 %v6972_v39, 0.0  ;;  %v6993_v60 = vmax.f32 %v6951_v41, 0.0  ;;  %v6994_v35 = vmax.f32 %v6956_v11, 0.0 }
 0x6bf   : > { %v6978_v61 = vpop.f32.mrf.mxu1  ;;  %v16689_v59 = vand.u32 4294901760, %v6998_v14  ;;  %v16691_v44 = vand.u32 4294901760, %v6997_v51  ;;  %v6990_v57 = vmax.f32 %v16677_v34, 0.0  ;;  %v6992_v13 = vmax.f32 %v6949_v5, 0.0 }
 0x6c0   : > { %v7000_v56 = vmax.f32 %v6977_v31, 0.0  ;;  %v6979_v37 = vadd.f32 %v6978_v61, %v6842_v10  ;;  %v16684_v53 = vand.u32 4294901760, %v6999_v42  ;;  %v16699_v16 = vand.u32 4294901760, %v6996_v29 }
 0x6c1   : > { %v6983_v15 = vpop.f32.mrf.mxu1  ;;  %v16704_v45 = vand.u32 4294901760, %v6995_v7  ;;  %v6991_v40 = vmax.f32 %v6944_v0, 0.0  ;;  %v16714_v21 = vand.u32 4294901760, %v6993_v60  ;;  %v16716_v52 = vand.u32 4294901760, %v6994_v35 }
 0x6c2   : > { %v7001_v49 = vmax.f32 %v6979_v37, 0.0  ;;  %v6984_v28 = vadd.f32 %v6983_v15, %v6847_v46  ;;  %v16682_v8 = vand.u32 4294901760, %v7000_v56  ;;  %v16707_v1 = vsub.f32 %v6999_v42, %v16684_v53 }
 0x6c3   : > { %v6985_v55 = vpop.f32.mrf.mxu1  ;;  %v16719_v27 = vsub.f32 %v6998_v14, %v16689_v59  ;;  %v16722_v43 = vsub.f32 %v6997_v51, %v16691_v44  ;;  %v6989_v20 = vmax.f32 %v16673_v63, 0.0  ;;  %v16731_v12 = vand.u32 4294901760, %v6990_v57 }
 0x6c4   : > { %v16686_v38 = vand.u32 4294901760, %v7001_v49  ;;  %v7002_v24 = vmax.f32 %v6984_v28, 0.0  ;;  %v6986_v30 = vadd.f32 %v6985_v55, %v6849_v47  ;;  %v16702_v39 = vsub.f32 %v7000_v56, %v16682_v8 }
 0x6c5   : > { %v16734_v26 = vsub.f32 %v6996_v29, %v16699_v16  ;;  %v16738_v18 = vand.u32 4294901760, %v6992_v13  ;;  %v16741_v36 = vsub.f32 %v6995_v7, %v16704_v45  ;;  %v7279_v63 = vand.u32 4294901760, %v16707_v1  ;;  %v7007_v7 = vld [vmem:[%s19451_s1 + $0x158] sm:$0xff] }
 0x6c6   : > { %v16694_v54 = vsub.f32 %v7001_v49, %v16686_v38  ;;  %v16696_v22 = vand.u32 4294901760, %v7002_v24  ;;  %v7003_v58 = vmax.f32 %v6986_v30, 0.0  ;;  %v7273_v23 = vand.u32 4294901760, %v16702_v39 }
 0x6c7   : > { %v16746_v46 = vand.u32 4294901760, %v6991_v40  ;;  %v16749_v42 = vsub.f32 %v6994_v35, %v16716_v52  ;;  %v7285_v56 = vand.u32 4294901760, %v16719_v27  ;;  %v16757_v2 = vsub.f32 %v6993_v60, %v16714_v21 }
 0x6c8   : > { %v16710_v50 = vsub.f32 %v7002_v24, %v16696_v22  ;;  %v16712_v62 = vand.u32 4294901760, %v7003_v58  ;;  %v7267_v31 = vand.u32 4294901760, %v16694_v54  ;;  %v7291_v11 = vand.u32 4294901760, %v16722_v43 }
 0x6c9   : > { %v16769_v14 = vand.u32 4294901760, %v6988_v19  ;;  %v16771_v15 = vand.u32 4294901760, %v6989_v20  ;;  %v19656_v51 = vand.u32 4294901760, %v16734_v26  ;;  %v7274_v47 = vsub.f32 %v16702_v39, %v7273_v23 }
 0x6ca   : > { %v7261_v10 = vand.u32 4294901760, %v16710_v50  ;;  %v16726_v17 = vsub.f32 %v7003_v58, %v16712_v62  ;;  %7085 = vmatprep.subr.mxu0 %v16712_v62  ;;  %v7268_v41 = vsub.f32 %v16694_v54, %v7267_v31  ;;  %v16779_v49 = vsub.f32 %v6992_v13, %v16738_v18 }
 0x6cb   : > { %7087 = vmatpush1.msra.mxu0 %v16696_v22  ;;  %v7280_v33 = vsub.f32 %v16707_v1, %v7279_v63  ;;  %v19653_v5 = vand.u32 4294901760, %v16741_v36  ;;  %v16790_v29 = vsub.f32 %v6991_v40, %v16746_v46  ;;  %v19652_v55 = vand.u32 4294901760, %v16749_v42 }
 0x6cc   : > { %7089 = vmatprep.subr.mxu0 %v16686_v38  ;;  %v7255_v61 = vand.u32 4294901760, %v16726_v17  ;;  %v7262_v37 = vsub.f32 %v16710_v50, %v7261_v10  ;;  %v7286_v24 = vsub.f32 %v16719_v27, %v7285_v56  ;;  %v16798_v6 = vsub.f32 %v6990_v57, %v16731_v12 }
 0x6cd   : > { %7091 = vmatpush1.msra.mxu0 %v16682_v8  ;;  %v7269_v0 = vand.u32 4294901760, %v7268_v41  ;;  %v7292_v60 = vsub.f32 %v16722_v43, %v7291_v11  ;;  %v19651_v35 = vand.u32 4294901760, %v16757_v2  ;;  %v16806_v58 = vsub.f32 %v6989_v20, %v16771_v15 }
 0x6ce   : > { %7093 = vmatprep.subr.mxu0 %v16684_v53  ;;  %v7256_v34 = vsub.f32 %v16726_v17, %v7255_v61  ;;  %v7263_v30 = vand.u32 4294901760, %v7262_v37  ;;  %v7298_v13 = vsub.f32 %v16734_v26, %v19656_v51  ;;  %v7275_v57 = vand.u32 4294901760, %v7274_v47 }
 0x6cf   : > { %7095 = vmatpush1.msra.mxu0 %v16689_v59  ;;  %v7054_v40 = vsel %vm4903_vm0, %v7007_v7, 0  ;;  %v19655_v37 = vand.u32 4294901760, %v16779_v49  ;;  %v7304_v20 = vsub.f32 %v16741_v36, %v19653_v5  ;;  %v16820_v41 = vsub.f32 %v16576_v3, %v16597_v4 }
 0x6d0   : > { %7097 = vmatprep.subr.mxu0 %v16691_v44  ;;  %v7257_v28 = vand.u32 4294901760, %v7256_v34  ;;  %v7281_v34 = vand.u32 4294901760, %v7280_v33  ;;  %v16825_v47 = vsub.f32 %v6988_v19, %v16769_v14  ;;  %v7287_v33 = vand.u32 4294901760, %v7286_v24 }
 0x6d1   : > { %7099 = vmatpush1.msra.mxu0 %v16699_v16  ;;  %v7327_v7 = vand.u32 4294901760, %v16790_v29  ;;  %v7293_v3 = vand.u32 4294901760, %v7292_v60  ;;  %v7316_v48 = vsub.f32 %v16757_v2, %v19651_v35  ;;  %v16837_v19 = vand.u32 4294901760, %v7054_v40 }
 0x6d2   : > { %7101 = vmatprep.subr.mxu0 %v16704_v45  ;;  %7258 = vmatprep.subr.mxu1 %v7257_v28  ;;  %v7310_v28 = vsub.f32 %v16749_v42, %v19652_v55  ;;  %v7299_v24 = vand.u32 4294901760, %v7298_v13  ;;  %v19659_v60 = vand.u32 4294901760, %v16806_v58  ;;  %v7305_v35 = vand.u32 4294901760, %v7304_v20 }
 0x6d3   : > { %7103 = vmatpush1.msra.mxu0 %v16716_v52  ;;  %7264 = vmatpush1.msra.mxu1 %v7263_v30  ;;  %v7333_v30 = vand.u32 4294901760, %v16798_v6  ;;  %v19657_v55 = vand.u32 4294901760, %v16820_v41  ;;  %v19658_v5 = vand.u32 4294901760, %v16825_v47  ;;  %v20132_v20 = vand.u32 4294901760, %v16560_v25 }
 0x6d4   : > { %7105 = vmatprep.subr.mxu0 %v16714_v21  ;;  %7270 = vmatprep.subr.mxu1 %v7269_v0  ;;  %v7008_v0 = vld [vmem:[%s19451_s1 + $0x160] sm:$0xff]  ;;  %v7311_v13 = vand.u32 4294901760, %v7310_v28  ;;  %v16864_v51 = vsub.f32 %v7054_v40, %v16837_v19  ;;  %v7009_v28 = vld [vmem:[%s19451_s1 + $0x168] sm:$0xff] }
 0x6d5   : > { %7107 = vmatpush1.msra.mxu0 %v16738_v18  ;;  %7276 = vmatpush1.msra.mxu1 %v7275_v57  ;;  %v7163_v57 = vsub.f32 %v16563_v9, %v19654_v32  ;;  %v7057_v32 = vsel %vm4903_vm0, %v7008_v0, 0 }
 0x6d6   : > { %7109 = vmatprep.subr.mxu0 %v16746_v46  ;;  %7282 = vmatprep.subr.mxu1 %v7281_v34  ;;  %v7322_v34 = vsub.f32 %v16779_v49, %v19655_v37  ;;  %v7334_v37 = vsub.f32 %v16798_v6, %v7333_v30  ;;  %v16877_v40 = vand.u32 4294901760, %v7057_v32 }
 0x6d7   : > { %7111 = vmatpush1.msra.mxu0 %v16731_v12  ;;  %7288 = vmatpush1.msra.mxu1 %v7287_v33  ;;  %v7328_v33 = vsub.f32 %v16790_v29, %v7327_v7  ;;  %v7164_v0 = vand.u32 4294901760, %v7163_v57  ;;  %v20133_v57 = vmov 0.0  }
 0x6d8   : > { %7113 = vmatprep.subr.mxu0 %v16771_v15  ;;  %7294 = vmatprep.subr.mxu1 %v7293_v3  ;;  %v7317_v3 = vand.u32 4294901760, %v7316_v48  ;;  %v7323_v25 = vand.u32 4294901760, %v7322_v34  ;;  %v7346_v48 = vsub.f32 %v16825_v47, %v19658_v5  ;;  %v7335_v34 = vand.u32 4294901760, %v7334_v37 }
 0x6d9   : > { %7115 = vmatpush1.msra.mxu0 %v16769_v14  ;;  %7300 = vmatpush1.msra.mxu1 %v7299_v24  ;;  %v7340_v24 = vsub.f32 %v16806_v58, %v19659_v60 }
 0x6da   : > { %7154 = vmatmul.mubr.f32.vlgmr.msra.gmra.mxu0 %v20132_v20  ;;  %7306 = vmatprep.subr.mxu1 %v7305_v35  ;;  %v7174_v35 = vsub.f32 %v16820_v41, %v19657_v55  ;;  %v7060_v20 = vsel %vm4903_vm0, %v7009_v28, 0  ;;  %v7010_v55 = vld [vmem:[%s19451_s1 + $0x170] sm:$0xff]  ;;  %v7347_v37 = vand.u32 4294901760, %v7346_v48 }
 0x6db   : > { %7456 = vmatprep.subr.mxu0 %v16726_v17  ;;  %7312 = vmatpush1.msra.mxu1 %v7311_v13  ;;  %v7329_v13 = vand.u32 4294901760, %v7328_v33  ;;  %v7341_v5 = vand.u32 4294901760, %v7340_v24  ;;  %v16892_v33 = vsub.f32 %v7057_v32, %v16877_v40  ;;  %v16894_v28 = vand.u32 4294901760, %v7060_v20  ;;  %v7011_v32 = vld [vmem:[%s19451_s1 + $0x178] sm:$0xff] }
 0x6dc   : > { %7459 = vmatpush1.msra.mxu0 %v16710_v50  ;;  %7318 = vmatprep.subr.mxu1 %v7317_v3  ;;  %v19661_v3 = vand.u32 4294901760, %v16864_v51  ;;  %v7175_v60 = vand.u32 4294901760, %v7174_v35  ;;  %v7066_v48 = vsel %vm4903_vm0, %v7011_v32, 0  ;;  %v20140_v50 = vand.u32 4294901760, %v16749_v42 }
 0x6dd   : > { %7462 = vmatprep.subr.mxu0 %v16694_v54  ;;  %7159 = vmatprep.mubr.f32.mxu0 %v20133_v57  ;;  %v16910_v24 = vsub.f32 %v7060_v20, %v16894_v28  ;;  %v20137_v54 = vand.u32 4294901760, %v16734_v26 }
 0x6de   : > { %7324 = vmatpush1.msra.mxu1 %v7323_v25  ;;  %7465 = vmatpush1.msra.mxu0 %v16702_v39  ;;  %v7063_v25 = vsel %vm4903_vm0, %v7010_v55, 0  ;;  %v19660_v55 = vand.u32 4294901760, %v16892_v33  ;;  %v20138_v39 = vand.u32 4294901760, %v16741_v36 }
 0x6df   : > { %7165 = vmatmul.mubr.f32.gmra.mxu0 %v7164_v0  ;;  %7330 = vmatprep.subr.mxu1 %v7329_v13  ;;  %v7185_v0 = vsub.f32 %v16864_v51, %v19661_v3  ;;  %v16912_v35 = vand.u32 4294901760, %v7063_v25  ;;  %v7206_v20 = vand.u32 4294901760, %v16910_v24 }
 0x6e0   : > { %7468 = vmatprep.subr.mxu0 %v16707_v1  ;;  %7336 = vmatpush1.msra.mxu1 %v7335_v34  ;;  %v7196_v13 = vsub.f32 %v16892_v33, %v19660_v55 }
 0x6e1   : > { %7471 = vmatpush1.msra.mxu0 %v16719_v27  ;;  %7342 = vmatprep.subr.mxu1 %v7341_v5  ;;  %v20134_v5 = vld [vmem:[#allocation99_spill] sm:$0xff]  ;;  %v16928_v34 = vsub.f32 %v7063_v25, %v16912_v35  ;;  %v7207_v25 = vsub.f32 %v16910_v24, %v7206_v20  ;;  %v20142_v27 = vand.u32 4294901760, %v16779_v49 }
 0x6e2   : > { %7474 = vmatprep.subr.mxu0 %v16722_v43  ;;  %7170 = vmatprep.mubr.f32.mxu0 %v20133_v57  ;;  %v7197_v32 = vand.u32 4294901760, %v7196_v13  ;;  %v8082_v43 = vld [vmem:[%s19451_s1 + $0x1c0] sm:$0xff] }
 0x6e3   : > { %7348 = vmatpush1.msra.mxu1 %v7347_v37  ;;  %7477 = vmatpush1.msra.mxu0 %v16734_v26  ;;  %v16930_v37 = vand.u32 4294901760, %v7066_v48  ;;  %v7217_v55 = vand.u32 4294901760, %v16928_v34  ;;  %v8083_v26 = vld [vmem:[%s19451_s1 + $0x1c8] sm:$0xff] }
 0x6e4   : > { %7176 = vmatmul.mubr.f32.gmra.mxu0 %v7175_v60  ;;  %7383 = vmatmul.mubr.f32.vlgmr.msra.gmra.mxu1 %v20134_v5  ;;  %v7186_v60 = vand.u32 4294901760, %v7185_v0  ;;  %v20135_v0 = vld [vmem:[#allocation129_spill] sm:$0xff] }
 0x6e5   : > { %7480 = vmatprep.subr.mxu0 %v16741_v36  ;;  %7616 = vmatprep.subr.mxu1 %v16712_v62  ;;  %v16944_v3 = vsub.f32 %v7066_v48, %v16930_v37  ;;  %v7218_v48 = vsub.f32 %v16928_v34, %v7217_v55  ;;  %v20159_v36 = vld [vmem:[#allocation27_spill] sm:$0xff] }
 0x6e6   : > { %7483 = vmatpush1.msra.mxu0 %v16749_v42  ;;  %7618 = vmatpush1.msra.mxu1 %v16696_v22  ;;  %v20161_v42 = vld [vmem:[#allocation28_spill] sm:$0xff] }
 0x6e7   : > { %7486 = vmatprep.subr.mxu0 %v16757_v2  ;;  %7620 = vmatprep.subr.mxu1 %v16686_v38  ;;  %v7228_v13 = vand.u32 4294901760, %v16944_v3 }
 0x6e8   : > { %7181 = vmatprep.mubr.f32.mxu0 %v20133_v57  ;;  %7388 = vmatprep.mubr.f32.mxu1 %v20133_v57 }
 0x6e9   : > { %7489 = vmatpush1.msra.mxu0 %v16779_v49  ;;  %7622 = vmatpush1.msra.mxu1 %v16682_v8  ;;  %v8085_v49 = vld [vmem:[%s19451_s1 + $0x1d8] sm:$0xff] }
 0x6ea   : > { %7187 = vmatmul.mubr.f32.gmra.mxu0 %v7186_v60  ;;  %7390 = vmatmul.mubr.f32.gmra.mxu1 %v20135_v0  ;;  %v7208_v60 = vand.u32 4294901760, %v7207_v25  ;;  %v7229_v25 = vsub.f32 %v16944_v3, %v7228_v13 }
 0x6eb   : > { %7492 = vmatprep.subr.mxu0 %v16790_v29  ;;  %7624 = vmatprep.subr.mxu1 %v16684_v53 }
 0x6ec   : > { %7495 = vmatpush1.msra.mxu0 %v16798_v6  ;;  %7626 = vmatpush1.msra.mxu1 %v16689_v59  ;;  %v7230_v17 = vand.u32 4294901760, %v7229_v25 }
 0x6ed   : > { %7498 = vmatprep.subr.mxu0 %v16806_v58  ;;  %7628 = vmatprep.subr.mxu1 %v16691_v44 }
 0x6ee   : > { %7192 = vmatprep.mubr.f32.mxu0 %v20133_v57  ;;  %7395 = vmatprep.mubr.f32.mxu1 %v20133_v57 }
 0x6ef   : > { %7501 = vmatpush1.msra.mxu0 %v16825_v47  ;;  %7630 = vmatpush1.msra.mxu1 %v16699_v16 }
 0x6f0   : > { %7198 = vmatmul.mubr.f32.gmra.mxu0 %v7197_v32  ;;  %7397 = vmatmul.mubr.f32.gmra.mxu1 %v16597_v4  ;;  %v7219_v32 = vand.u32 4294901760, %v7218_v48 }
 0x6f1   : > { %7632 = vmatprep.subr.mxu1 %v16704_v45  ;;  %7771 = vmatprep.subr.mxu0 %v7255_v61  ;;  %v20136_v61 = vld [vmem:[#allocation131_spill] sm:$0xff] }
 0x6f2   : > { %7634 = vmatpush1.msra.mxu1 %v16716_v52  ;;  %7203 = vmatprep.mubr.f32.mxu0 %v20133_v57  ;;  %v20139_v1 = vand.u32 4294901760, %v20136_v61 }
 0x6f3   : > { %7636 = vmatprep.subr.mxu1 %v16714_v21  ;;  %7402 = vmatprep.mubr.f32.mxu1 %v20133_v57 }
 0x6f4   : > { %7638 = vmatpush1.msra.mxu1 %v16738_v18  ;;  %7209 = vmatmul.mubr.f32.gmra.mxu0 %v7208_v60 }
 0x6f5   : > { %7404 = vmatmul.mubr.f32.gmra.mxu1 %v16837_v19  ;;  %7640 = vmatprep.subr.mxu1 %v16746_v46 }
 0x6f6   : > { %7642 = vmatpush1.msra.mxu1 %v16731_v12  ;;  %7214 = vmatprep.mubr.f32.mxu0 %v20133_v57 }
 0x6f7   : > { %7644 = vmatprep.subr.mxu1 %v16771_v15  ;;  %7409 = vmatprep.mubr.f32.mxu1 %v20133_v57 }
 0x6f8   : > { %7646 = vmatpush1.msra.mxu1 %v16769_v14  ;;  %7220 = vmatmul.mubr.f32.gmra.mxu0 %v7219_v32 }
 0x6f9   : > { %7411 = vmatmul.mubr.f32.gmra.mxu1 %v16877_v40  ;;  %7938 = vmatprep.subr.mxu1 %v16712_v62  ;;  %v20141_v62 = vand.u32 4294901760, %v16757_v2  ;;  %v20162_v2 = vld [vmem:[#allocation29_spill] sm:$0xff] }
 0x6fa   : > { %7225 = vmatprep.mubr.f32.mxu0 %v20133_v57  ;;  %7416 = vmatprep.mubr.f32.mxu1 %v20133_v57 }
 0x6fc   : > { %7231 = vmatmul.mubr.f32.gmra.mxu0 %v7230_v17  ;;  %v20169_v17 = vld [vmem:[#allocation14_spill] sm:$0xff] }
 0x6fd   : > { %7418 = vmatmul.mubr.f32.gmra.mxu1 %v16894_v28  ;;  %7534 = vmatprep.mubr.f32.mxu0 %v20133_v57 }
 0x6fe   : > { %7423 = vmatprep.mubr.f32.mxu1 %v20133_v57 }
 0x700   : > { %7537 = vmatmul.mubr.f32.vlgmr.msra.gmra.mxu0 %v20136_v61  ;;  %v8089_v61 = vld [vmem:[%s19451_s1 + $0x1f8] sm:$0xff] }
 0x701   : > { %7425 = vmatmul.mubr.f32.gmra.mxu1 %v16912_v35  ;;  %7775 = vmatpush1.msra.mxu0 %v7261_v10  ;;  %v20154_v10 = vld [vmem:[#allocation10_spill] sm:$0xff] }
 0x702   : > { %7779 = vmatprep.subr.mxu0 %v7267_v31  ;;  %7430 = vmatprep.mubr.f32.mxu1 %v20133_v57  ;;  %v8091_v31 = vsel %vm20155_vm9, %v8082_v43, 0 }
 0x703   : > { %7783 = vmatpush1.msra.mxu0 %v7273_v23  ;;  %7542 = vmatprep.mubr.f32.mxu0 %v20133_v57  ;;  %v20157_v23 = vld [vmem:[#allocation26_spill] sm:$0xff] }
 0x704   : > { %7787 = vmatprep.subr.mxu0 %v7279_v63  ;;  %7545 = vmatmul.mubr.f32.gmra.mxu0 %v16563_v9  ;;  %v17097_v63 = vand.u32 4294901760, %v8091_v31 }
 0x705   : > { %7432 = vmatmul.mubr.f32.gmra.mxu1 %v16930_v37  ;;  %7791 = vmatpush1.msra.mxu0 %v7285_v56  ;;  %v8084_v56 = vld [vmem:[%s19451_s1 + $0x1d0] sm:$0xff] }
 0x706   : > { %7795 = vmatprep.subr.mxu0 %v7291_v11  ;;  %7550 = vmatprep.mubr.f32.mxu0 %v20133_v57  ;;  %v20163_v11 = vld [vmem:[#allocation13_spill] sm:$0xff] }
 0x707   : > { %7799 = vmatpush1.msra.mxu0 %v20137_v54  ;;  %7679 = vmatprep.mubr.f32.mxu1 %v20133_v57 }
 0x708   : > { %7803 = vmatprep.subr.mxu0 %v20138_v39  ;;  %7553 = vmatmul.mubr.f32.gmra.mxu0 %v16820_v41  ;;  %v20170_v39 = vld [vmem:[#allocation11_spill] sm:$0xff] }
 0x709   : > { %7683 = vmatmul.mubr.f32.vlgmr.msra.gmra.mxu1 %v20139_v1  ;;  %7807 = vmatpush1.msra.mxu0 %v20140_v50 }
 0x70a   : > { %7940 = vmatpush1.msra.mxu1 %v16696_v22  ;;  %7811 = vmatprep.subr.mxu0 %v20141_v62  ;;  %v20143_v22 = vand.u32 4294901760, %v16563_v9  ;;  %v20146_v9 = vand.u32 4294901760, %v16820_v41  ;;  %v8086_v41 = vld [vmem:[%s19451_s1 + $0x1e0] sm:$0xff] }
 0x70b   : > { %7942 = vmatprep.subr.mxu1 %v16686_v38  ;;  %7815 = vmatpush1.msra.mxu0 %v20142_v27  ;;  %v20145_v38 = vand.u32 4294901760, %v16825_v47  ;;  %v8112_v27 = vsel %vm20171_vm6, %v8089_v61, 0 }
 0x70c   : > { %7944 = vmatpush1.msra.mxu1 %v16682_v8  ;;  %7558 = vmatprep.mubr.f32.mxu0 %v20133_v57  ;;  %v20144_v8 = vand.u32 4294901760, %v16806_v58 }
 0x70d   : > { %7688 = vmatprep.mubr.f32.mxu1 %v20133_v57  ;;  %7819 = vmatprep.subr.mxu0 %v7327_v7 }
 0x70e   : > { %7946 = vmatprep.subr.mxu1 %v16684_v53  ;;  %7561 = vmatmul.mubr.f32.gmra.mxu0 %v16864_v51  ;;  %v20147_v53 = vld [vmem:[#allocation7_spill] sm:$0xff] }
 0x70f   : > { %7692 = vmatmul.mubr.f32.gmra.mxu1 %v20143_v22  ;;  %7823 = vmatpush1.msra.mxu0 %v7333_v30  ;;  %v20172_v22 = vld [vmem:[#allocation15_spill] sm:$0xff] }
 0x710   : > { %7948 = vmatpush1.msra.mxu1 %v16689_v59  ;;  %7827 = vmatprep.subr.mxu0 %v20144_v8  ;;  %v20148_v59 = vand.u32 4294901760, %v16864_v51  ;;  %v8097_v51 = vsel %vm20164_vm7, %v8084_v56, 0 }
 0x711   : > { %7950 = vmatprep.subr.mxu1 %v16691_v44  ;;  %7831 = vmatpush1.msra.mxu0 %v20145_v38  ;;  %v20149_v44 = vand.u32 4294901760, %v16892_v33  ;;  %v17128_v58 = vand.u32 4294901760, %v8097_v51  ;;  %v20173_v38 = vld [vmem:[#allocation16_spill] sm:$0xff] }
 0x712   : > { %7952 = vmatpush1.msra.mxu1 %v16699_v16  ;;  %7566 = vmatprep.mubr.f32.mxu0 %v20133_v57  ;;  %v20150_v16 = vld [vmem:[#allocation24_spill] sm:$0xff] }
 0x713   : > { %7697 = vmatprep.mubr.f32.mxu1 %v20133_v57  ;;  %7954 = vmatprep.subr.mxu1 %v16704_v45  ;;  %v20151_v45 = vld [vmem:[#allocation8_spill] sm:$0xff] }
 0x714   : > { %7569 = vmatmul.mubr.f32.gmra.mxu0 %v16892_v33  ;;  %7701 = vmatmul.mubr.f32.gmra.mxu1 %v20146_v9  ;;  %v8087_v33 = vld [vmem:[%s19451_s1 + $0x1e8] sm:$0xff] }
 0x715   : > { %7956 = vmatpush1.msra.mxu1 %v16716_v52  ;;  %7574 = vmatprep.mubr.f32.mxu0 %v20133_v57  ;;  %v20153_v52 = vld [vmem:[#allocation9_spill] sm:$0xff] }
 0x716   : > { %7958 = vmatprep.subr.mxu1 %v16714_v21  ;;  %7706 = vmatprep.mubr.f32.mxu1 %v20133_v57  ;;  %v20152_v21 = vld [vmem:[#allocation6_spill] sm:$0xff] }
 0x717   : > { %7960 = vmatpush1.msra.mxu1 %v16738_v18  ;;  %8141 = vmatprep.subr.mxu0 %v20147_v53  ;;  %v20158_v18 = vld [vmem:[#allocation12_spill] sm:$0xff] }
 0x718   : > { %7962 = vmatprep.subr.mxu1 %v16746_v46  ;;  %7577 = vmatmul.mubr.f32.gmra.mxu0 %v16910_v24  ;;  %v8094_v46 = vsel %vm20160_vm4, %v8083_v26, 0 }
 0x719   : > { %7710 = vmatmul.mubr.f32.gmra.mxu1 %v20148_v59  ;;  %7582 = vmatprep.mubr.f32.mxu0 %v20133_v57 }
 0x71a   : > { %7964 = vmatpush1.msra.mxu1 %v16731_v12  ;;  %7715 = vmatprep.mubr.f32.mxu1 %v20133_v57  ;;  %v20156_v12 = vld [vmem:[#allocation25_spill] sm:$0xff] }
 0x71b   : > { %7966 = vmatprep.subr.mxu1 %v16771_v15  ;;  %v17113_v15 = vand.u32 4294901760, %v8094_v46 }
 0x71c   : > { %7968 = vmatpush1.msra.mxu1 %v16769_v14  ;;  %7585 = vmatmul.mubr.f32.gmra.mxu0 %v16928_v34  ;;  %v17111_v14 = vsub.f32 %v8091_v31, %v17097_v63  ;;  %v8106_v34 = vsel %vm20167_vm2, %v8087_v33, 0 }
 0x71d   : > { %7719 = vmatmul.mubr.f32.gmra.mxu1 %v20149_v44  ;;  %7590 = vmatprep.mubr.f32.mxu0 %v20133_v57  ;;  %v17126_v6 = vsub.f32 %v8094_v46, %v17113_v15  ;;  %v17178_v32 = vand.u32 4294901760, %v8106_v34  ;;  %v17211_v44 = vand.u32 4294901760, %v8112_v27 }
 0x71e   : > { %7724 = vmatprep.mubr.f32.mxu1 %v20133_v57  ;;  %8304 = vmatprep.subr.mxu1 %v20150_v16  ;;  %v8187_v29 = vand.u32 4294901760, %v17111_v14  ;;  %v20174_v16 = vld [vmem:[#allocation18_spill] sm:$0xff] }
 0x71f   : > { %v8198_v30 = vand.u32 4294901760, %v17126_v6  ;;  %v17194_v50 = vsub.f32 %v8106_v34, %v17178_v32  ;;  %v17224_v26 = vsub.f32 %v8112_v27, %v17211_v44 }
 0x720   : > { %7593 = vmatmul.mubr.f32.gmra.mxu0 %v16944_v3  ;;  %v8188_v7 = vsub.f32 %v17111_v14, %v8187_v29  ;;  %v8103_v3 = vsel %vm20166_vm15, %v8086_v41, 0  ;;  %v20180_v41 = vld [vmem:[#allocation23_spill] sm:$0xff] }
 0x721   : > { %7728 = vmatmul.mubr.f32.gmra.mxu1 %v7206_v20  ;;  %7864 = vmatprep.mubr.f32.mxu0 %v20133_v57  ;;  %v17162_v20 = vand.u32 4294901760, %v8103_v3  ;;  %v8242_v59 = vand.u32 4294901760, %v17194_v50 }
 0x722   : > { %7733 = vmatprep.mubr.f32.mxu1 %v20133_v57 }
 0x723   : > { %v8243_v31 = vsub.f32 %v17194_v50, %v8242_v59 }
 0x724   : > { %7866 = vmatmul.mubr.f32.vlgmr.msra.gmra.mxu0 %v20134_v5 }
 0x725   : > { %7737 = vmatmul.mubr.f32.gmra.mxu1 %v7217_v55  ;;  %7871 = vmatprep.mubr.f32.mxu0 %v20133_v57  ;;  %v8189_v55 = vand.u32 4294901760, %v8188_v7 }
 0x726   : > { %7742 = vmatprep.mubr.f32.mxu1 %v20133_v57  ;;  %8143 = vmatpush1.msra.mxu0 %v20151_v45 }
 0x727   : > { %8145 = vmatprep.subr.mxu0 %v20152_v21 }
 0x728   : > { %7873 = vmatmul.mubr.f32.gmra.mxu0 %v20135_v0 }
 0x729   : > { %7746 = vmatmul.mubr.f32.gmra.mxu1 %v7228_v13  ;;  %7878 = vmatprep.mubr.f32.mxu0 %v20133_v57 }
 0x72a   : > { %8001 = vmatprep.mubr.f32.mxu1 %v20133_v57  ;;  %8147 = vmatpush1.msra.mxu0 %v20153_v52 }
 0x72b   : > { %8149 = vmatprep.subr.mxu0 %v20154_v10 }
 0x72c   : > { %7880 = vmatmul.mubr.f32.gmra.mxu0 %v16597_v4 }
 0x72d   : > { %8003 = vmatmul.mubr.f32.vlgmr.msra.gmra.mxu1 %v20134_v5  ;;  %7885 = vmatprep.mubr.f32.mxu0 %v20133_v57 }
 0x72e   : > { %8008 = vmatprep.mubr.f32.mxu1 %v20133_v57  ;;  %8310 = vmatpush1.msra.mxu1 %v20156_v12 }
 0x72f   : > { %8316 = vmatprep.subr.mxu1 %v20157_v23  ;;  %8151 = vmatpush1.msra.mxu0 %v20158_v18  ;;  %v20175_v23 = vld [vmem:[#allocation19_spill] sm:$0xff] }
 0x730   : > { %7887 = vmatmul.mubr.f32.gmra.mxu0 %v16837_v19  ;;  %8322 = vmatpush1.msra.mxu1 %v20159_v36  ;;  %v8244_v36 = vand.u32 4294901760, %v8243_v31 }
 0x731   : > { %8010 = vmatmul.mubr.f32.gmra.mxu1 %v20135_v0  ;;  %7892 = vmatprep.mubr.f32.mxu0 %v20133_v57  ;;  %v8088_v0 = vld [vmem:[%s19451_s1 + $0x1f0] sm:$0xff] }
 0x732   : > { %8015 = vmatprep.mubr.f32.mxu1 %v20133_v57  ;;  %8328 = vmatprep.subr.mxu1 %v20161_v42  ;;  %v8109_v25 = vsel %vm20168_vm3, %v8088_v0, 0  ;;  %v8264_v42 = vand.u32 4294901760, %v17224_v26 }
 0x733   : > { %8334 = vmatpush1.msra.mxu1 %v20162_v2  ;;  %8452 = vmatprep.subr.mxu0 %v20163_v11  ;;  %v17196_v62 = vand.u32 4294901760, %v8109_v25  ;;  %v20176_v11 = vld [vmem:[#allocation20_spill] sm:$0xff] }
 0x734   : > { %7894 = vmatmul.mubr.f32.gmra.mxu0 %v16877_v40  ;;  %8592 = vmatprep.subr.mxu1 %v20147_v53  ;;  %v8265_v2 = vsub.f32 %v17224_v26, %v8264_v42 }
 0x735   : > { %8017 = vmatmul.mubr.f32.gmra.mxu1 %v16597_v4  ;;  %7899 = vmatprep.mubr.f32.mxu0 %v20133_v57  ;;  %v8100_v4 = vsel %vm20165_vm13, %v8085_v49, 0  ;;  %v20178_v49 = vld [vmem:[#allocation21_spill] sm:$0xff] }
 0x736   : > { %8022 = vmatprep.mubr.f32.mxu1 %v20133_v57  ;;  %v17137_v47 = vand.u32 4294901760, %v8100_v4 }
 0x738   : > { %7901 = vmatmul.mubr.f32.gmra.mxu0 %v16894_v28  ;;  %v17155_v5 = vsub.f32 %v8100_v4, %v17137_v47  ;;  %v20179_v4 = vld [vmem:[#allocation22_spill] sm:$0xff] }
 0x739   : > { %8024 = vmatmul.mubr.f32.gmra.mxu1 %v16837_v19  ;;  %7906 = vmatprep.mubr.f32.mxu0 %v20133_v57  ;;  %v17145_v19 = vsub.f32 %v8097_v51, %v17128_v58  ;;  %v20177_v51 = vld [vmem:[#allocation17_spill] sm:$0xff] }
 0x73a   : > { %8029 = vmatprep.mubr.f32.mxu1 %v20133_v57  ;;  %v8220_v60 = vand.u32 4294901760, %v17155_v5 }
 0x73b   : > { %v8209_v24 = vand.u32 4294901760, %v17145_v19 }
 0x73c   : > { %7908 = vmatmul.mubr.f32.gmra.mxu0 %v16912_v35  ;;  %v8221_v54 = vsub.f32 %v17155_v5, %v8220_v60 }
 0x73d   : > { %8031 = vmatmul.mubr.f32.gmra.mxu1 %v16877_v40  ;;  %7913 = vmatprep.mubr.f32.mxu0 %v20133_v57  ;;  %v8199_v40 = vsub.f32 %v17126_v6, %v8198_v30  ;;  %v8210_v13 = vsub.f32 %v17145_v19, %v8209_v24 }
 0x73e   : > { %8036 = vmatprep.mubr.f32.mxu1 %v20133_v57  ;;  %v8222_v8 = vand.u32 4294901760, %v8221_v54 }
 0x73f   : > { %v8200_v48 = vand.u32 4294901760, %v8199_v40 }
 0x740   : > { %7915 = vmatmul.mubr.f32.gmra.mxu0 %v16930_v37 }
 0x741   : > { %8038 = vmatmul.mubr.f32.gmra.mxu1 %v16894_v28  ;;  %8184 = vmatprep.mubr.f32.mxu0 %v20133_v57  ;;  %v17176_v28 = vsub.f32 %v8103_v3, %v17162_v20 }
 0x742   : > { %8043 = vmatprep.mubr.f32.mxu1 %v20133_v57 }
 0x743   : > { %v8231_v1 = vand.u32 4294901760, %v17176_v28 }
 0x744   : > { %8190 = vmatmul.mubr.f32.vlgmr.msra.gmra.mxu0 %v8189_v55 }
 0x745   : > { %8045 = vmatmul.mubr.f32.gmra.mxu1 %v16912_v35  ;;  %8195 = vmatprep.mubr.f32.mxu0 %v20133_v57  ;;  %v8211_v35 = vand.u32 4294901760, %v8210_v13  ;;  %v8232_v9 = vsub.f32 %v17176_v28, %v8231_v1 }
 0x746   : > { %8050 = vmatprep.mubr.f32.mxu1 %v20133_v57  ;;  %8455 = vmatpush1.msra.mxu0 %v20169_v17 }
 0x747   : > { %8458 = vmatprep.subr.mxu0 %v20170_v39  ;;  %v8233_v43 = vand.u32 4294901760, %v8232_v9 }
 0x748   : > { %8201 = vmatmul.mubr.f32.gmra.mxu0 %v8200_v48 }
 0x749   : > { %8052 = vmatmul.mubr.f32.gmra.mxu1 %v16930_v37  ;;  %8206 = vmatprep.mubr.f32.mxu0 %v20133_v57  ;;  %v17209_v37 = vsub.f32 %v8109_v25, %v17196_v62 }
 0x74a   : > { %8367 = vmatprep.mubr.f32.mxu1 %v20133_v57  ;;  %8461 = vmatpush1.msra.mxu0 %v20172_v22 }
 0x74b   : > { %8464 = vmatprep.subr.mxu0 %v20173_v38  ;;  %v8253_v12 = vand.u32 4294901760, %v17209_v37 }
 0x74c   : > { %8212 = vmatmul.mubr.f32.gmra.mxu0 %v8211_v35 }
 0x74d   : > { %8369 = vmatmul.mubr.f32.vlgmr.msra.gmra.mxu1 %v17097_v63  ;;  %8217 = vmatprep.mubr.f32.mxu0 %v20133_v57  ;;  %v8254_v46 = vsub.f32 %v17209_v37, %v8253_v12 }
 0x74e   : > { %8374 = vmatprep.mubr.f32.mxu1 %v20133_v57  ;;  %8594 = vmatpush1.msra.mxu1 %v20151_v45 }
 0x74f   : > { %8596 = vmatprep.subr.mxu1 %v20152_v21  ;;  %8467 = vmatpush1.msra.mxu0 %v20174_v16  ;;  %v8255_v56 = vand.u32 4294901760, %v8254_v46 }
 0x750   : > { %8223 = vmatmul.mubr.f32.gmra.mxu0 %v8222_v8  ;;  %8598 = vmatpush1.msra.mxu1 %v20153_v52 }
 0x751   : > { %8376 = vmatmul.mubr.f32.gmra.mxu1 %v17113_v15  ;;  %8228 = vmatprep.mubr.f32.mxu0 %v20133_v57 }
 0x752   : > { %8381 = vmatprep.mubr.f32.mxu1 %v20133_v57  ;;  %8600 = vmatprep.subr.mxu1 %v20154_v10 }
 0x753   : > { %8602 = vmatpush1.msra.mxu1 %v20158_v18  ;;  %8737 = vmatprep.subr.mxu0 %v20175_v23 }
 0x754   : > { %8234 = vmatmul.mubr.f32.gmra.mxu0 %v8233_v43  ;;  %8874 = vmatprep.subr.mxu1 %v20147_v53  ;;  %v8266_v53 = vand.u32 4294901760, %v8265_v2 }
 0x755   : > { %8383 = vmatmul.mubr.f32.gmra.mxu1 %v17128_v58  ;;  %8239 = vmatprep.mubr.f32.mxu0 %v20133_v57 }
 0x756   : > { %8388 = vmatprep.mubr.f32.mxu1 %v20133_v57 }
 0x758   : > { %8245 = vmatmul.mubr.f32.gmra.mxu0 %v8244_v36 }
 0x759   : > { %8390 = vmatmul.mubr.f32.gmra.mxu1 %v17137_v47  ;;  %8250 = vmatprep.mubr.f32.mxu0 %v20133_v57 }
 0x75a   : > { %8395 = vmatprep.mubr.f32.mxu1 %v20133_v57 }
 0x75c   : > { %8256 = vmatmul.mubr.f32.gmra.mxu0 %v8255_v56 }
 0x75d   : > { %8397 = vmatmul.mubr.f32.gmra.mxu1 %v17162_v20  ;;  %8261 = vmatprep.mubr.f32.mxu0 %v20133_v57 }
 0x75e   : > { %8402 = vmatprep.mubr.f32.mxu1 %v20133_v57 }
 0x760   : > { %8267 = vmatmul.mubr.f32.gmra.mxu0 %v8266_v53 }
 0x761   : > { %8404 = vmatmul.mubr.f32.gmra.mxu1 %v17178_v32  ;;  %8500 = vmatprep.mubr.f32.mxu0 %v20133_v57 }
 0x762   : > { %8409 = vmatprep.mubr.f32.mxu1 %v20133_v57 }
 0x764   : > { %8503 = vmatmul.mubr.f32.vlgmr.msra.gmra.mxu0 %v17111_v14 }
 0x765   : > { %8411 = vmatmul.mubr.f32.gmra.mxu1 %v17196_v62  ;;  %8508 = vmatprep.mubr.f32.mxu0 %v20133_v57 }
 0x766   : > { %8416 = vmatprep.mubr.f32.mxu1 %v20133_v57  ;;  %8741 = vmatpush1.msra.mxu0 %v20176_v11 }
 0x767   : > { %8745 = vmatprep.subr.mxu0 %v20177_v51 }
 0x768   : > { %8511 = vmatmul.mubr.f32.gmra.mxu0 %v17126_v6 }
 0x769   : > { %8418 = vmatmul.mubr.f32.gmra.mxu1 %v17211_v44  ;;  %8516 = vmatprep.mubr.f32.mxu0 %v20133_v57 }
 0x76a   : > { %8635 = vmatprep.mubr.f32.mxu1 %v20133_v57  ;;  %8749 = vmatpush1.msra.mxu0 %v20178_v49 }
 0x76b   : > { %8753 = vmatprep.subr.mxu0 %v20179_v4 }
 0x76c   : > { %8519 = vmatmul.mubr.f32.gmra.mxu0 %v17145_v19 }
 0x76d   : > { %8639 = vmatmul.mubr.f32.vlgmr.msra.gmra.mxu1 %v8187_v29  ;;  %8524 = vmatprep.mubr.f32.mxu0 %v20133_v57 }
 0x76e   : > { %8644 = vmatprep.mubr.f32.mxu1 %v20133_v57  ;;  %8876 = vmatpush1.msra.mxu1 %v20151_v45  ;;  %v17311_v45 = vpop.permute.xlu0 %7041 }
 0x76f   : > { %8878 = vmatprep.subr.mxu1 %v20152_v21  ;;  %8757 = vmatpush1.msra.mxu0 %v20180_v41  ;;  %v17318_v21 = vpop.permute.xlu1 %7037 }
 0x770   : > { %8527 = vmatmul.mubr.f32.gmra.mxu0 %v17155_v5  ;;  %8880 = vmatpush1.msra.mxu1 %v20153_v52 }
 0x771   : > { %8648 = vmatmul.mubr.f32.gmra.mxu1 %v8198_v30  ;;  %8532 = vmatprep.mubr.f32.mxu0 %v20133_v57 }
 0x772   : > { %8653 = vmatprep.mubr.f32.mxu1 %v20133_v57  ;;  %8882 = vmatprep.subr.mxu1 %v20154_v10  ;;  %v17322_v52 = vpop.permute.xlu0 %7029 }
 0x773   : > { %8884 = vmatpush1.msra.mxu1 %v20158_v18  ;;  %v17329_v10 = vpop.permute.xlu1 %7033 }
 0x774   : > { %8535 = vmatmul.mubr.f32.gmra.mxu0 %v17176_v28 }
 0x775   : > { %8657 = vmatmul.mubr.f32.gmra.mxu1 %v8209_v24  ;;  %8540 = vmatprep.mubr.f32.mxu0 %v20133_v57 }
 0x776   : > { %8662 = vmatprep.mubr.f32.mxu1 %v20133_v57  ;;  %v17331_v18 = vpop.permute.xlu0 %7021 }
 0x778   : > { %8543 = vmatmul.mubr.f32.gmra.mxu0 %v17194_v50 }
 0x779   : > { %8666 = vmatmul.mubr.f32.gmra.mxu1 %v8220_v60  ;;  %8548 = vmatprep.mubr.f32.mxu0 %v20133_v57 }
 0x77a   : > { %8671 = vmatprep.mubr.f32.mxu1 %v20133_v57  ;;  %v17344_v29 = vpop.permute.xlu0 %7013 }
 0x77c   : > { %8551 = vmatmul.mubr.f32.gmra.mxu0 %v17209_v37 }
 0x77d   : > { %8675 = vmatmul.mubr.f32.gmra.mxu1 %v8231_v1  ;;  %8556 = vmatprep.mubr.f32.mxu0 %v20133_v57 }
 0x77e   : > { %8680 = vmatprep.mubr.f32.mxu1 %v20133_v57 }
 0x780   : > { %8559 = vmatmul.mubr.f32.gmra.mxu0 %v17224_v26 }
 0x781   : > { %8684 = vmatmul.mubr.f32.gmra.mxu1 %v8242_v59  ;;  %8790 = vmatprep.mubr.f32.mxu0 %v20133_v57 }
 0x782   : > { %8689 = vmatprep.mubr.f32.mxu1 %v20133_v57 }
 0x784   : > { %8792 = vmatmul.mubr.f32.vlgmr.msra.gmra.mxu0 %v17097_v63 }
 0x785   : > { %8693 = vmatmul.mubr.f32.gmra.mxu1 %v8253_v12  ;;  %8797 = vmatprep.mubr.f32.mxu0 %v20133_v57 }
 0x786   : > { %8698 = vmatprep.mubr.f32.mxu1 %v20133_v57 }
 0x788   : > { %8799 = vmatmul.mubr.f32.gmra.mxu0 %v17113_v15 }
 0x789   : > { %8702 = vmatmul.mubr.f32.gmra.mxu1 %v8264_v42  ;;  %8804 = vmatprep.mubr.f32.mxu0 %v20133_v57 }
 0x78a   : > { %8917 = vmatprep.mubr.f32.mxu1 %v20133_v57 }
 0x78c   : > { %8806 = vmatmul.mubr.f32.gmra.mxu0 %v17128_v58 }
 0x78d   : > { %8919 = vmatmul.mubr.f32.vlgmr.msra.gmra.mxu1 %v17097_v63  ;;  %8811 = vmatprep.mubr.f32.mxu0 %v20133_v57 }
 0x78e   : > { %8924 = vmatprep.mubr.f32.mxu1 %v20133_v57 }
 0x790   : > { %8813 = vmatmul.mubr.f32.gmra.mxu0 %v17137_v47 }
 0x791   : > { %8926 = vmatmul.mubr.f32.gmra.mxu1 %v17113_v15  ;;  %8818 = vmatprep.mubr.f32.mxu0 %v20133_v57  ;;  %v17340_v15 = vpop.permute.xlu1 %7025 }
 0x792   : > { %8931 = vmatprep.mubr.f32.mxu1 %v20133_v57 }
 0x794   : > { %8820 = vmatmul.mubr.f32.gmra.mxu0 %v17162_v20 }
 0x795   : > { %8933 = vmatmul.mubr.f32.gmra.mxu1 %v17128_v58  ;;  %8825 = vmatprep.mubr.f32.mxu0 %v20133_v57  ;;  %v17354_v7 = vpop.permute.xlu1 %7017 }
 0x796   : > { %8938 = vmatprep.mubr.f32.mxu1 %v20133_v57 }
 0x798   : > { %8827 = vmatmul.mubr.f32.gmra.mxu0 %v17178_v32 }
 0x799   : > { %8940 = vmatmul.mubr.f32.gmra.mxu1 %v17137_v47  ;;  %8832 = vmatprep.mubr.f32.mxu0 %v20133_v57 }
 0x79a   : > { %v7155_v63 = vpop.f32.mrf.mxu0  ;;  %8945 = vmatprep.mubr.f32.mxu1 %v20133_v57 }
 0x79b   : > { %v7156_v58 = vadd.f32 %v7155_v63, %v17344_v29 }
 0x79c   : > { %v17337_v14 = vpop.f32.mrf.mxu0  ;;  %8834 = vmatmul.mubr.f32.gmra.mxu0 %v17196_v62 }
 0x79d   : > { %8947 = vmatmul.mubr.f32.gmra.mxu1 %v17162_v20  ;;  %8839 = vmatprep.mubr.f32.mxu0 %v20133_v57 }
 0x79e   : > { %8952 = vmatprep.mubr.f32.mxu1 %v20133_v57 }
 0x79f   : > { %v7166_v6 = vpop.f32.mrf.mxu0 }
 0x7a0   : > { %8841 = vmatmul.mubr.f32.gmra.mxu0 %v17211_v44  ;;  %v7167_v55 = vadd.f32 %v7166_v6, %v17354_v7 }
 0x7a1   : > { %v17349_v47 = vpop.f32.mrf.mxu0  ;;  %8954 = vmatmul.mubr.f32.gmra.mxu1 %v17178_v32  ;;  %9078 = vmatprep.mubr.f32.mxu0 %v20133_v57 }
 0x7a2   : > { %8959 = vmatprep.mubr.f32.mxu1 %v20133_v57 }
 0x7a4   : > { %v7177_v30 = vpop.f32.mrf.mxu0  ;;  %v7384_v19 = vpop.f32.mrf.mxu1 }
 0x7a5   : > { %v7385_v3 = vadd.f32 %v7384_v19, %v7156_v58  ;;  %8961 = vmatmul.mubr.f32.gmra.mxu1 %v17196_v62  ;;  %v7178_v60 = vadd.f32 %v7177_v30, %v17331_v18 }
 0x7a6   : > { %v17357_v33 = vpop.f32.mrf.mxu0  ;;  %v17359_v5 = vpop.f32.mrf.mxu1  ;;  %8966 = vmatprep.mubr.f32.mxu1 %v20133_v57 }
 0x7a9   : > { %8968 = vmatmul.mubr.f32.gmra.mxu1 %v17211_v44 }
 0x7aa   : > { %v7188_v40 = vpop.f32.mrf.mxu0  ;;  %v7391_v24 = vpop.f32.mrf.mxu1  ;;  %9311 = vmatprep.mubr.f32.mxu1 %v20133_v57 }
 0x7ab   : > { %v7392_v20 = vadd.f32 %v7391_v24, %v7167_v55  ;;  %v7189_v32 = vadd.f32 %v7188_v40, %v17340_v15 }
 0x7ac   : > { %v17365_v34 = vpop.f32.mrf.mxu0  ;;  %v17367_v0 = vpop.f32.mrf.mxu1 }
 0x7b0   : > { %v7199_v48 = vpop.f32.mrf.mxu0  ;;  %v7398_v13 = vpop.f32.mrf.mxu1 }
 0x7b1   : > { %v17370_v28 = vadd.f32 %v7398_v13, %v7178_v60  ;;  %v7200_v39 = vadd.f32 %v7199_v48, %v17322_v52 }
 0x7b2   : > { %v17373_v25 = vpop.f32.mrf.mxu0  ;;  %v17375_v17 = vpop.f32.mrf.mxu1 }
 0x7b4   : > { %v7210_v61 = vpop.f32.mrf.mxu0 }
 0x7b5   : > { %v7405_v54 = vpop.f32.mrf.mxu1  ;;  %v7211_v22 = vadd.f32 %v7210_v61, %v17329_v10 }
 0x7b6   : > { %v17378_v35 = vadd.f32 %v7405_v54, %v7189_v32  ;;  %v17380_v1 = vpop.f32.mrf.mxu0 }
 0x7b7   : > { %v17382_v50 = vpop.f32.mrf.mxu1 }
 0x7b8   : > { %v7221_v62 = vpop.f32.mrf.mxu0 }
 0x7b9   : > { %v7412_v27 = vpop.f32.mrf.mxu1  ;;  %v7222_v44 = vadd.f32 %v7221_v62, %v17318_v21 }
 0x7ba   : > { %v17385_v8 = vadd.f32 %v7412_v27, %v7200_v39  ;;  %v17387_v38 = vpop.f32.mrf.mxu0 }
 0x7bb   : > { %v17389_v9 = vpop.f32.mrf.mxu1 }
 0x7bc   : > { %v17391_v59 = vpop.f32.mrf.mxu0 }
 0x7bd   : > { %v7419_v37 = vpop.f32.mrf.mxu1 }
 0x7be   : > { %v17394_v16 = vadd.f32 %v7419_v37, %v7211_v22  ;;  %v17396_v43 = vpop.f32.mrf.mxu0  ;;  %v8074_v22 = vld [vmem:[%s19451_s1 + $0x180] sm:$0xff] }
 0x7bf   : > { %v17398_v31 = vpop.f32.mrf.mxu1 }
 0x7c0   : > { %v7538_v12 = vpop.f32.mrf.mxu0 }
 0x7c1   : > { %v7426_v26 = vpop.f32.mrf.mxu1  ;;  %v7539_v23 = vadd.f32 %v7538_v12, %v7385_v3 }
 0x7c2   : > { %v17400_v36 = vadd.f32 %v7426_v26, %v7222_v44  ;;  %v17402_v46 = vpop.f32.mrf.mxu0  ;;  %v8975_v26 = vsel %vm4903_vm0, %v8074_v22, 0 }
 0x7c3   : > { %v17404_v42 = vpop.f32.mrf.mxu1 }
 0x7c4   : > { %v7546_v56 = vpop.f32.mrf.mxu0 }
 0x7c5   : > { %v17406_v2 = vpop.f32.mrf.mxu1  ;;  %v7547_v53 = vadd.f32 %v7546_v56, %v7392_v20 }
 0x7c6   : > { %v17408_v11 = vpop.f32.mrf.mxu0 }
 0x7c7   : > { %v17410_v51 = vpop.f32.mrf.mxu1 }
 0x7c8   : > { %v17412_v49 = vpop.f32.mrf.mxu0 }
 0x7c9   : > { %v7684_v4 = vpop.f32.mrf.mxu1 }
 0x7ca   : > { %v17414_v41 = vadd.f32 %v7684_v4, %v7539_v23  ;;  %v17416_v63 = vpop.f32.mrf.mxu0  ;;  %v17468_v4 = vand.u32 4294901760, %v8975_v26 }
 0x7cb   : > { %v17418_v6 = vpop.f32.mrf.mxu1 }
 0x7cc   : > { %20190 = vst [vmem:[#allocation145_spill] sm:$0xff] %v17468_v4  ;;  %v17482_v22 = vsub.f32 %v8975_v26, %v17468_v4  ;;  %v8076_v26 = vld [vmem:[%s19451_s1 + $0x190] sm:$0xff] }
 0x7ce   : > { %v17420_v58 = vpop.f32.mrf.mxu0  ;;  %20195 = vst [vmem:[#allocation84_spill] sm:$0xff] %v17482_v22 }
 0x7cf   : > { %v7693_v30 = vpop.f32.mrf.mxu1 }
 0x7d0   : > { %v17422_v19 = vadd.f32 %v7693_v30, %v7547_v53  ;;  %v17424_v3 = vpop.f32.mrf.mxu0 }
 0x7d1   : > { %v17426_v55 = vpop.f32.mrf.mxu1 }
 0x7d2   : > { %20181 = vst [vmem:[#allocation142_spill] sm:$0xff] %v17422_v19  ;;  %v8075_v19 = vld [vmem:[%s19451_s1 + $0x188] sm:$0xff] }
 0x7d4   : > { %v17428_v40 = vpop.f32.mrf.mxu0  ;;  %v17430_v24 = vpop.f32.mrf.mxu1 }
 0x7d6   : > { %v17432_v20 = vpop.f32.mrf.mxu0  ;;  %v17434_v60 = vpop.f32.mrf.mxu1 }
 0x7d8   : > { %v17436_v48 = vpop.f32.mrf.mxu0 }
 0x7d9   : > { %v17438_v13 = vpop.f32.mrf.mxu1 }
 0x7da   : > { %v17440_v32 = vpop.f32.mrf.mxu0 }
 0x7db   : > { %v17442_v61 = vpop.f32.mrf.mxu1 }
 0x7dc   : > { %v17444_v54 = vpop.f32.mrf.mxu0 }
 0x7dd   : > { %v17446_v39 = vpop.f32.mrf.mxu1 }
 0x7de   : > { %20182 = vst [vmem:[#allocation146_spill] sm:$0xff] %v17446_v39  ;;  %v17448_v62 = vpop.f32.mrf.mxu0 }
 0x7df   : > { %20183 = vst [vmem:[#allocation148_spill] sm:$0xff] %v17448_v62  ;;  %v17450_v27 = vpop.f32.mrf.mxu1 }
 0x7e0   : > { %20184 = vst [vmem:[#allocation138_spill] sm:$0xff] %v17450_v27  ;;  %v17455_v37 = vpop.f32.mrf.mxu0  ;;  %v19665_v27 = vand.u32 4294901760, %v17482_v22 }
 0x7e1   : > { %20185 = vst [vmem:[#allocation143_spill] sm:$0xff] %v17455_v37  ;;  %v17457_v44 = vpop.f32.mrf.mxu1 }
 0x7e2   : > { %20186 = vst [vmem:[#allocation130_spill] sm:$0xff] %v17457_v44  ;;  %v17459_v12 = vpop.f32.mrf.mxu0 }
 0x7e3   : > { %20187 = vst [vmem:[#allocation144_spill] sm:$0xff] %v17459_v12  ;;  %v17462_v23 = vpop.f32.mrf.mxu1 }
 0x7e4   : > { %20188 = vst [vmem:[#allocation103_spill] sm:$0xff] %v17462_v23  ;;  %v17464_v56 = vpop.f32.mrf.mxu0 }
 0x7e5   : > { %v17466_v53 = vpop.f32.mrf.mxu1 }
 0x7e6   : > { %20189 = vst [vmem:[#allocation140_spill] sm:$0xff] %v17466_v53  ;;  %v17470_v30 = vpop.f32.mrf.mxu0  ;;  %v8978_v53 = vsel %vm4903_vm0, %v8075_v19, 0 }
 0x7e7   : > { %20191 = vst [vmem:[#allocation147_spill] sm:$0xff] %v17470_v30  ;;  %v17472_v57 = vpop.f32.mrf.mxu1  ;;  %v17494_v62 = vand.u32 4294901760, %v8978_v53 }
 0x7e8   : > { %20192 = vst [vmem:[#allocation106_spill] sm:$0xff] %v17472_v57  ;;  %v17477_v44 = vpop.f32.mrf.mxu0 }
 0x7e9   : > { %20193 = vst [vmem:[#allocation109_spill] sm:$0xff] %v17477_v44  ;;  %v17479_v12 = vpop.f32.mrf.mxu1  ;;  %20199 = vst [vmem:[#allocation80_spill] sm:$0xff] %v17494_v62 }
 0x7ea   : > { %20194 = vst [vmem:[#allocation112_spill] sm:$0xff] %v17479_v12  ;;  %v17484_v23 = vpop.f32.mrf.mxu0 }
 0x7eb   : > { %20196 = vst [vmem:[#allocation83_spill] sm:$0xff] %v17484_v23  ;;  %v17487_v37 = vpop.f32.mrf.mxu1  ;;  %v17513_v23 = vsub.f32 %v8978_v53, %v17494_v62  ;;  %v7169_v53 = vadd.f32 %v17349_v47, %v17354_v7  ;;  %v7233_v47 = vadd.f32 %v17391_v59, %v17311_v45  ;;  %v7202_v62 = vadd.f32 %v17373_v25, %v17322_v52 }
 0x7ec   : > { %20197 = vst [vmem:[#allocation82_spill] sm:$0xff] %v17487_v37  ;;  %v17489_v30 = vpop.f32.mrf.mxu0  ;;  %v7235_v52 = vadd.f32 %v17396_v43, %v17311_v45  ;;  %v7555_v45 = vadd.f32 %v17412_v49, %v17370_v28  ;;  %v7868_v28 = vadd.f32 %v17464_v56, %v17414_v41  ;;  %v20209_v56 = vld [vmem:[#allocation138_spill] sm:$0xff] }
 0x7ed   : > { %20198 = vst [vmem:[#allocation81_spill] sm:$0xff] %v17489_v30  ;;  %v17491_v57 = vpop.f32.mrf.mxu1  ;;  %v17510_v30 = vsub.f32 %v17482_v22, %v19665_v27  ;;  %20204 = vst [vmem:[#allocation85_spill] sm:$0xff] %v17513_v23  ;;  %v8077_v27 = vld [vmem:[%s19451_s1 + $0x198] sm:$0xff] }
 0x7ee   : > { %v17496_v44 = vpop.f32.mrf.mxu0  ;;  %v17595_v41 = vadd.f32 %v17491_v57, %v7868_v28 }
 0x7ef   : > { %20200 = vst [vmem:[#allocation149_spill] sm:$0xff] %v17496_v44  ;;  %v17498_v12 = vpop.f32.mrf.mxu1  ;;  %20203 = vst [vmem:[#allocation89_spill] sm:$0xff] %v17510_v30  ;;  %v17518_v44 = vsel %vm4903_vm0, %v8076_v26, 0  ;;  %v7213_v26 = vadd.f32 %v17380_v1, %v17329_v10  ;;  %v7224_v30 = vadd.f32 %v17387_v38, %v17318_v21  ;;  %v7415_v10 = vadd.f32 %v17389_v9, %v7202_v62 }
 0x7f0   : > { %20201 = vst [vmem:[#allocation78_spill] sm:$0xff] %v17498_v12  ;;  %v17503_v4 = vpop.f32.mrf.mxu0 }
 0x7f1   : > { %20202 = vst [vmem:[#allocation79_spill] sm:$0xff] %v17503_v4  ;;  %v17505_v19 = vpop.f32.mrf.mxu1  ;;  %v7158_v4 = vadd.f32 %v17337_v14, %v17344_v29  ;;  %v7180_v14 = vadd.f32 %v17357_v33, %v17331_v18  ;;  %v17556_v33 = vsel %vm4903_vm0, %v8077_v27, 0  ;;  %v7422_v1 = vadd.f32 %v17398_v31, %v7213_v26  ;;  %v20213_v26 = vld [vmem:[#allocation103_spill] sm:$0xff] }
 0x7f2   : > { %v17515_v37 = vpop.f32.mrf.mxu0  ;;  %v7429_v21 = vadd.f32 %v17404_v42, %v7224_v30  ;;  %v7563_v42 = vadd.f32 %v17420_v58, %v17378_v35  ;;  %v7579_v35 = vadd.f32 %v17436_v48, %v17394_v16  ;;  %v20210_v48 = vld [vmem:[#allocation143_spill] sm:$0xff]  ;;  %v20211_v30 = vld [vmem:[#allocation130_spill] sm:$0xff] }
 0x7f3   : > { %v17520_v12 = vpop.f32.mrf.mxu1  ;;  %v7387_v29 = vadd.f32 %v17359_v5, %v7158_v4  ;;  %v7401_v5 = vadd.f32 %v17375_v17, %v7180_v14  ;;  %v7436_v17 = vadd.f32 %v17410_v51, %v7235_v52  ;;  %v7571_v51 = vadd.f32 %v17428_v40, %v17385_v8 }
 0x7f4   : > { %20205 = vst [vmem:[#allocation90_spill] sm:$0xff] %v17520_v12  ;;  %v17524_v39 = vpop.f32.mrf.mxu0  ;;  %v17536_v12 = vand.u32 4294901760, %v17518_v44  ;;  %v7712_v58 = vadd.f32 %v17438_v13, %v7563_v42  ;;  %v7587_v40 = vadd.f32 %v17444_v54, %v17400_v36  ;;  %v20214_v36 = vld [vmem:[#allocation140_spill] sm:$0xff] }
 0x7f5   : > { %20206 = vst [vmem:[#allocation87_spill] sm:$0xff] %v17524_v39  ;;  %v17531_v22 = vpop.f32.mrf.mxu1  ;;  %v7191_v39 = vadd.f32 %v17365_v34, %v17340_v15  ;;  %v7394_v15 = vadd.f32 %v17367_v0, %v7169_v53  ;;  %v7541_v38 = vadd.f32 %v17402_v46, %v7387_v29  ;;  %v7434_v0 = vadd.f32 %v17406_v2, %v7233_v47  ;;  %v20212_v53 = vld [vmem:[#allocation144_spill] sm:$0xff]  ;;  %v20215_v29 = vld [vmem:[#allocation106_spill] sm:$0xff] }
 0x7f6   : > { %v17545_v7 = vpop.f32.mrf.mxu0  ;;  %v7557_v9 = vadd.f32 %v17416_v63, %v7401_v5  ;;  %v7573_v63 = vadd.f32 %v17432_v20, %v7415_v10  ;;  %v20207_v20 = vld [vmem:[#allocation146_spill] sm:$0xff]  ;;  %v7739_v54 = vadd.f32 %v20214_v36, %v7587_v40 }
 0x7f7   : > { %v17553_v18 = vpop.f32.mrf.mxu1  ;;  %v7408_v34 = vadd.f32 %v17382_v50, %v7191_v39  ;;  %v7549_v50 = vadd.f32 %v17408_v11, %v7394_v15  ;;  %v7687_v31 = vadd.f32 %v17418_v6, %v7541_v38  ;;  %v7703_v11 = vadd.f32 %v17430_v24, %v7555_v45  ;;  %v20216_v15 = vld [vmem:[#allocation147_spill] sm:$0xff]  ;;  %v20218_v10 = vld [vmem:[#allocation142_spill] sm:$0xff] }
 0x7f8   : > { %v7902_v25 = vpop.f32.mrf.mxu0  ;;  %v7705_v6 = vadd.f32 %v17434_v60, %v7557_v9  ;;  %v7721_v62 = vadd.f32 %v20207_v20, %v7571_v51  ;;  %v20208_v60 = vld [vmem:[#allocation148_spill] sm:$0xff]  ;;  %v7723_v16 = vadd.f32 %v20209_v56, %v7573_v63  ;;  %v7595_v13 = vadd.f32 %v20210_v48, %v7434_v0  ;;  %v20220_v0 = vld [vmem:[#allocation82_spill] sm:$0xff]  ;;  %v20221_v45 = vld [vmem:[#allocation83_spill] sm:$0xff] }
 0x7f9   : > { %v17567_v59 = vpop.f32.mrf.mxu1  ;;  %v7565_v46 = vadd.f32 %v17424_v3, %v7408_v34  ;;  %v7696_v2 = vadd.f32 %v17426_v55, %v7549_v50  ;;  %v7581_v55 = vadd.f32 %v17440_v32, %v7422_v1  ;;  %v7589_v27 = vadd.f32 %v20208_v60, %v7429_v21  ;;  %v20217_v34 = vld [vmem:[#allocation112_spill] sm:$0xff]  ;;  %v20219_v1 = vld [vmem:[#allocation109_spill] sm:$0xff]  ;;  %v20223_v63 = vld [vmem:[#allocation78_spill] sm:$0xff] }
 0x7fa   : > { %v7904_v43 = vpop.f32.mrf.mxu0  ;;  %v7730_v32 = vadd.f32 %v20211_v30, %v7579_v35  ;;  %v7870_v5 = vadd.f32 %v20216_v15, %v7687_v31  ;;  %v7748_v52 = vadd.f32 %v20217_v34, %v7595_v13  ;;  %v7875_v21 = vadd.f32 %v20219_v1, %v20218_v10  ;;  %v20222_v51 = vld [vmem:[#allocation81_spill] sm:$0xff]  ;;  %v20225_v13 = vld [vmem:[#allocation79_spill] sm:$0xff] }
 0x7fb   : > { %v8027_v39 = vpop.f32.mrf.mxu1  ;;  %v7714_v8 = vadd.f32 %v17442_v61, %v7565_v46  ;;  %v7597_v61 = vadd.f32 %v20212_v53, %v7436_v17  ;;  %v7732_v14 = vadd.f32 %v20213_v26, %v7581_v55  ;;  %v7741_v47 = vadd.f32 %v20215_v29, %v7589_v27  ;;  %v20224_v20 = vld [vmem:[#allocation149_spill] sm:$0xff]  ;;  %v20228_v15 = vld [vmem:[#allocation90_spill] sm:$0xff] }
 0x7fc   : > { %v7909_v49 = vpop.f32.mrf.mxu0  ;;  %v7877_v9 = vadd.f32 %v20221_v45, %v7696_v2  ;;  %v19674_v17 = vmax.f32 %v17595_v41, 0.0  ;;  %v7882_v28 = vadd.f32 %v20222_v51, %v7703_v11  ;;  %v17615_v35 = vadd.f32 %v20223_v63, %v7870_v5  ;;  %v20226_v11 = vld [vmem:[#allocation87_spill] sm:$0xff] }
 0x7fd   : > { %v8032_v3 = vpop.f32.mrf.mxu1  ;;  %v7750_v50 = vadd.f32 %v20220_v0, %v7597_v61  ;;  %v7905_v42 = vadd.f32 %v7904_v43, %v7732_v14  ;;  %v17618_v31 = vadd.f32 %v17505_v19, %v7875_v21  ;;  %v7903_v55 = vadd.f32 %v7902_v25, %v7730_v32 }
 0x7fe   : > { %v7911_v24 = vpop.f32.mrf.mxu0  ;;  %v7884_v60 = vadd.f32 %v20224_v20, %v7705_v6  ;;  %v7898_v27 = vadd.f32 %v17545_v7, %v7723_v16  ;;  %v7910_v56 = vadd.f32 %v7909_v49, %v7739_v54  ;;  %v7889_v43 = vadd.f32 %v20225_v13, %v7712_v58 }
 0x7ff   : > { %v8034_v4 = vpop.f32.mrf.mxu1  ;;  %v7891_v30 = vadd.f32 %v17515_v37, %v7714_v8  ;;  %v7896_v53 = vadd.f32 %v20226_v11, %v7721_v62  ;;  %v17627_v19 = vand.u32 4294901760, %v19674_v17  ;;  %v7912_v25 = vadd.f32 %v7911_v24, %v7741_v47 }
 0x800   : > { %v7916_v57 = vpop.f32.mrf.mxu0  ;;  %v8035_v32 = vadd.f32 %v8034_v4, %v7898_v27  ;;  %v19676_v7 = vmax.f32 %v17615_v35, 0.0  ;;  %v8060_v49 = vmax.f32 %v17618_v31, 0.0  ;;  %v17636_v5 = vadd.f32 %v20228_v15, %v7877_v9 }
 0x801   : > { %v8039_v38 = vpop.f32.mrf.mxu1  ;;  %v17633_v58 = vadd.f32 %v8027_v39, %v7891_v30  ;;  %v8033_v37 = vadd.f32 %v8032_v3, %v7896_v53  ;;  %v7917_v62 = vadd.f32 %v7916_v57, %v7748_v52  ;;  %v17639_v24 = vadd.f32 %v17553_v18, %v7884_v60 }
 0x802   : > { %v7918_v46 = vpop.f32.mrf.mxu0  ;;  %v8040_v61 = vadd.f32 %v8039_v38, %v7903_v55  ;;  %v17642_v4 = vadd.f32 %v17567_v59, %v7889_v43  ;;  %v8067_v39 = vmax.f32 %v8035_v32, 0.0  ;;  %v17647_v52 = vadd.f32 %v17531_v22, %v7882_v28 }
 0x803   : > { %v8041_v40 = vpop.f32.mrf.mxu1  ;;  %v7919_v10 = vadd.f32 %v7918_v46, %v7750_v50  ;;  %v8065_v21 = vmax.f32 %v17633_v58, 0.0  ;;  %v8066_v38 = vmax.f32 %v8033_v37, 0.0  ;;  %v8061_v46 = vmax.f32 %v17636_v5, 0.0 }
 0x804   : > { %v8042_v2 = vadd.f32 %v8041_v40, %v7905_v42  ;;  %v8191_v48 = vpop.f32.mrf.mxu0  ;;  %v8068_v47 = vmax.f32 %v8040_v61, 0.0  ;;  %v8063_v51 = vmax.f32 %v17639_v24, 0.0  ;;  %v8064_v22 = vmax.f32 %v17642_v4, 0.0 }
 0x805   : > { %v8046_v26 = vpop.f32.mrf.mxu1  ;;  %v17661_v55 = vand.u32 4294901760, %v8067_v39  ;;  %v17680_v11 = vand.u32 4294901760, %v8065_v21  ;;  %v17692_v32 = vand.u32 4294901760, %v8060_v49  ;;  %v17714_v15 = vand.u32 4294901760, %v8061_v46 }
 0x806   : > { %v8047_v6 = vadd.f32 %v8046_v26, %v7910_v56  ;;  %v17629_v14 = vpop.f32.mrf.mxu0  ;;  %v8069_v16 = vmax.f32 %v8042_v2, 0.0  ;;  %v17659_v28 = vand.u32 4294901760, %v8068_v47  ;;  %v8062_v56 = vmax.f32 %v17647_v52, 0.0 }
 0x807   : > { %20227 = vst [vmem:[#allocation88_spill] sm:$0xff] %v17629_v14  ;;  %v8048_v8 = vpop.f32.mrf.mxu1  ;;  %v17671_v2 = vand.u32 4294901760, %v8066_v38 }
 0x808   : > { %v8070_v36 = vmax.f32 %v8047_v6, 0.0  ;;  %v8049_v54 = vadd.f32 %v8048_v8, %v7912_v25  ;;  %v8202_v29 = vpop.f32.mrf.mxu0  ;;  %v17652_v45 = vand.u32 4294901760, %v8069_v16  ;;  %v17694_v6 = vand.u32 4294901760, %v8063_v51 }
 0x809   : > { %v8053_v34 = vpop.f32.mrf.mxu1  ;;  %v17699_v58 = vsub.f32 %v8068_v47, %v17659_v28  ;;  %v17702_v8 = vsub.f32 %v8067_v39, %v17661_v55  ;;  %v17717_v24 = vsub.f32 %v8066_v38, %v17671_v2  ;;  %v17725_v39 = vand.u32 4294901760, %v8062_v56 }
 0x80a   : > { %v8071_v3 = vmax.f32 %v8049_v54, 0.0  ;;  %v8054_v1 = vadd.f32 %v8053_v34, %v7917_v62  ;;  %v17644_v57 = vpop.f32.mrf.mxu0  ;;  %v17650_v0 = vand.u32 4294901760, %v8070_v36  ;;  %v17683_v53 = vsub.f32 %v8069_v16, %v17652_v45 }
 0x80b   : > { %20229 = vst [vmem:[#allocation91_spill] sm:$0xff] %v17644_v57  ;;  %v8055_v18 = vpop.f32.mrf.mxu1  ;;  %v17736_v38 = vsub.f32 %v8063_v51, %v17694_v6 }
 0x80c   : > { %v17654_v59 = vand.u32 4294901760, %v8071_v3  ;;  %v8072_v9 = vmax.f32 %v8054_v1, 0.0  ;;  %v8056_v42 = vadd.f32 %v8055_v18, %v7919_v10  ;;  %v8213_v50 = vpop.f32.mrf.mxu0  ;;  %v17674_v13 = vsub.f32 %v8070_v36, %v17650_v0 }
 0x80d   : > { %v8370_v63 = vpop.f32.mrf.mxu1  ;;  %v17728_v10 = vsub.f32 %v8065_v21, %v17680_v11  ;;  %v19677_v1 = vand.u32 4294901760, %v17683_v53  ;;  %v19678_v18 = vand.u32 4294901760, %v17699_v58 }
 0x80e   : > { %v17664_v40 = vsub.f32 %v8071_v3, %v17654_v59  ;;  %v17666_v20 = vand.u32 4294901760, %v8072_v9  ;;  %v8073_v60 = vmax.f32 %v8056_v42, 0.0  ;;  %v17668_v27 = vpop.f32.mrf.mxu0  ;;  %v17676_v43 = vadd.f32 %v8370_v63, %v8191_v48 }
 0x80f   : > { %20230 = vst [vmem:[#allocation92_spill] sm:$0xff] %v17668_v27  ;;  %v17678_v30 = vpop.f32.mrf.mxu1  ;;  %v17696_v48 = vand.u32 4294901760, %v8064_v22  ;;  %v19675_v4 = vand.u32 4294901760, %v17674_v13  ;;  %v9210_v31 = vsub.f32 %v17683_v53, %v19677_v1 }
 0x810   : > { %20231 = vst [vmem:[#allocation93_spill] sm:$0xff] %v17678_v30  ;;  %v17686_v61 = vsub.f32 %v8072_v9, %v17666_v20  ;;  %v17688_v26 = vand.u32 4294901760, %v8073_v60  ;;  %v8224_v25 = vpop.f32.mrf.mxu0  ;;  %v19673_v36 = vand.u32 4294901760, %v17664_v40 }
 0x811   : > { %v8377_v37 = vpop.f32.mrf.mxu1 }
 0x812   : > { %v19671_v62 = vand.u32 4294901760, %v17686_v61  ;;  %v17706_v16 = vsub.f32 %v8073_v60, %v17688_v26  ;;  %9015 = vmatprep.subr.mxu0 %v17688_v26  ;;  %v17710_v54 = vpop.f32.mrf.mxu0  ;;  %v17721_v47 = vadd.f32 %v8377_v37, %v8202_v29  ;;  %v17739_v29 = vsub.f32 %v8064_v22, %v17696_v48 }
 0x813   : > { %20232 = vst [vmem:[#allocation86_spill] sm:$0xff] %v17710_v54  ;;  %9017 = vmatpush1.msra.mxu0 %v17666_v20  ;;  %v17723_v34 = vpop.f32.mrf.mxu1  ;;  %v9198_v51 = vsub.f32 %v17664_v40, %v19673_v36  ;;  %v17760_v37 = vand.u32 4294901760, %v19676_v7  ;;  %v9204_v36 = vsub.f32 %v17674_v13, %v19675_v4  ;;  %v17787_v4 = vsub.f32 %v8061_v46, %v17714_v15 }
 0x814   : > { %20233 = vst [vmem:[#allocation95_spill] sm:$0xff] %v17723_v34  ;;  %9019 = vmatprep.subr.mxu0 %v17654_v59  ;;  %v19672_v3 = vand.u32 4294901760, %v17706_v16  ;;  %v17733_v52 = vpop.f32.mrf.mxu0  ;;  %v9192_v21 = vsub.f32 %v17686_v61, %v19671_v62  ;;  %v17765_v62 = vsub.f32 %v8060_v49, %v17692_v32  ;;  %v20236_v49 = vand.u32 4294901760, %v17702_v8 }
 0x815   : > { %9021 = vmatpush1.msra.mxu0 %v17650_v0  ;;  %v8384_v9 = vpop.f32.mrf.mxu1  ;;  %v9199_v1 = vand.u32 4294901760, %v9198_v51  ;;  %v9205_v51 = vand.u32 4294901760, %v9204_v36  ;;  %v17824_v46 = vand.u32 4294901760, %v17556_v33 }
 0x816   : > { %9023 = vmatprep.subr.mxu0 %v17652_v45  ;;  %v9186_v42 = vsub.f32 %v17706_v16, %v19672_v3  ;;  %v17754_v63 = vadd.f32 %v8384_v9, %v8213_v50  ;;  %v17756_v60 = vpop.f32.mrf.mxu0  ;;  %v17775_v9 = vsub.f32 %v8062_v56, %v17725_v39  ;;  %v9216_v56 = vsub.f32 %v17699_v58, %v19678_v18 }
 0x817   : > { %20234 = vst [vmem:[#allocation107_spill] sm:$0xff] %v17756_v60  ;;  %9025 = vmatpush1.msra.mxu0 %v17659_v28  ;;  %v17772_v50 = vpop.f32.mrf.mxu1  ;;  %v9222_v5 = vsub.f32 %v17702_v8, %v20236_v49  ;;  %v20238_v18 = vmax.f32 %v17615_v35, 0.0  ;;  %v17814_v49 = vsub.f32 %v17518_v44, %v17536_v12  ;;  %v9211_v35 = vand.u32 4294901760, %v9210_v31 }
 0x818   : > { %20235 = vst [vmem:[#allocation96_spill] sm:$0xff] %v17772_v50  ;;  %9027 = vmatprep.subr.mxu0 %v17661_v55  ;;  %v9187_v17 = vand.u32 4294901760, %v9186_v42  ;;  %v17782_v3 = vpop.f32.mrf.mxu0  ;;  %v9193_v42 = vand.u32 4294901760, %v9192_v21  ;;  %v20239_v21 = vand.u32 4294901760, %v17717_v24  ;;  %v20243_v44 = vmax.f32 %v17595_v41, 0.0 }
 0x819   : > { %9029 = vmatpush1.msra.mxu0 %v17671_v2  ;;  %v8391_v22 = vpop.f32.mrf.mxu1  ;;  %v17806_v54 = vsub.f32 %v20238_v18, %v17760_v37  ;;  %20240 = vst [vmem:[#allocation98_spill] sm:$0xff] %v17814_v49  ;;  %v20242_v18 = vand.u32 4294901760, %v17728_v10  ;;  %v9223_v50 = vand.u32 4294901760, %v9222_v5  ;;  %v20245_v41 = vand.u32 4294901760, %v17736_v38 }
 0x81a   : > { %9031 = vmatprep.subr.mxu0 %v17680_v11  ;;  %9188 = vmatprep.subr.mxu1 %v9187_v17  ;;  %v17799_v60 = vadd.f32 %v8391_v22, %v8224_v25  ;;  %v17801_v7 = vpop.f32.mrf.mxu0  ;;  %v9228_v17 = vsub.f32 %v17717_v24, %v20239_v21  ;;  %v20244_v22 = vand.u32 4294901760, %v17739_v29  ;;  %v20249_v27 = vand.u32 4294901760, %v17775_v9 }
 0x81b   : > { %20237 = vst [vmem:[#allocation100_spill] sm:$0xff] %v17801_v7  ;;  %9033 = vmatpush1.msra.mxu0 %v17696_v48  ;;  %9194 = vmatpush1.msra.mxu1 %v9193_v42  ;;  %v17816_v25 = vpop.f32.mrf.mxu1  ;;  %v9234_v21 = vsub.f32 %v17728_v10, %v20242_v18  ;;  %v17831_v42 = vsub.f32 %v20243_v44, %v17627_v19  ;;  %v20250_v31 = vand.u32 4294901760, %v17787_v4  ;;  %v20251_v57 = vand.u32 4294901760, %v17765_v62 }
 0x81c   : > { %20241 = vst [vmem:[#allocation104_spill] sm:$0xff] %v17816_v25  ;;  %9035 = vmatprep.subr.mxu0 %v17694_v6  ;;  %9200 = vmatprep.subr.mxu1 %v9199_v1  ;;  %v17826_v36 = vpop.f32.mrf.mxu0  ;;  %v9240_v7 = vsub.f32 %v17739_v29, %v20244_v22  ;;  %v9217_v1 = vand.u32 4294901760, %v9216_v56  ;;  %v9246_v44 = vsub.f32 %v17736_v38, %v20245_v41  ;;  %v8078_v22 = vld [vmem:[%s19451_s1 + $0x1a0] sm:$0xff]  ;;  %v9229_v25 = vand.u32 4294901760, %v9228_v17 }
 0x81d   : > { %9037 = vmatpush1.msra.mxu0 %v17725_v39  ;;  %9206 = vmatpush1.msra.mxu1 %v9205_v51  ;;  %v8398_v18 = vpop.f32.mrf.mxu1  ;;  %v9252_v34 = vsub.f32 %v17775_v9, %v20249_v27 }
 0x81e   : > { %9039 = vmatprep.subr.mxu0 %v17714_v15  ;;  %9212 = vmatprep.subr.mxu1 %v9211_v35  ;;  %v17847_v51 = vadd.f32 %v8398_v18, %v17733_v52  ;;  %v17849_v56 = vpop.f32.mrf.mxu0  ;;  %v20247_v35 = vand.u32 4294901760, %v17513_v23  ;;  %v9235_v52 = vand.u32 4294901760, %v9234_v21  ;;  %v20252_v21 = vld [vmem:[#allocation89_spill] sm:$0xff]  ;;  %v9247_v17 = vand.u32 4294901760, %v9246_v44 }
 0x81f   : > { %20246 = vst [vmem:[#allocation97_spill] sm:$0xff] %v17849_v56  ;;  %9041 = vmatpush1.msra.mxu0 %v17692_v32  ;;  %9218 = vmatpush1.msra.mxu1 %v9217_v1  ;;  %v17856_v41 = vpop.f32.mrf.mxu1  ;;  %v9258_v56 = vsub.f32 %v17787_v4, %v20250_v31  ;;  %v20253_v18 = vand.u32 4294901760, %v20252_v21  ;;  %v20257_v21 = vand.u32 4294901760, %v17814_v49 }
 0x820   : > { %v9093_v5 = vsub.f32 %v17513_v23, %v20247_v35  ;;  %20248 = vst [vmem:[#allocation114_spill] sm:$0xff] %v17856_v41  ;;  %9043 = vmatprep.subr.mxu0 %v17760_v37  ;;  %9224 = vmatprep.subr.mxu1 %v9223_v50  ;;  %v8268_v1 = vpop.f32.mrf.mxu0  ;;  %v9241_v35 = vand.u32 4294901760, %v9240_v7  ;;  %v8987_v41 = vsel %vm4903_vm0, %v8078_v22, 0  ;;  %v9264_v50 = vsub.f32 %v17765_v62, %v20251_v57  ;;  %v8079_v7 = vld [vmem:[%s19451_s1 + $0x1a8] sm:$0xff] }
 0x821   : > { %9045 = vmatpush1.msra.mxu0 %v17627_v19  ;;  %9230 = vmatpush1.msra.mxu1 %v9229_v25  ;;  %v8405_v27 = vpop.f32.mrf.mxu1  ;;  %v17876_v25 = vsub.f32 %v17556_v33, %v17824_v46  ;;  %v9253_v33 = vand.u32 4294901760, %v9252_v34  ;;  %v8990_v30 = vsel %vm4903_vm0, %v8079_v7, 0 }
 0x822   : > { %9084 = vmatmul.mubr.f32.vlgmr.msra.gmra.mxu0 %v20253_v18  ;;  %9236 = vmatprep.subr.mxu1 %v9235_v52  ;;  %v17882_v31 = vadd.f32 %v8405_v27, %v17782_v3  ;;  %v17884_v22 = vpop.f32.mrf.mxu0  ;;  %v9094_v57 = vand.u32 4294901760, %v9093_v5  ;;  %v20255_v52 = vand.u32 4294901760, %v17806_v54  ;;  %v9104_v3 = vsub.f32 %v17814_v49, %v20257_v21 }
 0x823   : > { %20254 = vst [vmem:[#allocation105_spill] sm:$0xff] %v17884_v22  ;;  %9386 = vmatprep.subr.mxu0 %v17706_v16  ;;  %9242 = vmatpush1.msra.mxu1 %v9241_v35  ;;  %v17890_v18 = vpop.f32.mrf.mxu1  ;;  %v17896_v27 = vand.u32 4294901760, %v8987_v41  ;;  %v20258_v35 = vand.u32 4294901760, %v17831_v42  ;;  %v9265_v21 = vand.u32 4294901760, %v9264_v50  ;;  %v19683_v14 = vand.u32 4294901760, %v17876_v25 }
 0x824   : > { %v9270_v44 = vsub.f32 %v17806_v54, %v20255_v52  ;;  %20256 = vst [vmem:[#allocation108_spill] sm:$0xff] %v17890_v18  ;;  %9389 = vmatpush1.msra.mxu0 %v17686_v61  ;;  %9248 = vmatprep.subr.mxu1 %v9247_v17  ;;  %v8504_v22 = vpop.f32.mrf.mxu0  ;;  %v20259_v52 = vmov 0.0   ;;  %v9259_v18 = vand.u32 4294901760, %v9258_v56 }
 0x825   : > { %v9276_v5 = vsub.f32 %v17831_v42, %v20258_v35  ;;  %9392 = vmatprep.subr.mxu0 %v17664_v40  ;;  %9089 = vmatprep.mubr.f32.mxu0 %v20259_v52  ;;  %v8412_v17 = vpop.f32.mrf.mxu1  ;;  %v8505_v34 = vadd.f32 %v8504_v22, %v17676_v43  ;;  %v8080_v35 = vld [vmem:[%s19451_s1 + $0x1b0] sm:$0xff]  ;;  %v9105_v43 = vand.u32 4294901760, %v9104_v3  ;;  %v17919_v50 = vsub.f32 %v8987_v41, %v17896_v27  ;;  %v8081_v3 = vld [vmem:[%s19451_s1 + $0x1b8] sm:$0xff] }
 0x826   : > { %9254 = vmatpush1.msra.mxu1 %v9253_v33  ;;  %9395 = vmatpush1.msra.mxu0 %v17674_v13  ;;  %v17911_v49 = vadd.f32 %v8412_v17, %v17826_v36  ;;  %v17913_v23 = vpop.f32.mrf.mxu0  ;;  %v9271_v56 = vand.u32 4294901760, %v9270_v44  ;;  %v17921_v22 = vand.u32 4294901760, %v8990_v30  ;;  %v9115_v41 = vsub.f32 %v17876_v25, %v19683_v14 }
 0x827   : > { %20260 = vst [vmem:[#allocation111_spill] sm:$0xff] %v17913_v23  ;;  %9095 = vmatmul.mubr.f32.gmra.mxu0 %v9094_v57  ;;  %9260 = vmatprep.subr.mxu1 %v9259_v18  ;;  %v17915_v7 = vpop.f32.mrf.mxu1  ;;  %v9277_v36 = vand.u32 4294901760, %v9276_v5  ;;  %v8993_v57 = vsel %vm4903_vm0, %v8080_v35, 0 }
 0x828   : > { %20261 = vst [vmem:[#allocation110_spill] sm:$0xff] %v17915_v7  ;;  %9398 = vmatprep.subr.mxu0 %v17683_v53  ;;  %9266 = vmatpush1.msra.mxu1 %v9265_v21  ;;  %v8512_v33 = vpop.f32.mrf.mxu0  ;;  %v20264_v21 = vld [vmem:[#allocation145_spill] sm:$0xff] }
 0x829   : > { %9401 = vmatpush1.msra.mxu0 %v17699_v58  ;;  %9272 = vmatprep.subr.mxu1 %v9271_v56  ;;  %v8419_v18 = vpop.f32.mrf.mxu1  ;;  %v8513_v44 = vadd.f32 %v8512_v33, %v17721_v47  ;;  %v17944_v56 = vsub.f32 %v8990_v30, %v17921_v22  ;;  %v17946_v33 = vand.u32 4294901760, %v8993_v57 }
 0x82a   : > { %9404 = vmatprep.subr.mxu0 %v17702_v8  ;;  %9100 = vmatprep.mubr.f32.mxu0 %v20259_v52  ;;  %v17934_v17 = vadd.f32 %v8419_v18, %v8268_v1  ;;  %v17936_v5 = vpop.f32.mrf.mxu0  ;;  %v8996_v1 = vsel %vm4903_vm0, %v8081_v3, 0 }
 0x82b   : > { %20262 = vst [vmem:[#allocation94_spill] sm:$0xff] %v17936_v5  ;;  %9278 = vmatpush1.msra.mxu1 %v9277_v36  ;;  %9407 = vmatpush1.msra.mxu0 %v17717_v24  ;;  %v17939_v47 = vpop.f32.mrf.mxu1  ;;  %v17971_v3 = vand.u32 4294901760, %v8996_v1 }
 0x82c   : > { %20263 = vst [vmem:[#allocation121_spill] sm:$0xff] %v17939_v47  ;;  %9106 = vmatmul.mubr.f32.gmra.mxu0 %v9105_v43  ;;  %9313 = vmatmul.mubr.f32.vlgmr.msra.gmra.mxu1 %v20264_v21  ;;  %v8520_v14 = vpop.f32.mrf.mxu0  ;;  %v9116_v43 = vand.u32 4294901760, %v9115_v41 }
 0x82d   : > { %9410 = vmatprep.subr.mxu0 %v17728_v10  ;;  %9546 = vmatprep.subr.mxu1 %v17688_v26  ;;  %v8640_v36 = vpop.f32.mrf.mxu1  ;;  %v8521_v18 = vadd.f32 %v8520_v14, %v17754_v63  ;;  %v20267_v14 = vand.u32 4294901760, %v17919_v50 }
 0x82e   : > { %9413 = vmatpush1.msra.mxu0 %v17739_v29  ;;  %9548 = vmatpush1.msra.mxu1 %v17666_v20  ;;  %v17954_v35 = vadd.f32 %v8640_v36, %v8505_v34  ;;  %v17956_v30 = vpop.f32.mrf.mxu0  ;;  %v17969_v34 = vsub.f32 %v8993_v57, %v17946_v33 }
 0x82f   : > { %20265 = vst [vmem:[#allocation102_spill] sm:$0xff] %v17956_v30  ;;  %9416 = vmatprep.subr.mxu0 %v17736_v38  ;;  %9550 = vmatprep.subr.mxu1 %v17654_v59  ;;  %v17960_v47 = vpop.f32.mrf.mxu1  ;;  %v9126_v63 = vsub.f32 %v17919_v50, %v20267_v14 }
 0x830   : > { %20266 = vst [vmem:[#allocation120_spill] sm:$0xff] %v17960_v47  ;;  %9111 = vmatprep.mubr.f32.mxu0 %v20259_v52  ;;  %9318 = vmatprep.mubr.f32.mxu1 %v20259_v52  ;;  %v8528_v36 = vpop.f32.mrf.mxu0  ;;  %v20268_v47 = vld [vmem:[#allocation80_spill] sm:$0xff] }
 0x831   : > { %9419 = vmatpush1.msra.mxu0 %v17775_v9  ;;  %9552 = vmatpush1.msra.mxu1 %v17650_v0  ;;  %v8649_v7 = vpop.f32.mrf.mxu1  ;;  %v8529_v30 = vadd.f32 %v8528_v36, %v17799_v60  ;;  %v9127_v41 = vand.u32 4294901760, %v9126_v63  ;;  %v20271_v60 = vand.u32 4294901760, %v17944_v56 }
 0x832   : > { %9117 = vmatmul.mubr.f32.gmra.mxu0 %v9116_v43  ;;  %9320 = vmatmul.mubr.f32.gmra.mxu1 %v20268_v47  ;;  %v17977_v5 = vadd.f32 %v8649_v7, %v8513_v44  ;;  %v17979_v14 = vpop.f32.mrf.mxu0  ;;  %v17992_v44 = vsub.f32 %v8996_v1, %v17971_v3 }
 0x833   : > { %20269 = vst [vmem:[#allocation116_spill] sm:$0xff] %v17979_v14  ;;  %9422 = vmatprep.subr.mxu0 %v17787_v4  ;;  %9554 = vmatprep.subr.mxu1 %v17652_v45  ;;  %v17983_v57 = vpop.f32.mrf.mxu1  ;;  %v9137_v43 = vsub.f32 %v17944_v56, %v20271_v60 }
 0x834   : > { %20270 = vst [vmem:[#allocation124_spill] sm:$0xff] %v17983_v57  ;;  %9425 = vmatpush1.msra.mxu0 %v17765_v62  ;;  %9556 = vmatpush1.msra.mxu1 %v17659_v28  ;;  %v8536_v36 = vpop.f32.mrf.mxu0  ;;  %v19684_v23 = vand.u32 4294901760, %v17992_v44 }
 0x835   : > { %9428 = vmatprep.subr.mxu0 %v17806_v54  ;;  %9558 = vmatprep.subr.mxu1 %v17661_v55  ;;  %v8658_v14 = vpop.f32.mrf.mxu1  ;;  %v8537_v57 = vadd.f32 %v8536_v36, %v17847_v51  ;;  %v9138_v7 = vand.u32 4294901760, %v9137_v43  ;;  %v20273_v51 = vand.u32 4294901760, %v17969_v34 }
 0x836   : > { %9122 = vmatprep.mubr.f32.mxu0 %v20259_v52  ;;  %9325 = vmatprep.mubr.f32.mxu1 %v20259_v52  ;;  %v17999_v63 = vadd.f32 %v8658_v14, %v8521_v18  ;;  %v18001_v60 = vpop.f32.mrf.mxu0  ;;  %v20274_v14 = vand.u32 4294901760, %v17706_v16 }
 0x837   : > { %20272 = vst [vmem:[#allocation118_spill] sm:$0xff] %v18001_v60  ;;  %9431 = vmatpush1.msra.mxu0 %v17831_v42  ;;  %9560 = vmatpush1.msra.mxu1 %v17671_v2  ;;  %v18005_v1 = vpop.f32.mrf.mxu1  ;;  %v9148_v36 = vsub.f32 %v17969_v34, %v20273_v51 }
 0x838   : > { %9128 = vmatmul.mubr.f32.gmra.mxu0 %v9127_v41  ;;  %9327 = vmatmul.mubr.f32.gmra.mxu1 %v17536_v12  ;;  %v8544_v18 = vpop.f32.mrf.mxu0 }
 0x839   : > { %9562 = vmatprep.subr.mxu1 %v17680_v11  ;;  %9701 = vmatprep.subr.mxu0 %v20274_v14  ;;  %v8667_v60 = vpop.f32.mrf.mxu1  ;;  %v8545_v47 = vadd.f32 %v8544_v18, %v17882_v31  ;;  %v9149_v16 = vand.u32 4294901760, %v9148_v36  ;;  %v9159_v31 = vsub.f32 %v17992_v44, %v19684_v23 }
 0x83a   : > { %9564 = vmatpush1.msra.mxu1 %v17696_v48  ;;  %9133 = vmatprep.mubr.f32.mxu0 %v20259_v52  ;;  %v18018_v41 = vadd.f32 %v8667_v60, %v8529_v30  ;;  %v18020_v43 = vpop.f32.mrf.mxu0 }
 0x83b   : > { %20275 = vst [vmem:[#allocation115_spill] sm:$0xff] %v18020_v43  ;;  %9566 = vmatprep.subr.mxu1 %v17694_v6  ;;  %9332 = vmatprep.mubr.f32.mxu1 %v20259_v52  ;;  %v18024_v51 = vpop.f32.mrf.mxu1  ;;  %v9160_v23 = vand.u32 4294901760, %v9159_v31 }
 0x83c   : > { %9568 = vmatpush1.msra.mxu1 %v17725_v39  ;;  %9139 = vmatmul.mubr.f32.gmra.mxu0 %v9138_v7  ;;  %v8552_v18 = vpop.f32.mrf.mxu0 }
 0x83d   : > { %9334 = vmatmul.mubr.f32.gmra.mxu1 %v17824_v46  ;;  %9570 = vmatprep.subr.mxu1 %v17714_v15  ;;  %v8676_v30 = vpop.f32.mrf.mxu1  ;;  %v8553_v60 = vadd.f32 %v8552_v18, %v17911_v49 }
 0x83e   : > { %9572 = vmatpush1.msra.mxu1 %v17692_v32  ;;  %9144 = vmatprep.mubr.f32.mxu0 %v20259_v52  ;;  %v18035_v14 = vadd.f32 %v8676_v30, %v8537_v57  ;;  %v18037_v7 = vpop.f32.mrf.mxu0 }
 0x83f   : > { %20276 = vst [vmem:[#allocation117_spill] sm:$0xff] %v18037_v7  ;;  %9574 = vmatprep.subr.mxu1 %v17760_v37  ;;  %9339 = vmatprep.mubr.f32.mxu1 %v20259_v52  ;;  %v18041_v36 = vpop.f32.mrf.mxu1 }
 0x840   : > { %20277 = vst [vmem:[#allocation123_spill] sm:$0xff] %v18041_v36  ;;  %9576 = vmatpush1.msra.mxu1 %v17627_v19  ;;  %9150 = vmatmul.mubr.f32.gmra.mxu0 %v9149_v16  ;;  %v8560_v43 = vpop.f32.mrf.mxu0 }
 0x841   : > { %9341 = vmatmul.mubr.f32.gmra.mxu1 %v17896_v27  ;;  %9868 = vmatprep.subr.mxu1 %v17688_v26  ;;  %v8685_v49 = vpop.f32.mrf.mxu1  ;;  %v8561_v57 = vadd.f32 %v8560_v43, %v17934_v17 }
 0x842   : > { %9155 = vmatprep.mubr.f32.mxu0 %v20259_v52  ;;  %9346 = vmatprep.mubr.f32.mxu1 %v20259_v52  ;;  %v18049_v18 = vadd.f32 %v8685_v49, %v8545_v47  ;;  %v18051_v30 = vpop.f32.mrf.mxu0  ;;  %v20281_v49 = vld [vmem:[#allocation84_spill] sm:$0xff] }
 0x843   : > { %20278 = vst [vmem:[#allocation119_spill] sm:$0xff] %v18051_v30  ;;  %v18053_v7 = vpop.f32.mrf.mxu1 }
 0x844   : > { %20279 = vst [vmem:[#allocation113_spill] sm:$0xff] %v18053_v7  ;;  %9161 = vmatmul.mubr.f32.gmra.mxu0 %v9160_v23  ;;  %v8793_v16 = vpop.f32.mrf.mxu0  ;;  %v20282_v23 = vand.u32 4294901760, %v17686_v61  ;;  %v20285_v61 = vand.u32 4294901760, %v17683_v53 }
 0x845   : > { %9348 = vmatmul.mubr.f32.gmra.mxu1 %v17921_v22  ;;  %9464 = vmatprep.mubr.f32.mxu0 %v20259_v52  ;;  %v8694_v26 = vpop.f32.mrf.mxu1  ;;  %v8794_v31 = vadd.f32 %v8793_v16, %v17954_v35  ;;  %v20283_v35 = vand.u32 4294901760, %v17664_v40 }
 0x846   : > { %9353 = vmatprep.mubr.f32.mxu1 %v20259_v52  ;;  %v18059_v17 = vadd.f32 %v8694_v26, %v8553_v60  ;;  %v18061_v43 = vpop.f32.mrf.mxu0  ;;  %v20284_v26 = vand.u32 4294901760, %v17674_v13  ;;  %v20288_v13 = vand.u32 4294901760, %v17702_v8 }
 0x847   : > { %v18063_v47 = vpop.f32.mrf.mxu1 }
 0x848   : > { %20280 = vst [vmem:[#allocation126_spill] sm:$0xff] %v18063_v47  ;;  %9467 = vmatmul.mubr.f32.vlgmr.msra.gmra.mxu0 %v20281_v49  ;;  %v8800_v30 = vpop.f32.mrf.mxu0 }
 0x849   : > { %9355 = vmatmul.mubr.f32.gmra.mxu1 %v17946_v33  ;;  %9705 = vmatpush1.msra.mxu0 %v20282_v23  ;;  %v8703_v7 = vpop.f32.mrf.mxu1  ;;  %v8801_v36 = vadd.f32 %v8800_v30, %v17977_v5  ;;  %v20286_v5 = vld [vmem:[#allocation85_spill] sm:$0xff] }
 0x84a   : > { %9709 = vmatprep.subr.mxu0 %v20283_v35  ;;  %9360 = vmatprep.mubr.f32.mxu1 %v20259_v52  ;;  %v18073_v60 = vadd.f32 %v8703_v7, %v8561_v57  ;;  %v18075_v16 = vpop.f32.mrf.mxu0  ;;  %v20287_v7 = vand.u32 4294901760, %v17699_v58  ;;  %v20289_v35 = vand.u32 4294901760, %v17717_v24  ;;  %v20290_v58 = vand.u32 4294901760, %v17728_v10 }
 0x84b   : > { %9713 = vmatpush1.msra.mxu0 %v20284_v26  ;;  %9472 = vmatprep.mubr.f32.mxu0 %v20259_v52  ;;  %v18080_v47 = vpop.f32.mrf.mxu1 }
 0x84c   : > { %9717 = vmatprep.subr.mxu0 %v20285_v61  ;;  %9475 = vmatmul.mubr.f32.gmra.mxu0 %v20286_v5  ;;  %v8807_v40 = vpop.f32.mrf.mxu0  ;;  %v20292_v61 = vand.u32 4294901760, %v20281_v49  ;;  %v20295_v49 = vand.u32 4294901760, %v17775_v9 }
 0x84d   : > { %9362 = vmatmul.mubr.f32.gmra.mxu1 %v17971_v3  ;;  %9721 = vmatpush1.msra.mxu0 %v20287_v7  ;;  %v8920_v57 = vpop.f32.mrf.mxu1  ;;  %v8808_v30 = vadd.f32 %v8807_v40, %v17999_v63  ;;  %v20291_v63 = vld [vmem:[#allocation98_spill] sm:$0xff]  ;;  %v20294_v7 = vand.u32 4294901760, %v17736_v38 }
 0x84e   : > { %9725 = vmatprep.subr.mxu0 %v20288_v13  ;;  %9480 = vmatprep.mubr.f32.mxu0 %v20259_v52  ;;  %v18092_v23 = vadd.f32 %v8920_v57, %v8794_v31  ;;  %v18094_v53 = vpop.f32.mrf.mxu0  ;;  %v20293_v31 = vand.u32 4294901760, %v17739_v29 }
 0x84f   : > { %9729 = vmatpush1.msra.mxu0 %v20289_v35  ;;  %9609 = vmatprep.mubr.f32.mxu1 %v20259_v52  ;;  %v18099_v26 = vpop.f32.mrf.mxu1 }
 0x850   : > { %9733 = vmatprep.subr.mxu0 %v20290_v58  ;;  %9483 = vmatmul.mubr.f32.gmra.mxu0 %v20291_v63  ;;  %v8814_v8 = vpop.f32.mrf.mxu0 }
 0x851   : > { %9613 = vmatmul.mubr.f32.vlgmr.msra.gmra.mxu1 %v20292_v61  ;;  %9737 = vmatpush1.msra.mxu0 %v20293_v31  ;;  %v8927_v40 = vpop.f32.mrf.mxu1  ;;  %v8815_v24 = vadd.f32 %v8814_v8, %v18018_v41 }
 0x852   : > { %9870 = vmatpush1.msra.mxu1 %v17666_v20  ;;  %9741 = vmatprep.subr.mxu0 %v20294_v7  ;;  %v18112_v57 = vadd.f32 %v8927_v40, %v8801_v36  ;;  %v18114_v10 = vpop.f32.mrf.mxu0  ;;  %v20296_v20 = vand.u32 4294901760, %v17787_v4  ;;  %v20298_v36 = vand.u32 4294901760, %v17765_v62  ;;  %v20299_v4 = vand.u32 4294901760, %v17806_v54  ;;  %v20308_v7 = vld [vmem:[#allocation35_spill] sm:$0xff] }
 0x853   : > { %9872 = vmatprep.subr.mxu1 %v17654_v59  ;;  %9745 = vmatpush1.msra.mxu0 %v20295_v49  ;;  %v18119_v13 = vpop.f32.mrf.mxu1  ;;  %v20309_v49 = vld [vmem:[#allocation36_spill] sm:$0xff] }
 0x854   : > { %9874 = vmatpush1.msra.mxu1 %v17650_v0  ;;  %9488 = vmatprep.mubr.f32.mxu0 %v20259_v52  ;;  %v8821_v29 = vpop.f32.mrf.mxu0  ;;  %v20297_v0 = vand.u32 4294901760, %v20286_v5 }
 0x855   : > { %9618 = vmatprep.mubr.f32.mxu1 %v20259_v52  ;;  %9749 = vmatprep.subr.mxu0 %v20296_v20  ;;  %v8934_v38 = vpop.f32.mrf.mxu1  ;;  %v8822_v41 = vadd.f32 %v8821_v29, %v18035_v14  ;;  %v20300_v14 = vand.u32 4294901760, %v17831_v42  ;;  %v20302_v42 = vand.u32 4294901760, %v20291_v63  ;;  %v20311_v29 = vld [vmem:[#allocation31_spill] sm:$0xff]  ;;  %v20312_v20 = vld [vmem:[#allocation80_spill] sm:$0xff] }
 0x856   : > { %9876 = vmatprep.subr.mxu1 %v17652_v45  ;;  %9491 = vmatmul.mubr.f32.gmra.mxu0 %v17876_v25  ;;  %v18129_v59 = vadd.f32 %v8934_v38, %v8808_v30  ;;  %v18131_v9 = vpop.f32.mrf.mxu0  ;;  %v20313_v38 = vand.u32 4294901760, %v17992_v44 }
 0x857   : > { %9622 = vmatmul.mubr.f32.gmra.mxu1 %v20297_v0  ;;  %9753 = vmatpush1.msra.mxu0 %v20298_v36  ;;  %v18137_v35 = vpop.f32.mrf.mxu1  ;;  %v20315_v0 = vld [vmem:[#allocation42_spill] sm:$0xff] }
 0x858   : > { %9878 = vmatpush1.msra.mxu1 %v17659_v28  ;;  %9757 = vmatprep.subr.mxu0 %v20299_v4  ;;  %v8828_v45 = vpop.f32.mrf.mxu0  ;;  %v9989_v4 = vld [vmem:[%s19451_s1 + $0x208] sm:$0xff] }
 0x859   : > { %9880 = vmatprep.subr.mxu1 %v17661_v55  ;;  %9761 = vmatpush1.msra.mxu0 %v20300_v14  ;;  %v8941_v30 = vpop.f32.mrf.mxu1  ;;  %v8829_v5 = vadd.f32 %v8828_v45, %v18049_v18  ;;  %v20301_v55 = vld [vmem:[#allocation40_spill] sm:$0xff]  ;;  %v20317_v45 = vld [vmem:[#allocation51_spill] sm:$0xff] }
 0x85a   : > { %9882 = vmatpush1.msra.mxu1 %v17671_v2  ;;  %9496 = vmatprep.mubr.f32.mxu0 %v20259_v52  ;;  %v18148_v62 = vadd.f32 %v8941_v30, %v8815_v24  ;;  %v18150_v58 = vpop.f32.mrf.mxu0  ;;  %v20307_v24 = vand.u32 4294901760, %v17969_v34  ;;  %v20318_v30 = vld [vmem:[#allocation52_spill] sm:$0xff] }
 0x85b   : > { %9627 = vmatprep.mubr.f32.mxu1 %v20259_v52  ;;  %9884 = vmatprep.subr.mxu1 %v17680_v11  ;;  %v18154_v28 = vpop.f32.mrf.mxu1 }
 0x85c   : > { %10047 = vmatprep.subr.mxu0 %v20301_v55  ;;  %9499 = vmatmul.mubr.f32.gmra.mxu0 %v17919_v50  ;;  %v8835_v54 = vpop.f32.mrf.mxu0 }
 0x85d   : > { %9631 = vmatmul.mubr.f32.gmra.mxu1 %v20302_v42  ;;  %9504 = vmatprep.mubr.f32.mxu0 %v20259_v52  ;;  %v8948_v2 = vpop.f32.mrf.mxu1  ;;  %v8836_v18 = vadd.f32 %v8835_v54, %v18059_v17  ;;  %v20303_v17 = vand.u32 4294901760, %v17876_v25  ;;  %v20305_v25 = vand.u32 4294901760, %v17919_v50  ;;  %v20320_v54 = vld [vmem:[#allocation54_spill] sm:$0xff]  ;;  %v9990_v42 = vld [vmem:[%s19451_s1 + $0x210] sm:$0xff] }
 0x85e   : > { %9886 = vmatpush1.msra.mxu1 %v17696_v48  ;;  %9636 = vmatprep.mubr.f32.mxu1 %v20259_v52  ;;  %v18164_v11 = vadd.f32 %v8948_v2, %v8822_v41  ;;  %v18166_v8 = vpop.f32.mrf.mxu0  ;;  %v20314_v41 = vld [vmem:[#allocation32_spill] sm:$0xff] }
 0x85f   : > { %9888 = vmatprep.subr.mxu1 %v17694_v6  ;;  %v18169_v61 = vpop.f32.mrf.mxu1 }
 0x860   : > { %9890 = vmatpush1.msra.mxu1 %v17725_v39  ;;  %9507 = vmatmul.mubr.f32.gmra.mxu0 %v17944_v56  ;;  %v8842_v63 = vpop.f32.mrf.mxu0 }
 0x861   : > { %9892 = vmatprep.subr.mxu1 %v17714_v15  ;;  %9640 = vmatmul.mubr.f32.gmra.mxu1 %v20303_v17  ;;  %v8955_v48 = vpop.f32.mrf.mxu1  ;;  %v8843_v31 = vadd.f32 %v8842_v63, %v18073_v60  ;;  %v20304_v15 = vld [vmem:[#allocation49_spill] sm:$0xff]  ;;  %v10003_v63 = vsel %vm2106_vm14, %v9990_v42, 0 }
 0x862   : > { %9894 = vmatpush1.msra.mxu1 %v17692_v32  ;;  %9512 = vmatprep.mubr.f32.mxu0 %v20259_v52  ;;  %v18179_v6 = vadd.f32 %v8955_v48, %v8829_v5  ;;  %v20319_v5 = vld [vmem:[#allocation53_spill] sm:$0xff] }
 0x863   : > { %9896 = vmatprep.subr.mxu1 %v17760_v37  ;;  %9645 = vmatprep.mubr.f32.mxu1 %v20259_v52  ;;  %v18183_v39 = vpop.f32.mrf.mxu1  ;;  %v9991_v17 = vld [vmem:[%s19451_s1 + $0x218] sm:$0xff] }
 0x864   : > { %9898 = vmatpush1.msra.mxu1 %v17627_v19  ;;  %9515 = vmatmul.mubr.f32.gmra.mxu0 %v17969_v34  ;;  %v20306_v19 = vand.u32 4294901760, %v17944_v56  ;;  %v20310_v56 = vld [vmem:[#allocation34_spill] sm:$0xff] }
 0x865   : > { %10210 = vmatprep.subr.mxu1 %v20304_v15  ;;  %9649 = vmatmul.mubr.f32.gmra.mxu1 %v20305_v25  ;;  %v8962_v32 = vpop.f32.mrf.mxu1  ;;  %v9988_v34 = vld [vmem:[%s19451_s1 + $0x200] sm:$0xff]  ;;  %v18264_v15 = vand.u32 4294901760, %v10003_v63 }
 0x866   : > { %9520 = vmatprep.mubr.f32.mxu0 %v20259_v52  ;;  %9654 = vmatprep.mubr.f32.mxu1 %v20259_v52  ;;  %v18192_v60 = vadd.f32 %v8962_v32, %v8836_v18  ;;  %v9997_v36 = vsel %vm2106_vm14, %v9988_v34, 0  ;;  %v9992_v25 = vld [vmem:[%s19451_s1 + $0x220] sm:$0xff] }
 0x867   : > { %v18194_v37 = vpop.f32.mrf.mxu1  ;;  %v18232_v14 = vand.u32 4294901760, %v9997_v36 }
 0x868   : > { %9523 = vmatmul.mubr.f32.gmra.mxu0 %v17992_v44  ;;  %v20316_v44 = vld [vmem:[#allocation50_spill] sm:$0xff] }
 0x869   : > { %9658 = vmatmul.mubr.f32.gmra.mxu1 %v20306_v19  ;;  %9794 = vmatprep.mubr.f32.mxu0 %v20259_v52  ;;  %v8969_v40 = vpop.f32.mrf.mxu1  ;;  %v18247_v2 = vsub.f32 %v9997_v36, %v18232_v14 }
 0x86a   : > { %9663 = vmatprep.mubr.f32.mxu1 %v20259_v52  ;;  %v18201_v50 = vadd.f32 %v8969_v40, %v8843_v31 }
 0x86b   : > { %v10093_v48 = vand.u32 4294901760, %v18247_v2 }
 0x86c   : > { %9796 = vmatmul.mubr.f32.vlgmr.msra.gmra.mxu0 %v20264_v21 }
 0x86d   : > { %9667 = vmatmul.mubr.f32.gmra.mxu1 %v20307_v24  ;;  %10049 = vmatpush1.msra.mxu0 %v20308_v7  ;;  %v10094_v32 = vsub.f32 %v18247_v2, %v10093_v48  ;;  %v10009_v24 = vsel %vm2106_vm14, %v9992_v25, 0 }
 0x86e   : > { %10051 = vmatprep.subr.mxu0 %v20309_v49  ;;  %9672 = vmatprep.mubr.f32.mxu1 %v20259_v52 }
 0x86f   : > { %10053 = vmatpush1.msra.mxu0 %v20310_v56  ;;  %9801 = vmatprep.mubr.f32.mxu0 %v20259_v52  ;;  %v10095_v34 = vand.u32 4294901760, %v10094_v32  ;;  %v20324_v32 = vld [vmem:[#allocation33_spill] sm:$0xff] }
 0x870   : > { %10055 = vmatprep.subr.mxu0 %v20311_v29  ;;  %9803 = vmatmul.mubr.f32.gmra.mxu0 %v20312_v20 }
 0x871   : > { %9676 = vmatmul.mubr.f32.gmra.mxu1 %v20313_v38  ;;  %10057 = vmatpush1.msra.mxu0 %v20314_v41  ;;  %v18290_v38 = vand.u32 4294901760, %v10009_v24 }
 0x872   : > { %10358 = vmatprep.subr.mxu0 %v20315_v0  ;;  %9808 = vmatprep.mubr.f32.mxu0 %v20259_v52 }
 0x873   : > { %9931 = vmatprep.mubr.f32.mxu1 %v20259_v52 }
 0x874   : > { %9810 = vmatmul.mubr.f32.gmra.mxu0 %v17536_v12 }
 0x875   : > { %9933 = vmatmul.mubr.f32.vlgmr.msra.gmra.mxu1 %v20264_v21  ;;  %9815 = vmatprep.mubr.f32.mxu0 %v20259_v52  ;;  %v10000_v21 = vsel %vm2106_vm14, %v9989_v4, 0  ;;  %v9994_v4 = vld [vmem:[%s19451_s1 + $0x230] sm:$0xff] }
 0x876   : > { %10216 = vmatpush1.msra.mxu1 %v20316_v44  ;;  %9938 = vmatprep.mubr.f32.mxu1 %v20259_v52  ;;  %v18250_v18 = vand.u32 4294901760, %v10000_v21  ;;  %v10015_v42 = vsel %vm2106_vm14, %v9994_v4, 0 }
 0x877   : > { %10222 = vmatprep.subr.mxu1 %v20317_v45  ;;  %v18308_v45 = vsub.f32 %v10009_v24, %v18290_v38 }
 0x878   : > { %10228 = vmatpush1.msra.mxu1 %v20318_v30  ;;  %9817 = vmatmul.mubr.f32.gmra.mxu0 %v17824_v46  ;;  %v18262_v31 = vsub.f32 %v10000_v21, %v18250_v18 }
 0x879   : > { %10234 = vmatprep.subr.mxu1 %v20319_v5  ;;  %9940 = vmatmul.mubr.f32.gmra.mxu1 %v20312_v20  ;;  %v9993_v20 = vld [vmem:[%s19451_s1 + $0x228] sm:$0xff]  ;;  %v10137_v25 = vand.u32 4294901760, %v18308_v45 }
 0x87a   : > { %10240 = vmatpush1.msra.mxu1 %v20320_v54  ;;  %9822 = vmatprep.mubr.f32.mxu0 %v20259_v52  ;;  %v10104_v19 = vand.u32 4294901760, %v18262_v31  ;;  %v10012_v44 = vsel %vm2106_vm14, %v9993_v20, 0  ;;  %v20321_v54 = vld [vmem:[#allocation37_spill] sm:$0xff] }
 0x87b   : > { %10498 = vmatprep.subr.mxu1 %v20301_v55  ;;  %9945 = vmatprep.mubr.f32.mxu1 %v20259_v52  ;;  %v18314_v21 = vand.u32 4294901760, %v10012_v44 }
 0x87c   : > { %9824 = vmatmul.mubr.f32.gmra.mxu0 %v17896_v27  ;;  %v10105_v0 = vsub.f32 %v18262_v31, %v10104_v19 }
 0x87d   : > { %9947 = vmatmul.mubr.f32.gmra.mxu1 %v17536_v12  ;;  %9829 = vmatprep.mubr.f32.mxu0 %v20259_v52  ;;  %v10006_v12 = vsel %vm2106_vm14, %v9991_v17, 0  ;;  %v9995_v17 = vld [vmem:[%s19451_s1 + $0x238] sm:$0xff]  ;;  %v18332_v20 = vsub.f32 %v10012_v44, %v18314_v21 }
 0x87e   : > { %9952 = vmatprep.mubr.f32.mxu1 %v20259_v52  ;;  %v18281_v40 = vand.u32 4294901760, %v10006_v12  ;;  %v10106_v30 = vand.u32 4294901760, %v10105_v0  ;;  %v20325_v0 = vld [vmem:[#allocation44_spill] sm:$0xff]  ;;  %v10018_v4 = vsel %vm2106_vm14, %v9995_v17, 0 }
 0x880   : > { %9831 = vmatmul.mubr.f32.gmra.mxu0 %v17921_v22 }
 0x881   : > { %9954 = vmatmul.mubr.f32.gmra.mxu1 %v17824_v46  ;;  %9836 = vmatprep.mubr.f32.mxu0 %v20259_v52  ;;  %v18279_v46 = vsub.f32 %v10003_v63, %v18264_v15  ;;  %v20322_v63 = vld [vmem:[#allocation38_spill] sm:$0xff] }
 0x882   : > { %9959 = vmatprep.mubr.f32.mxu1 %v20259_v52 }
 0x883   : > { %v10115_v36 = vand.u32 4294901760, %v18279_v46 }
 0x884   : > { %9838 = vmatmul.mubr.f32.gmra.mxu0 %v17946_v33 }
 0x885   : > { %9961 = vmatmul.mubr.f32.gmra.mxu1 %v17896_v27  ;;  %9843 = vmatprep.mubr.f32.mxu0 %v20259_v52  ;;  %v18298_v27 = vsub.f32 %v10006_v12, %v18281_v40  ;;  %v10116_v5 = vsub.f32 %v18279_v46, %v10115_v36  ;;  %v20323_v12 = vld [vmem:[#allocation39_spill] sm:$0xff] }
 0x886   : > { %9966 = vmatprep.mubr.f32.mxu1 %v20259_v52 }
 0x888   : > { %9845 = vmatmul.mubr.f32.gmra.mxu0 %v17971_v3 }
 0x889   : > { %9968 = vmatmul.mubr.f32.gmra.mxu1 %v17921_v22  ;;  %10090 = vmatprep.mubr.f32.mxu0 %v20259_v52  ;;  %v10126_v22 = vand.u32 4294901760, %v18298_v27 }
 0x88a   : > { %9973 = vmatprep.mubr.f32.mxu1 %v20259_v52 }
 0x88b   : > { %v10127_v24 = vsub.f32 %v18298_v27, %v10126_v22 }
 0x88c   : > { %10096 = vmatmul.mubr.f32.vlgmr.msra.gmra.mxu0 %v10095_v34  ;;  %v18334_v34 = vand.u32 4294901760, %v10015_v42 }
 0x88d   : > { %9975 = vmatmul.mubr.f32.gmra.mxu1 %v17946_v33  ;;  %10361 = vmatpush1.msra.mxu0 %v20321_v54  ;;  %v10117_v33 = vand.u32 4294901760, %v10116_v5  ;;  %v20326_v54 = vld [vmem:[#allocation47_spill] sm:$0xff]  ;;  %v10128_v44 = vand.u32 4294901760, %v10127_v24  ;;  %v10148_v5 = vand.u32 4294901760, %v18332_v20 }
 0x88e   : > { %10364 = vmatprep.subr.mxu0 %v20322_v63  ;;  %9980 = vmatprep.mubr.f32.mxu1 %v20259_v52  ;;  %v18349_v63 = vand.u32 4294901760, %v10018_v4 }
 0x88f   : > { %10367 = vmatpush1.msra.mxu0 %v20323_v12  ;;  %10101 = vmatprep.mubr.f32.mxu0 %v20259_v52 }
 0x890   : > { %10370 = vmatprep.subr.mxu0 %v20324_v32  ;;  %10107 = vmatmul.mubr.f32.gmra.mxu0 %v10106_v30  ;;  %v10138_v30 = vsub.f32 %v18308_v45, %v10137_v25  ;;  %v18362_v32 = vsub.f32 %v10018_v4, %v18349_v63 }
 0x891   : > { %9982 = vmatmul.mubr.f32.gmra.mxu1 %v17971_v3  ;;  %10373 = vmatpush1.msra.mxu0 %v20325_v0  ;;  %v18347_v3 = vsub.f32 %v10015_v42, %v18334_v34  ;;  %v10149_v42 = vsub.f32 %v18332_v20, %v10148_v5 }
 0x892   : > { %10643 = vmatprep.subr.mxu0 %v20326_v54  ;;  %10112 = vmatprep.mubr.f32.mxu0 %v20259_v52  ;;  %v10139_v17 = vand.u32 4294901760, %v10138_v30  ;;  %v10170_v0 = vand.u32 4294901760, %v18362_v32  ;;  %v20327_v30 = vld [vmem:[#allocation41_spill] sm:$0xff] }
 0x893   : > { %10273 = vmatprep.mubr.f32.mxu1 %v20259_v52  ;;  %v10159_v12 = vand.u32 4294901760, %v18347_v3 }
 0x894   : > { %10118 = vmatmul.mubr.f32.gmra.mxu0 %v10117_v33  ;;  %v10150_v33 = vand.u32 4294901760, %v10149_v42  ;;  %v20330_v42 = vld [vmem:[#allocation46_spill] sm:$0xff] }
 0x895   : > { %10275 = vmatmul.mubr.f32.vlgmr.msra.gmra.mxu1 %v18232_v14  ;;  %10123 = vmatprep.mubr.f32.mxu0 %v20259_v52  ;;  %v10160_v24 = vsub.f32 %v18347_v3, %v10159_v12 }
 0x896   : > { %10500 = vmatpush1.msra.mxu1 %v20308_v7  ;;  %10280 = vmatprep.mubr.f32.mxu1 %v20259_v52 }
 0x897   : > { %10502 = vmatprep.subr.mxu1 %v20309_v49  ;;  %v10161_v4 = vand.u32 4294901760, %v10160_v24  ;;  %v20332_v24 = vld [vmem:[#allocation55_spill] sm:$0xff] }
 0x898   : > { %10504 = vmatpush1.msra.mxu1 %v20310_v56  ;;  %10129 = vmatmul.mubr.f32.gmra.mxu0 %v10128_v44  ;;  %v20328_v44 = vld [vmem:[#allocation43_spill] sm:$0xff] }
 0x899   : > { %10506 = vmatprep.subr.mxu1 %v20311_v29  ;;  %10282 = vmatmul.mubr.f32.gmra.mxu1 %v18250_v18 }
 0x89a   : > { %10508 = vmatpush1.msra.mxu1 %v20314_v41  ;;  %10134 = vmatprep.mubr.f32.mxu0 %v20259_v52 }
 0x89b   : > { %10780 = vmatprep.subr.mxu1 %v20301_v55  ;;  %10287 = vmatprep.mubr.f32.mxu1 %v20259_v52  ;;  %v10171_v55 = vsub.f32 %v18362_v32, %v10170_v0 }
 0x89c   : > { %10140 = vmatmul.mubr.f32.gmra.mxu0 %v10139_v17  ;;  %v20329_v17 = vld [vmem:[#allocation45_spill] sm:$0xff] }
 0x89d   : > { %10289 = vmatmul.mubr.f32.gmra.mxu1 %v18264_v15  ;;  %10145 = vmatprep.mubr.f32.mxu0 %v20259_v52  ;;  %v10172_v54 = vand.u32 4294901760, %v10171_v55  ;;  %v10899_v55 = vld [vmem:[%s19451_s1 + $0x258] sm:$0xff] }
 0x89e   : > { %10294 = vmatprep.mubr.f32.mxu1 %v20259_v52 }
 0x8a0   : > { %10151 = vmatmul.mubr.f32.gmra.mxu0 %v10150_v33  ;;  %v20331_v33 = vld [vmem:[#allocation48_spill] sm:$0xff] }
 0x8a1   : > { %10296 = vmatmul.mubr.f32.gmra.mxu1 %v18281_v40  ;;  %10156 = vmatprep.mubr.f32.mxu0 %v20259_v52 }
 0x8a2   : > { %10301 = vmatprep.mubr.f32.mxu1 %v20259_v52 }
 0x8a4   : > { %10162 = vmatmul.mubr.f32.gmra.mxu0 %v10161_v4 }
 0x8a5   : > { %10303 = vmatmul.mubr.f32.gmra.mxu1 %v18290_v38  ;;  %10167 = vmatprep.mubr.f32.mxu0 %v20259_v52 }
 0x8a6   : > { %10308 = vmatprep.mubr.f32.mxu1 %v20259_v52 }
 0x8a8   : > { %10173 = vmatmul.mubr.f32.gmra.mxu0 %v10172_v54  ;;  %v20348_v54 = vld [vmem:[#allocation91_spill] sm:$0xff] }
 0x8a9   : > { %10310 = vmatmul.mubr.f32.gmra.mxu1 %v18314_v21  ;;  %10406 = vmatprep.mubr.f32.mxu0 %v20259_v52 }
 0x8aa   : > { %10315 = vmatprep.mubr.f32.mxu1 %v20259_v52 }
 0x8ac   : > { %10409 = vmatmul.mubr.f32.vlgmr.msra.gmra.mxu0 %v18247_v2  ;;  %v20333_v2 = vld [vmem:[#allocation58_spill] sm:$0xff] }
 0x8ad   : > { %10317 = vmatmul.mubr.f32.gmra.mxu1 %v18334_v34  ;;  %10647 = vmatpush1.msra.mxu0 %v20327_v30  ;;  %v20349_v30 = vld [vmem:[#allocation95_spill] sm:$0xff] }
 0x8ae   : > { %10651 = vmatprep.subr.mxu0 %v20328_v44  ;;  %10322 = vmatprep.mubr.f32.mxu1 %v20259_v52  ;;  %v8380_v44 = vadd.f32 %v20349_v30, %v20348_v54  ;;  %v10901_v54 = vld [vmem:[%s19451_s1 + $0x268] sm:$0xff]  ;;  %v20357_v30 = vld [vmem:[#allocation124_spill] sm:$0xff] }
 0x8af   : > { %10655 = vmatpush1.msra.mxu0 %v20329_v17  ;;  %10414 = vmatprep.mubr.f32.mxu0 %v20259_v52  ;;  %v20350_v17 = vld [vmem:[#allocation111_spill] sm:$0xff] }
 0x8b0   : > { %10659 = vmatprep.subr.mxu0 %v20330_v42  ;;  %10417 = vmatmul.mubr.f32.gmra.mxu0 %v18262_v31  ;;  %v10896_v31 = vld [vmem:[%s19451_s1 + $0x240] sm:$0xff] }
 0x8b1   : > { %10324 = vmatmul.mubr.f32.gmra.mxu1 %v18349_v63  ;;  %10663 = vmatpush1.msra.mxu0 %v20331_v33 }
 0x8b2   : > { %10955 = vmatprep.subr.mxu0 %v20332_v24  ;;  %10422 = vmatprep.mubr.f32.mxu0 %v20259_v52 }
 0x8b3   : > { %10541 = vmatprep.mubr.f32.mxu1 %v20259_v52 }
 0x8b4   : > { %10425 = vmatmul.mubr.f32.gmra.mxu0 %v18279_v46  ;;  %v20340_v46 = vld [vmem:[#allocation73_spill] sm:$0xff] }
 0x8b5   : > { %10545 = vmatmul.mubr.f32.vlgmr.msra.gmra.mxu1 %v10093_v48  ;;  %10430 = vmatprep.mubr.f32.mxu0 %v20259_v52  ;;  %v20339_v48 = vld [vmem:[#allocation56_spill] sm:$0xff] }
 0x8b6   : > { %10782 = vmatpush1.msra.mxu1 %v20308_v7  ;;  %10550 = vmatprep.mubr.f32.mxu1 %v20259_v52  ;;  %v20334_v7 = vld [vmem:[#allocation59_spill] sm:$0xff] }
 0x8b7   : > { %10784 = vmatprep.subr.mxu1 %v20309_v49  ;;  %v20335_v49 = vld [vmem:[#allocation60_spill] sm:$0xff] }
 0x8b8   : > { %10786 = vmatpush1.msra.mxu1 %v20310_v56  ;;  %10433 = vmatmul.mubr.f32.gmra.mxu0 %v18298_v27  ;;  %v20336_v56 = vld [vmem:[#allocation61_spill] sm:$0xff]  ;;  %v20341_v27 = vld [vmem:[#allocation74_spill] sm:$0xff] }
 0x8b9   : > { %10788 = vmatprep.subr.mxu1 %v20311_v29  ;;  %10554 = vmatmul.mubr.f32.gmra.mxu1 %v10104_v19  ;;  %v20337_v29 = vld [vmem:[#allocation62_spill] sm:$0xff]  ;;  %v10905_v19 = vsel %vm2106_vm14, %v10896_v31, 0  ;;  %v10914_v31 = vsel %vm2106_vm14, %v10899_v55, 0 }
 0x8ba   : > { %10790 = vmatpush1.msra.mxu1 %v20314_v41  ;;  %10438 = vmatprep.mubr.f32.mxu0 %v20259_v52  ;;  %v20338_v41 = vld [vmem:[#allocation30_spill] sm:$0xff] }
 0x8bb   : > { %11118 = vmatprep.subr.mxu1 %v20333_v2  ;;  %10559 = vmatprep.mubr.f32.mxu1 %v20259_v52  ;;  %v18502_v2 = vpop.f32.mrf.mxu0 }
 0x8bc   : > { %10441 = vmatmul.mubr.f32.gmra.mxu0 %v18308_v45  ;;  %v20342_v45 = vld [vmem:[#allocation75_spill] sm:$0xff] }
 0x8bd   : > { %10563 = vmatmul.mubr.f32.gmra.mxu1 %v10115_v36  ;;  %10446 = vmatprep.mubr.f32.mxu0 %v20259_v52  ;;  %v10897_v36 = vld [vmem:[%s19451_s1 + $0x248] sm:$0xff] }
 0x8be   : > { %10568 = vmatprep.mubr.f32.mxu1 %v20259_v52 }
 0x8c0   : > { %10449 = vmatmul.mubr.f32.gmra.mxu0 %v18332_v20  ;;  %v10898_v20 = vld [vmem:[%s19451_s1 + $0x250] sm:$0xff] }
 0x8c1   : > { %10572 = vmatmul.mubr.f32.gmra.mxu1 %v10126_v22  ;;  %10454 = vmatprep.mubr.f32.mxu0 %v20259_v52  ;;  %v18470_v22 = vand.u32 4294901760, %v10905_v19  ;;  %v10911_v4 = vsel %vm2106_vm14, %v10898_v20, 0 }
 0x8c2   : > { %10577 = vmatprep.mubr.f32.mxu1 %v20259_v52  ;;  %v18500_v33 = vand.u32 4294901760, %v10911_v4 }
 0x8c4   : > { %10457 = vmatmul.mubr.f32.gmra.mxu0 %v18347_v3  ;;  %v20345_v3 = vld [vmem:[#allocation88_spill] sm:$0xff]  ;;  %v18520_v20 = vsub.f32 %v10911_v4, %v18500_v33 }
 0x8c5   : > { %10581 = vmatmul.mubr.f32.gmra.mxu1 %v10137_v25  ;;  %10462 = vmatprep.mubr.f32.mxu0 %v20259_v52  ;;  %v10908_v25 = vsel %vm2106_vm14, %v10897_v36, 0  ;;  %v20356_v4 = vld [vmem:[#allocation96_spill] sm:$0xff] }
 0x8c6   : > { %10586 = vmatprep.mubr.f32.mxu1 %v20259_v52  ;;  %20354 = vst [vmem:[#allocation127_spill] sm:$0xff] %v18520_v20 }
 0x8c8   : > { %10465 = vmatmul.mubr.f32.gmra.mxu0 %v18362_v32 }
 0x8c9   : > { %10590 = vmatmul.mubr.f32.gmra.mxu1 %v10148_v5  ;;  %10696 = vmatprep.mubr.f32.mxu0 %v20259_v52  ;;  %v20344_v5 = vld [vmem:[#allocation77_spill] sm:$0xff] }
 0x8ca   : > { %10595 = vmatprep.mubr.f32.mxu1 %v20259_v52 }
 0x8cc   : > { %10698 = vmatmul.mubr.f32.vlgmr.msra.gmra.mxu0 %v18232_v14 }
 0x8cd   : > { %10599 = vmatmul.mubr.f32.gmra.mxu1 %v10159_v12  ;;  %10957 = vmatpush1.msra.mxu0 %v20334_v7  ;;  %v20346_v12 = vld [vmem:[#allocation93_spill] sm:$0xff] }
 0x8ce   : > { %10959 = vmatprep.subr.mxu0 %v20335_v49  ;;  %10604 = vmatprep.mubr.f32.mxu1 %v20259_v52  ;;  %v8373_v32 = vadd.f32 %v20346_v12, %v20345_v3 }
 0x8cf   : > { %10961 = vmatpush1.msra.mxu0 %v20336_v56  ;;  %10703 = vmatprep.mubr.f32.mxu0 %v20259_v52 }
 0x8d0   : > { %10963 = vmatprep.subr.mxu0 %v20337_v29  ;;  %10705 = vmatmul.mubr.f32.gmra.mxu0 %v18250_v18  ;;  %v8507_v42 = vadd.f32 %v20350_v17, %v8373_v32  ;;  %v20355_v32 = vld [vmem:[#allocation92_spill] sm:$0xff] }
 0x8d1   : > { %10608 = vmatmul.mubr.f32.gmra.mxu1 %v10170_v0  ;;  %10965 = vmatpush1.msra.mxu0 %v20338_v41  ;;  %v18488_v0 = vand.u32 4294901760, %v10908_v25  ;;  %v8387_v55 = vadd.f32 %v20356_v4, %v20355_v32 }
 0x8d2   : > { %11266 = vmatprep.subr.mxu0 %v20339_v48  ;;  %10710 = vmatprep.mubr.f32.mxu0 %v20259_v52 }
 0x8d3   : > { %10823 = vmatprep.mubr.f32.mxu1 %v20259_v52  ;;  %v18507_v48 = vsub.f32 %v10908_v25, %v18488_v0 }
 0x8d4   : > { %10712 = vmatmul.mubr.f32.gmra.mxu0 %v18264_v15 }
 0x8d5   : > { %10825 = vmatmul.mubr.f32.vlgmr.msra.gmra.mxu1 %v18232_v14  ;;  %10717 = vmatprep.mubr.f32.mxu0 %v20259_v52  ;;  %v20343_v14 = vld [vmem:[#allocation76_spill] sm:$0xff]  ;;  %20351 = vst [vmem:[#allocation122_spill] sm:$0xff] %v18507_v48  ;;  %v19686_v12 = vand.u32 4294901760, %v18507_v48 }
 0x8d6   : > { %11124 = vmatpush1.msra.mxu1 %v20340_v46  ;;  %10830 = vmatprep.mubr.f32.mxu1 %v20259_v52 }
 0x8d7   : > { %11130 = vmatprep.subr.mxu1 %v20341_v27  ;;  %v10900_v27 = vld [vmem:[%s19451_s1 + $0x260] sm:$0xff] }
 0x8d8   : > { %11136 = vmatpush1.msra.mxu1 %v20342_v45  ;;  %10719 = vmatmul.mubr.f32.gmra.mxu0 %v18281_v40  ;;  %v20353_v45 = vld [vmem:[#allocation120_spill] sm:$0xff] }
 0x8d9   : > { %11142 = vmatprep.subr.mxu1 %v20343_v14  ;;  %10832 = vmatmul.mubr.f32.gmra.mxu1 %v18250_v18  ;;  %v18486_v18 = vsub.f32 %v10905_v19, %v18470_v22  ;;  %v20352_v19 = vld [vmem:[#allocation94_spill] sm:$0xff]  ;;  %v8643_v14 = vadd.f32 %v20353_v45, %v8507_v42  ;;  %v11013_v45 = vsub.f32 %v18507_v48, %v19686_v12 }
 0x8da   : > { %11148 = vmatpush1.msra.mxu1 %v20344_v5  ;;  %10724 = vmatprep.mubr.f32.mxu0 %v20259_v52  ;;  %v8515_v46 = vadd.f32 %v20352_v19, %v8380_v44  ;;  %v18522_v5 = vand.u32 4294901760, %v10914_v31 }
 0x8db   : > { %11406 = vmatprep.subr.mxu1 %v20332_v24  ;;  %10837 = vmatprep.mubr.f32.mxu1 %v20259_v52  ;;  %20347 = vst [vmem:[#allocation133_spill] sm:$0xff] %v18486_v18  ;;  %v8796_v17 = vadd.f32 %v18061_v43, %v8643_v14  ;;  %v20359_v14 = vld [vmem:[#allocation104_spill] sm:$0xff] }
 0x8dc   : > { %10726 = vmatmul.mubr.f32.gmra.mxu0 %v18290_v38  ;;  %v8652_v44 = vadd.f32 %v20357_v30, %v8515_v46  ;;  %v18542_v19 = vsub.f32 %v10914_v31, %v18522_v5  ;;  %v10920_v46 = vsel %vm2106_vm14, %v10901_v54, 0  ;;  %v20358_v31 = vld [vmem:[#allocation86_spill] sm:$0xff] }
 0x8dd   : > { %10839 = vmatmul.mubr.f32.gmra.mxu1 %v18264_v15  ;;  %10731 = vmatprep.mubr.f32.mxu0 %v20259_v52  ;;  %v19685_v15 = vand.u32 4294901760, %v18486_v18  ;;  %v8394_v4 = vadd.f32 %v20359_v14, %v20358_v31  ;;  %v20360_v30 = vld [vmem:[#allocation102_spill] sm:$0xff]  ;;  %v18572_v48 = vand.u32 4294901760, %v10920_v46 }
 0x8de   : > { %10844 = vmatprep.mubr.f32.mxu1 %v20259_v52  ;;  %v8803_v31 = vadd.f32 %v18075_v16, %v8652_v44  ;;  %v20363_v44 = vld [vmem:[#allocation107_spill] sm:$0xff] }
 0x8e0   : > { %10733 = vmatmul.mubr.f32.gmra.mxu0 %v18314_v21 }
 0x8e1   : > { %10846 = vmatmul.mubr.f32.gmra.mxu1 %v18281_v40  ;;  %10738 = vmatprep.mubr.f32.mxu0 %v20259_v52  ;;  %v11002_v40 = vsub.f32 %v18486_v18, %v19685_v15  ;;  %v18557_v15 = vpop.f32.mrf.mxu1 }
 0x8e2   : > { %10851 = vmatprep.mubr.f32.mxu1 %v20259_v52  ;;  %v9085_v36 = vpop.f32.mrf.mxu0  ;;  %20361 = vst [vmem:[#allocation125_spill] sm:$0xff] %v18557_v15  ;;  %v20366_v15 = vld [vmem:[#allocation64_spill] sm:$0xff] }
 0x8e3   : > { %v9086_v25 = vadd.f32 %v9085_v36, %v18092_v23  ;;  %v10917_v23 = vsel %vm2106_vm14, %v10900_v27, 0  ;;  %v11003_v36 = vand.u32 4294901760, %v11002_v40  ;;  %v8523_v40 = vadd.f32 %v20360_v30, %v8387_v55 }
 0x8e4   : > { %10740 = vmatmul.mubr.f32.gmra.mxu0 %v18334_v34  ;;  %v9087_v3 = vpop.f32.mrf.mxu0  ;;  %v18549_v32 = vand.u32 4294901760, %v10917_v23  ;;  %v11014_v55 = vand.u32 4294901760, %v11013_v45 }
 0x8e5   : > { %10853 = vmatmul.mubr.f32.gmra.mxu1 %v18290_v38  ;;  %10745 = vmatprep.mubr.f32.mxu0 %v20259_v52  ;;  %v19689_v38 = vand.u32 4294901760, %v18520_v20 }
 0x8e6   : > { %10858 = vmatprep.mubr.f32.mxu1 %v20259_v52  ;;  %v18570_v12 = vsub.f32 %v10917_v23, %v18549_v32  ;;  %v8661_v23 = vadd.f32 %v18005_v1, %v8523_v40  ;;  %v20368_v1 = vand.u32 4294901760, %v18542_v19  ;;  %v18601_v40 = vsub.f32 %v10920_v46, %v18572_v48 }
 0x8e7   : > { %v9096_v42 = vpop.f32.mrf.mxu0 }
 0x8e8   : > { %10747 = vmatmul.mubr.f32.gmra.mxu0 %v18349_v63  ;;  %v9097_v27 = vadd.f32 %v9096_v42, %v18112_v57  ;;  %v10902_v57 = vld [vmem:[%s19451_s1 + $0x270] sm:$0xff]  ;;  %v11024_v42 = vsub.f32 %v18520_v20, %v19689_v38  ;;  %v8810_v46 = vadd.f32 %v18094_v53, %v8661_v23  ;;  %v11056_v23 = vand.u32 4294901760, %v18601_v40 }
 0x8e9   : > { %10860 = vmatmul.mubr.f32.gmra.mxu1 %v18314_v21  ;;  %10998 = vmatprep.mubr.f32.mxu0 %v20259_v52  ;;  %v9098_v43 = vpop.f32.mrf.mxu0  ;;  %v8923_v21 = vadd.f32 %v18099_v26, %v8796_v17  ;;  %v20362_v26 = vld [vmem:[#allocation63_spill] sm:$0xff]  ;;  %v10923_v16 = vsel %vm2106_vm14, %v10902_v57, 0  ;;  %v20365_v20 = vld [vmem:[#allocation116_spill] sm:$0xff] }
 0x8ea   : > { %10865 = vmatprep.mubr.f32.mxu1 %v20259_v52  ;;  %v8531_v18 = vadd.f32 %v20365_v20, %v8394_v4  ;;  %v11025_v57 = vand.u32 4294901760, %v11024_v42  ;;  %v11035_v20 = vsub.f32 %v18542_v19, %v20368_v1  ;;  %v11045_v4 = vand.u32 4294901760, %v18570_v12  ;;  %v20374_v1 = vld [vmem:[#allocation57_spill] sm:$0xff] }
 0x8eb   : > { %v9088_v17 = vadd.f32 %v9087_v3, %v8923_v21  ;;  %v8930_v42 = vadd.f32 %v18119_v13, %v8803_v31 }
 0x8ec   : > { %11004 = vmatmul.mubr.f32.vlgmr.msra.gmra.mxu0 %v11003_v36  ;;  %v9107_v14 = vpop.f32.mrf.mxu0  ;;  %v9314_v30 = vpop.f32.mrf.mxu1  ;;  %v20364_v36 = vld [vmem:[#allocation114_spill] sm:$0xff]  ;;  %v11036_v31 = vand.u32 4294901760, %v11035_v20 }
 0x8ed   : > { %10867 = vmatmul.mubr.f32.gmra.mxu1 %v18334_v34  ;;  %11269 = vmatpush1.msra.mxu0 %v20362_v26  ;;  %v18577_v38 = vadd.f32 %v9107_v14, %v18129_v59  ;;  %v18579_v54 = vadd.f32 %v9314_v30, %v9086_v25  ;;  %v8401_v45 = vadd.f32 %v20364_v36, %v20363_v44  ;;  %v10903_v59 = vld [vmem:[%s19451_s1 + $0x278] sm:$0xff]  ;;  %v18603_v14 = vand.u32 4294901760, %v10923_v16  ;;  %v20376_v20 = vld [vmem:[#allocation110_spill] sm:$0xff] }
 0x8ee   : > { %11272 = vmatprep.subr.mxu0 %v20366_v15  ;;  %10872 = vmatprep.mubr.f32.mxu1 %v20259_v52  ;;  %v9109_v34 = vpop.f32.mrf.mxu0  ;;  %v9316_v3 = vpop.f32.mrf.mxu1  ;;  %v20367_v25 = vld [vmem:[#allocation65_spill] sm:$0xff]  ;;  %v20369_v15 = vld [vmem:[#allocation66_spill] sm:$0xff]  ;;  %v20370_v30 = vld [vmem:[#allocation100_spill] sm:$0xff]  ;;  %v10926_v36 = vsel %vm2106_vm14, %v10903_v59, 0 }
 0x8ef   : > { %11275 = vmatpush1.msra.mxu0 %v20367_v25  ;;  %11009 = vmatprep.mubr.f32.mxu0 %v20259_v52  ;;  %v18593_v21 = vadd.f32 %v9316_v3, %v9088_v17  ;;  %v20371_v26 = vld [vmem:[#allocation108_spill] sm:$0xff]  ;;  %v20373_v3 = vld [vmem:[#allocation118_spill] sm:$0xff]  ;;  %v18629_v59 = vand.u32 4294901760, %v10926_v36 }
 0x8f0   : > { %11278 = vmatprep.subr.mxu0 %v20369_v15  ;;  %11015 = vmatmul.mubr.f32.gmra.mxu0 %v11014_v55  ;;  %v8408_v44 = vadd.f32 %v20371_v26, %v20370_v30  ;;  %v20372_v17 = vld [vmem:[#allocation68_spill] sm:$0xff]  ;;  %v8670_v55 = vadd.f32 %v18024_v51, %v8531_v18  ;;  %v8539_v25 = vadd.f32 %v20373_v3, %v8401_v45  ;;  %v12917_v51 = vmov 4  }
 0x8f1   : > { %10874 = vmatmul.mubr.f32.gmra.mxu1 %v18349_v63  ;;  %11281 = vmatpush1.msra.mxu0 %v20372_v17  ;;  %v9099_v26 = vadd.f32 %v9098_v43, %v8930_v42  ;;  %v11046_v45 = vsub.f32 %v18570_v12, %v11045_v4  ;;  %v18627_v43 = vsub.f32 %v10923_v16, %v18603_v14  ;;  %v20377_v17 = vld [vmem:[#allocation115_spill] sm:$0xff] }
 0x8f2   : > { %11551 = vmatprep.subr.mxu0 %v20374_v1  ;;  %11020 = vmatprep.mubr.f32.mxu0 %v20259_v52  ;;  %v9118_v15 = vpop.f32.mrf.mxu0  ;;  %v9321_v30 = vpop.f32.mrf.mxu1  ;;  %v8547_v3 = vadd.f32 %v20377_v17, %v8408_v44  ;;  %v20378_v16 = vld [vmem:[#allocation123_spill] sm:$0xff]  ;;  %v11057_v44 = vsub.f32 %v18601_v40, %v11056_v23  ;;  %v20382_v17 = vld [vmem:[#allocation113_spill] sm:$0xff] }
 0x8f3   : > { %11181 = vmatprep.mubr.f32.mxu1 %v20259_v52  ;;  %v18618_v13 = vadd.f32 %v9118_v15, %v18148_v62  ;;  %v18620_v63 = vadd.f32 %v9321_v30, %v9097_v27  ;;  %12780 = vset.pattern.permute.xlu1 %v12917_v51  ;;  %v12835_v62 = vld [vmem:[%s19452_s2 + $0x38] sm:$0xff]  ;;  %v8679_v1 = vadd.f32 %v20378_v16, %v8539_v25 }
 0x8f4   : > { %11026 = vmatmul.mubr.f32.gmra.mxu0 %v11025_v57  ;;  %v9120_v18 = vpop.f32.mrf.mxu0  ;;  %v9323_v53 = vpop.f32.mrf.mxu1  ;;  %11833 = vperm.xlu1 %12780, %v12835_v62   ;;  %v20375_v57 = vld [vmem:[#allocation97_spill] sm:$0xff]  ;;  %v8937_v15 = vadd.f32 %v18137_v35, %v8810_v46  ;;  %v8817_v30 = vadd.f32 %v18114_v10, %v8670_v55  ;;  %v11047_v62 = vand.u32 4294901760, %v11046_v45  ;;  %v18653_v25 = vsub.f32 %v10926_v36, %v18629_v59 }
 0x8f5   : > { %11183 = vmatmul.mubr.f32.vlgmr.msra.gmra.mxu1 %v18470_v22  ;;  %11031 = vmatprep.mubr.f32.mxu0 %v20259_v52  ;;  %v18636_v27 = vadd.f32 %v9323_v53, %v9099_v26  ;;  %v8415_v42 = vadd.f32 %v20376_v20, %v20375_v57  ;;  %v11067_v57 = vand.u32 4294901760, %v18627_v43  ;;  %v20379_v46 = vld [vmem:[#allocation105_spill] sm:$0xff]  ;;  %v8688_v16 = vadd.f32 %v20382_v17, %v8547_v3 }
 0x8f6   : > { %11408 = vmatpush1.msra.mxu1 %v20334_v7  ;;  %11188 = vmatprep.mubr.f32.mxu1 %v20259_v52  ;;  %v9110_v35 = vadd.f32 %v9109_v34, %v8937_v15  ;;  %v20381_v45 = vld [vmem:[#allocation117_spill] sm:$0xff]  ;;  %v8824_v15 = vadd.f32 %v18131_v9, %v8679_v1  ;;  %v12836_v9 = vld [vmem:[%s19452_s2 + $0x28] sm:$0xff] }
 0x8f7   : > { %11410 = vmatprep.subr.mxu1 %v20335_v49  ;;  %12781 = vset.pattern.permute.xlu0 %v12917_v51  ;;  %v8555_v20 = vadd.f32 %v20381_v45, %v8415_v42 }
 0x8f8   : > { %11412 = vmatpush1.msra.mxu1 %v20336_v56  ;;  %11037 = vmatmul.mubr.f32.gmra.mxu0 %v11036_v31  ;;  %v9129_v26 = vpop.f32.mrf.mxu0  ;;  %v9328_v53 = vpop.f32.mrf.mxu1  ;;  %v20380_v31 = vld [vmem:[#allocation121_spill] sm:$0xff] }
 0x8f9   : > { %11414 = vmatprep.subr.mxu1 %v20337_v29  ;;  %11190 = vmatmul.mubr.f32.gmra.mxu1 %v18488_v0  ;;  %v9130_v10 = vadd.f32 %v9129_v26, %v18164_v11  ;;  %v18659_v55 = vadd.f32 %v9328_v53, %v18577_v38  ;;  %v8422_v51 = vadd.f32 %v20380_v31, %v20379_v46  ;;  %v11058_v26 = vand.u32 4294901760, %v11057_v44  ;;  %v20383_v44 = vld [vmem:[#allocation126_spill] sm:$0xff]  ;;  %v20384_v31 = vld [vmem:[#allocation119_spill] sm:$0xff] }
 0x8fa   : > { %11416 = vmatpush1.msra.mxu1 %v20338_v41  ;;  %11042 = vmatprep.mubr.f32.mxu0 %v20259_v52  ;;  %v9131_v36 = vpop.f32.mrf.mxu0  ;;  %v9330_v34 = vpop.f32.mrf.mxu1  ;;  %v8944_v38 = vadd.f32 %v18154_v28, %v8817_v30  ;;  %v11068_v53 = vsub.f32 %v18627_v43, %v11067_v57  ;;  %v11078_v46 = vand.u32 4294901760, %v18653_v25 }
 0x8fb   : > { %11688 = vmatprep.subr.mxu1 %v20332_v24  ;;  %11195 = vmatprep.mubr.f32.mxu1 %v20259_v52  ;;  %v18670_v11 = vadd.f32 %v9330_v34, %v9110_v35  ;;  %v8697_v35 = vadd.f32 %v20383_v44, %v8555_v20  ;;  %v8563_v45 = vadd.f32 %v20384_v31, %v8422_v51  ;;  %v12838_v20 = vld [vmem:[%s19452_s2 + $0x20] sm:$0xff]  ;;  %v12841_v31 = vld [vmem:[%s19452_s2 + $0x8] sm:$0xff] }
 0x8fc   : > { %11048 = vmatmul.mubr.f32.gmra.mxu0 %v11047_v62  ;;  %v9140_v42 = vpop.f32.mrf.mxu0  ;;  %11825 = vperm.xlu1 %12780, %v12836_v9   ;;  %v9121_v3 = vadd.f32 %v9120_v18, %v8944_v38  ;;  %v12837_v62 = vld [vmem:[%s19452_s2 + $0x30] sm:$0xff]  ;;  %v8831_v34 = vadd.f32 %v18150_v58, %v8688_v16  ;;  %v8951_v18 = vadd.f32 %v18169_v61, %v8824_v15  ;;  %v11069_v38 = vand.u32 4294901760, %v11068_v53 }
 0x8fd   : > { %11197 = vmatmul.mubr.f32.gmra.mxu1 %v18500_v33  ;;  %11053 = vmatprep.mubr.f32.mxu0 %v20259_v52  ;;  %v9141_v28 = vadd.f32 %v9140_v42, %v18179_v6  ;;  %v9335_v24 = vpop.f32.mrf.mxu1  ;;  %v11079_v42 = vsub.f32 %v18653_v25, %v11078_v46  ;;  %v8706_v53 = vadd.f32 %v18080_v47, %v8563_v45 }
 0x8fe   : > { %11202 = vmatprep.mubr.f32.mxu1 %v20259_v52  ;;  %v18685_v1 = vadd.f32 %v9335_v24, %v18618_v13  ;;  %v9142_v30 = vpop.f32.mrf.mxu0  ;;  %11829 = vperm.xlu0 %12781, %v12837_v62   ;;  %v9132_v51 = vadd.f32 %v9131_v36, %v8951_v18  ;;  %v8958_v24 = vadd.f32 %v18183_v39, %v8831_v34 }
 0x8ff   : > { %v9337_v6 = vpop.f32.mrf.mxu1  ;;  %v11080_v62 = vand.u32 4294901760, %v11079_v42 }
 0x900   : > { %11059 = vmatmul.mubr.f32.gmra.mxu0 %v11058_v26  ;;  %v18694_v17 = vadd.f32 %v9337_v6, %v9121_v3  ;;  %v9151_v13 = vpop.f32.mrf.mxu0  ;;  %11821 = vperm.xlu1 %12780, %v12838_v20   ;;  %v12839_v26 = vld [vmem:[%s19452_s2 + $0x18] sm:$0xff]  ;;  %v8838_v3 = vadd.f32 %v18166_v8, %v8697_v35  ;;  %v9143_v39 = vadd.f32 %v9142_v30, %v8958_v24  ;;  %v20387_v24 = vld [vmem:[#allocation67_spill] sm:$0xff] }
 0x901   : > { %11204 = vmatmul.mubr.f32.gmra.mxu1 %v18522_v5  ;;  %11064 = vmatprep.mubr.f32.mxu0 %v20259_v52  ;;  %v9152_v58 = vadd.f32 %v9151_v13, %v18192_v60  ;;  %v9342_v61 = vpop.f32.mrf.mxu1  ;;  %v8845_v6 = vadd.f32 %v18502_v2, %v8706_v53 }
 0x902   : > { %11209 = vmatprep.mubr.f32.mxu1 %v20259_v52  ;;  %v18706_v16 = vadd.f32 %v9342_v61, %v9130_v10  ;;  %v9153_v15 = vpop.f32.mrf.mxu0  ;;  %11817 = vperm.xlu0 %12781, %v12839_v26   ;;  %v12840_v10 = vld [vmem:[%s19452_s2 + $0x10] sm:$0xff]  ;;  %v8965_v34 = vadd.f32 %v18194_v37, %v8838_v3  ;;  %v20385_v61 = vld [vmem:[#allocation125_spill] sm:$0xff] }
 0x903   : > { %v9344_v9 = vpop.f32.mrf.mxu1  ;;  %v20386_v26 = vld [vmem:[#allocation133_spill] sm:$0xff] }
 0x904   : > { %11070 = vmatmul.mubr.f32.gmra.mxu0 %v11069_v38  ;;  %v18714_v60 = vadd.f32 %v9344_v9, %v9132_v51  ;;  %v9162_v36 = vpop.f32.mrf.mxu0  ;;  %11813 = vperm.xlu1 %12780, %v12840_v10   ;;  %v9154_v38 = vadd.f32 %v9153_v15, %v8965_v34  ;;  %v8972_v51 = vadd.f32 %v20385_v61, %v8845_v6  ;;  %v20388_v3 = vld [vmem:[#allocation69_spill] sm:$0xff] }
 0x905   : > { %11211 = vmatmul.mubr.f32.gmra.mxu1 %v18549_v32  ;;  %11075 = vmatprep.mubr.f32.mxu0 %v20259_v52  ;;  %v9163_v47 = vadd.f32 %v9162_v36, %v18201_v50  ;;  %v9349_v44 = vpop.f32.mrf.mxu1 }
 0x906   : > { %11216 = vmatprep.mubr.f32.mxu1 %v20259_v52  ;;  %v18723_v8 = vadd.f32 %v9349_v44, %v9141_v28  ;;  %v9164_v35 = vpop.f32.mrf.mxu0  ;;  %11809 = vperm.xlu0 %12781, %v12841_v31   ;;  %v12842_v28 = vld [vmem:[%s19452_s2] sm:$0xff] }
 0x907   : > { %v9351_v45 = vpop.f32.mrf.mxu1  ;;  %v20391_v31 = vld [vmem:[#allocation122_spill] sm:$0xff] }
 0x908   : > { %11081 = vmatmul.mubr.f32.gmra.mxu0 %v11080_v62  ;;  %v18730_v18 = vadd.f32 %v9351_v45, %v9143_v39  ;;  %v9468_v50 = vpop.f32.mrf.mxu0  ;;  %11805 = vperm.xlu1 %12780, %v12842_v28   ;;  %v20389_v62 = vld [vmem:[#allocation70_spill] sm:$0xff]  ;;  %v20390_v39 = vld [vmem:[#allocation71_spill] sm:$0xff]  ;;  %v20392_v45 = vld [vmem:[#allocation72_spill] sm:$0xff]  ;;  %v20395_v61 = vand.u32 4294901760, %v20391_v31 }
 0x909   : > { %11218 = vmatmul.mubr.f32.gmra.mxu1 %v18572_v48  ;;  %11314 = vmatprep.mubr.f32.mxu0 %v20259_v52  ;;  %v9356_v30 = vpop.f32.mrf.mxu1  ;;  %v9469_v13 = vadd.f32 %v9468_v50, %v18579_v54 }
 0x90a   : > { %11223 = vmatprep.mubr.f32.mxu1 %v20259_v52  ;;  %v18739_v37 = vadd.f32 %v9356_v30, %v9152_v58  ;;  %v9470_v2 = vpop.f32.mrf.mxu0  ;;  %v9165_v58 = vadd.f32 %v9164_v35, %v8972_v51  ;;  %v20393_v30 = vld [vmem:[#allocation127_spill] sm:$0xff] }
 0x90b   : > { %v9358_v42 = vpop.f32.mrf.mxu1  ;;  %v9471_v20 = vadd.f32 %v9470_v2, %v18593_v21  ;;  %v20394_v2 = vand.u32 4294901760, %v20386_v26 }
 0x90c   : > { %11317 = vmatmul.mubr.f32.vlgmr.msra.gmra.mxu0 %v20386_v26  ;;  %v18744_v53 = vadd.f32 %v9358_v42, %v9154_v38  ;;  %v9476_v9 = vpop.f32.mrf.mxu0  ;;  %v20396_v26 = vand.u32 4294901760, %v20393_v30 }
 0x90d   : > { %11225 = vmatmul.mubr.f32.gmra.mxu1 %v18603_v14  ;;  %11555 = vmatpush1.msra.mxu0 %v20387_v24  ;;  %v9363_v54 = vpop.f32.mrf.mxu1  ;;  %v9477_v15 = vadd.f32 %v9476_v9, %v18620_v63 }
 0x90e   : > { %11559 = vmatprep.subr.mxu0 %v20388_v3  ;;  %11230 = vmatprep.mubr.f32.mxu1 %v20259_v52  ;;  %v18751_v21 = vadd.f32 %v9363_v54, %v9163_v47  ;;  %v9478_v36 = vpop.f32.mrf.mxu0  ;;  %v20397_v3 = vand.u32 4294901760, %v18542_v19 }
 0x90f   : > { %11563 = vmatpush1.msra.mxu0 %v20389_v62  ;;  %11322 = vmatprep.mubr.f32.mxu0 %v20259_v52  ;;  %v9365_v10 = vpop.f32.mrf.mxu1  ;;  %v9479_v44 = vadd.f32 %v9478_v36, %v18636_v27 }
 0x910   : > { %11567 = vmatprep.subr.mxu0 %v20390_v39  ;;  %11325 = vmatmul.mubr.f32.gmra.mxu0 %v20391_v31  ;;  %v18758_v63 = vadd.f32 %v9365_v10, %v9165_v58  ;;  %v9484_v35 = vpop.f32.mrf.mxu0 }
 0x911   : > { %11232 = vmatmul.mubr.f32.gmra.mxu1 %v18629_v59  ;;  %11571 = vmatpush1.msra.mxu0 %v20392_v45  ;;  %v9485_v47 = vadd.f32 %v9484_v35, %v18659_v55  ;;  %v9614_v34 = vpop.f32.mrf.mxu1 }
 0x912   : > { %11330 = vmatprep.mubr.f32.mxu0 %v20259_v52  ;;  %11449 = vmatprep.mubr.f32.mxu1 %v20259_v52  ;;  %v18765_v6 = vadd.f32 %v9614_v34, %v9469_v13  ;;  %v9486_v27 = vpop.f32.mrf.mxu0 }
 0x913   : > { %v9487_v50 = vadd.f32 %v9486_v27, %v18670_v11  ;;  %v9616_v28 = vpop.f32.mrf.mxu1 }
 0x914   : > { %11333 = vmatmul.mubr.f32.gmra.mxu0 %v20393_v30  ;;  %v18769_v38 = vadd.f32 %v9616_v28, %v9471_v20 }
 0x915   : > { %11453 = vmatmul.mubr.f32.vlgmr.msra.gmra.mxu1 %v20394_v2  ;;  %11338 = vmatprep.mubr.f32.mxu0 %v20259_v52 }
 0x916   : > { %11690 = vmatpush1.msra.mxu1 %v20334_v7  ;;  %11458 = vmatprep.mubr.f32.mxu1 %v20259_v52  ;;  %v9492_v55 = vpop.f32.mrf.mxu0 }
 0x917   : > { %11692 = vmatprep.subr.mxu1 %v20335_v49  ;;  %v9493_v13 = vadd.f32 %v9492_v55, %v18685_v1  ;;  %v9623_v11 = vpop.f32.mrf.mxu1 }
 0x918   : > { %11694 = vmatpush1.msra.mxu1 %v20336_v56  ;;  %v18779_v42 = vadd.f32 %v9623_v11, %v9477_v15  ;;  %11341 = vmatmul.mubr.f32.gmra.mxu0 %v18542_v19  ;;  %v9494_v20 = vpop.f32.mrf.mxu0 }
 0x919   : > { %11696 = vmatprep.subr.mxu1 %v20337_v29  ;;  %11462 = vmatmul.mubr.f32.gmra.mxu1 %v20395_v61  ;;  %v9495_v7 = vadd.f32 %v9494_v20, %v18694_v17  ;;  %v9625_v51 = vpop.f32.mrf.mxu1 }
 0x91a   : > { %11698 = vmatpush1.msra.mxu1 %v20338_v41  ;;  %v18787_v49 = vadd.f32 %v9625_v51, %v9479_v44  ;;  %11346 = vmatprep.mubr.f32.mxu0 %v20259_v52 }
 0x91b   : > { %11467 = vmatprep.mubr.f32.mxu1 %v20259_v52 }
 0x91c   : > { %v9500_v56 = vpop.f32.mrf.mxu0  ;;  %11349 = vmatmul.mubr.f32.gmra.mxu0 %v18570_v12 }
 0x91d   : > { %v9501_v1 = vadd.f32 %v9500_v56, %v18706_v16  ;;  %v9632_v29 = vpop.f32.mrf.mxu1  ;;  %11471 = vmatmul.mubr.f32.gmra.mxu1 %v20396_v26  ;;  %11354 = vmatprep.mubr.f32.mxu0 %v20259_v52 }
 0x91e   : > { %v18796_v17 = vadd.f32 %v9632_v29, %v9485_v47  ;;  %v9502_v41 = vpop.f32.mrf.mxu0  ;;  %11476 = vmatprep.mubr.f32.mxu1 %v20259_v52 }
 0x91f   : > { %v9503_v9 = vadd.f32 %v9502_v41, %v18714_v60  ;;  %v9634_v24 = vpop.f32.mrf.mxu1 }
 0x920   : > { %v18800_v54 = vadd.f32 %v9634_v24, %v9487_v50  ;;  %v9508_v15 = vpop.f32.mrf.mxu0  ;;  %11357 = vmatmul.mubr.f32.gmra.mxu0 %v18601_v40 }
 0x921   : > { %v9509_v16 = vadd.f32 %v9508_v15, %v18723_v8  ;;  %v9641_v58 = vpop.f32.mrf.mxu1  ;;  %11480 = vmatmul.mubr.f32.gmra.mxu1 %v20397_v3  ;;  %11362 = vmatprep.mubr.f32.mxu0 %v20259_v52 }
 0x922   : > { %v18807_v36 = vadd.f32 %v9641_v58, %v9493_v13  ;;  %v9510_v62 = vpop.f32.mrf.mxu0  ;;  %11485 = vmatprep.mubr.f32.mxu1 %v20259_v52 }
 0x923   : > { %v9511_v60 = vadd.f32 %v9510_v62, %v18730_v18  ;;  %v9643_v10 = vpop.f32.mrf.mxu1 }
 0x924   : > { %v18811_v44 = vadd.f32 %v9643_v10, %v9495_v7  ;;  %v9516_v39 = vpop.f32.mrf.mxu0  ;;  %11365 = vmatmul.mubr.f32.gmra.mxu0 %v18627_v43 }
 0x925   : > { %v9517_v8 = vadd.f32 %v9516_v39, %v18739_v37  ;;  %v9650_v31 = vpop.f32.mrf.mxu1  ;;  %11489 = vmatmul.mubr.f32.gmra.mxu1 %v11045_v4  ;;  %11370 = vmatprep.mubr.f32.mxu0 %v20259_v52 }
 0x926   : > { %v18818_v19 = vadd.f32 %v9650_v31, %v9501_v1  ;;  %v9518_v35 = vpop.f32.mrf.mxu0  ;;  %11494 = vmatprep.mubr.f32.mxu1 %v20259_v52 }
 0x927   : > { %v9519_v18 = vadd.f32 %v9518_v35, %v18744_v53  ;;  %v9652_v45 = vpop.f32.mrf.mxu1 }
 0x928   : > { %v18822_v47 = vadd.f32 %v9652_v45, %v9503_v9  ;;  %v9524_v34 = vpop.f32.mrf.mxu0  ;;  %11373 = vmatmul.mubr.f32.gmra.mxu0 %v18653_v25 }
 0x929   : > { %v9525_v37 = vadd.f32 %v9524_v34, %v18751_v21  ;;  %v9659_v27 = vpop.f32.mrf.mxu1  ;;  %11498 = vmatmul.mubr.f32.gmra.mxu1 %v11056_v23  ;;  %11604 = vmatprep.mubr.f32.mxu0 %v20259_v52 }
 0x92a   : > { %v9660_v12 = vadd.f32 %v9659_v27, %v9509_v16  ;;  %v9526_v4 = vpop.f32.mrf.mxu0  ;;  %11503 = vmatprep.mubr.f32.mxu1 %v20259_v52 }
 0x92b   : > { %v9527_v53 = vadd.f32 %v9526_v4, %v18758_v63  ;;  %v9661_v50 = vpop.f32.mrf.mxu1 }
 0x92c   : > { %v18831_v28 = vadd.f32 %v9661_v50, %v9511_v60  ;;  %v9797_v30 = vpop.f32.mrf.mxu0  ;;  %11606 = vmatmul.mubr.f32.vlgmr.msra.gmra.mxu0 %v18470_v22 }
 0x92d   : > { %v9668_v2 = vpop.f32.mrf.mxu1  ;;  %v9798_v21 = vadd.f32 %v9797_v30, %v18765_v6  ;;  %11507 = vmatmul.mubr.f32.gmra.mxu1 %v11067_v57  ;;  %11611 = vmatprep.mubr.f32.mxu0 %v20259_v52 }
 0x92e   : > { %v9669_v40 = vadd.f32 %v9668_v2, %v9517_v8  ;;  %v18838_v23 = vpop.f32.mrf.mxu0  ;;  %11512 = vmatprep.mubr.f32.mxu1 %v20259_v52 }
 0x92f   : > { %v9670_v63 = vpop.f32.mrf.mxu1 }
 0x930   : > { %v18841_v55 = vadd.f32 %v9670_v63, %v9519_v18  ;;  %v9804_v13 = vpop.f32.mrf.mxu0  ;;  %11613 = vmatmul.mubr.f32.gmra.mxu0 %v18488_v0 }
 0x931   : > { %v9677_v11 = vpop.f32.mrf.mxu1  ;;  %v9805_v20 = vadd.f32 %v9804_v13, %v18779_v42  ;;  %11516 = vmatmul.mubr.f32.gmra.mxu1 %v11078_v46  ;;  %11618 = vmatprep.mubr.f32.mxu0 %v20259_v52 }
 0x932   : > { %v18848_v43 = vadd.f32 %v9677_v11, %v9525_v37  ;;  %v18850_v57 = vpop.f32.mrf.mxu0  ;;  %11731 = vmatprep.mubr.f32.mxu1 %v20259_v52 }
 0x933   : > { %v9679_v6 = vpop.f32.mrf.mxu1 }
 0x934   : > { %v18853_v61 = vadd.f32 %v9679_v6, %v9527_v53  ;;  %v9811_v7 = vpop.f32.mrf.mxu0  ;;  %11620 = vmatmul.mubr.f32.gmra.mxu0 %v18500_v33 }
 0x935   : > { %v9812_v51 = vadd.f32 %v9811_v7, %v18796_v17  ;;  %v9934_v42 = vpop.f32.mrf.mxu1  ;;  %11733 = vmatmul.mubr.f32.vlgmr.msra.gmra.mxu1 %v18470_v22  ;;  %11625 = vmatprep.mubr.f32.mxu0 %v20259_v52 }
 0x936   : > { %v18859_v25 = vadd.f32 %v9934_v42, %v9798_v21  ;;  %v18861_v46 = vpop.f32.mrf.mxu0  ;;  %11738 = vmatprep.mubr.f32.mxu1 %v20259_v52 }
 0x937   : > { %v18864_v56 = vpop.f32.mrf.mxu1 }
 0x938   : > { %v9818_v1 = vpop.f32.mrf.mxu0  ;;  %11627 = vmatmul.mubr.f32.gmra.mxu0 %v18522_v5 }
 0x939   : > { %v9819_v29 = vadd.f32 %v9818_v1, %v18807_v36  ;;  %v9941_v26 = vpop.f32.mrf.mxu1  ;;  %11740 = vmatmul.mubr.f32.gmra.mxu1 %v18488_v0  ;;  %11632 = vmatprep.mubr.f32.mxu0 %v20259_v52 }
 0x93a   : > { %v18870_v22 = vadd.f32 %v9941_v26, %v9805_v20  ;;  %v9820_v17 = vpop.f32.mrf.mxu0  ;;  %11745 = vmatprep.mubr.f32.mxu1 %v20259_v52 }
 0x93b   : > { %v9821_v41 = vadd.f32 %v9820_v17, %v18811_v44  ;;  %v18874_v9 = vpop.f32.mrf.mxu1 }
 0x93c   : > { %v9825_v24 = vpop.f32.mrf.mxu0  ;;  %11634 = vmatmul.mubr.f32.gmra.mxu0 %v18549_v32 }
 0x93d   : > { %v9826_v15 = vadd.f32 %v9825_v24, %v18818_v19  ;;  %v9948_v16 = vpop.f32.mrf.mxu1  ;;  %11747 = vmatmul.mubr.f32.gmra.mxu1 %v18500_v33  ;;  %11639 = vmatprep.mubr.f32.mxu0 %v20259_v52 }
 0x93e   : > { %v18880_v0 = vadd.f32 %v9948_v16, %v9812_v51  ;;  %v9827_v58 = vpop.f32.mrf.mxu0  ;;  %11752 = vmatprep.mubr.f32.mxu1 %v20259_v52 }
 0x93f   : > { %v9828_v3 = vadd.f32 %v9827_v58, %v18822_v47  ;;  %v18884_v36 = vpop.f32.mrf.mxu1 }
 0x940   : > { %v9832_v62 = vpop.f32.mrf.mxu0  ;;  %11641 = vmatmul.mubr.f32.gmra.mxu0 %v18572_v48 }
 0x941   : > { %v9833_v60 = vadd.f32 %v9832_v62, %v9660_v12  ;;  %v9955_v10 = vpop.f32.mrf.mxu1  ;;  %11754 = vmatmul.mubr.f32.gmra.mxu1 %v18522_v5  ;;  %11646 = vmatprep.mubr.f32.mxu0 %v20259_v52 }
 0x942   : > { %v18889_v33 = vadd.f32 %v9955_v10, %v9819_v29  ;;  %v9834_v44 = vpop.f32.mrf.mxu0  ;;  %11759 = vmatprep.mubr.f32.mxu1 %v20259_v52 }
 0x943   : > { %v9835_v39 = vadd.f32 %v9834_v44, %v18831_v28  ;;  %v9957_v8 = vpop.f32.mrf.mxu1 }
 0x944   : > { %v18893_v31 = vadd.f32 %v9957_v8, %v9821_v41  ;;  %v9839_v19 = vpop.f32.mrf.mxu0  ;;  %11648 = vmatmul.mubr.f32.gmra.mxu0 %v18603_v14 }
 0x945   : > { %v9840_v35 = vadd.f32 %v9839_v19, %v9669_v40  ;;  %v9962_v18 = vpop.f32.mrf.mxu1  ;;  %11761 = vmatmul.mubr.f32.gmra.mxu1 %v18549_v32  ;;  %11653 = vmatprep.mubr.f32.mxu0 %v20259_v52 }
 0x946   : > { %v18898_v5 = vadd.f32 %v9962_v18, %v9826_v15  ;;  %v9841_v45 = vpop.f32.mrf.mxu0  ;;  %11766 = vmatprep.mubr.f32.mxu1 %v20259_v52 }
 0x947   : > { %v9842_v47 = vadd.f32 %v9841_v45, %v18841_v55  ;;  %v9964_v34 = vpop.f32.mrf.mxu1 }
 0x948   : > { %v18902_v37 = vadd.f32 %v9964_v34, %v9828_v3  ;;  %v9846_v27 = vpop.f32.mrf.mxu0  ;;  %11655 = vmatmul.mubr.f32.gmra.mxu0 %v18629_v59 }
 0x949   : > { %v9847_v12 = vadd.f32 %v9846_v27, %v18848_v43  ;;  %v9969_v4 = vpop.f32.mrf.mxu1  ;;  %11768 = vmatmul.mubr.f32.gmra.mxu1 %v18572_v48  ;;  %11958 = vmatprep.mubr.f32.mxu0 %v20259_v52 }
 0x94a   : > { %v18908_v32 = vadd.f32 %v9969_v4, %v9833_v60  ;;  %v9848_v53 = vpop.f32.mrf.mxu0  ;;  %11773 = vmatprep.mubr.f32.mxu1 %v20259_v52 }
 0x94b   : > { %v9849_v50 = vadd.f32 %v9848_v53, %v18853_v61  ;;  %v9971_v28 = vpop.f32.mrf.mxu1 }
 0x94c   : > { %v18912_v30 = vadd.f32 %v9971_v28, %v9835_v39  ;;  %v10097_v2 = vpop.f32.mrf.mxu0 }
 0x94d   : > { %v9976_v21 = vpop.f32.mrf.mxu1  ;;  %11775 = vmatmul.mubr.f32.gmra.mxu1 %v18603_v14 }
 0x94e   : > { %v18915_v40 = vadd.f32 %v9976_v21, %v9840_v35  ;;  %v10099_v63 = vpop.f32.mrf.mxu0  ;;  %11780 = vmatprep.mubr.f32.mxu1 %v20259_v52 }
 0x94f   : > { %v9978_v48 = vpop.f32.mrf.mxu1 }
 0x950   : > { %v18918_v55 = vadd.f32 %v9978_v48, %v9842_v47  ;;  %v10108_v13 = vpop.f32.mrf.mxu0 }
 0x951   : > { %v9983_v11 = vpop.f32.mrf.mxu1  ;;  %11782 = vmatmul.mubr.f32.gmra.mxu1 %v18629_v59 }
 0x952   : > { %v18921_v20 = vadd.f32 %v9983_v11, %v9847_v12  ;;  %v10110_v43 = vpop.f32.mrf.mxu0  ;;  %12114 = vmatprep.mubr.f32.mxu1 %v20259_v52 }
 0x953   : > { %v9985_v6 = vpop.f32.mrf.mxu1 }
 0x954   : > { %v18924_v61 = vadd.f32 %v9985_v6, %v9849_v50  ;;  %v10119_v14 = vpop.f32.mrf.mxu0 }
 0x955   : > { %v10276_v7 = vpop.f32.mrf.mxu1 }
 0x956   : > { %v10277_v51 = vadd.f32 %v10276_v7, %v10097_v2  ;;  %v10121_v42 = vpop.f32.mrf.mxu0 }
 0x957   : > { %v10278_v1 = vpop.f32.mrf.mxu1 }
 0x958   : > { %v10279_v29 = vadd.f32 %v10278_v1, %v10099_v63  ;;  %v10130_v26 = vpop.f32.mrf.mxu0 }
 0x959   : > { %v10283_v17 = vpop.f32.mrf.mxu1 }
 0x95a   : > { %v10284_v41 = vadd.f32 %v10283_v17, %v10108_v13  ;;  %v10132_v24 = vpop.f32.mrf.mxu0 }
 0x95b   : > { %v10285_v15 = vpop.f32.mrf.mxu1 }
 0x95c   : > { %v10286_v59 = vadd.f32 %v10285_v15, %v10110_v43  ;;  %v10141_v16 = vpop.f32.mrf.mxu0 }
 0x95d   : > { %v10290_v58 = vpop.f32.mrf.mxu1 }
 0x95e   : > { %v10291_v3 = vadd.f32 %v10290_v58, %v10119_v14  ;;  %v10143_v62 = vpop.f32.mrf.mxu0 }
 0x95f   : > { %v10292_v60 = vpop.f32.mrf.mxu1 }
 0x960   : > { %v10293_v10 = vadd.f32 %v10292_v60, %v10121_v42  ;;  %v10152_v44 = vpop.f32.mrf.mxu0 }
 0x961   : > { %v10297_v39 = vpop.f32.mrf.mxu1 }
 0x962   : > { %v10298_v8 = vadd.f32 %v10297_v39, %v10130_v26  ;;  %v10154_v19 = vpop.f32.mrf.mxu0 }
 0x963   : > { %v10299_v35 = vpop.f32.mrf.mxu1 }
 0x964   : > { %v10300_v18 = vadd.f32 %v10299_v35, %v10132_v24  ;;  %v10163_v45 = vpop.f32.mrf.mxu0 }
 0x965   : > { %v10304_v47 = vpop.f32.mrf.mxu1 }
 0x966   : > { %v10305_v34 = vadd.f32 %v10304_v47, %v10141_v16  ;;  %v10165_v27 = vpop.f32.mrf.mxu0 }
 0x967   : > { %v10306_v12 = vpop.f32.mrf.mxu1 }
 0x968   : > { %v10307_v4 = vadd.f32 %v10306_v12, %v10143_v62  ;;  %v10174_v53 = vpop.f32.mrf.mxu0 }
 0x969   : > { %v10311_v50 = vpop.f32.mrf.mxu1 }
 0x96a   : > { %v10312_v28 = vadd.f32 %v10311_v50, %v10152_v44  ;;  %v10176_v2 = vpop.f32.mrf.mxu0 }
 0x96b   : > { %v10313_v21 = vpop.f32.mrf.mxu1 }
 0x96c   : > { %v10314_v63 = vadd.f32 %v10313_v21, %v10154_v19  ;;  %v10410_v48 = vpop.f32.mrf.mxu0 }
 0x96d   : > { %v10318_v13 = vpop.f32.mrf.mxu1  ;;  %v10411_v11 = vadd.f32 %v10410_v48, %v10277_v51 }
 0x96e   : > { %v10319_v43 = vadd.f32 %v10318_v13, %v10163_v45  ;;  %v10412_v6 = vpop.f32.mrf.mxu0 }
 0x96f   : > { %v10320_v14 = vpop.f32.mrf.mxu1  ;;  %v10413_v7 = vadd.f32 %v10412_v6, %v10279_v29 }
 0x970   : > { %v10321_v42 = vadd.f32 %v10320_v14, %v10165_v27  ;;  %v10418_v1 = vpop.f32.mrf.mxu0 }
 0x971   : > { %v10325_v26 = vpop.f32.mrf.mxu1  ;;  %v10419_v17 = vadd.f32 %v10418_v1, %v10284_v41 }
 0x972   : > { %v10326_v24 = vadd.f32 %v10325_v26, %v10174_v53  ;;  %v10420_v15 = vpop.f32.mrf.mxu0 }
 0x973   : > { %v10327_v16 = vpop.f32.mrf.mxu1  ;;  %v10421_v58 = vadd.f32 %v10420_v15, %v10286_v59 }
 0x974   : > { %v10328_v62 = vadd.f32 %v10327_v16, %v10176_v2  ;;  %v10426_v60 = vpop.f32.mrf.mxu0 }
 0x975   : > { %v10427_v44 = vadd.f32 %v10426_v60, %v10291_v3  ;;  %v10546_v39 = vpop.f32.mrf.mxu1 }
 0x976   : > { %v10547_v19 = vadd.f32 %v10546_v39, %v10411_v11  ;;  %v10428_v35 = vpop.f32.mrf.mxu0 }
 0x977   : > { %v10429_v47 = vadd.f32 %v10428_v35, %v10293_v10  ;;  %v10548_v51 = vpop.f32.mrf.mxu1 }
 0x978   : > { %v10549_v45 = vadd.f32 %v10548_v51, %v10413_v7  ;;  %v10434_v12 = vpop.f32.mrf.mxu0 }
 0x979   : > { %v10435_v50 = vadd.f32 %v10434_v12, %v10298_v8  ;;  %v10555_v29 = vpop.f32.mrf.mxu1 }
 0x97a   : > { %v10556_v27 = vadd.f32 %v10555_v29, %v10419_v17  ;;  %v10436_v21 = vpop.f32.mrf.mxu0 }
 0x97b   : > { %v10437_v48 = vadd.f32 %v10436_v21, %v10300_v18  ;;  %v10557_v41 = vpop.f32.mrf.mxu1 }
 0x97c   : > { %v10558_v53 = vadd.f32 %v10557_v41, %v10421_v58  ;;  %v10442_v13 = vpop.f32.mrf.mxu0 }
 0x97d   : > { %v10443_v6 = vadd.f32 %v10442_v13, %v10305_v34  ;;  %v10564_v59 = vpop.f32.mrf.mxu1 }
 0x97e   : > { %v10565_v2 = vadd.f32 %v10564_v59, %v10427_v44  ;;  %v10444_v14 = vpop.f32.mrf.mxu0 }
 0x97f   : > { %v10445_v3 = vadd.f32 %v10444_v14, %v10307_v4  ;;  %v10566_v1 = vpop.f32.mrf.mxu1 }
 0x980   : > { %v10567_v11 = vadd.f32 %v10566_v1, %v10429_v47  ;;  %v10450_v26 = vpop.f32.mrf.mxu0 }
 0x981   : > { %v10451_v10 = vadd.f32 %v10450_v26, %v10312_v28  ;;  %v10573_v15 = vpop.f32.mrf.mxu1 }
 0x982   : > { %v10574_v7 = vadd.f32 %v10573_v15, %v10435_v50  ;;  %v10452_v16 = vpop.f32.mrf.mxu0 }
 0x983   : > { %v10453_v8 = vadd.f32 %v10452_v16, %v10314_v63  ;;  %v10575_v60 = vpop.f32.mrf.mxu1 }
 0x984   : > { %v10576_v17 = vadd.f32 %v10575_v60, %v10437_v48  ;;  %v10458_v39 = vpop.f32.mrf.mxu0 }
 0x985   : > { %v10459_v18 = vadd.f32 %v10458_v39, %v10319_v43  ;;  %v10582_v35 = vpop.f32.mrf.mxu1 }
 0x986   : > { %v10583_v58 = vadd.f32 %v10582_v35, %v10443_v6  ;;  %v10460_v51 = vpop.f32.mrf.mxu0 }
 0x987   : > { %v10461_v34 = vadd.f32 %v10460_v51, %v10321_v42  ;;  %v10584_v12 = vpop.f32.mrf.mxu1 }
 0x988   : > { %v10585_v44 = vadd.f32 %v10584_v12, %v10445_v3  ;;  %v10466_v29 = vpop.f32.mrf.mxu0 }
 0x989   : > { %v10467_v4 = vadd.f32 %v10466_v29, %v10326_v24  ;;  %v10591_v21 = vpop.f32.mrf.mxu1 }
 0x98a   : > { %v10592_v47 = vadd.f32 %v10591_v21, %v10451_v10  ;;  %v10468_v41 = vpop.f32.mrf.mxu0 }
 0x98b   : > { %v10469_v28 = vadd.f32 %v10468_v41, %v10328_v62  ;;  %v10593_v13 = vpop.f32.mrf.mxu1 }
 0x98c   : > { %v10594_v50 = vadd.f32 %v10593_v13, %v10453_v8  ;;  %v10699_v59 = vpop.f32.mrf.mxu0  ;;  %v9800_v8 = vadd.f32 %v18838_v23, %v18769_v38 }
 0x98d   : > { %v10600_v63 = vpop.f32.mrf.mxu1  ;;  %v10700_v14 = vadd.f32 %v10699_v59, %v10547_v19 }
 0x98e   : > { %v10601_v48 = vadd.f32 %v10600_v63, %v10459_v18  ;;  %v10701_v1 = vpop.f32.mrf.mxu0 }
 0x98f   : > { %v10602_v43 = vpop.f32.mrf.mxu1  ;;  %v10702_v26 = vadd.f32 %v10701_v1, %v10549_v45  ;;  %v9937_v45 = vadd.f32 %v18864_v56, %v9800_v8 }
 0x990   : > { %v10603_v6 = vadd.f32 %v10602_v43, %v10461_v34  ;;  %v10706_v15 = vpop.f32.mrf.mxu0 }
 0x991   : > { %v10609_v42 = vpop.f32.mrf.mxu1  ;;  %v10707_v16 = vadd.f32 %v10706_v15, %v10556_v27 }
 0x992   : > { %v10610_v3 = vadd.f32 %v10609_v42, %v10467_v4  ;;  %v10708_v60 = vpop.f32.mrf.mxu0 }
 0x993   : > { %v10611_v24 = vpop.f32.mrf.mxu1  ;;  %v10709_v39 = vadd.f32 %v10708_v60, %v10558_v53 }
 0x994   : > { %v10612_v10 = vadd.f32 %v10611_v24, %v10469_v28  ;;  %v10713_v35 = vpop.f32.mrf.mxu0 }
 0x995   : > { %v10714_v62 = vadd.f32 %v10713_v35, %v10565_v2  ;;  %v10826_v51 = vpop.f32.mrf.mxu1  ;;  %v9807_v2 = vadd.f32 %v18850_v57, %v18787_v49 }
 0x996   : > { %v10827_v19 = vadd.f32 %v10826_v51, %v10700_v14  ;;  %v10715_v18 = vpop.f32.mrf.mxu0 }
 0x997   : > { %v10716_v12 = vadd.f32 %v10715_v18, %v10567_v11  ;;  %v10828_v29 = vpop.f32.mrf.mxu1  ;;  %v9944_v11 = vadd.f32 %v18874_v9, %v9807_v2 }
 0x998   : > { %v18930_v34 = vadd.f32 %v10827_v19, %v18859_v25  ;;  %v10829_v27 = vadd.f32 %v10828_v29, %v10702_v26  ;;  %v10720_v4 = vpop.f32.mrf.mxu0 }
 0x999   : > { %v10721_v21 = vadd.f32 %v10720_v4, %v10574_v7  ;;  %v10833_v53 = vpop.f32.mrf.mxu1  ;;  %v9814_v7 = vadd.f32 %v18861_v46, %v18800_v54 }
 0x99a   : > { %v18934_v41 = vadd.f32 %v10829_v27, %v9937_v45  ;;  %v10834_v28 = vadd.f32 %v10833_v53, %v10707_v16  ;;  %v10722_v38 = vpop.f32.mrf.mxu0 }
 0x99b   : > { %v10723_v23 = vadd.f32 %v10722_v38, %v10576_v17  ;;  %v10835_v13 = vpop.f32.mrf.mxu1  ;;  %v9951_v17 = vadd.f32 %v18884_v36, %v9814_v7 }
 0x99c   : > { %v18938_v56 = vadd.f32 %v10834_v28, %v18870_v22  ;;  %v10836_v25 = vadd.f32 %v10835_v13, %v10709_v39  ;;  %v10727_v59 = vpop.f32.mrf.mxu0 }
 0x99d   : > { %v10728_v63 = vadd.f32 %v10727_v59, %v10583_v58  ;;  %v10840_v14 = vpop.f32.mrf.mxu1 }
 0x99e   : > { %v18942_v1 = vadd.f32 %v10836_v25, %v9944_v11  ;;  %v10841_v49 = vadd.f32 %v10840_v14, %v10714_v62  ;;  %v10729_v57 = vpop.f32.mrf.mxu0 }
 0x99f   : > { %v10730_v43 = vadd.f32 %v10729_v57, %v10585_v44  ;;  %v10842_v26 = vpop.f32.mrf.mxu1 }
 0x9a0   : > { %v18946_v9 = vadd.f32 %v10841_v49, %v18880_v0  ;;  %v10843_v22 = vadd.f32 %v10842_v26, %v10716_v12  ;;  %v10734_v15 = vpop.f32.mrf.mxu0 }
 0x9a1   : > { %v10735_v42 = vadd.f32 %v10734_v15, %v10592_v47  ;;  %v10847_v16 = vpop.f32.mrf.mxu1 }
 0x9a2   : > { %v18948_v58 = vadd.f32 %v10843_v22, %v9951_v17  ;;  %v10848_v60 = vadd.f32 %v10847_v16, %v10721_v21  ;;  %v10736_v24 = vpop.f32.mrf.mxu0 }
 0x9a3   : > { %v10737_v54 = vadd.f32 %v10736_v24, %v10594_v50  ;;  %v10849_v46 = vpop.f32.mrf.mxu1 }
 0x9a4   : > { %v18951_v39 = vadd.f32 %v10848_v60, %v18889_v33  ;;  %v10850_v44 = vadd.f32 %v10849_v46, %v10723_v23  ;;  %v10741_v35 = vpop.f32.mrf.mxu0 }
 0x9a5   : > { %v10742_v62 = vadd.f32 %v10741_v35, %v10601_v48  ;;  %v10854_v36 = vpop.f32.mrf.mxu1 }
 0x9a6   : > { %v18954_v0 = vadd.f32 %v10850_v44, %v18893_v31  ;;  %v10855_v51 = vadd.f32 %v10854_v36, %v10728_v63  ;;  %v10743_v8 = vpop.f32.mrf.mxu0 }
 0x9a7   : > { %v10744_v47 = vadd.f32 %v10743_v8, %v10603_v6  ;;  %v10856_v19 = vpop.f32.mrf.mxu1 }
 0x9a8   : > { %v18957_v18 = vadd.f32 %v10855_v51, %v18898_v5  ;;  %v10857_v12 = vadd.f32 %v10856_v19, %v10730_v43  ;;  %v10748_v50 = vpop.f32.mrf.mxu0 }
 0x9a9   : > { %v10749_v29 = vadd.f32 %v10748_v50, %v10610_v3  ;;  %v10861_v45 = vpop.f32.mrf.mxu1 }
 0x9aa   : > { %v18960_v33 = vadd.f32 %v10857_v12, %v18902_v37  ;;  %v10862_v27 = vadd.f32 %v10861_v45, %v10735_v42  ;;  %v10750_v48 = vpop.f32.mrf.mxu0 }
 0x9ab   : > { %v10751_v4 = vadd.f32 %v10750_v48, %v10612_v10  ;;  %v10863_v21 = vpop.f32.mrf.mxu1 }
 0x9ac   : > { %20398 = vst [vmem:[#allocation132_spill] sm:$0xff] %v18960_v33  ;;  %v18963_v31 = vadd.f32 %v10862_v27, %v18908_v32  ;;  %v10864_v53 = vadd.f32 %v10863_v21, %v10737_v54  ;;  %v11005_v6 = vpop.f32.mrf.mxu0 }
 0x9ad   : > { %v10868_v2 = vpop.f32.mrf.mxu1 }
 0x9ae   : > { %20399 = vst [vmem:[#allocation136_spill] sm:$0xff] %v18963_v31  ;;  %v18966_v5 = vadd.f32 %v10864_v53, %v18912_v30  ;;  %v10869_v28 = vadd.f32 %v10868_v2, %v10742_v62  ;;  %v11007_v38 = vpop.f32.mrf.mxu0 }
 0x9af   : > { %v10870_v3 = vpop.f32.mrf.mxu1 }
 0x9b0   : > { %20400 = vst [vmem:[#allocation141_spill] sm:$0xff] %v18966_v5  ;;  %v18969_v23 = vadd.f32 %v10869_v28, %v18915_v40  ;;  %v10871_v37 = vadd.f32 %v10870_v3, %v10744_v47  ;;  %v11016_v13 = vpop.f32.mrf.mxu0 }
 0x9b1   : > { %v10875_v11 = vpop.f32.mrf.mxu1 }
 0x9b2   : > { %20401 = vst [vmem:[#allocation137_spill] sm:$0xff] %v18969_v23  ;;  %v18972_v10 = vadd.f32 %v10871_v37, %v18918_v55  ;;  %v10876_v32 = vadd.f32 %v10875_v11, %v10749_v29  ;;  %v11018_v25 = vpop.f32.mrf.mxu0 }
 0x9b3   : > { %v10877_v59 = vpop.f32.mrf.mxu1 }
 0x9b4   : > { %20402 = vst [vmem:[#allocation134_spill] sm:$0xff] %v18972_v10  ;;  %v18975_v63 = vadd.f32 %v10876_v32, %v18921_v20  ;;  %v10878_v30 = vadd.f32 %v10877_v59, %v10751_v4  ;;  %v11027_v14 = vpop.f32.mrf.mxu0 }
 0x9b5   : > { %v11184_v7 = vpop.f32.mrf.mxu1 }
 0x9b6   : > { %20403 = vst [vmem:[#allocation139_spill] sm:$0xff] %v18975_v63  ;;  %v18978_v49 = vadd.f32 %v10878_v30, %v18924_v61  ;;  %v11185_v40 = vadd.f32 %v11184_v7, %v11005_v6  ;;  %v11029_v57 = vpop.f32.mrf.mxu0 }
 0x9b7   : > { %v11186_v43 = vpop.f32.mrf.mxu1 }
 0x9b8   : > { %20404 = vst [vmem:[#allocation128_spill] sm:$0xff] %v18978_v49  ;;  %v11187_v26 = vadd.f32 %v11186_v43, %v11007_v38  ;;  %v11038_v17 = vpop.f32.mrf.mxu0 }
 0x9b9   : > { %v11191_v22 = vpop.f32.mrf.mxu1 }
 0x9ba   : > { %v11192_v55 = vadd.f32 %v11191_v22, %v11016_v13  ;;  %v11040_v15 = vpop.f32.mrf.mxu0 }
 0x9bb   : > { %v11193_v42 = vpop.f32.mrf.mxu1 }
 0x9bc   : > { %v11194_v16 = vadd.f32 %v11193_v42, %v11018_v25  ;;  %v11049_v60 = vpop.f32.mrf.mxu0 }
 0x9bd   : > { %v11198_v24 = vpop.f32.mrf.mxu1 }
 0x9be   : > { %v18980_v20 = vadd.f32 %v11198_v24, %v11027_v14  ;;  %v11051_v54 = vpop.f32.mrf.mxu0 }
 0x9bf   : > { %v11200_v46 = vpop.f32.mrf.mxu1 }
 0x9c0   : > { %v18982_v44 = vadd.f32 %v11200_v46, %v11029_v57  ;;  %v11060_v61 = vpop.f32.mrf.mxu0 }
 0x9c1   : > { %v11205_v35 = vpop.f32.mrf.mxu1 }
 0x9c2   : > { %v18984_v62 = vadd.f32 %v11205_v35, %v11038_v17  ;;  %v11062_v36 = vpop.f32.mrf.mxu0 }
 0x9c3   : > { %v11207_v51 = vpop.f32.mrf.mxu1 }
 0x9c4   : > { %v18986_v8 = vadd.f32 %v11207_v51, %v11040_v15  ;;  %v11071_v47 = vpop.f32.mrf.mxu0 }
 0x9c5   : > { %v11212_v19 = vpop.f32.mrf.mxu1 }
 0x9c6   : > { %v18988_v12 = vadd.f32 %v11212_v19, %v11049_v60  ;;  %v18990_v50 = vpop.f32.mrf.mxu0 }
 0x9c7   : > { %v11214_v29 = vpop.f32.mrf.mxu1 }
 0x9c8   : > { %v18992_v45 = vadd.f32 %v11214_v29, %v11051_v54  ;;  %v18994_v27 = vpop.f32.mrf.mxu0 }
 0x9c9   : > { %v11219_v48 = vpop.f32.mrf.mxu1 }
 0x9ca   : > { %v18996_v4 = vadd.f32 %v11219_v48, %v11060_v61  ;;  %v18998_v21 = vpop.f32.mrf.mxu0 }
 0x9cb   : > { %20405 = vst [vmem:[#allocation101_spill] sm:$0xff] %v18998_v21  ;;  %v11221_v53 = vpop.f32.mrf.mxu1 }
 0x9cc   : > { %v19000_v6 = vadd.f32 %v11221_v53, %v11062_v36  ;;  %v11318_v2 = vpop.f32.mrf.mxu0 }
 0x9cd   : > { %v11226_v28 = vpop.f32.mrf.mxu1  ;;  %v11319_v38 = vadd.f32 %v11318_v2, %v11185_v40 }
 0x9ce   : > { %v19002_v3 = vadd.f32 %v11226_v28, %v11071_v47  ;;  %v11320_v37 = vpop.f32.mrf.mxu0 }
 0x9cf   : > { %v19004_v13 = vpop.f32.mrf.mxu1  ;;  %v11321_v11 = vadd.f32 %v11320_v37, %v11187_v26  ;;  %v11869_v26 = vld [vmem:[%s19452_s2] sm:$0x1] }
 0x9d0   : > { %v11326_v32 = vpop.f32.mrf.mxu0 }
 0x9d1   : > { %v19006_v25 = vpop.f32.mrf.mxu1  ;;  %v11327_v59 = vadd.f32 %v11326_v32, %v11192_v55  ;;  %v12918_v55 = vmov 5  }
 0x9d2   : > { %v11328_v30 = vpop.f32.mrf.mxu0  ;;  %12782 = vset.pattern.permute.xlu0 %v12918_v55 }
 0x9d3   : > { %v19008_v14 = vpop.f32.mrf.mxu1  ;;  %v11329_v7 = vadd.f32 %v11328_v30, %v11194_v16  ;;  %11872 = vperm.xlu0 %12782, %v11869_v26   ;;  %v19039_v26 = vpop.permute.xlu1 %11833 }
 0x9d4   : > { %20406 = vst [vmem:[#allocation135_spill] sm:$0xff] %v19008_v14  ;;  %v11334_v57 = vpop.f32.mrf.mxu0  ;;  %20411 = vst [vmem:[#allocation24_spill] sm:$0xff] %v19039_v26 }
 0x9d5   : > { %v11454_v43 = vpop.f32.mrf.mxu1 }
 0x9d6   : > { %v11455_v17 = vadd.f32 %v11454_v43, %v11319_v38  ;;  %v11336_v22 = vpop.f32.mrf.mxu0 }
 0x9d7   : > { %v11456_v15 = vpop.f32.mrf.mxu1  ;;  %v19045_v31 = vpop.permute.xlu1 %11825 }
 0x9d8   : > { %v11457_v40 = vadd.f32 %v11456_v15, %v11321_v11  ;;  %v11342_v42 = vpop.f32.mrf.mxu0 }
 0x9d9   : > { %v11463_v60 = vpop.f32.mrf.mxu1 }
 0x9da   : > { %v11464_v24 = vadd.f32 %v11463_v60, %v11327_v59  ;;  %v11344_v54 = vpop.f32.mrf.mxu0 }
 0x9db   : > { %v11465_v46 = vpop.f32.mrf.mxu1 }
 0x9dc   : > { %v11466_v61 = vadd.f32 %v11465_v46, %v11329_v7  ;;  %v19013_v35 = vpop.f32.mrf.mxu0 }
 0x9dd   : > { %v11472_v16 = vpop.f32.mrf.mxu1 }
 0x9de   : > { %v19015_v36 = vpop.f32.mrf.mxu0 }
 0x9df   : > { %v11474_v51 = vpop.f32.mrf.mxu1 }
 0x9e0   : > { %v19017_v47 = vpop.f32.mrf.mxu0 }
 0x9e1   : > { %v11481_v19 = vpop.f32.mrf.mxu1 }
 0x9e2   : > { %v19019_v29 = vpop.f32.mrf.mxu0 }
 0x9e3   : > { %v11483_v48 = vpop.f32.mrf.mxu1 }
 0x9e4   : > { %v19021_v53 = vpop.f32.mrf.mxu0 }
 0x9e5   : > { %v11490_v2 = vpop.f32.mrf.mxu1 }
 0x9e6   : > { %v19023_v28 = vpop.f32.mrf.mxu0 }
 0x9e7   : > { %v19025_v38 = vpop.f32.mrf.mxu1 }
 0x9e8   : > { %v19027_v37 = vpop.f32.mrf.mxu0 }
 0x9e9   : > { %20407 = vst [vmem:[#allocation99_spill] sm:$0xff] %v19027_v37  ;;  %v19029_v11 = vpop.f32.mrf.mxu1 }
 0x9ea   : > { %v19031_v32 = vpop.f32.mrf.mxu0 }
 0x9eb   : > { %20408 = vst [vmem:[#allocation129_spill] sm:$0xff] %v19031_v32  ;;  %v19033_v59 = vpop.f32.mrf.mxu1 }
 0x9ec   : > { %v11607_v30 = vpop.f32.mrf.mxu0 }
 0x9ed   : > { %v19035_v7 = vpop.f32.mrf.mxu1  ;;  %v11608_v49 = vadd.f32 %v11607_v30, %v11455_v17 }
 0x9ee   : > { %20409 = vst [vmem:[#allocation131_spill] sm:$0xff] %v19035_v7  ;;  %v11609_v43 = vpop.f32.mrf.mxu0 }
 0x9ef   : > { %v19037_v15 = vpop.f32.mrf.mxu1  ;;  %v11610_v23 = vadd.f32 %v11609_v43, %v11457_v40 }
 0x9f0   : > { %20410 = vst [vmem:[#allocation7_spill] sm:$0xff] %v19037_v15  ;;  %v11614_v60 = vpop.f32.mrf.mxu0 }
 0x9f1   : > { %v19041_v46 = vpop.f32.mrf.mxu1  ;;  %v11615_v7 = vadd.f32 %v11614_v60, %v11464_v24 }
 0x9f2   : > { %20412 = vst [vmem:[#allocation8_spill] sm:$0xff] %v19041_v46  ;;  %v11616_v55 = vpop.f32.mrf.mxu0  ;;  %v11335_v46 = vadd.f32 %v11334_v57, %v18980_v20  ;;  %v19059_v20 = vpop.permute.xlu1 %11821 }
 0x9f3   : > { %v19043_v52 = vpop.f32.mrf.mxu1  ;;  %v11617_v33 = vadd.f32 %v11616_v55, %v11466_v61 }
 0x9f4   : > { %v11621_v63 = vpop.f32.mrf.mxu0 }
 0x9f5   : > { %v11734_v10 = vpop.f32.mrf.mxu1 }
 0x9f6   : > { %v11735_v5 = vadd.f32 %v11734_v10, %v11608_v49  ;;  %v11623_v32 = vpop.f32.mrf.mxu0  ;;  %v11337_v10 = vadd.f32 %v11336_v22, %v18982_v44  ;;  %v11473_v49 = vadd.f32 %v11472_v16, %v11335_v46  ;;  %v11345_v44 = vadd.f32 %v11344_v54, %v18986_v8  ;;  %v19076_v55 = vpop.permute.xlu1 %11813 }
 0x9f7   : > { %v11736_v37 = vpop.f32.mrf.mxu1 }
 0x9f8   : > { %v11737_v14 = vadd.f32 %v11736_v37, %v11610_v23  ;;  %v19048_v15 = vadd.f32 %v11735_v5, %v18930_v34  ;;  %v11628_v26 = vpop.f32.mrf.mxu0  ;;  %v11343_v5 = vadd.f32 %v11342_v42, %v18984_v62  ;;  %v11475_v37 = vadd.f32 %v11474_v51, %v11337_v10 }
 0x9f9   : > { %v11741_v21 = vpop.f32.mrf.mxu1  ;;  %v11622_v57 = vadd.f32 %v11621_v63, %v11473_v49  ;;  %v11351_v62 = vadd.f32 %v19013_v35, %v18988_v12  ;;  %v11484_v42 = vadd.f32 %v11483_v48, %v11345_v44 }
 0x9fa   : > { %v19052_v17 = vadd.f32 %v11737_v14, %v18934_v41  ;;  %v11742_v30 = vadd.f32 %v11741_v21, %v11615_v7  ;;  %v11630_v40 = vpop.f32.mrf.mxu0  ;;  %v11868_v41 = vld [vmem:[%s19451_s1 + $0x280] sm:$0x1]  ;;  %v11482_v14 = vadd.f32 %v11481_v19, %v11343_v5 }
 0x9fb   : > { %v11743_v43 = vpop.f32.mrf.mxu1  ;;  %v11876_v51 = vsel %vm4903_vm0, %v11868_v41, 0  ;;  %v11491_v19 = vadd.f32 %v11490_v2, %v11351_v62  ;;  %v11806_v41 = vpop.permute.xlu1 %11805 }
 0x9fc   : > { %v19056_v24 = vadd.f32 %v11742_v30, %v18938_v56  ;;  %v11744_v23 = vadd.f32 %v11743_v43, %v11617_v33  ;;  %v11635_v34 = vpop.f32.mrf.mxu0  ;;  %v11624_v33 = vadd.f32 %v11623_v32, %v11475_v37  ;;  %v11629_v7 = vadd.f32 %v11628_v26, %v11482_v14 }
 0x9fd   : > { %v11748_v61 = vpop.f32.mrf.mxu1  ;;  %v11631_v32 = vadd.f32 %v11630_v40, %v11484_v42  ;;  %v19081_v30 = vand.u32 4294901760, %v11876_v51  ;;  %v11636_v10 = vadd.f32 %v11635_v34, %v11491_v19 }
 0x9fe   : > { %v19066_v21 = vadd.f32 %v11744_v23, %v18942_v1  ;;  %v11637_v56 = vpop.f32.mrf.mxu0  ;;  %v11749_v22 = vadd.f32 %v11748_v61, %v11622_v57  ;;  %v11353_v1 = vadd.f32 %v19015_v36, %v18992_v45  ;;  %v11367_v61 = vadd.f32 %v19021_v53, %v19002_v3 }
 0x9ff   : > { %v11750_v16 = vpop.f32.mrf.mxu1  ;;  %v19096_v34 = vsub.f32 %v11876_v51, %v19081_v30  ;;  %v20418_v51 = vld [vmem:[#allocation7_spill] sm:$0xff] }
 0xa00   : > { %v11642_v63 = vpop.f32.mrf.mxu0  ;;  %v19072_v60 = vadd.f32 %v11749_v22, %v18946_v9  ;;  %v11751_v8 = vadd.f32 %v11750_v16, %v11624_v33  ;;  %v11359_v9 = vadd.f32 %v19017_v47, %v18996_v4  ;;  %v11493_v26 = vadd.f32 %v19025_v38, %v11353_v1 }
 0xa01   : > { %v11755_v54 = vpop.f32.mrf.mxu1  ;;  %v11361_v4 = vadd.f32 %v19019_v29, %v19000_v6  ;;  %v11234_v6 = vadd.f32 %v19006_v25, %v18994_v27  ;;  %v11961_v53 = vand.u32 4294901760, %v19096_v34  ;;  %v19115_v27 = vadd.f32 %v11806_v41, %v19048_v15 }
 0xa02   : > { %v11644_v46 = vpop.f32.mrf.mxu0  ;;  %v19079_v12 = vadd.f32 %v11751_v8, %v18948_v58  ;;  %v11756_v35 = vadd.f32 %v11755_v54, %v11629_v7  ;;  %v11500_v40 = vadd.f32 %v19029_v11, %v11359_v9  ;;  %v19090_v58 = vpop.permute.xlu0 %11829  ;;  %v11638_v43 = vadd.f32 %v11637_v56, %v11493_v26  ;;  %v20413_v56 = vld [vmem:[#allocation132_spill] sm:$0xff] }
 0xa03   : > { %v11757_v48 = vpop.f32.mrf.mxu1  ;;  %v19119_v54 = vadd.f32 %v11806_v41, %v19052_v17 }
 0xa04   : > { %v11758_v49 = vadd.f32 %v11757_v48, %v11631_v32  ;;  %v11649_v45 = vpop.f32.mrf.mxu0  ;;  %v19087_v36 = vadd.f32 %v11756_v35, %v18951_v39  ;;  %v11229_v39 = vadd.f32 %v19004_v13, %v18990_v50  ;;  %v11643_v37 = vadd.f32 %v11642_v63, %v11500_v40  ;;  %v20414_v50 = vld [vmem:[#allocation101_spill] sm:$0xff]  ;;  %v20415_v13 = vld [vmem:[#allocation135_spill] sm:$0xff]  ;;  %v20421_v48 = vld [vmem:[#allocation8_spill] sm:$0xff] }
 0xa05   : > { %v11762_v2 = vpop.f32.mrf.mxu1  ;;  %v11236_v22 = vadd.f32 %v20415_v13, %v20414_v50 }
 0xa06   : > { %v11795_v23 = vadd.f32 %v11758_v49, %v18954_v0  ;;  %v11763_v5 = vadd.f32 %v11762_v2, %v11636_v10  ;;  %v11651_v47 = vpop.f32.mrf.mxu0  ;;  %v11502_v0 = vadd.f32 %v19033_v59, %v11361_v4  ;;  %v11369_v29 = vadd.f32 %v19023_v28, %v11229_v39  ;;  %v20417_v59 = vld [vmem:[#allocation99_spill] sm:$0xff]  ;;  %v11818_v25 = vpop.permute.xlu0 %11817  ;;  %v20419_v28 = vld [vmem:[#allocation136_spill] sm:$0xff]  ;;  %v20422_v49 = vld [vmem:[#allocation141_spill] sm:$0xff] }
 0xa07   : > { %v11764_v38 = vpop.f32.mrf.mxu1  ;;  %v11375_v63 = vadd.f32 %v20417_v59, %v11234_v6  ;;  %v20424_v6 = vld [vmem:[#allocation134_spill] sm:$0xff] }
 0xa08   : > { %v11796_v11 = vadd.f32 %v11763_v5, %v18957_v18  ;;  %v11765_v57 = vadd.f32 %v11764_v38, %v11638_v43  ;;  %v20416_v18 = vld [vmem:[#allocation131_spill] sm:$0xff]  ;;  %v11645_v62 = vadd.f32 %v11644_v46, %v11502_v0  ;;  %v11656_v42 = vpop.f32.mrf.mxu0  ;;  %v11511_v7 = vadd.f32 %v20418_v51, %v11369_v29  ;;  %v20420_v46 = vld [vmem:[#allocation129_spill] sm:$0xff]  ;;  %v20426_v51 = vld [vmem:[#allocation24_spill] sm:$0xff] }
 0xa09   : > { %v11769_v44 = vpop.f32.mrf.mxu1  ;;  %v11509_v16 = vadd.f32 %v20416_v18, %v11367_v61  ;;  %v11377_v35 = vadd.f32 %v20420_v46, %v11236_v22  ;;  %v11518_v9 = vadd.f32 %v20421_v48, %v11375_v63  ;;  %v19127_v43 = vsub.f32 %v19096_v34, %v11961_v53 }
 0xa0a   : > { %v11797_v14 = vadd.f32 %v11765_v57, %v20413_v56  ;;  %v11770_v33 = vadd.f32 %v11769_v44, %v11643_v37  ;;  %v11652_v26 = vadd.f32 %v11651_v47, %v11511_v7  ;;  %v11658_v10 = vpop.f32.mrf.mxu0  ;;  %v11853_v38 = vmax.f32 %v19119_v54, 0.0  ;;  %v20423_v37 = vld [vmem:[#allocation137_spill] sm:$0xff]  ;;  %v11810_v0 = vpop.permute.xlu0 %11809 }
 0xa0b   : > { %v11771_v3 = vpop.f32.mrf.mxu1  ;;  %v11650_v1 = vadd.f32 %v11649_v45, %v11509_v16  ;;  %v11520_v17 = vadd.f32 %v19043_v52, %v11377_v35  ;;  %v11852_v45 = vmax.f32 %v19115_v27, 0.0  ;;  %v11657_v5 = vadd.f32 %v11656_v42, %v11518_v9  ;;  %v20425_v16 = vld [vmem:[#allocation139_spill] sm:$0xff] }
 0xa0c   : > { %v11798_v8 = vadd.f32 %v11770_v33, %v20419_v28  ;;  %v11772_v19 = vadd.f32 %v11771_v3, %v11645_v62  ;;  %v11845_v41 = vadd.f32 %v19059_v20, %v11797_v14  ;;  %v19138_v56 = vadd.f32 %v11810_v0, %v19066_v21 }
 0xa0d   : > { %v11776_v32 = vpop.f32.mrf.mxu1  ;;  %v11659_v44 = vadd.f32 %v11658_v10, %v11520_v17  ;;  %v11843_v33 = vadd.f32 %v11818_v25, %v11795_v23  ;;  %v11844_v50 = vadd.f32 %v19059_v20, %v11796_v11  ;;  %v11841_v14 = vadd.f32 %v19076_v55, %v19079_v12  ;;  %v20427_v11 = vld [vmem:[#allocation128_spill] sm:$0xff] }
 0xa0e   : > { %v11799_v2 = vadd.f32 %v11772_v19, %v20422_v49  ;;  %v11777_v40 = vadd.f32 %v11776_v32, %v11650_v1  ;;  %v11846_v47 = vadd.f32 %v19045_v31, %v11798_v8  ;;  %v11842_v3 = vadd.f32 %v11818_v25, %v19087_v36 }
 0xa0f   : > { %v11778_v15 = vpop.f32.mrf.mxu1  ;;  %v11861_v63 = vmax.f32 %v11845_v41, 0.0  ;;  %v11840_v28 = vadd.f32 %v19076_v55, %v19072_v60  ;;  %v11860_v8 = vmax.f32 %v11844_v50, 0.0  ;;  %v11838_v32 = vadd.f32 %v11810_v0, %v19056_v24 }
 0xa10   : > { %v11779_v4 = vadd.f32 %v11778_v15, %v11652_v26  ;;  %v11847_v39 = vadd.f32 %v19045_v31, %v11799_v2  ;;  %v11800_v57 = vadd.f32 %v11777_v40, %v20423_v37  ;;  %v11862_v59 = vmax.f32 %v11846_v47, 0.0 }
 0xa11   : > { %v11783_v61 = vpop.f32.mrf.mxu1  ;;  %v11857_v46 = vmax.f32 %v11841_v14, 0.0  ;;  %v11858_v35 = vmax.f32 %v11842_v3, 0.0  ;;  %v19161_v9 = vand.u32 4294901760, %v11861_v63  ;;  %v11855_v10 = vmax.f32 %v19138_v56, 0.0 }
 0xa12   : > { %v11801_v29 = vadd.f32 %v11779_v4, %v20424_v6  ;;  %v11784_v52 = vadd.f32 %v11783_v61, %v11657_v5  ;;  %v11848_v13 = vadd.f32 %v19090_v58, %v11800_v57  ;;  %v11863_v31 = vmax.f32 %v11847_v39, 0.0 }
 0xa13   : > { %v11785_v22 = vpop.f32.mrf.mxu1  ;;  %v19159_v48 = vand.u32 4294901760, %v11862_v59  ;;  %v11856_v49 = vmax.f32 %v11840_v28, 0.0  ;;  %v19169_v2 = vand.u32 4294901760, %v11860_v8  ;;  %v11854_v4 = vmax.f32 %v11838_v32, 0.0 }
 0xa14   : > { %v11849_v18 = vadd.f32 %v19090_v58, %v11801_v29  ;;  %v11802_v62 = vadd.f32 %v11784_v52, %v20425_v16  ;;  %v11786_v42 = vadd.f32 %v11785_v22, %v11659_v44  ;;  %v11864_v21 = vmax.f32 %v11848_v13, 0.0 }
 0xa15   : > { %v11859_v58 = vmax.f32 %v11843_v33, 0.0  ;;  %v19153_v19 = vand.u32 4294901760, %v11863_v31  ;;  %v19184_v47 = vand.u32 4294901760, %v11857_v46  ;;  %v19186_v39 = vand.u32 4294901760, %v11858_v35 }
 0xa16   : > { %v11865_v23 = vmax.f32 %v11849_v18, 0.0  ;;  %v11850_v20 = vadd.f32 %v20426_v51, %v11802_v62  ;;  %v11803_v7 = vadd.f32 %v11786_v42, %v20427_v11  ;;  %v19151_v1 = vand.u32 4294901760, %v11864_v21 }
 0xa17   : > { %v19174_v24 = vand.u32 4294901760, %v11859_v58  ;;  %v19177_v15 = vsub.f32 %v11863_v31, %v19153_v19  ;;  %v19189_v37 = vsub.f32 %v11862_v59, %v19159_v48  ;;  %v19192_v57 = vsub.f32 %v11861_v63, %v19161_v9 }
 0xa18   : > { %v19155_v12 = vand.u32 4294901760, %v11865_v23  ;;  %v11866_v36 = vmax.f32 %v11850_v20, 0.0  ;;  %v11851_v25 = vadd.f32 %v20426_v51, %v11803_v7  ;;  %v19172_v40 = vsub.f32 %v11864_v21, %v19151_v1 }
 0xa19   : > { %v19202_v44 = vand.u32 4294901760, %v11853_v38  ;;  %v19204_v6 = vand.u32 4294901760, %v11856_v49  ;;  %v19207_v29 = vsub.f32 %v11860_v8, %v19169_v2  ;;  %v19211_v56 = vand.u32 4294901760, %v11855_v10 }
 0xa1a   : > { %v19164_v60 = vsub.f32 %v11865_v23, %v19155_v12  ;;  %v19166_v55 = vand.u32 4294901760, %v11866_v36  ;;  %v11867_v26 = vmax.f32 %v11851_v25, 0.0  ;;  %v12006_v52 = vand.u32 4294901760, %v19172_v40 }
 0xa1b   : > { %v19214_v33 = vsub.f32 %v11859_v58, %v19174_v24  ;;  %v12012_v13 = vand.u32 4294901760, %v19177_v15  ;;  %v19219_v22 = vand.u32 4294901760, %v11854_v4  ;;  %v19222_v31 = vsub.f32 %v11858_v35, %v19186_v39 }
 0xa1c   : > { %v19180_v17 = vsub.f32 %v11866_v36, %v19166_v55  ;;  %v19182_v5 = vand.u32 4294901760, %v11867_v26  ;;  %v12000_v41 = vand.u32 4294901760, %v19164_v60  ;;  %v12018_v16 = vand.u32 4294901760, %v19189_v37 }
 0xa1d   : > { %v19230_v62 = vsub.f32 %v11857_v46, %v19184_v47  ;;  %v12024_v3 = vand.u32 4294901760, %v19192_v57  ;;  %v19242_v59 = vand.u32 4294901760, %v11852_v45  ;;  %v19245_v21 = vsub.f32 %v11856_v49, %v19204_v6 }
 0xa1e   : > { %v19195_v61 = vsub.f32 %v11867_v26, %v19182_v5  ;;  %11895 = vmatprep.subr.mxu0 %v19182_v5  ;;  %v11994_v0 = vand.u32 4294901760, %v19180_v17  ;;  %v12001_v14 = vsub.f32 %v19164_v60, %v12000_v41  ;;  %v12007_v63 = vsub.f32 %v19172_v40, %v12006_v52 }
 0xa1f   : > { %11897 = vmatpush1.msra.mxu0 %v19166_v55  ;;  %v12030_v23 = vand.u32 4294901760, %v19207_v29  ;;  %v19253_v51 = vsub.f32 %v11855_v10, %v19211_v56  ;;  %v12013_v11 = vsub.f32 %v19177_v15, %v12012_v13  ;;  %v12036_v7 = vand.u32 4294901760, %v19214_v33 }
 0xa20   : > { %11899 = vmatprep.subr.mxu0 %v19155_v12  ;;  %v11988_v50 = vand.u32 4294901760, %v19195_v61  ;;  %v11995_v18 = vsub.f32 %v19180_v17, %v11994_v0  ;;  %v19261_v28 = vsub.f32 %v11854_v4, %v19219_v22  ;;  %v12019_v8 = vsub.f32 %v19189_v37, %v12018_v16 }
 0xa21   : > { %11901 = vmatpush1.msra.mxu0 %v19151_v1  ;;  %v12042_v36 = vand.u32 4294901760, %v19222_v31  ;;  %v19271_v25 = vsub.f32 %v11853_v38, %v19202_v44  ;;  %v12002_v32 = vand.u32 4294901760, %v12001_v14  ;;  %v12025_v46 = vsub.f32 %v19192_v57, %v12024_v3 }
 0xa22   : > { %11903 = vmatprep.subr.mxu0 %v19153_v19  ;;  %v11989_v42 = vsub.f32 %v19195_v61, %v11988_v50  ;;  %v11996_v58 = vand.u32 4294901760, %v11995_v18  ;;  %v12048_v35 = vand.u32 4294901760, %v19230_v62  ;;  %v19281_v26 = vsub.f32 %v11852_v45, %v19242_v59 }
 0xa23   : > { %11905 = vmatpush1.msra.mxu0 %v19159_v48  ;;  %v12008_v54 = vand.u32 4294901760, %v12007_v63  ;;  %v12031_v38 = vsub.f32 %v19207_v29, %v12030_v23  ;;  %v12054_v10 = vand.u32 4294901760, %v19245_v21  ;;  %v12014_v49 = vand.u32 4294901760, %v12013_v11 }
 0xa24   : > { %11907 = vmatprep.subr.mxu0 %v19161_v9  ;;  %v11990_v20 = vand.u32 4294901760, %v11989_v42  ;;  %v12037_v27 = vsub.f32 %v19214_v33, %v12036_v7  ;;  %v12060_v45 = vand.u32 4294901760, %v19253_v51  ;;  %v12066_v4 = vand.u32 4294901760, %v19261_v28 }
 0xa25   : > { %11909 = vmatpush1.msra.mxu0 %v19169_v2  ;;  %v12020_v18 = vand.u32 4294901760, %v12019_v8  ;;  %v12043_v42 = vsub.f32 %v19222_v31, %v12042_v36  ;;  %v12026_v14 = vand.u32 4294901760, %v12025_v46  ;;  %v12049_v63 = vsub.f32 %v19230_v62, %v12048_v35 }
 0xa26   : > { %11911 = vmatprep.subr.mxu0 %v19174_v24  ;;  %11991 = vmatprep.subr.mxu1 %v11990_v20  ;;  %v12072_v20 = vand.u32 4294901760, %v19271_v25  ;;  %v12078_v11 = vand.u32 4294901760, %v19281_v26  ;;  %v11963_v8 = vand.u32 4294901760, %v19127_v43  ;;  %v12038_v46 = vand.u32 4294901760, %v12037_v27 }
 0xa27   : > { %11913 = vmatpush1.msra.mxu0 %v19186_v39  ;;  %11997 = vmatpush1.msra.mxu1 %v11996_v58  ;;  %v12032_v58 = vand.u32 4294901760, %v12031_v38  ;;  %v12067_v43 = vsub.f32 %v19261_v28, %v12066_v4  ;;  %v12050_v38 = vand.u32 4294901760, %v12049_v63 }
 0xa28   : > { %11915 = vmatprep.subr.mxu0 %v19184_v47  ;;  %12003 = vmatprep.subr.mxu1 %v12002_v32  ;;  %v12055_v32 = vsub.f32 %v19245_v21, %v12054_v10  ;;  %v12073_v27 = vsub.f32 %v19271_v25, %v12072_v20 }
 0xa29   : > { %11917 = vmatpush1.msra.mxu0 %v19204_v6  ;;  %12009 = vmatpush1.msra.mxu1 %v12008_v54  ;;  %v12061_v54 = vsub.f32 %v19253_v51, %v12060_v45 }
 0xa2a   : > { %11919 = vmatprep.subr.mxu0 %v19211_v56  ;;  %12015 = vmatprep.subr.mxu1 %v12014_v49  ;;  %v12044_v49 = vand.u32 4294901760, %v12043_v42  ;;  %v12074_v63 = vand.u32 4294901760, %v12073_v27 }
 0xa2b   : > { %11921 = vmatpush1.msra.mxu0 %v19219_v22  ;;  %12021 = vmatpush1.msra.mxu1 %v12020_v18  ;;  %v12079_v18 = vsub.f32 %v19281_v26, %v12078_v11  ;;  %v12062_v42 = vand.u32 4294901760, %v12061_v54 }
 0xa2c   : > { %11923 = vmatprep.subr.mxu0 %v19202_v44  ;;  %12027 = vmatprep.subr.mxu1 %v12026_v14  ;;  %v12056_v14 = vand.u32 4294901760, %v12055_v32 }
 0xa2d   : > { %11925 = vmatpush1.msra.mxu0 %v19242_v59  ;;  %12033 = vmatpush1.msra.mxu1 %v12032_v58  ;;  %v12068_v58 = vand.u32 4294901760, %v12067_v43 }
 0xa2e   : > { %12039 = vmatprep.subr.mxu1 %v12038_v46  ;;  %12140 = vmatprep.subr.mxu0 %v19195_v61  ;;  %v12080_v46 = vand.u32 4294901760, %v12079_v18 }
 0xa2f   : > { %11964 = vmatmul.mubr.f32.vlgmr.msra.gmra.mxu0 %v11963_v8  ;;  %12045 = vmatpush1.msra.mxu1 %v12044_v49  ;;  %v20428_v8 = vmov 0.0  }
 0xa30   : > { %12143 = vmatpush1.msra.mxu0 %v19180_v17  ;;  %12051 = vmatprep.subr.mxu1 %v12050_v38 }
 0xa31   : > { %12146 = vmatprep.subr.mxu0 %v19164_v60  ;;  %12057 = vmatpush1.msra.mxu1 %v12056_v14 }
 0xa32   : > { %12149 = vmatpush1.msra.mxu0 %v19172_v40  ;;  %12063 = vmatprep.subr.mxu1 %v12062_v42 }
 0xa33   : > { %12152 = vmatprep.subr.mxu0 %v19177_v15  ;;  %12069 = vmatpush1.msra.mxu1 %v12068_v58 }
 0xa34   : > { %12155 = vmatpush1.msra.mxu0 %v19189_v37  ;;  %12075 = vmatprep.subr.mxu1 %v12074_v63 }
 0xa35   : > { %12158 = vmatprep.subr.mxu0 %v19192_v57  ;;  %12081 = vmatpush1.msra.mxu1 %v12080_v46 }
 0xa36   : > { %12161 = vmatpush1.msra.mxu0 %v19207_v29  ;;  %12244 = vmatprep.subr.mxu1 %v19182_v5  ;;  %v12919_v29 = vmov 1966171168  }
 0xa37   : > { %12164 = vmatprep.subr.mxu0 %v19214_v33  ;;  %12116 = vmatmul.mubr.f32.vlgmr.msra.gmra.mxu1 %v19081_v30 }
 0xa38   : > { %12167 = vmatpush1.msra.mxu0 %v19222_v31  ;;  %12246 = vmatpush1.msra.mxu1 %v19166_v55 }
 0xa39   : > { %12170 = vmatprep.subr.mxu0 %v19230_v62  ;;  %12248 = vmatprep.subr.mxu1 %v19155_v12 }
 0xa3a   : > { %12173 = vmatpush1.msra.mxu0 %v19245_v21  ;;  %12250 = vmatpush1.msra.mxu1 %v19151_v1 }
 0xa3b   : > { %12176 = vmatprep.subr.mxu0 %v19253_v51  ;;  %12252 = vmatprep.subr.mxu1 %v19153_v19 }
 0xa3c   : > { %12179 = vmatpush1.msra.mxu0 %v19261_v28  ;;  %12254 = vmatpush1.msra.mxu1 %v19159_v48 }
 0xa3d   : > { %12182 = vmatprep.subr.mxu0 %v19271_v25  ;;  %12256 = vmatprep.subr.mxu1 %v19161_v9 }
 0xa3e   : > { %12185 = vmatpush1.msra.mxu0 %v19281_v26  ;;  %12258 = vmatpush1.msra.mxu1 %v19169_v2 }
 0xa3f   : > { %12218 = vmatprep.mubr.f32.mxu0 %v20428_v8  ;;  %12260 = vmatprep.subr.mxu1 %v19174_v24 }
 0xa40   : > { %12336 = vmatprep.subr.mxu0 %v11988_v50  ;;  %12221 = vmatmul.mubr.f32.vlgmr.msra.gmra.mxu0 %v19096_v34 }
 0xa41   : > { %12262 = vmatpush1.msra.mxu1 %v19186_v39  ;;  %12340 = vmatpush1.msra.mxu0 %v11994_v0 }
 0xa42   : > { %12264 = vmatprep.subr.mxu1 %v19184_v47  ;;  %12344 = vmatprep.subr.mxu0 %v12000_v41 }
 0xa43   : > { %12266 = vmatpush1.msra.mxu1 %v19204_v6  ;;  %12348 = vmatpush1.msra.mxu0 %v12006_v52  ;;  %v12531_v52 = vunpack.c.l.s4 %v12919_v29 }
 0xa44   : > { %12268 = vmatprep.subr.mxu1 %v19211_v56  ;;  %12352 = vmatprep.subr.mxu0 %v12012_v13 }
 0xa45   : > { %12270 = vmatpush1.msra.mxu1 %v19219_v22  ;;  %12356 = vmatpush1.msra.mxu0 %v12018_v16  ;;  %v12532_v33 = vunpack.c.0.s8 %v12531_v52 }
 0xa46   : > { %12272 = vmatprep.subr.mxu1 %v19202_v44  ;;  %12360 = vmatprep.subr.mxu0 %v12024_v3 }
 0xa47   : > { %12274 = vmatpush1.msra.mxu1 %v19242_v59  ;;  %12364 = vmatpush1.msra.mxu0 %v12030_v23 }
 0xa48   : > { %12307 = vmatprep.mubr.f32.mxu1 %v20428_v8  ;;  %12368 = vmatprep.subr.mxu0 %v12036_v7 }
 0xa49   : > { %12454 = vmatprep.subr.mxu1 %v19182_v5  ;;  %12311 = vmatmul.mubr.f32.vlgmr.msra.gmra.mxu1 %v11961_v53 }
 0xa4a   : > { %12372 = vmatpush1.msra.mxu0 %v12042_v36  ;;  %12456 = vmatpush1.msra.mxu1 %v19166_v55 }
 0xa4b   : > { %12376 = vmatprep.subr.mxu0 %v12048_v35  ;;  %12458 = vmatprep.subr.mxu1 %v19155_v12 }
 0xa4c   : > { %12380 = vmatpush1.msra.mxu0 %v12054_v10  ;;  %12460 = vmatpush1.msra.mxu1 %v19151_v1 }
 0xa4d   : > { %12384 = vmatprep.subr.mxu0 %v12060_v45  ;;  %12462 = vmatprep.subr.mxu1 %v19153_v19 }
 0xa4e   : > { %12388 = vmatpush1.msra.mxu0 %v12066_v4  ;;  %12464 = vmatpush1.msra.mxu1 %v19159_v48  ;;  %v11873_v53 = vpop.permute.xlu0 %11872 }
 0xa4f   : > { %12392 = vmatprep.subr.mxu0 %v12072_v20  ;;  %12466 = vmatprep.subr.mxu1 %v19161_v9 }
 0xa50   : > { %12396 = vmatpush1.msra.mxu0 %v12078_v11  ;;  %12429 = vmatprep.mubr.f32.mxu0 %v20428_v8 }
 0xa51   : > { %12468 = vmatpush1.msra.mxu1 %v19169_v2  ;;  %12431 = vmatmul.mubr.f32.vlgmr.msra.gmra.mxu0 %v19081_v30 }
 0xa52   : > { %12470 = vmatprep.subr.mxu1 %v19174_v24  ;;  %12517 = vmatprep.mubr.f32.mxu1 %v20428_v8 }
 0xa53   : > { %12472 = vmatpush1.msra.mxu1 %v19186_v39 }
 0xa54   : > { %12474 = vmatprep.subr.mxu1 %v19184_v47 }
 0xa55   : > { %12476 = vmatpush1.msra.mxu1 %v19204_v6 }
 0xa56   : > { %12478 = vmatprep.subr.mxu1 %v19211_v56  ;;  %v12533_v56 = vlaneseq }
 0xa57   : > { %12480 = vmatpush1.msra.mxu1 %v19219_v22 }
 0xa58   : > { %12482 = vmatprep.subr.mxu1 %v19202_v44  ;;  %v12534_v50 = vshrl.u32 %v12533_v56, 7  ;;  %vm12547_vm14 = vcmp.lt.s32.totalorder %v12533_v56, 256 }
 0xa59   : > { %12484 = vmatpush1.msra.mxu1 %v19242_v59 }
 0xa5a   : > { %12519 = vmatmul.mubr.f32.vlgmr.msra.gmra.mxu1 %v19081_v30  ;;  %v12535_v22 = vsub.s32 %v12532_v33, %v12534_v50 }
 0xaef   : > { %v11965_v34 = vpop.f32.mrf.mxu0 }
 0xaf0   : > { %v11966_v48 = vadd.f32 %v11965_v34, %v11873_v53 }
 0xaf1   : > { %v11967_v1 = vpop.f32.mrf.mxu0 }
 0xaf2   : > { %v11968_v60 = vadd.f32 %v11967_v1, %v11873_v53 }
 0xaf7   : > { %v12117_v19 = vpop.f32.mrf.mxu1 }
 0xaf8   : > { %v12118_v40 = vadd.f32 %v12117_v19, %v11966_v48 }
 0xaf9   : > { %v12119_v9 = vpop.f32.mrf.mxu1 }
 0xafa   : > { %v12120_v15 = vadd.f32 %v12119_v9, %v11968_v60 }
 0xb00   : > { %v12222_v12 = vpop.f32.mrf.mxu0 }
 0xb01   : > { %v12223_v17 = vadd.f32 %v12222_v12, %v12118_v40 }
 0xb02   : > { %v12224_v55 = vpop.f32.mrf.mxu0 }
 0xb03   : > { %v12225_v47 = vadd.f32 %v12224_v55, %v12120_v15 }
 0xb09   : > { %v12312_v2 = vpop.f32.mrf.mxu1 }
 0xb0a   : > { %v12313_v39 = vadd.f32 %v12312_v2, %v12223_v17 }
 0xb0b   : > { %v12314_v5 = vpop.f32.mrf.mxu1 }
 0xb0c   : > { %v12315_v30 = vadd.f32 %v12314_v5, %v12225_v47 }
 0xb11   : > { %v12432_v24 = vpop.f32.mrf.mxu0 }
 0xb12   : > { %v12433_v57 = vadd.f32 %v12432_v24, %v12313_v39 }
 0xb13   : > { %v12434_v37 = vpop.f32.mrf.mxu0 }
 0xb14   : > { %v12435_v0 = vadd.f32 %v12434_v37, %v12315_v30 }
 0xb1a   : > { %v12520_v61 = vpop.f32.mrf.mxu1 }
 0xb1b   : > { %v12521_v41 = vadd.f32 %v12520_v61, %v12433_v57 }
 0xb1c   : > { %v12522_v44 = vpop.f32.mrf.mxu1 }
 0xb1d   : > { %v12523_v6 = vadd.f32 %v12522_v44, %v12435_v0  ;;  %12807 = vtanh.f32 %v12521_v41 }
 0xb1f   : > { %12809 = vtanh.f32 %v12523_v6 }
 0xb2a   : > { %v12808_v13 = vpop.eup %12807 }
 0xb2c   : > { %v12810_v31 = vpop.eup %12809 }
 0xb2d   : > { %v12529_v16 = vcombine.low %v12808_v13, %v12810_v31 }
 0xb2f   : > { %v12536_v62 = vrot.slane %v12529_v16, %v12535_v22 }
 0xb31   : > { %v12543_v3 = vrot.slane %v12536_v62, %v12535_v22 }
 0xb33   : > { %12549 = vst.msk [vmem:[%s198_s4] sm:$0x3] %vm12547_vm14, %v12543_v3 }
 0xb34   : > { %12856 = shalt.err (!%p12853_p5)
}
 0xb35   : > { %s12857_s20 = scalar_lea.hbm %s12563_s9, 32  ;;  %s12861_s25 = scalar_lea.hbm %s19453_s3, 64 }
 0xb36   : > { %p12858_p7 = scmp.ne.s32.totalorder %s12563_s9, %s12857_s20  ;;  %p12862_p12 = scmp.lt.s32.totalorder %s12563_s9, %s19453_s3 }
 0xb37   : > { %p12863_p13 = scmp.lt.s32.totalorder %s12861_s25, %s12857_s20 }
 0xb38   : > { %p12859_p10 = pnand %p12858_p7, %p12979_p6 }
 0xb39   : > { %p12864_p0 = por %p12863_p13, %p12862_p12 }
 0xb3a   : > { %p12860_p11 = pneg %p12859_p10 }
 0xb3c   : > { %p12865_p9 = pnand %p12864_p0, %p12860_p11 }
 0xb3e   : > { %12868 = shalt.err (!%p12865_p9)
}
 0xb3f   : > { %12718 = dma.vmem_to_hbm [thread:$0]  (%p12979_p6), %s12566_s5, 32, %s12563_s9, %s12551_s10  }
 0xb40 PF: > { %s12577_s28 = sand.u32 1, %s12891_s12   ;;  %p20429_p1 = scmp.ge.s32.totalorder %s12903_s15, 2 }
 0xb41   : > { %s12578_s29 = scalar_lea.sflag [#allocation4], %s12577_s28 }
 0xb42   : > { %p12721_p2 = pnand %p20429_p1, %p12983_p8 }
 0xb44   : > { %p12722_p3 = pneg %p12721_p2 }
 0xb46   : > { %12886 = dma.done.wait (%p12722_p3), %s12578_s29, 32  }
 0xb47   : > { %12888 = vsyncadd (%p12722_p3), %s12578_s29, 4294967264  ;;  %p13_p9 = scmp.ge.s32.totalorder %s12964_s18, 4   ;;  %s20430_s12 = smov %s12895_s13 }
 0xb48   : > { %s20431_s13 = smov %s12899_s14  ;;  %s20432_s14 = smov %s12977_s21 }
 0xb49   : > { %s20433_s15 = smov %s12964_s18  ;;  %15 = sbr.rel (!%p13_p9) target bundleno = 3 (0x3), region = 95 }
 0xb4e   :  { %12583 = vsyncpa [#allocation4], 1 }
 0xb4f   :  { %12585 = vsyncpa [#allocation4 + $0x1], 1 }

</bundles_post_ra>
